<compile_context>
chip_gen: v6e
topology: v6e:2x2x1
jax: 0.10.0
libtpu: 0.0.40
codegen_flags: <defaults>
</compile_context>

<pallas_src>
import functools

import jax
import jax.numpy as jnp
from jax import lax
from jax.experimental import pallas as pl
from jax.experimental.pallas import tpu as pltpu

BN_EPS = 1e-5
CP = 128            # lane-dense channel padding, kept end-to-end


def _round_up(x, m):
    return ((x + m - 1) // m) * m


# ----------------------------------------------------------------------------
# fused Pallas kernel: matmul -> BN batch stats -> BN apply -> (+res) -> ReLU
# ----------------------------------------------------------------------------
def _fused_body(x_ref, w_ref, g_ref, b_ref, r_ref, o_ref, inv_m):
    # (Mp, K) bf16 @ (K, 128) bf16 -> f32 on the MXU; single shot (no K grid).
    y = jnp.dot(x_ref[...], w_ref[...], preferred_element_type=jnp.float32)
    # Training-mode BatchNorm batch statistics.  Zero-padded rows / channels
    # contribute exactly zero to both sums, so dividing by the valid row
    # count M (inv_m = 1/M, a static constant) keeps the stats exact.
    mean = jnp.sum(y, axis=0, keepdims=True) * inv_m          # (1, 128)
    ex2 = jnp.sum(y * y, axis=0, keepdims=True) * inv_m       # (1, 128)
    var = jnp.maximum(ex2 - mean * mean, 0.0)
    scale = g_ref[...] * lax.rsqrt(var + BN_EPS)              # (1, 128)
    shift = b_ref[...] - mean * scale
    out = y * scale + shift
    if r_ref is not None:
        out = out + r_ref[...].astype(jnp.float32)
    o_ref[...] = jnp.maximum(out, 0.0).astype(o_ref.dtype)    # bf16 store


def _conv_bn_relu_kernel(x_ref, w_ref, g_ref, b_ref, o_ref, *, inv_m):
    _fused_body(x_ref, w_ref, g_ref, b_ref, None, o_ref, inv_m)


def _conv_bn_add_relu_kernel(x_ref, w_ref, g_ref, b_ref, r_ref, o_ref, *, inv_m):
    _fused_body(x_ref, w_ref, g_ref, b_ref, r_ref, o_ref, inv_m)


# ----------------------------------------------------------------------------
# XLA glue: im2col on the 128-lane-padded bf16 NHWC activation (no pad, no cast)
# ----------------------------------------------------------------------------
def _im2col_nhwc(x, KH, KW, stride):
    """NHWC im2col with padding=1; K ordered (kh, kw, c)."""
    N, H, W, C = x.shape
    s = stride
    OH = (H + 2 - KH) // s + 1
    OW = (W + 2 - KW) // s + 1
    xp = jnp.pad(x, ((0, 0), (1, 1), (1, 1), (0, 0)))
    pieces = []
    for kh in range(KH):
        for kw in range(KW):
            sl = lax.slice(
                xp,
                (0, kh, kw, 0),
                (N, kh + (OH - 1) * s + 1, kw + (OW - 1) * s + 1, C),
                (1, s, s, 1))
            pieces.append(sl)                        # (N, OH, OW, C)
    pat = jnp.concatenate(pieces, axis=-1)           # (N, OH, OW, KH*KW*C)
    return pat.reshape(N * OH * OW, KH * KW * C), OH, OW


# ----------------------------------------------------------------------------
# one pallas_call per conv layer
# ----------------------------------------------------------------------------
def conv_bn_relu(x_p, w_oihw, gamma, beta, *, stride, residual_nhwc=None):
    """x_p: (N,H,W,128) bf16, valid channels = w_oihw.shape[1].  Returns
    (N,OH,OW,128) bf16 with valid channels = w_oihw.shape[0]."""
    N, H, W, Cp = x_p.shape
    assert Cp == CP
    OC, Cin, KH, KW = w_oihw.shape

    pat, OH, OW = _im2col_nhwc(x_p, KH, KW, stride)          # (M, 9*128) bf16
    M, K = pat.shape
    assert K % 128 == 0
    Mp = _round_up(M, 8)
    if Mp != M:
        pat = jnp.pad(pat, ((0, Mp - M), (0, 0)))
    # single-shot tile must fit VMEM (see TODO about the tiled fallback)
    assert Mp * (K + 8 * CP) * 2 < 24 * 1024 * 1024

    # weight -> (K, 128), K ordered (kh, kw, c) over the padded 128 channels
    w_k = jnp.transpose(w_oihw, (2, 3, 1, 0))                # (KH,KW,Cin,OC)
    w_k = jnp.pad(w_k, ((0, 0), (0, 0), (0, CP - Cin), (0, CP - OC)))
    w_mat = w_k.reshape(K, CP).astype(jnp.bfloat16)
    g = jnp.pad(gamma.astype(jnp.float32), (0, CP - OC)).reshape(1, CP)
    b = jnp.pad(beta.astype(jnp.float32), (0, CP - OC)).reshape(1, CP)

    args = [pat, w_mat, g, b]
    if residual_nhwc is not None:
        r = residual_nhwc.reshape(-1, CP)                    # (M, 128) bf16
        if r.shape[0] != Mp:
            r = jnp.pad(r, ((0, Mp - r.shape[0]), (0, 0)))
        args.append(r)
        kern = functools.partial(_conv_bn_add_relu_kernel, inv_m=1.0 / M)
    else:
        kern = functools.partial(_conv_bn_relu_kernel, inv_m=1.0 / M)

    vmem = pl.BlockSpec(memory_space=pltpu.MemorySpace.VMEM)
    bytes_accessed = (pat.size * 2 + w_mat.size * 2 + 2 * CP * 4
                      + Mp * CP * 2
                      + (Mp * CP * 2 if residual_nhwc is not None else 0))
    out = pl.pallas_call(
        kern,
        out_shape=jax.ShapeDtypeStruct((Mp, CP), jnp.bfloat16),
        in_specs=[vmem] * len(args),
        out_specs=vmem,
        compiler_params=pltpu.CompilerParams(
            vmem_limit_bytes=32 * 1024 * 1024),
        cost_estimate=pl.CostEstimate(flops=2 * Mp * K * CP,
                                      transcendentals=CP,
                                      bytes_accessed=int(bytes_accessed)),
    )(*args)
    return out[:M].reshape(N, OH, OW, CP)


# ----------------------------------------------------------------------------
# StudentResNet forward (NHWC, 128-lane padded, bf16 activations)
# ----------------------------------------------------------------------------
def basic_block(x_p, p, stride):
    planes = p['conv2_w'].shape[0]
    in_planes = p['conv1_w'].shape[1]
    out = conv_bn_relu(x_p, p['conv1_w'], p['bn1_g'], p['bn1_b'], stride=stride)
    if stride != 1 or in_planes != planes:
        # option-A shortcut: spatial ::2 downsample + channel zero-pad by
        # planes//4 on each side.  Padded channels of x_p are exactly zero,
        # so the pad is a plain lane roll of the 128-channel representation.
        sc = x_p[:, ::2, ::2, :]
        sc = jnp.roll(sc, planes // 4, axis=-1)
    else:
        sc = x_p
    return conv_bn_relu(out, p['conv2_w'], p['bn2_g'], p['bn2_b'],
                        stride=1, residual_nhwc=sc)


def student_resnet_forward(x_nchw, params):
    x = jnp.transpose(x_nchw, (0, 2, 3, 1))                  # NCHW -> NHWC once
    x = jnp.pad(x, ((0, 0), (0, 0), (0, 0), (0, CP - x.shape[-1])))
    x = x.astype(jnp.bfloat16)
    out = conv_bn_relu(x, params['conv1_w'], params['bn1_g'], params['bn1_b'],
                       stride=1)
    out = basic_block(out, params['layer1'][0], stride=1)
    out = basic_block(out, params['layer2'][0], stride=2)
    out = basic_block(out, params['layer3'][0], stride=2)
    # global average pool + tiny linear head stay in XLA (per perf review)
    oc = params['lin_w'].shape[1]
    feat = jnp.mean(out[..., :oc].astype(jnp.float32), axis=(1, 2))   # (N, 64)
    return feat @ params['lin_w'].T + params['lin_b']


# ----------------------------------------------------------------------------
# plain-JAX (XLA) reference with matching precision (bf16 activations,
# bf16-operand / f32-accum convs, f32 BatchNorm with batch statistics)
# ----------------------------------------------------------------------------
def _ref_conv(x_bf16, w_oihw, stride):
    w = jnp.transpose(w_oihw, (2, 3, 1, 0)).astype(jnp.bfloat16)
    return lax.conv_general_dilated(
        x_bf16, w, (stride, stride), [(1, 1), (1, 1)],
        dimension_numbers=("NHWC", "HWIO", "NHWC"),
        preferred_element_type=jnp.float32)


def _ref_bn(y, g, b):
    mean = jnp.mean(y, axis=(0, 1, 2))
    var = jnp.var(y, axis=(0, 1, 2))
    return (y - mean) * lax.rsqrt(var + BN_EPS) * g + b


def _ref_block(x, p, stride):
    planes = p['conv2_w'].shape[0]
    h = jax.nn.relu(_ref_bn(_ref_conv(x, p['conv1_w'], stride),
                            p['bn1_g'], p['bn1_b'])).astype(jnp.bfloat16)
    y = _ref_bn(_ref_conv(h, p['conv2_w'], 1), p['bn2_g'], p['bn2_b'])
    if stride != 1 or x.shape[-1] != planes:
        sc = x[:, ::2, ::2, :]
        sc = jnp.pad(sc, ((0, 0), (0, 0), (0, 0), (planes // 4, planes // 4)))
    else:
        sc = x
    return jax.nn.relu(y + sc.astype(jnp.float32)).astype(jnp.bfloat16)


def ref_forward(x_nchw, params):
    x = jnp.transpose(x_nchw, (0, 2, 3, 1)).astype(jnp.bfloat16)
    out = jax.nn.relu(_ref_bn(_ref_conv(x, params['conv1_w'], 1),
                              params['bn1_g'], params['bn1_b'])).astype(jnp.bfloat16)
    out = _ref_block(out, params['layer1'][0], 1)
    out = _ref_block(out, params['layer2'][0], 2)
    out = _ref_block(out, params['layer3'][0], 2)
    feat = jnp.mean(out.astype(jnp.float32), axis=(1, 2))
    return feat @ params['lin_w'].T + params['lin_b']


# ----------------------------------------------------------------------------
# main
# ----------------------------------------------------------------------------
def _kaiming_conv(key, oc, ic, kh, kw):
    fan_in = ic * kh * kw
    return jax.random.normal(key, (oc, ic, kh, kw), jnp.float32) * (2.0 / fan_in) ** 0.5


def _block_params(key, in_planes, planes):
    k1, k2 = jax.random.split(key)
    return {
        'conv1_w': _kaiming_conv(k1, planes, in_planes, 3, 3),
        'bn1_g': jnp.ones((planes,), jnp.float32),
        'bn1_b': jnp.zeros((planes,), jnp.float32),
        'conv2_w': _kaiming_conv(k2, planes, planes, 3, 3),
        'bn2_g': jnp.ones((planes,), jnp.float32),
        'bn2_b': jnp.zeros((planes,), jnp.float32),
    }


if __name__ == "__main__":
    key = jax.random.PRNGKey(0)
    keys = jax.random.split(key, 8)

    num_classes = 10
    params = {
        'conv1_w': _kaiming_conv(keys[0], 16, 3, 3, 3),
        'bn1_g': jnp.ones((16,), jnp.float32),
        'bn1_b': jnp.zeros((16,), jnp.float32),
        'layer1': [_block_params(keys[1], 16, 16)],
        'layer2': [_block_params(keys[2], 16, 32)],
        'layer3': [_block_params(keys[3], 32, 64)],
        'lin_w': jax.random.uniform(keys[4], (num_classes, 64), jnp.float32,
                                    -0.125, 0.125),
        'lin_b': jax.random.uniform(keys[5], (num_classes,), jnp.float32,
                                    -0.125, 0.125),
    }

    # CIFAR-like small input: batch=2, 3 channels, 16x16 spatial
    x = jax.random.normal(keys[6], (2, 3, 16, 16), jnp.float32)

    fwd = jax.jit(student_resnet_forward)
    logits = jax.block_until_ready(fwd(x, params))

    ref = jax.block_until_ready(jax.jit(ref_forward)(x, params))

    assert logits.shape == (2, num_classes), logits.shape
    assert bool(jnp.all(jnp.isfinite(logits)))
    assert jnp.allclose(logits, ref, atol=2e-2, rtol=2e-2), (logits, ref)

    print("KERNEL_OK")
</pallas_src>

<mosaic_0001>
module attributes {stable_mosaic.version = 11 : i64} {
  func.func @_conv_bn_relu_kernel(%arg0: memref<512x1152xbf16, #tpu.memory_space<vmem>>, %arg1: memref<1152x128xbf16, #tpu.memory_space<vmem>>, %arg2: memref<1x128xf32, #tpu.memory_space<vmem>>, %arg3: memref<1x128xf32, #tpu.memory_space<vmem>>, %arg4: memref<512x128xbf16, #tpu.memory_space<vmem>>) attributes {dimension_semantics = [], scalar_prefetch = 0 : i64, scratch_operands = 0 : i64, tpu.core_type = #tpu.core_type<tc>} {
    %c0 = arith.constant 0 : index
    %c0_0 = arith.constant 0 : index
    %0 = vector.load %arg0[%c0, %c0_0] : memref<512x1152xbf16, #tpu.memory_space<vmem>>, vector<512x1152xbf16>
    %c0_1 = arith.constant 0 : index
    %c0_2 = arith.constant 0 : index
    %1 = vector.load %arg1[%c0_1, %c0_2] : memref<1152x128xbf16, #tpu.memory_space<vmem>>, vector<1152x128xbf16>
    %cst = arith.constant dense<0.000000e+00> : vector<512x128xf32>
    %2 = tpu.matmul %0, %1, %cst {dimension_numbers = #tpu.dot_dimension_numbers<[1], [0], [0], [1], [0, 0, 1, 1], [], []>} : vector<512x1152xbf16>, vector<1152x128xbf16>, vector<512x128xf32> -> vector<512x128xf32>
    %cst_3 = arith.constant dense<0.000000e+00> : vector<128xf32>
    %3 = vector.multi_reduction <add>, %2, %cst_3 [0] : vector<512x128xf32> to vector<128xf32>
    %4 = vector.shape_cast %3 : vector<128xf32> to vector<1x128xf32>
    %cst_4 = arith.constant 0.001953125 : f32
    %5 = vector.broadcast %cst_4 : f32 to vector<1x128xf32>
    %6 = arith.mulf %4, %5 : vector<1x128xf32>
    %7 = arith.mulf %2, %2 : vector<512x128xf32>
    %cst_5 = arith.constant dense<0.000000e+00> : vector<128xf32>
    %8 = vector.multi_reduction <add>, %7, %cst_5 [0] : vector<512x128xf32> to vector<128xf32>
    %9 = vector.shape_cast %8 : vector<128xf32> to vector<1x128xf32>
    %cst_6 = arith.constant 0.001953125 : f32
    %10 = vector.broadcast %cst_6 : f32 to vector<1x128xf32>
    %11 = arith.mulf %9, %10 : vector<1x128xf32>
    %12 = arith.mulf %6, %6 : vector<1x128xf32>
    %13 = arith.subf %11, %12 : vector<1x128xf32>
    %cst_7 = arith.constant 0.000000e+00 : f32
    %14 = vector.broadcast %cst_7 : f32 to vector<1x128xf32>
    %15 = arith.maximumf %13, %14 : vector<1x128xf32>
    %c0_8 = arith.constant 0 : index
    %c0_9 = arith.constant 0 : index
    %16 = vector.load %arg2[%c0_8, %c0_9] : memref<1x128xf32, #tpu.memory_space<vmem>>, vector<1x128xf32>
    %cst_10 = arith.constant 9.99999974E-6 : f32
    %17 = vector.broadcast %cst_10 : f32 to vector<1x128xf32>
    %18 = arith.addf %15, %17 : vector<1x128xf32>
    %19 = math.rsqrt %18 : vector<1x128xf32>
    %20 = arith.mulf %16, %19 : vector<1x128xf32>
    %c0_11 = arith.constant 0 : index
    %c0_12 = arith.constant 0 : index
    %21 = vector.load %arg3[%c0_11, %c0_12] : memref<1x128xf32, #tpu.memory_space<vmem>>, vector<1x128xf32>
    %22 = arith.mulf %6, %20 : vector<1x128xf32>
    %23 = arith.subf %21, %22 : vector<1x128xf32>
    %24 = vector.broadcast %20 : vector<1x128xf32> to vector<512x128xf32>
    %25 = arith.mulf %2, %24 : vector<512x128xf32>
    %26 = vector.broadcast %23 : vector<1x128xf32> to vector<512x128xf32>
    %27 = arith.addf %25, %26 : vector<512x128xf32>
    %cst_13 = arith.constant 0.000000e+00 : f32
    %28 = vector.broadcast %cst_13 : f32 to vector<512x128xf32>
    %29 = arith.maximumf %27, %28 : vector<512x128xf32>
    %30 = arith.truncf %29 : vector<512x128xf32> to vector<512x128xbf16>
    %c0_14 = arith.constant 0 : index
    %c0_15 = arith.constant 0 : index
    %31 = vector.load %arg4[%c0_14, %c0_15] : memref<512x128xbf16, #tpu.memory_space<vmem>>, vector<512x128xbf16>
    tpu.vector_store %arg4[%c0_14, %c0_15], %30 {strides = array<i32>} : memref<512x128xbf16, #tpu.memory_space<vmem>>, vector<512x128xbf16>,
    return
  }
}

module attributes {stable_mosaic.version = 11 : i64} {
  func.func @_conv_bn_add_relu_kernel(%arg0: memref<512x1152xbf16, #tpu.memory_space<vmem>>, %arg1: memref<1152x128xbf16, #tpu.memory_space<vmem>>, %arg2: memref<1x128xf32, #tpu.memory_space<vmem>>, %arg3: memref<1x128xf32, #tpu.memory_space<vmem>>, %arg4: memref<512x128xbf16, #tpu.memory_space<vmem>>, %arg5: memref<512x128xbf16, #tpu.memory_space<vmem>>) attributes {dimension_semantics = [], scalar_prefetch = 0 : i64, scratch_operands = 0 : i64, tpu.core_type = #tpu.core_type<tc>} {
    %c0 = arith.constant 0 : index
    %c0_0 = arith.constant 0 : index
    %0 = vector.load %arg0[%c0, %c0_0] : memref<512x1152xbf16, #tpu.memory_space<vmem>>, vector<512x1152xbf16>
    %c0_1 = arith.constant 0 : index
    %c0_2 = arith.constant 0 : index
    %1 = vector.load %arg1[%c0_1, %c0_2] : memref<1152x128xbf16, #tpu.memory_space<vmem>>, vector<1152x128xbf16>
    %cst = arith.constant dense<0.000000e+00> : vector<512x128xf32>
    %2 = tpu.matmul %0, %1, %cst {dimension_numbers = #tpu.dot_dimension_numbers<[1], [0], [0], [1], [0, 0, 1, 1], [], []>} : vector<512x1152xbf16>, vector<1152x128xbf16>, vector<512x128xf32> -> vector<512x128xf32>
    %cst_3 = arith.constant dense<0.000000e+00> : vector<128xf32>
    %3 = vector.multi_reduction <add>, %2, %cst_3 [0] : vector<512x128xf32> to vector<128xf32>
    %4 = vector.shape_cast %3 : vector<128xf32> to vector<1x128xf32>
    %cst_4 = arith.constant 0.001953125 : f32
    %5 = vector.broadcast %cst_4 : f32 to vector<1x128xf32>
    %6 = arith.mulf %4, %5 : vector<1x128xf32>
    %7 = arith.mulf %2, %2 : vector<512x128xf32>
    %cst_5 = arith.constant dense<0.000000e+00> : vector<128xf32>
    %8 = vector.multi_reduction <add>, %7, %cst_5 [0] : vector<512x128xf32> to vector<128xf32>
    %9 = vector.shape_cast %8 : vector<128xf32> to vector<1x128xf32>
    %cst_6 = arith.constant 0.001953125 : f32
    %10 = vector.broadcast %cst_6 : f32 to vector<1x128xf32>
    %11 = arith.mulf %9, %10 : vector<1x128xf32>
    %12 = arith.mulf %6, %6 : vector<1x128xf32>
    %13 = arith.subf %11, %12 : vector<1x128xf32>
    %cst_7 = arith.constant 0.000000e+00 : f32
    %14 = vector.broadcast %cst_7 : f32 to vector<1x128xf32>
    %15 = arith.maximumf %13, %14 : vector<1x128xf32>
    %c0_8 = arith.constant 0 : index
    %c0_9 = arith.constant 0 : index
    %16 = vector.load %arg2[%c0_8, %c0_9] : memref<1x128xf32, #tpu.memory_space<vmem>>, vector<1x128xf32>
    %cst_10 = arith.constant 9.99999974E-6 : f32
    %17 = vector.broadcast %cst_10 : f32 to vector<1x128xf32>
    %18 = arith.addf %15, %17 : vector<1x128xf32>
    %19 = math.rsqrt %18 : vector<1x128xf32>
    %20 = arith.mulf %16, %19 : vector<1x128xf32>
    %c0_11 = arith.constant 0 : index
    %c0_12 = arith.constant 0 : index
    %21 = vector.load %arg3[%c0_11, %c0_12] : memref<1x128xf32, #tpu.memory_space<vmem>>, vector<1x128xf32>
    %22 = arith.mulf %6, %20 : vector<1x128xf32>
    %23 = arith.subf %21, %22 : vector<1x128xf32>
    %24 = vector.broadcast %20 : vector<1x128xf32> to vector<512x128xf32>
    %25 = arith.mulf %2, %24 : vector<512x128xf32>
    %26 = vector.broadcast %23 : vector<1x128xf32> to vector<512x128xf32>
    %27 = arith.addf %25, %26 : vector<512x128xf32>
    %c0_13 = arith.constant 0 : index
    %c0_14 = arith.constant 0 : index
    %28 = vector.load %arg4[%c0_13, %c0_14] : memref<512x128xbf16, #tpu.memory_space<vmem>>, vector<512x128xbf16>
    %29 = arith.extf %28 : vector<512x128xbf16> to vector<512x128xf32>
    %30 = arith.addf %27, %29 : vector<512x128xf32>
    %cst_15 = arith.constant 0.000000e+00 : f32
    %31 = vector.broadcast %cst_15 : f32 to vector<512x128xf32>
    %32 = arith.maximumf %30, %31 : vector<512x128xf32>
    %33 = arith.truncf %32 : vector<512x128xf32> to vector<512x128xbf16>
    %c0_16 = arith.constant 0 : index
    %c0_17 = arith.constant 0 : index
    %34 = vector.load %arg5[%c0_16, %c0_17] : memref<512x128xbf16, #tpu.memory_space<vmem>>, vector<512x128xbf16>
    tpu.vector_store %arg5[%c0_16, %c0_17], %33 {strides = array<i32>} : memref<512x128xbf16, #tpu.memory_space<vmem>>, vector<512x128xbf16>,
    return
  }
}

module attributes {stable_mosaic.version = 11 : i64} {
  func.func @_conv_bn_relu_kernel(%arg0: memref<128x1152xbf16, #tpu.memory_space<vmem>>, %arg1: memref<1152x128xbf16, #tpu.memory_space<vmem>>, %arg2: memref<1x128xf32, #tpu.memory_space<vmem>>, %arg3: memref<1x128xf32, #tpu.memory_space<vmem>>, %arg4: memref<128x128xbf16, #tpu.memory_space<vmem>>) attributes {dimension_semantics = [], scalar_prefetch = 0 : i64, scratch_operands = 0 : i64, tpu.core_type = #tpu.core_type<tc>} {
    %c0 = arith.constant 0 : index
    %c0_0 = arith.constant 0 : index
    %0 = vector.load %arg0[%c0, %c0_0] : memref<128x1152xbf16, #tpu.memory_space<vmem>>, vector<128x1152xbf16>
    %c0_1 = arith.constant 0 : index
    %c0_2 = arith.constant 0 : index
    %1 = vector.load %arg1[%c0_1, %c0_2] : memref<1152x128xbf16, #tpu.memory_space<vmem>>, vector<1152x128xbf16>
    %cst = arith.constant dense<0.000000e+00> : vector<128x128xf32>
    %2 = tpu.matmul %0, %1, %cst {dimension_numbers = #tpu.dot_dimension_numbers<[1], [0], [0], [1], [0, 0, 1, 1], [], []>} : vector<128x1152xbf16>, vector<1152x128xbf16>, vector<128x128xf32> -> vector<128x128xf32>
    %cst_3 = arith.constant dense<0.000000e+00> : vector<128xf32>
    %3 = vector.multi_reduction <add>, %2, %cst_3 [0] : vector<128x128xf32> to vector<128xf32>
    %4 = vector.shape_cast %3 : vector<128xf32> to vector<1x128xf32>
    %cst_4 = arith.constant 7.812500e-03 : f32
    %5 = vector.broadcast %cst_4 : f32 to vector<1x128xf32>
    %6 = arith.mulf %4, %5 : vector<1x128xf32>
    %7 = arith.mulf %2, %2 : vector<128x128xf32>
    %cst_5 = arith.constant dense<0.000000e+00> : vector<128xf32>
    %8 = vector.multi_reduction <add>, %7, %cst_5 [0] : vector<128x128xf32> to vector<128xf32>
    %9 = vector.shape_cast %8 : vector<128xf32> to vector<1x128xf32>
    %cst_6 = arith.constant 7.812500e-03 : f32
    %10 = vector.broadcast %cst_6 : f32 to vector<1x128xf32>
    %11 = arith.mulf %9, %10 : vector<1x128xf32>
    %12 = arith.mulf %6, %6 : vector<1x128xf32>
    %13 = arith.subf %11, %12 : vector<1x128xf32>
    %cst_7 = arith.constant 0.000000e+00 : f32
    %14 = vector.broadcast %cst_7 : f32 to vector<1x128xf32>
    %15 = arith.maximumf %13, %14 : vector<1x128xf32>
    %c0_8 = arith.constant 0 : index
    %c0_9 = arith.constant 0 : index
    %16 = vector.load %arg2[%c0_8, %c0_9] : memref<1x128xf32, #tpu.memory_space<vmem>>, vector<1x128xf32>
    %cst_10 = arith.constant 9.99999974E-6 : f32
    %17 = vector.broadcast %cst_10 : f32 to vector<1x128xf32>
    %18 = arith.addf %15, %17 : vector<1x128xf32>
    %19 = math.rsqrt %18 : vector<1x128xf32>
    %20 = arith.mulf %16, %19 : vector<1x128xf32>
    %c0_11 = arith.constant 0 : index
    %c0_12 = arith.constant 0 : index
    %21 = vector.load %arg3[%c0_11, %c0_12] : memref<1x128xf32, #tpu.memory_space<vmem>>, vector<1x128xf32>
    %22 = arith.mulf %6, %20 : vector<1x128xf32>
    %23 = arith.subf %21, %22 : vector<1x128xf32>
    %24 = vector.broadcast %20 : vector<1x128xf32> to vector<128x128xf32>
    %25 = arith.mulf %2, %24 : vector<128x128xf32>
    %26 = vector.broadcast %23 : vector<1x128xf32> to vector<128x128xf32>
    %27 = arith.addf %25, %26 : vector<128x128xf32>
    %cst_13 = arith.constant 0.000000e+00 : f32
    %28 = vector.broadcast %cst_13 : f32 to vector<128x128xf32>
    %29 = arith.maximumf %27, %28 : vector<128x128xf32>
    %30 = arith.truncf %29 : vector<128x128xf32> to vector<128x128xbf16>
    %c0_14 = arith.constant 0 : index
    %c0_15 = arith.constant 0 : index
    %31 = vector.load %arg4[%c0_14, %c0_15] : memref<128x128xbf16, #tpu.memory_space<vmem>>, vector<128x128xbf16>
    tpu.vector_store %arg4[%c0_14, %c0_15], %30 {strides = array<i32>} : memref<128x128xbf16, #tpu.memory_space<vmem>>, vector<128x128xbf16>,
    return
  }
}

module attributes {stable_mosaic.version = 11 : i64} {
  func.func @_conv_bn_add_relu_kernel(%arg0: memref<128x1152xbf16, #tpu.memory_space<vmem>>, %arg1: memref<1152x128xbf16, #tpu.memory_space<vmem>>, %arg2: memref<1x128xf32, #tpu.memory_space<vmem>>, %arg3: memref<1x128xf32, #tpu.memory_space<vmem>>, %arg4: memref<128x128xbf16, #tpu.memory_space<vmem>>, %arg5: memref<128x128xbf16, #tpu.memory_space<vmem>>) attributes {dimension_semantics = [], scalar_prefetch = 0 : i64, scratch_operands = 0 : i64, tpu.core_type = #tpu.core_type<tc>} {
    %c0 = arith.constant 0 : index
    %c0_0 = arith.constant 0 : index
    %0 = vector.load %arg0[%c0, %c0_0] : memref<128x1152xbf16, #tpu.memory_space<vmem>>, vector<128x1152xbf16>
    %c0_1 = arith.constant 0 : index
    %c0_2 = arith.constant 0 : index
    %1 = vector.load %arg1[%c0_1, %c0_2] : memref<1152x128xbf16, #tpu.memory_space<vmem>>, vector<1152x128xbf16>
    %cst = arith.constant dense<0.000000e+00> : vector<128x128xf32>
    %2 = tpu.matmul %0, %1, %cst {dimension_numbers = #tpu.dot_dimension_numbers<[1], [0], [0], [1], [0, 0, 1, 1], [], []>} : vector<128x1152xbf16>, vector<1152x128xbf16>, vector<128x128xf32> -> vector<128x128xf32>
    %cst_3 = arith.constant dense<0.000000e+00> : vector<128xf32>
    %3 = vector.multi_reduction <add>, %2, %cst_3 [0] : vector<128x128xf32> to vector<128xf32>
    %4 = vector.shape_cast %3 : vector<128xf32> to vector<1x128xf32>
    %cst_4 = arith.constant 7.812500e-03 : f32
    %5 = vector.broadcast %cst_4 : f32 to vector<1x128xf32>
    %6 = arith.mulf %4, %5 : vector<1x128xf32>
    %7 = arith.mulf %2, %2 : vector<128x128xf32>
    %cst_5 = arith.constant dense<0.000000e+00> : vector<128xf32>
    %8 = vector.multi_reduction <add>, %7, %cst_5 [0] : vector<128x128xf32> to vector<128xf32>
    %9 = vector.shape_cast %8 : vector<128xf32> to vector<1x128xf32>
    %cst_6 = arith.constant 7.812500e-03 : f32
    %10 = vector.broadcast %cst_6 : f32 to vector<1x128xf32>
    %11 = arith.mulf %9, %10 : vector<1x128xf32>
    %12 = arith.mulf %6, %6 : vector<1x128xf32>
    %13 = arith.subf %11, %12 : vector<1x128xf32>
    %cst_7 = arith.constant 0.000000e+00 : f32
    %14 = vector.broadcast %cst_7 : f32 to vector<1x128xf32>
    %15 = arith.maximumf %13, %14 : vector<1x128xf32>
    %c0_8 = arith.constant 0 : index
    %c0_9 = arith.constant 0 : index
    %16 = vector.load %arg2[%c0_8, %c0_9] : memref<1x128xf32, #tpu.memory_space<vmem>>, vector<1x128xf32>
    %cst_10 = arith.constant 9.99999974E-6 : f32
    %17 = vector.broadcast %cst_10 : f32 to vector<1x128xf32>
    %18 = arith.addf %15, %17 : vector<1x128xf32>
    %19 = math.rsqrt %18 : vector<1x128xf32>
    %20 = arith.mulf %16, %19 : vector<1x128xf32>
    %c0_11 = arith.constant 0 : index
    %c0_12 = arith.constant 0 : index
    %21 = vector.load %arg3[%c0_11, %c0_12] : memref<1x128xf32, #tpu.memory_space<vmem>>, vector<1x128xf32>
    %22 = arith.mulf %6, %20 : vector<1x128xf32>
    %23 = arith.subf %21, %22 : vector<1x128xf32>
    %24 = vector.broadcast %20 : vector<1x128xf32> to vector<128x128xf32>
    %25 = arith.mulf %2, %24 : vector<128x128xf32>
    %26 = vector.broadcast %23 : vector<1x128xf32> to vector<128x128xf32>
    %27 = arith.addf %25, %26 : vector<128x128xf32>
    %c0_13 = arith.constant 0 : index
    %c0_14 = arith.constant 0 : index
    %28 = vector.load %arg4[%c0_13, %c0_14] : memref<128x128xbf16, #tpu.memory_space<vmem>>, vector<128x128xbf16>
    %29 = arith.extf %28 : vector<128x128xbf16> to vector<128x128xf32>
    %30 = arith.addf %27, %29 : vector<128x128xf32>
    %cst_15 = arith.constant 0.000000e+00 : f32
    %31 = vector.broadcast %cst_15 : f32 to vector<128x128xf32>
    %32 = arith.maximumf %30, %31 : vector<128x128xf32>
    %33 = arith.truncf %32 : vector<128x128xf32> to vector<128x128xbf16>
    %c0_16 = arith.constant 0 : index
    %c0_17 = arith.constant 0 : index
    %34 = vector.load %arg5[%c0_16, %c0_17] : memref<128x128xbf16, #tpu.memory_space<vmem>>, vector<128x128xbf16>
    tpu.vector_store %arg5[%c0_16, %c0_17], %33 {strides = array<i32>} : memref<128x128xbf16, #tpu.memory_space<vmem>>, vector<128x128xbf16>,
    return
  }
}

module attributes {stable_mosaic.version = 11 : i64} {
  func.func @_conv_bn_relu_kernel(%arg0: memref<32x1152xbf16, #tpu.memory_space<vmem>>, %arg1: memref<1152x128xbf16, #tpu.memory_space<vmem>>, %arg2: memref<1x128xf32, #tpu.memory_space<vmem>>, %arg3: memref<1x128xf32, #tpu.memory_space<vmem>>, %arg4: memref<32x128xbf16, #tpu.memory_space<vmem>>) attributes {dimension_semantics = [], scalar_prefetch = 0 : i64, scratch_operands = 0 : i64, tpu.core_type = #tpu.core_type<tc>} {
    %c0 = arith.constant 0 : index
    %c0_0 = arith.constant 0 : index
    %0 = vector.load %arg0[%c0, %c0_0] : memref<32x1152xbf16, #tpu.memory_space<vmem>>, vector<32x1152xbf16>
    %c0_1 = arith.constant 0 : index
    %c0_2 = arith.constant 0 : index
    %1 = vector.load %arg1[%c0_1, %c0_2] : memref<1152x128xbf16, #tpu.memory_space<vmem>>, vector<1152x128xbf16>
    %cst = arith.constant dense<0.000000e+00> : vector<32x128xf32>
    %2 = tpu.matmul %0, %1, %cst {dimension_numbers = #tpu.dot_dimension_numbers<[1], [0], [0], [1], [0, 0, 1, 1], [], []>} : vector<32x1152xbf16>, vector<1152x128xbf16>, vector<32x128xf32> -> vector<32x128xf32>
    %cst_3 = arith.constant dense<0.000000e+00> : vector<128xf32>
    %3 = vector.multi_reduction <add>, %2, %cst_3 [0] : vector<32x128xf32> to vector<128xf32>
    %4 = vector.shape_cast %3 : vector<128xf32> to vector<1x128xf32>
    %cst_4 = arith.constant 3.125000e-02 : f32
    %5 = vector.broadcast %cst_4 : f32 to vector<1x128xf32>
    %6 = arith.mulf %4, %5 : vector<1x128xf32>
    %7 = arith.mulf %2, %2 : vector<32x128xf32>
    %cst_5 = arith.constant dense<0.000000e+00> : vector<128xf32>
    %8 = vector.multi_reduction <add>, %7, %cst_5 [0] : vector<32x128xf32> to vector<128xf32>
    %9 = vector.shape_cast %8 : vector<128xf32> to vector<1x128xf32>
    %cst_6 = arith.constant 3.125000e-02 : f32
    %10 = vector.broadcast %cst_6 : f32 to vector<1x128xf32>
    %11 = arith.mulf %9, %10 : vector<1x128xf32>
    %12 = arith.mulf %6, %6 : vector<1x128xf32>
    %13 = arith.subf %11, %12 : vector<1x128xf32>
    %cst_7 = arith.constant 0.000000e+00 : f32
    %14 = vector.broadcast %cst_7 : f32 to vector<1x128xf32>
    %15 = arith.maximumf %13, %14 : vector<1x128xf32>
    %c0_8 = arith.constant 0 : index
    %c0_9 = arith.constant 0 : index
    %16 = vector.load %arg2[%c0_8, %c0_9] : memref<1x128xf32, #tpu.memory_space<vmem>>, vector<1x128xf32>
    %cst_10 = arith.constant 9.99999974E-6 : f32
    %17 = vector.broadcast %cst_10 : f32 to vector<1x128xf32>
    %18 = arith.addf %15, %17 : vector<1x128xf32>
    %19 = math.rsqrt %18 : vector<1x128xf32>
    %20 = arith.mulf %16, %19 : vector<1x128xf32>
    %c0_11 = arith.constant 0 : index
    %c0_12 = arith.constant 0 : index
    %21 = vector.load %arg3[%c0_11, %c0_12] : memref<1x128xf32, #tpu.memory_space<vmem>>, vector<1x128xf32>
    %22 = arith.mulf %6, %20 : vector<1x128xf32>
    %23 = arith.subf %21, %22 : vector<1x128xf32>
    %24 = vector.broadcast %20 : vector<1x128xf32> to vector<32x128xf32>
    %25 = arith.mulf %2, %24 : vector<32x128xf32>
    %26 = vector.broadcast %23 : vector<1x128xf32> to vector<32x128xf32>
    %27 = arith.addf %25, %26 : vector<32x128xf32>
    %cst_13 = arith.constant 0.000000e+00 : f32
    %28 = vector.broadcast %cst_13 : f32 to vector<32x128xf32>
    %29 = arith.maximumf %27, %28 : vector<32x128xf32>
    %30 = arith.truncf %29 : vector<32x128xf32> to vector<32x128xbf16>
    %c0_14 = arith.constant 0 : index
    %c0_15 = arith.constant 0 : index
    %31 = vector.load %arg4[%c0_14, %c0_15] : memref<32x128xbf16, #tpu.memory_space<vmem>>, vector<32x128xbf16>
    tpu.vector_store %arg4[%c0_14, %c0_15], %30 {strides = array<i32>} : memref<32x128xbf16, #tpu.memory_space<vmem>>, vector<32x128xbf16>,
    return
  }
}

module attributes {stable_mosaic.version = 11 : i64} {
  func.func @_conv_bn_add_relu_kernel(%arg0: memref<32x1152xbf16, #tpu.memory_space<vmem>>, %arg1: memref<1152x128xbf16, #tpu.memory_space<vmem>>, %arg2: memref<1x128xf32, #tpu.memory_space<vmem>>, %arg3: memref<1x128xf32, #tpu.memory_space<vmem>>, %arg4: memref<32x128xbf16, #tpu.memory_space<vmem>>, %arg5: memref<32x128xbf16, #tpu.memory_space<vmem>>) attributes {dimension_semantics = [], scalar_prefetch = 0 : i64, scratch_operands = 0 : i64, tpu.core_type = #tpu.core_type<tc>} {
    %c0 = arith.constant 0 : index
    %c0_0 = arith.constant 0 : index
    %0 = vector.load %arg0[%c0, %c0_0] : memref<32x1152xbf16, #tpu.memory_space<vmem>>, vector<32x1152xbf16>
    %c0_1 = arith.constant 0 : index
    %c0_2 = arith.constant 0 : index
    %1 = vector.load %arg1[%c0_1, %c0_2] : memref<1152x128xbf16, #tpu.memory_space<vmem>>, vector<1152x128xbf16>
    %cst = arith.constant dense<0.000000e+00> : vector<32x128xf32>
    %2 = tpu.matmul %0, %1, %cst {dimension_numbers = #tpu.dot_dimension_numbers<[1], [0], [0], [1], [0, 0, 1, 1], [], []>} : vector<32x1152xbf16>, vector<1152x128xbf16>, vector<32x128xf32> -> vector<32x128xf32>
    %cst_3 = arith.constant dense<0.000000e+00> : vector<128xf32>
    %3 = vector.multi_reduction <add>, %2, %cst_3 [0] : vector<32x128xf32> to vector<128xf32>
    %4 = vector.shape_cast %3 : vector<128xf32> to vector<1x128xf32>
    %cst_4 = arith.constant 3.125000e-02 : f32
    %5 = vector.broadcast %cst_4 : f32 to vector<1x128xf32>
    %6 = arith.mulf %4, %5 : vector<1x128xf32>
    %7 = arith.mulf %2, %2 : vector<32x128xf32>
    %cst_5 = arith.constant dense<0.000000e+00> : vector<128xf32>
    %8 = vector.multi_reduction <add>, %7, %cst_5 [0] : vector<32x128xf32> to vector<128xf32>
    %9 = vector.shape_cast %8 : vector<128xf32> to vector<1x128xf32>
    %cst_6 = arith.constant 3.125000e-02 : f32
    %10 = vector.broadcast %cst_6 : f32 to vector<1x128xf32>
    %11 = arith.mulf %9, %10 : vector<1x128xf32>
    %12 = arith.mulf %6, %6 : vector<1x128xf32>
    %13 = arith.subf %11, %12 : vector<1x128xf32>
    %cst_7 = arith.constant 0.000000e+00 : f32
    %14 = vector.broadcast %cst_7 : f32 to vector<1x128xf32>
    %15 = arith.maximumf %13, %14 : vector<1x128xf32>
    %c0_8 = arith.constant 0 : index
    %c0_9 = arith.constant 0 : index
    %16 = vector.load %arg2[%c0_8, %c0_9] : memref<1x128xf32, #tpu.memory_space<vmem>>, vector<1x128xf32>
    %cst_10 = arith.constant 9.99999974E-6 : f32
    %17 = vector.broadcast %cst_10 : f32 to vector<1x128xf32>
    %18 = arith.addf %15, %17 : vector<1x128xf32>
    %19 = math.rsqrt %18 : vector<1x128xf32>
    %20 = arith.mulf %16, %19 : vector<1x128xf32>
    %c0_11 = arith.constant 0 : index
    %c0_12 = arith.constant 0 : index
    %21 = vector.load %arg3[%c0_11, %c0_12] : memref<1x128xf32, #tpu.memory_space<vmem>>, vector<1x128xf32>
    %22 = arith.mulf %6, %20 : vector<1x128xf32>
    %23 = arith.subf %21, %22 : vector<1x128xf32>
    %24 = vector.broadcast %20 : vector<1x128xf32> to vector<32x128xf32>
    %25 = arith.mulf %2, %24 : vector<32x128xf32>
    %26 = vector.broadcast %23 : vector<1x128xf32> to vector<32x128xf32>
    %27 = arith.addf %25, %26 : vector<32x128xf32>
    %c0_13 = arith.constant 0 : index
    %c0_14 = arith.constant 0 : index
    %28 = vector.load %arg4[%c0_13, %c0_14] : memref<32x128xbf16, #tpu.memory_space<vmem>>, vector<32x128xbf16>
    %29 = arith.extf %28 : vector<32x128xbf16> to vector<32x128xf32>
    %30 = arith.addf %27, %29 : vector<32x128xf32>
    %cst_15 = arith.constant 0.000000e+00 : f32
    %31 = vector.broadcast %cst_15 : f32 to vector<32x128xf32>
    %32 = arith.maximumf %30, %31 : vector<32x128xf32>
    %33 = arith.truncf %32 : vector<32x128xf32> to vector<32x128xbf16>
    %c0_16 = arith.constant 0 : index
    %c0_17 = arith.constant 0 : index
    %34 = vector.load %arg5[%c0_16, %c0_17] : memref<32x128xbf16, #tpu.memory_space<vmem>>, vector<32x128xbf16>
    tpu.vector_store %arg5[%c0_16, %c0_17], %33 {strides = array<i32>} : memref<32x128xbf16, #tpu.memory_space<vmem>>, vector<32x128xbf16>,
    return
  }
}

</mosaic_0001>

<bundles_post_ra>
// kernel: student_resnet_forward.7
= control target key start
LH: loop header
LB: loop body
LE: loop exit
PB: predicated region body
PF: predicated region fallthrough
CT: control target
= control target key end

     0   :  { %v5895_v0 = vmov 0   ;;  %s8830_s1 = inlined_call_operand.vmem [shape: bf16[1152,128], index: 1, kind: input, shape index: {}]   ;;  %s8831_s0 = inlined_call_operand.vmem [shape: bf16[512,1152], index: 0, kind: input, shape index: {}]   ;;  %s8832_s2 = inlined_call_operand.vmem [shape: f32[1,128], index: 2, kind: input, shape index: {}]   ;;  %s8833_s3 = inlined_call_operand.vmem [shape: f32[1,128], index: 3, kind: input, shape index: {}]   ;;  %s8834_s4 = inlined_call_operand.vmem [shape: bf16[512,128], index: 4, kind: output, shape index: {}]  }
   0x1   :  { %2386 = vmatprep.subr.bf16.mxu0 %v5895_v0  ;;  %5372 = vmatprep.subr.bf16.mxu1 %v5895_v0  ;;  %v5405_v1 = vld [vmem:[%s8830_s1 + $0x38] sm:$0xff]   ;;  %v5406_v2 = vld [vmem:[%s8830_s1 + $0x30] sm:$0xff]   ;;  %v5407_v3 = vld [vmem:[%s8830_s1 + $0x28] sm:$0xff]  }
   0x2   :  { %2387 = vmatpush1.bf16.msra.mxu0 %v5405_v1  ;;  %5388 = vmatpush1.bf16.msra.mxu1 %v5405_v1  ;;  %v5408_v4 = vld [vmem:[%s8830_s1 + $0x20] sm:$0xff]   ;;  %v5409_v5 = vld [vmem:[%s8830_s1 + $0x18] sm:$0xff]   ;;  %v5410_v7 = vld [vmem:[%s8830_s1 + $0x10] sm:$0xff]  }
   0x3   :  { %2388 = vmatprep.subr.bf16.mxu0 %v5895_v0  ;;  %5373 = vmatprep.subr.bf16.mxu1 %v5895_v0  ;;  %v5423_v6 = vld [vmem:[%s8831_s0 + $0x4] ss:$36 sps:$4 sm:$0xff]   ;;  %v5413_v11 = vld [vmem:[%s8830_s1 + $0x78] sm:$0xff]   ;;  %v5414_v12 = vld [vmem:[%s8830_s1 + $0x70] sm:$0xff]  }
   0x4   :  { %v5426_v8 = vld [vmem:[%s8831_s0 + $0x6c4] ss:$36 sps:$4 sm:$0xff]   ;;  %2418 = vmatprep.mubr.bf16.mxu0 %v5423_v6  ;;  %v5417_v15 = vld [vmem:[%s8830_s1 + $0x58] sm:$0xff]   ;;  %v5418_v16 = vld [vmem:[%s8830_s1 + $0x50] sm:$0xff]  }
   0x5   :  { %2610 = vmatprep.mubr.bf16.mxu1 %v5426_v8  ;;  %v5411_v9 = vld [vmem:[%s8830_s1 + $0x8] sm:$0xff]   ;;  %v5412_v10 = vld [vmem:[%s8830_s1] sm:$0xff]   ;;  %v5427_v21 = vld [vmem:[%s8830_s1 + $0xb8] sm:$0xff]  }
   0x6   :  { %2389 = vmatpush1.bf16.msra.mxu0 %v5406_v2  ;;  %5389 = vmatpush1.bf16.msra.mxu1 %v5406_v2  ;;  %v5415_v13 = vld [vmem:[%s8830_s1 + $0x68] sm:$0xff]   ;;  %v5416_v14 = vld [vmem:[%s8830_s1 + $0x60] sm:$0xff]   ;;  %v5428_v22 = vld [vmem:[%s8830_s1 + $0x138] sm:$0xff]  }
   0x7   :  { %2390 = vmatprep.subr.bf16.mxu0 %v5895_v0  ;;  %5374 = vmatprep.subr.bf16.mxu1 %v5895_v0  ;;  %v5419_v17 = vld [vmem:[%s8830_s1 + $0x48] sm:$0xff]   ;;  %v5420_v18 = vld [vmem:[%s8830_s1 + $0x40] sm:$0xff]   ;;  %v5429_v25 = vld [vmem:[%s8830_s1 + $0xb0] sm:$0xff]  }
   0x8   :  { %v5421_v19 = vld [vmem:[%s8831_s0] ss:$36 sps:$4 sm:$0xff]   ;;  %v5430_v23 = vld [vmem:[%s8831_s0 + $0x4c] ss:$36 sps:$4 sm:$0xff]   ;;  %v5439_v30 = vld [vmem:[%s8831_s0 + $0x94] ss:$36 sps:$4 sm:$0xff]  }
   0x9   :  { %v5424_v20 = vld [vmem:[%s8831_s0 + $0x6c0] ss:$36 sps:$4 sm:$0xff]   ;;  %v5432_v24 = vld [vmem:[%s8831_s0 + $0x70c] ss:$36 sps:$4 sm:$0xff]   ;;  %v5441_v31 = vld [vmem:[%s8831_s0 + $0x754] ss:$36 sps:$4 sm:$0xff]  }
   0xa   :  { %2391 = vmatpush1.bf16.msra.mxu0 %v5407_v3  ;;  %5390 = vmatpush1.bf16.msra.mxu1 %v5407_v3  ;;  %v5438_v26 = vld [vmem:[%s8830_s1 + $0x130] sm:$0xff]   ;;  %v5434_v27 = vld [vmem:[%s8831_s0 + $0x48] ss:$36 sps:$4 sm:$0xff]   ;;  %v5437_v33 = vld [vmem:[%s8830_s1 + $0xa0] sm:$0xff]  }
   0xb   :  { %2392 = vmatprep.subr.bf16.mxu0 %v5895_v0  ;;  %5375 = vmatprep.subr.bf16.mxu1 %v5895_v0  ;;  %v5435_v28 = vld [vmem:[%s8831_s0 + $0x708] ss:$36 sps:$4 sm:$0xff]   ;;  %v5443_v34 = vld [vmem:[%s8831_s0 + $0x90] ss:$36 sps:$4 sm:$0xff]   ;;  %v5464_v36 = vld [vmem:[%s8830_s1 + $0x120] sm:$0xff]  }
   0xc   :  { %v5436_v29 = vld [vmem:[%s8830_s1 + $0xa8] sm:$0xff]   ;;  %v5444_v35 = vld [vmem:[%s8831_s0 + $0x750] ss:$36 sps:$4 sm:$0xff]   ;;  %v5445_v37 = vld [vmem:[%s8830_s1 + $0x98] sm:$0xff]  }
   0xd   :  { %v5454_v32 = vld [vmem:[%s8830_s1 + $0x128] sm:$0xff]   ;;  %v5447_v38 = vld [vmem:[%s8831_s0 + $0xdc] ss:$36 sps:$4 sm:$0xff]   ;;  %v5446_v41 = vld [vmem:[%s8830_s1 + $0x90] sm:$0xff]  }
   0xe   :  { %2393 = vmatpush1.bf16.msra.mxu0 %v5408_v4  ;;  %5391 = vmatpush1.bf16.msra.mxu1 %v5408_v4  ;;  %v5449_v39 = vld [vmem:[%s8831_s0 + $0x79c] ss:$36 sps:$4 sm:$0xff]   ;;  %v5453_v44 = vld [vmem:[%s8830_s1 + $0x88] sm:$0xff]   ;;  %v5490_v47 = vld [vmem:[%s8830_s1 + $0x110] sm:$0xff]  }
   0xf   :  { %2394 = vmatprep.subr.bf16.mxu0 %v5895_v0  ;;  %5376 = vmatprep.subr.bf16.mxu1 %v5895_v0  ;;  %v5480_v40 = vld [vmem:[%s8830_s1 + $0x118] sm:$0xff]   ;;  %v5456_v45 = vld [vmem:[%s8831_s0 + $0x124] ss:$36 sps:$4 sm:$0xff]   ;;  %v5465_v53 = vld [vmem:[%s8831_s0 + $0x16c] ss:$36 sps:$4 sm:$0xff]  }
  0x10   :  { %v5451_v42 = vld [vmem:[%s8831_s0 + $0xd8] ss:$36 sps:$4 sm:$0xff]   ;;  %v5458_v46 = vld [vmem:[%s8831_s0 + $0x7e4] ss:$36 sps:$4 sm:$0xff]   ;;  %v5467_v54 = vld [vmem:[%s8831_s0 + $0x82c] ss:$36 sps:$4 sm:$0xff]  }
  0x11   :  { %v5452_v43 = vld [vmem:[%s8831_s0 + $0x798] ss:$36 sps:$4 sm:$0xff]   ;;  %v5455_v48 = vld [vmem:[%s8830_s1 + $0x80] sm:$0xff]   ;;  %v5504_v51 = vld [vmem:[%s8830_s1 + $0x108] sm:$0xff]  }
  0x12   :  { %2395 = vmatpush1.bf16.msra.mxu0 %v5409_v5  ;;  %5392 = vmatpush1.bf16.msra.mxu1 %v5409_v5  ;;  %v5460_v49 = vld [vmem:[%s8831_s0 + $0x120] ss:$36 sps:$4 sm:$0xff]   ;;  %v5462_v52 = vld [vmem:[%s8830_s1 + $0xf8] sm:$0xff]   ;;  %v5463_v56 = vld [vmem:[%s8830_s1 + $0xf0] sm:$0xff]  }
  0x13   :  { %2396 = vmatprep.subr.bf16.mxu0 %v5895_v0  ;;  %5377 = vmatprep.subr.bf16.mxu1 %v5895_v0  ;;  %v5461_v50 = vld [vmem:[%s8831_s0 + $0x7e0] ss:$36 sps:$4 sm:$0xff]   ;;  %v5469_v57 = vld [vmem:[%s8831_s0 + $0x168] ss:$36 sps:$4 sm:$0xff]   ;;  %v5473_v60 = vld [vmem:[%s8831_s0 + $0x1b4] ss:$36 sps:$4 sm:$0xff]  }
  0x14   :  { %v5511_v55 = vld [vmem:[%s8830_s1 + $0x100] sm:$0xff]   ;;  %v5470_v58 = vld [vmem:[%s8831_s0 + $0x828] ss:$36 sps:$4 sm:$0xff]   ;;  %v5475_v61 = vld [vmem:[%s8831_s0 + $0x874] ss:$36 sps:$4 sm:$0xff]  }
  0x15   :  { %v5471_v59 = vld [vmem:[%s8830_s1 + $0xe8] sm:$0xff]   ;;  %v5525_v62 = vld [vmem:[%s8830_s1 + $0x178] sm:$0xff]   ;;  %v5472_v63 = vld [vmem:[%s8830_s1 + $0xe0] sm:$0xff]  }
  0x16   :  { %2397 = vmatpush1.bf16.msra.mxu0 %v5410_v7  ;;  %5393 = vmatpush1.bf16.msra.mxu1 %v5410_v7  ;;  %v5477_v1 = vld [vmem:[%s8831_s0 + $0x1b0] ss:$36 sps:$4 sm:$0xff]   ;;  %v5479_v4 = vld [vmem:[%s8830_s1 + $0xd8] sm:$0xff]   ;;  %v5547_v7 = vld [vmem:[%s8830_s1 + $0x168] sm:$0xff]  }
  0x17   :  { %2398 = vmatprep.subr.bf16.mxu0 %v5895_v0  ;;  %5378 = vmatprep.subr.bf16.mxu1 %v5895_v0  ;;  %v5478_v2 = vld [vmem:[%s8831_s0 + $0x870] ss:$36 sps:$4 sm:$0xff]   ;;  %v5482_v5 = vld [vmem:[%s8831_s0 + $0x1fc] ss:$36 sps:$4 sm:$0xff]  }
  0x18   :  { %v5533_v3 = vld [vmem:[%s8830_s1 + $0x170] sm:$0xff]   ;;  %v5484_v6 = vld [vmem:[%s8831_s0 + $0x8bc] ss:$36 sps:$4 sm:$0xff]  }
  0x19   :  { %v5481_v8 = vld [vmem:[%s8830_s1 + $0xd0] sm:$0xff]  }
  0x1a   :  { %2399 = vmatpush1.bf16.msra.mxu0 %v5411_v9  ;;  %5394 = vmatpush1.bf16.msra.mxu1 %v5411_v9  ;;  %v5486_v9 = vld [vmem:[%s8831_s0 + $0x1f8] ss:$36 sps:$4 sm:$0xff]  }
  0x1b   :  { %2400 = vmatprep.subr.bf16.mxu0 %v5895_v0  ;;  %5379 = vmatprep.subr.bf16.mxu1 %v5895_v0 }
  0x1e   :  { %2401 = vmatpush1.bf16.msra.mxu0 %v5412_v10  ;;  %5395 = vmatpush1.bf16.msra.mxu1 %v5412_v10  ;;  %v5487_v10 = vld [vmem:[%s8831_s0 + $0x8b8] ss:$36 sps:$4 sm:$0xff]  }
  0x1f   :  { %2402 = vmatprep.subr.bf16.mxu0 %v5895_v0  ;;  %5380 = vmatprep.subr.bf16.mxu1 %v5895_v0 }
  0x22   :  { %2403 = vmatpush2.bf16.msra.mxu0 %v5413_v11  ;;  %5396 = vmatpush2.bf16.msra.mxu1 %v5413_v11  ;;  %v5488_v11 = vld [vmem:[%s8830_s1 + $0xc8] sm:$0xff]  }
  0x23   :  { %2404 = vmatprep.subr.bf16.mxu0 %v5895_v0  ;;  %5381 = vmatprep.subr.bf16.mxu1 %v5895_v0 }
  0x26   :  { %2405 = vmatpush2.bf16.msra.mxu0 %v5414_v12  ;;  %5397 = vmatpush2.bf16.msra.mxu1 %v5414_v12  ;;  %v5491_v12 = vld [vmem:[%s8831_s0 + $0x244] ss:$36 sps:$4 sm:$0xff]  }
  0x27   :  { %2406 = vmatprep.subr.bf16.mxu0 %v5895_v0  ;;  %5382 = vmatprep.subr.bf16.mxu1 %v5895_v0 }
  0x2a   :  { %2407 = vmatpush2.bf16.msra.mxu0 %v5415_v13  ;;  %5398 = vmatpush2.bf16.msra.mxu1 %v5415_v13  ;;  %v5495_v13 = vld [vmem:[%s8831_s0 + $0xc] ss:$36 sps:$4 sm:$0xff]  }
  0x2b   :  { %2408 = vmatprep.subr.bf16.mxu0 %v5895_v0  ;;  %5383 = vmatprep.subr.bf16.mxu1 %v5895_v0 }
  0x2e   :  { %2409 = vmatpush2.bf16.msra.mxu0 %v5416_v14  ;;  %5399 = vmatpush2.bf16.msra.mxu1 %v5416_v14  ;;  %v5554_v14 = vld [vmem:[%s8830_s1 + $0x160] sm:$0xff]  }
  0x2f   :  { %2410 = vmatprep.subr.bf16.mxu0 %v5895_v0  ;;  %5384 = vmatprep.subr.bf16.mxu1 %v5895_v0 }
  0x32   :  { %2411 = vmatpush2.bf16.msra.mxu0 %v5417_v15  ;;  %5400 = vmatpush2.bf16.msra.mxu1 %v5417_v15  ;;  %v5489_v15 = vld [vmem:[%s8830_s1 + $0xc0] sm:$0xff]  }
  0x33   :  { %2412 = vmatprep.subr.bf16.mxu0 %v5895_v0  ;;  %5385 = vmatprep.subr.bf16.mxu1 %v5895_v0 }
  0x36   :  { %2413 = vmatpush2.bf16.msra.mxu0 %v5418_v16  ;;  %5401 = vmatpush2.bf16.msra.mxu1 %v5418_v16  ;;  %v5568_v16 = vld [vmem:[%s8830_s1 + $0x158] sm:$0xff]  }
  0x37   :  { %2414 = vmatprep.subr.bf16.mxu0 %v5895_v0  ;;  %5386 = vmatprep.subr.bf16.mxu1 %v5895_v0 }
  0x3a   :  { %2415 = vmatpush2.bf16.msra.mxu0 %v5419_v17  ;;  %5402 = vmatpush2.bf16.msra.mxu1 %v5419_v17  ;;  %v5493_v17 = vld [vmem:[%s8831_s0 + $0x8] ss:$36 sps:$4 sm:$0xff]  }
  0x3b   :  { %2416 = vmatprep.subr.bf16.mxu0 %v5895_v0  ;;  %5387 = vmatprep.subr.bf16.mxu1 %v5895_v0 }
  0x3e   :  { %2417 = vmatpush2.bf16.msra.mxu0 %v5420_v18  ;;  %5403 = vmatpush2.bf16.msra.mxu1 %v5420_v18  ;;  %v5496_v18 = vld [vmem:[%s8831_s0 + $0x240] ss:$36 sps:$4 sm:$0xff]  }
  0x3f   :  { %2675 = vmatprep.subr.bf16.mxu1 %v5895_v0  ;;  %2964 = vmatprep.subr.bf16.mxu0 %v5895_v0 }
  0x41   :  { %2419 = vmatmul.mubr.bf16.vlgmr.msra.gmra.mxu0 %v5421_v19  ;;  %2611 = vmatmul.mubr.bf16.vlgmr.msra.gmra.mxu1 %v5424_v20  ;;  %v5497_v19 = vld [vmem:[%s8830_s1 + $0x1b8] sm:$0xff]   ;;  %v5498_v20 = vld [vmem:[%s8831_s0 + $0x28c] ss:$36 sps:$4 sm:$0xff]  }
  0x42   :  { %2676 = vmatpush1.bf16.msra.mxu1 %v5427_v21  ;;  %2965 = vmatpush1.bf16.msra.mxu0 %v5428_v22  ;;  %v5500_v21 = vld [vmem:[%s8831_s0 + $0x54] ss:$36 sps:$4 sm:$0xff]  }
  0x43   :  { %2677 = vmatprep.subr.bf16.mxu1 %v5895_v0  ;;  %2426 = vmatprep.mubr.bf16.mxu0 %v5430_v23  ;;  %v5512_v22 = vld [vmem:[%s8830_s1 + $0x1b0] sm:$0xff]  }
  0x44   :  { %2618 = vmatprep.mubr.bf16.mxu1 %v5432_v24  ;;  %2966 = vmatprep.subr.bf16.mxu0 %v5895_v0  ;;  %v5576_v23 = vld [vmem:[%s8830_s1 + $0x150] sm:$0xff]   ;;  %v5502_v24 = vld [vmem:[%s8831_s0 + $0x288] ss:$36 sps:$4 sm:$0xff]  }
  0x46   :  { %2678 = vmatpush1.bf16.msra.mxu1 %v5429_v25  ;;  %2967 = vmatpush1.bf16.msra.mxu0 %v5438_v26  ;;  %v5503_v25 = vld [vmem:[%s8831_s0 + $0x50] ss:$36 sps:$4 sm:$0xff]  }
  0x47   :  { %2679 = vmatprep.subr.bf16.mxu1 %v5895_v0  ;;  %2968 = vmatprep.subr.bf16.mxu0 %v5895_v0  ;;  %v5505_v26 = vld [vmem:[%s8831_s0 + $0x2d4] ss:$36 sps:$4 sm:$0xff]  }
  0x49   :  { %2427 = vmatmul.mubr.bf16.gmra.mxu0 %v5434_v27  ;;  %2619 = vmatmul.mubr.bf16.gmra.mxu1 %v5435_v28  ;;  %v5507_v27 = vld [vmem:[%s8831_s0 + $0x9c] ss:$36 sps:$4 sm:$0xff]   ;;  %v5526_v28 = vld [vmem:[%s8830_s1 + $0x1a8] sm:$0xff]  }
  0x4a   :  { %2680 = vmatpush1.bf16.msra.mxu1 %v5436_v29  ;;  %2434 = vmatprep.mubr.bf16.mxu0 %v5439_v30  ;;  %v5590_v29 = vld [vmem:[%s8830_s1 + $0x148] sm:$0xff]   ;;  %v5540_v30 = vld [vmem:[%s8830_s1 + $0x1a0] sm:$0xff]  }
  0x4b   :  { %2681 = vmatprep.subr.bf16.mxu1 %v5895_v0  ;;  %2626 = vmatprep.mubr.bf16.mxu1 %v5441_v31  ;;  %v5597_v31 = vld [vmem:[%s8830_s1 + $0x140] sm:$0xff]  }
  0x4c   :  { %2969 = vmatpush1.bf16.msra.mxu0 %v5454_v32  ;;  %v6272_v32 = vld [vmem:[%s8830_s1 + $0x238] sm:$0xff]  }
  0x4d   :  { %2970 = vmatprep.subr.bf16.mxu0 %v5895_v0 }
  0x4e   :  { %2682 = vmatpush1.bf16.msra.mxu1 %v5437_v33  ;;  %v5509_v33 = vld [vmem:[%s8831_s0 + $0x2d0] ss:$36 sps:$4 sm:$0xff]  }
  0x4f   :  { %2683 = vmatprep.subr.bf16.mxu1 %v5895_v0 }
  0x50   :  { %2971 = vmatpush1.bf16.msra.mxu0 %v5464_v36  ;;  %v5515_v36 = vld [vmem:[%s8831_s0 + $0xe4] ss:$36 sps:$4 sm:$0xff]  }
  0x51   :  { %2435 = vmatmul.mubr.bf16.gmra.mxu0 %v5443_v34  ;;  %2627 = vmatmul.mubr.bf16.gmra.mxu1 %v5444_v35  ;;  %v5510_v34 = vld [vmem:[%s8831_s0 + $0x98] ss:$36 sps:$4 sm:$0xff]  }
  0x52   :  { %2684 = vmatpush1.bf16.msra.mxu1 %v5445_v37  ;;  %2442 = vmatprep.mubr.bf16.mxu0 %v5447_v38  ;;  %v5513_v35 = vld [vmem:[%s8831_s0 + $0x31c] ss:$36 sps:$4 sm:$0xff]   ;;  %v5569_v38 = vld [vmem:[%s8830_s1 + $0x190] sm:$0xff]  }
  0x53   :  { %2685 = vmatprep.subr.bf16.mxu1 %v5895_v0  ;;  %2634 = vmatprep.mubr.bf16.mxu1 %v5449_v39  ;;  %v5555_v37 = vld [vmem:[%s8830_s1 + $0x198] sm:$0xff]  }
  0x54   :  { %2972 = vmatprep.subr.bf16.mxu0 %v5895_v0  ;;  %v5517_v39 = vld [vmem:[%s8831_s0 + $0x318] ss:$36 sps:$4 sm:$0xff]  }
  0x55   :  { %2973 = vmatpush1.bf16.msra.mxu0 %v5480_v40  ;;  %v5518_v40 = vld [vmem:[%s8831_s0 + $0xe0] ss:$36 sps:$4 sm:$0xff]  }
  0x56   :  { %2686 = vmatpush1.bf16.msra.mxu1 %v5446_v41  ;;  %2974 = vmatprep.subr.bf16.mxu0 %v5895_v0  ;;  %v5519_v41 = vld [vmem:[%s8831_s0 + $0x364] ss:$36 sps:$4 sm:$0xff]  }
  0x57   :  { %2687 = vmatprep.subr.bf16.mxu1 %v5895_v0 }
  0x59   :  { %2443 = vmatmul.mubr.bf16.gmra.mxu0 %v5451_v42  ;;  %2635 = vmatmul.mubr.bf16.gmra.mxu1 %v5452_v43  ;;  %v5521_v42 = vld [vmem:[%s8831_s0 + $0x12c] ss:$36 sps:$4 sm:$0xff]  }
  0x5a   :  { %2688 = vmatpush1.bf16.msra.mxu1 %v5453_v44  ;;  %2450 = vmatprep.mubr.bf16.mxu0 %v5456_v45  ;;  %v5583_v43 = vld [vmem:[%s8830_s1 + $0x188] sm:$0xff]   ;;  %v5598_v44 = vld [vmem:[%s8830_s1 + $0x180] sm:$0xff]  }
  0x5b   :  { %2689 = vmatprep.subr.bf16.mxu1 %v5895_v0  ;;  %2642 = vmatprep.mubr.bf16.mxu1 %v5458_v46  ;;  %v5523_v45 = vld [vmem:[%s8831_s0 + $0x360] ss:$36 sps:$4 sm:$0xff]   ;;  %v5524_v46 = vld [vmem:[%s8831_s0 + $0x128] ss:$36 sps:$4 sm:$0xff]  }
  0x5c   :  { %2975 = vmatpush1.bf16.msra.mxu0 %v5490_v47  ;;  %v5527_v47 = vld [vmem:[%s8831_s0 + $0x3ac] ss:$36 sps:$4 sm:$0xff]  }
  0x5d   :  { %2976 = vmatprep.subr.bf16.mxu0 %v5895_v0 }
  0x5e   :  { %2690 = vmatpush1.bf16.msra.mxu1 %v5455_v48  ;;  %v5529_v48 = vld [vmem:[%s8831_s0 + $0x174] ss:$36 sps:$4 sm:$0xff]  }
  0x5f   :  { %2691 = vmatprep.subr.bf16.mxu1 %v5895_v0 }
  0x60   :  { %2977 = vmatpush1.bf16.msra.mxu0 %v5504_v51  ;;  %v5531_v51 = vld [vmem:[%s8831_s0 + $0x3a8] ss:$36 sps:$4 sm:$0xff]  }
  0x61   :  { %2451 = vmatmul.mubr.bf16.gmra.mxu0 %v5460_v49  ;;  %2643 = vmatmul.mubr.bf16.gmra.mxu1 %v5461_v50  ;;  %v5612_v49 = vld [vmem:[%s8830_s1 + $0x1f8] sm:$0xff]   ;;  %v5625_v50 = vld [vmem:[%s8830_s1 + $0x1f0] sm:$0xff]  }
  0x62   :  { %2692 = vmatpush2.bf16.msra.mxu1 %v5462_v52  ;;  %2458 = vmatprep.mubr.bf16.mxu0 %v5465_v53  ;;  %v5532_v52 = vld [vmem:[%s8831_s0 + $0x170] ss:$36 sps:$4 sm:$0xff]  }
  0x63   :  { %2693 = vmatprep.subr.bf16.mxu1 %v5895_v0  ;;  %2650 = vmatprep.mubr.bf16.mxu1 %v5467_v54  ;;  %v5534_v53 = vld [vmem:[%s8831_s0 + $0x3f4] ss:$36 sps:$4 sm:$0xff]   ;;  %v5536_v54 = vld [vmem:[%s8831_s0 + $0x1bc] ss:$36 sps:$4 sm:$0xff]  }
  0x64   :  { %2978 = vmatprep.subr.bf16.mxu0 %v5895_v0 }
  0x65   :  { %2979 = vmatpush1.bf16.msra.mxu0 %v5511_v55  ;;  %v5639_v55 = vld [vmem:[%s8830_s1 + $0x1e8] sm:$0xff]  }
  0x66   :  { %2694 = vmatpush2.bf16.msra.mxu1 %v5463_v56  ;;  %2980 = vmatprep.subr.bf16.mxu0 %v5895_v0  ;;  %v5538_v56 = vld [vmem:[%s8831_s0 + $0x3f0] ss:$36 sps:$4 sm:$0xff]  }
  0x67   :  { %2695 = vmatprep.subr.bf16.mxu1 %v5895_v0 }
  0x69   :  { %2459 = vmatmul.mubr.bf16.gmra.mxu0 %v5469_v57  ;;  %2651 = vmatmul.mubr.bf16.gmra.mxu1 %v5470_v58  ;;  %v5539_v57 = vld [vmem:[%s8831_s0 + $0x1b8] ss:$36 sps:$4 sm:$0xff]  }
  0x6a   :  { %2696 = vmatpush2.bf16.msra.mxu1 %v5471_v59  ;;  %2466 = vmatprep.mubr.bf16.mxu0 %v5473_v60  ;;  %v5541_v58 = vld [vmem:[%s8831_s0 + $0x43c] ss:$36 sps:$4 sm:$0xff]   ;;  %v5543_v59 = vld [vmem:[%s8831_s0 + $0x204] ss:$36 sps:$4 sm:$0xff]  }
  0x6b   :  { %2697 = vmatprep.subr.bf16.mxu1 %v5895_v0  ;;  %2658 = vmatprep.mubr.bf16.mxu1 %v5475_v61  ;;  %v5545_v60 = vld [vmem:[%s8831_s0 + $0x438] ss:$36 sps:$4 sm:$0xff]   ;;  %v5546_v61 = vld [vmem:[%s8831_s0 + $0x200] ss:$36 sps:$4 sm:$0xff]  }
  0x6c   :  { %2981 = vmatpush2.bf16.msra.mxu0 %v5525_v62  ;;  %v5652_v62 = vld [vmem:[%s8830_s1 + $0x1e0] sm:$0xff]  }
  0x6d   :  { %2982 = vmatprep.subr.bf16.mxu0 %v5895_v0 }
  0x6e   :  { %2698 = vmatpush2.bf16.msra.mxu1 %v5472_v63  ;;  %v5548_v63 = vld [vmem:[%s8831_s0 + $0x484] ss:$36 sps:$4 sm:$0xff]  }
  0x6f   :  { %2699 = vmatprep.subr.bf16.mxu1 %v5895_v0 }
  0x70   :  { %2983 = vmatpush2.bf16.msra.mxu0 %v5533_v3  ;;  %v5553_v3 = vld [vmem:[%s8831_s0 + $0x248] ss:$36 sps:$4 sm:$0xff]  }
  0x71   :  { %2467 = vmatmul.mubr.bf16.gmra.mxu0 %v5477_v1  ;;  %2659 = vmatmul.mubr.bf16.gmra.mxu1 %v5478_v2  ;;  %v5550_v1 = vld [vmem:[%s8831_s0 + $0x24c] ss:$36 sps:$4 sm:$0xff]   ;;  %v5552_v2 = vld [vmem:[%s8831_s0 + $0x480] ss:$36 sps:$4 sm:$0xff]  }
  0x72   :  { %2700 = vmatpush2.bf16.msra.mxu1 %v5479_v4  ;;  %2474 = vmatprep.mubr.bf16.mxu0 %v5482_v5  ;;  %v5556_v4 = vld [vmem:[%s8831_s0 + $0x4cc] ss:$36 sps:$4 sm:$0xff]   ;;  %v5558_v5 = vld [vmem:[%s8831_s0 + $0x294] ss:$36 sps:$4 sm:$0xff]  }
  0x73   :  { %2701 = vmatprep.subr.bf16.mxu1 %v5895_v0  ;;  %2666 = vmatprep.mubr.bf16.mxu1 %v5484_v6  ;;  %v5560_v6 = vld [vmem:[%s8831_s0 + $0x4c8] ss:$36 sps:$4 sm:$0xff]  }
  0x74   :  { %2984 = vmatprep.subr.bf16.mxu0 %v5895_v0 }
  0x75   :  { %2985 = vmatpush2.bf16.msra.mxu0 %v5547_v7  ;;  %v5561_v7 = vld [vmem:[%s8831_s0 + $0x290] ss:$36 sps:$4 sm:$0xff]  }
  0x76   :  { %2702 = vmatpush2.bf16.msra.mxu1 %v5481_v8  ;;  %2986 = vmatprep.subr.bf16.mxu0 %v5895_v0  ;;  %v5562_v8 = vld [vmem:[%s8831_s0 + $0x514] ss:$36 sps:$4 sm:$0xff]  }
  0x77   :  { %2703 = vmatprep.subr.bf16.mxu1 %v5895_v0 }
  0x79   :  { %2475 = vmatmul.mubr.bf16.gmra.mxu0 %v5486_v9  ;;  %2667 = vmatmul.mubr.bf16.gmra.mxu1 %v5487_v10  ;;  %v5564_v9 = vld [vmem:[%s8831_s0 + $0x2dc] ss:$36 sps:$4 sm:$0xff]  }
  0x7a   :  { %2704 = vmatpush2.bf16.msra.mxu1 %v5488_v11  ;;  %2482 = vmatprep.mubr.bf16.mxu0 %v5491_v12  ;;  %v5666_v10 = vld [vmem:[%s8830_s1 + $0x1d8] sm:$0xff]   ;;  %v5566_v11 = vld [vmem:[%s8831_s0 + $0x510] ss:$36 sps:$4 sm:$0xff]  }
  0x7b   :  { %2705 = vmatprep.subr.bf16.mxu1 %v5895_v0  ;;  %2707 = vmatprep.mubr.bf16.mxu1 %v5495_v13  ;;  %v5567_v12 = vld [vmem:[%s8831_s0 + $0x2d8] ss:$36 sps:$4 sm:$0xff]  }
  0x7c   :  { %2987 = vmatpush2.bf16.msra.mxu0 %v5554_v14  ;;  %v5570_v13 = vld [vmem:[%s8831_s0 + $0x55c] ss:$36 sps:$4 sm:$0xff]   ;;  %v5572_v14 = vld [vmem:[%s8831_s0 + $0x324] ss:$36 sps:$4 sm:$0xff]  }
  0x7d   :  { %2988 = vmatprep.subr.bf16.mxu0 %v5895_v0 }
  0x7e   :  { %2706 = vmatpush2.bf16.msra.mxu1 %v5489_v15  ;;  %v5574_v15 = vld [vmem:[%s8831_s0 + $0x558] ss:$36 sps:$4 sm:$0xff]  }
  0x7f   :  { %3253 = vmatprep.subr.bf16.mxu1 %v5895_v0 }
  0x80   :  { %2989 = vmatpush2.bf16.msra.mxu0 %v5568_v16  ;;  %v5575_v16 = vld [vmem:[%s8831_s0 + $0x320] ss:$36 sps:$4 sm:$0xff]  }
  0x81   :  { %2483 = vmatmul.mubr.bf16.gmra.mxu0 %v5496_v18  ;;  %2708 = vmatmul.mubr.bf16.vlgmr.msra.gmra.mxu1 %v5493_v17  ;;  %v5577_v17 = vld [vmem:[%s8831_s0 + $0x5a4] ss:$36 sps:$4 sm:$0xff]   ;;  %v5579_v18 = vld [vmem:[%s8831_s0 + $0x36c] ss:$36 sps:$4 sm:$0xff]  }
  0x82   :  { %3254 = vmatpush1.bf16.msra.mxu1 %v5497_v19  ;;  %2490 = vmatprep.mubr.bf16.mxu0 %v5498_v20  ;;  %v5679_v19 = vld [vmem:[%s8830_s1 + $0x1d0] sm:$0xff]   ;;  %v5581_v20 = vld [vmem:[%s8831_s0 + $0x5a0] ss:$36 sps:$4 sm:$0xff]  }
  0x83   :  { %2715 = vmatprep.mubr.bf16.mxu1 %v5500_v21  ;;  %3255 = vmatprep.subr.bf16.mxu1 %v5895_v0  ;;  %v5582_v21 = vld [vmem:[%s8831_s0 + $0x368] ss:$36 sps:$4 sm:$0xff]  }
  0x84   :  { %2990 = vmatprep.subr.bf16.mxu0 %v5895_v0 }
  0x85   :  { %2991 = vmatpush2.bf16.msra.mxu0 %v5576_v23  ;;  %v5586_v23 = vld [vmem:[%s8831_s0 + $0x3b4] ss:$36 sps:$4 sm:$0xff]  }
  0x86   :  { %3256 = vmatpush1.bf16.msra.mxu1 %v5512_v22  ;;  %2992 = vmatprep.subr.bf16.mxu0 %v5895_v0  ;;  %v5584_v22 = vld [vmem:[%s8831_s0 + $0x5ec] ss:$36 sps:$4 sm:$0xff]  }
  0x87   :  { %3257 = vmatprep.subr.bf16.mxu1 %v5895_v0 }
  0x89   :  { %2491 = vmatmul.mubr.bf16.gmra.mxu0 %v5502_v24  ;;  %2716 = vmatmul.mubr.bf16.gmra.mxu1 %v5503_v25  ;;  %v5588_v24 = vld [vmem:[%s8831_s0 + $0x5e8] ss:$36 sps:$4 sm:$0xff]   ;;  %v5589_v25 = vld [vmem:[%s8831_s0 + $0x3b0] ss:$36 sps:$4 sm:$0xff]  }
  0x8a   :  { %2498 = vmatprep.mubr.bf16.mxu0 %v5505_v26  ;;  %2723 = vmatprep.mubr.bf16.mxu1 %v5507_v27  ;;  %v5591_v26 = vld [vmem:[%s8831_s0 + $0x634] ss:$36 sps:$4 sm:$0xff]   ;;  %v5593_v27 = vld [vmem:[%s8831_s0 + $0x3fc] ss:$36 sps:$4 sm:$0xff]  }
  0x8b   :  { %3258 = vmatpush1.bf16.msra.mxu1 %v5526_v28  ;;  %2993 = vmatpush2.bf16.msra.mxu0 %v5590_v29  ;;  %v5693_v28 = vld [vmem:[%s8830_s1 + $0x1c8] sm:$0xff]   ;;  %v5595_v29 = vld [vmem:[%s8831_s0 + $0x630] ss:$36 sps:$4 sm:$0xff]  }
  0x8c   :  { %3259 = vmatprep.subr.bf16.mxu1 %v5895_v0  ;;  %2994 = vmatprep.subr.bf16.mxu0 %v5895_v0 }
  0x8f   :  { %3260 = vmatpush1.bf16.msra.mxu1 %v5540_v30  ;;  %2995 = vmatpush2.bf16.msra.mxu0 %v5597_v31  ;;  %v5596_v30 = vld [vmem:[%s8831_s0 + $0x3f8] ss:$36 sps:$4 sm:$0xff]  }
  0x90   :  { %3261 = vmatprep.subr.bf16.mxu1 %v5895_v0  ;;  %5292 = vmatprep.subr.bf16.mxu0 %v6272_v32  ;;  %v5599_v31 = vld [vmem:[%s8831_s0 + $0x67c] ss:$36 sps:$4 sm:$0xff]  }
  0x91   :  { %2499 = vmatmul.mubr.bf16.gmra.mxu0 %v5509_v33  ;;  %2724 = vmatmul.mubr.bf16.gmra.mxu1 %v5510_v34  ;;  %v5601_v33 = vld [vmem:[%s8831_s0 + $0x444] ss:$36 sps:$4 sm:$0xff]  }
  0x92   :  { %2506 = vmatprep.mubr.bf16.mxu0 %v5513_v35  ;;  %2731 = vmatprep.mubr.bf16.mxu1 %v5515_v36  ;;  %v5604_v34 = vld [vmem:[%s8831_s0 + $0x440] ss:$36 sps:$4 sm:$0xff]   ;;  %v5605_v35 = vld [vmem:[%s8831_s0 + $0x48c] ss:$36 sps:$4 sm:$0xff]   ;;  %v5609_v36 = vld [vmem:[%s8831_s0 + $0x14] ss:$36 sps:$4 sm:$0xff]  }
  0x93   :  { %3262 = vmatpush1.bf16.msra.mxu1 %v5555_v37  ;;  %v5706_v37 = vld [vmem:[%s8830_s1 + $0x1c0] sm:$0xff]  }
  0x94   :  { %3263 = vmatprep.subr.bf16.mxu1 %v5895_v0 }
  0x97   :  { %3264 = vmatpush1.bf16.msra.mxu1 %v5569_v38  ;;  %v5607_v38 = vld [vmem:[%s8831_s0 + $0x10] ss:$36 sps:$4 sm:$0xff]  }
  0x98   :  { %3265 = vmatprep.subr.bf16.mxu1 %v5895_v0 }
  0x99   :  { %2507 = vmatmul.mubr.bf16.gmra.mxu0 %v5517_v39  ;;  %2732 = vmatmul.mubr.bf16.gmra.mxu1 %v5518_v40  ;;  %v5610_v39 = vld [vmem:[%s8831_s0 + $0x488] ss:$36 sps:$4 sm:$0xff]   ;;  %v5613_v40 = vld [vmem:[%s8831_s0 + $0x4d4] ss:$36 sps:$4 sm:$0xff]  }
  0x9a   :  { %2514 = vmatprep.mubr.bf16.mxu0 %v5519_v41  ;;  %2739 = vmatprep.mubr.bf16.mxu1 %v5521_v42  ;;  %v5615_v41 = vld [vmem:[%s8831_s0 + $0x5c] ss:$36 sps:$4 sm:$0xff]   ;;  %v5638_v42 = vld [vmem:[%s8830_s1 + $0x230] sm:$0xff]  }
  0x9b   :  { %3266 = vmatpush1.bf16.msra.mxu1 %v5583_v43 }
  0x9c   :  { %3267 = vmatprep.subr.bf16.mxu1 %v5895_v0 }
  0x9f   :  { %3268 = vmatpush1.bf16.msra.mxu1 %v5598_v44 }
  0xa0   :  { %3269 = vmatprep.subr.bf16.mxu1 %v5895_v0 }
  0xa1   :  { %2515 = vmatmul.mubr.bf16.gmra.mxu0 %v5523_v45  ;;  %2740 = vmatmul.mubr.bf16.gmra.mxu1 %v5524_v46 }
  0xa2   :  { %2522 = vmatprep.mubr.bf16.mxu0 %v5527_v47  ;;  %2747 = vmatprep.mubr.bf16.mxu1 %v5529_v48  ;;  %v5665_v47 = vld [vmem:[%s8830_s1 + $0x228] sm:$0xff]  }
  0xa3   :  { %3270 = vmatpush2.bf16.msra.mxu1 %v5612_v49 }
  0xa4   :  { %3271 = vmatprep.subr.bf16.mxu1 %v5895_v0 }
  0xa7   :  { %3272 = vmatpush2.bf16.msra.mxu1 %v5625_v50  ;;  %v5617_v50 = vld [vmem:[%s8831_s0 + $0x4d0] ss:$36 sps:$4 sm:$0xff]  }
  0xa8   :  { %3273 = vmatprep.subr.bf16.mxu1 %v5895_v0 }
  0xa9   :  { %2523 = vmatmul.mubr.bf16.gmra.mxu0 %v5531_v51  ;;  %2748 = vmatmul.mubr.bf16.gmra.mxu1 %v5532_v52  ;;  %v5619_v51 = vld [vmem:[%s8831_s0 + $0x51c] ss:$36 sps:$4 sm:$0xff]   ;;  %v5621_v52 = vld [vmem:[%s8831_s0 + $0xa4] ss:$36 sps:$4 sm:$0xff]  }
  0xaa   :  { %2530 = vmatprep.mubr.bf16.mxu0 %v5534_v53  ;;  %2755 = vmatprep.mubr.bf16.mxu1 %v5536_v54 }
  0xab   :  { %3274 = vmatpush2.bf16.msra.mxu1 %v5639_v55  ;;  %v5692_v55 = vld [vmem:[%s8830_s1 + $0x220] sm:$0xff]  }
  0xac   :  { %3275 = vmatprep.subr.bf16.mxu1 %v5895_v0 }
  0xaf   :  { %3276 = vmatpush2.bf16.msra.mxu1 %v5652_v62 }
  0xb0   :  { %3277 = vmatprep.subr.bf16.mxu1 %v5895_v0 }
  0xb1   :  { %2531 = vmatmul.mubr.bf16.gmra.mxu0 %v5538_v56  ;;  %2756 = vmatmul.mubr.bf16.gmra.mxu1 %v5539_v57 }
  0xb2   :  { %2538 = vmatprep.mubr.bf16.mxu0 %v5541_v58  ;;  %2763 = vmatprep.mubr.bf16.mxu1 %v5543_v59 }
  0xb3   :  { %3278 = vmatpush2.bf16.msra.mxu1 %v5666_v10 }
  0xb4   :  { %3279 = vmatprep.subr.bf16.mxu1 %v5895_v0 }
  0xb7   :  { %3280 = vmatpush2.bf16.msra.mxu1 %v5679_v19 }
  0xb8   :  { %3281 = vmatprep.subr.bf16.mxu1 %v5895_v0 }
  0xb9   :  { %2539 = vmatmul.mubr.bf16.gmra.mxu0 %v5545_v60  ;;  %2764 = vmatmul.mubr.bf16.gmra.mxu1 %v5546_v61  ;;  %v5719_v60 = vld [vmem:[%s8830_s1 + $0x218] sm:$0xff]  }
  0xba   :  { %2546 = vmatprep.mubr.bf16.mxu0 %v5548_v63  ;;  %2771 = vmatprep.mubr.bf16.mxu1 %v5550_v1  ;;  %v5623_v63 = vld [vmem:[%s8831_s0 + $0x518] ss:$36 sps:$4 sm:$0xff]   ;;  %v5624_v1 = vld [vmem:[%s8831_s0 + $0xa0] ss:$36 sps:$4 sm:$0xff]  }
  0xbb   :  { %3282 = vmatpush2.bf16.msra.mxu1 %v5693_v28 }
  0xbc   :  { %3283 = vmatprep.subr.bf16.mxu1 %v5895_v0  ;;  %v5603_v0 = vld [vmem:[%s8831_s0 + $0x678] ss:$36 sps:$4 sm:$0xff]  }
  0xbf   :  { %3284 = vmatpush2.bf16.msra.mxu1 %v5706_v37  ;;  %v5640_v37 = vld [vmem:[%s8831_s0 + $0x5f0] ss:$36 sps:$4 sm:$0xff]  }
  0xc1   :  { %2547 = vmatmul.mubr.bf16.gmra.mxu0 %v5552_v2  ;;  %2772 = vmatmul.mubr.bf16.gmra.mxu1 %v5553_v3  ;;  %v5626_v2 = vld [vmem:[%s8831_s0 + $0x564] ss:$36 sps:$4 sm:$0xff]   ;;  %v5628_v3 = vld [vmem:[%s8831_s0 + $0xec] ss:$36 sps:$4 sm:$0xff]  }
  0xc2   :  { %2554 = vmatprep.mubr.bf16.mxu0 %v5556_v4  ;;  %2779 = vmatprep.mubr.bf16.mxu1 %v5558_v5 }
  0xc9   :  { %2555 = vmatmul.mubr.bf16.gmra.mxu0 %v5560_v6  ;;  %2780 = vmatmul.mubr.bf16.gmra.mxu1 %v5561_v7 }
  0xca   :  { %2562 = vmatprep.mubr.bf16.mxu0 %v5562_v8  ;;  %2787 = vmatprep.mubr.bf16.mxu1 %v5564_v9 }
  0xd1   :  { %2563 = vmatmul.mubr.bf16.gmra.mxu0 %v5566_v11  ;;  %2788 = vmatmul.mubr.bf16.gmra.mxu1 %v5567_v12  ;;  %v5630_v12 = vld [vmem:[%s8831_s0 + $0x560] ss:$36 sps:$4 sm:$0xff]  }
  0xd2   :  { %2570 = vmatprep.mubr.bf16.mxu0 %v5570_v13  ;;  %2795 = vmatprep.mubr.bf16.mxu1 %v5572_v14  ;;  %v5631_v13 = vld [vmem:[%s8831_s0 + $0xe8] ss:$36 sps:$4 sm:$0xff]  }
  0xd3   :  { %v5634_v14 = vld [vmem:[%s8831_s0 + $0x5ac] ss:$36 sps:$4 sm:$0xff]  }
  0xd9   :  { %2571 = vmatmul.mubr.bf16.gmra.mxu0 %v5574_v15  ;;  %2796 = vmatmul.mubr.bf16.gmra.mxu1 %v5575_v16  ;;  %v5637_v15 = vld [vmem:[%s8831_s0 + $0x134] ss:$36 sps:$4 sm:$0xff]  }
  0xda   :  { %2578 = vmatprep.mubr.bf16.mxu0 %v5577_v17  ;;  %2803 = vmatprep.mubr.bf16.mxu1 %v5579_v18 }
  0xe1   :  { %2579 = vmatmul.mubr.bf16.gmra.mxu0 %v5581_v20  ;;  %2804 = vmatmul.mubr.bf16.gmra.mxu1 %v5582_v21 }
  0xe2   :  { %2586 = vmatprep.mubr.bf16.mxu0 %v5584_v22  ;;  %2811 = vmatprep.mubr.bf16.mxu1 %v5586_v23 }
  0xe9   :  { %2587 = vmatmul.mubr.bf16.gmra.mxu0 %v5588_v24  ;;  %2812 = vmatmul.mubr.bf16.gmra.mxu1 %v5589_v25  ;;  %v5632_v24 = vld [vmem:[%s8831_s0 + $0x5a8] ss:$36 sps:$4 sm:$0xff]   ;;  %v5635_v25 = vld [vmem:[%s8831_s0 + $0x130] ss:$36 sps:$4 sm:$0xff]  }
  0xea   :  { %2594 = vmatprep.mubr.bf16.mxu0 %v5591_v26  ;;  %2819 = vmatprep.mubr.bf16.mxu1 %v5593_v27  ;;  %v5642_v26 = vld [vmem:[%s8831_s0 + $0x5f4] ss:$36 sps:$4 sm:$0xff]   ;;  %v5645_v27 = vld [vmem:[%s8831_s0 + $0x17c] ss:$36 sps:$4 sm:$0xff]  }
  0xf1   :  { %2595 = vmatmul.mubr.bf16.gmra.mxu0 %v5595_v29  ;;  %2820 = vmatmul.mubr.bf16.gmra.mxu1 %v5596_v30 }
  0xf2   :  { %2602 = vmatprep.mubr.bf16.mxu0 %v5599_v31  ;;  %2827 = vmatprep.mubr.bf16.mxu1 %v5601_v33  ;;  %v5744_v33 = vld [vmem:[%s8830_s1 + $0x210] sm:$0xff]  }
  0xf9   :  { %2603 = vmatmul.mubr.bf16.gmra.mxu0 %v5603_v0  ;;  %2828 = vmatmul.mubr.bf16.gmra.mxu1 %v5604_v34 }
  0xfa   :  { %2835 = vmatprep.mubr.bf16.mxu1 %v5605_v35  ;;  %2996 = vmatprep.mubr.bf16.mxu0 %v5609_v36 }
 0x101   :  { %v6508_v43 = vpop.f32.mrf.mxu0  ;;  %v6510_v44 = vpop.f32.mrf.mxu1  ;;  %2836 = vmatmul.mubr.bf16.gmra.mxu1 %v5610_v39  ;;  %2997 = vmatmul.mubr.bf16.vlgmr.msra.gmra.mxu0 %v5607_v38  ;;  %v5643_v38 = vld [vmem:[%s8831_s0 + $0x178] ss:$36 sps:$4 sm:$0xff]  }
 0x102   :  { %5293 = vmatpush3.bf16.msra.mxu0 %v6272_v32  ;;  %2843 = vmatprep.mubr.bf16.mxu1 %v5613_v40  ;;  %v5618_v32 = vld [vmem:[%s8831_s0 + $0x58] ss:$36 sps:$4 sm:$0xff]   ;;  %v5651_v40 = vld [vmem:[%s8831_s0 + $0x1c4] ss:$36 sps:$4 sm:$0xff]  }
 0x103   :  { %v2422_v45 = vpop.f32.mrf.mxu0  ;;  %v2614_v46 = vpop.f32.mrf.mxu1  ;;  %3004 = vmatprep.mubr.bf16.mxu0 %v5615_v41  ;;  %5294 = vmatprep.subr.bf16.mxu0 %v5638_v42  ;;  %v5648_v39 = vld [vmem:[%s8831_s0 + $0x63c] ss:$36 sps:$4 sm:$0xff]  }
 0x105   :  { %v6516_v48 = vpop.f32.mrf.mxu0  ;;  %v6518_v49 = vpop.f32.mrf.mxu1 }
 0x106   :  { %5295 = vmatpush3.bf16.msra.mxu0 %v5638_v42 }
 0x107   :  { %v2425_v53 = vpop.f32.mrf.mxu0  ;;  %v2617_v54 = vpop.f32.mrf.mxu1  ;;  %5296 = vmatprep.subr.bf16.mxu0 %v5665_v47 }
 0x108   :  { %v5649_v53 = vld [vmem:[%s8831_s0 + $0x1c0] ss:$36 sps:$4 sm:$0xff]  }
 0x109   :  { %v6535_v56 = vpop.f32.mrf.mxu0  ;;  %v6537_v57 = vpop.f32.mrf.mxu1  ;;  %2844 = vmatmul.mubr.bf16.gmra.mxu1 %v5617_v50  ;;  %3005 = vmatmul.mubr.bf16.gmra.mxu0 %v5618_v32  ;;  %v5655_v54 = vld [vmem:[%s8831_s0 + $0x684] ss:$36 sps:$4 sm:$0xff]  }
 0x10a   :  { %8865 = vst [vmem:[#allocation2_spill] sm:$0xff] %v6537_v57  ;;  %2851 = vmatprep.mubr.bf16.mxu1 %v5619_v51  ;;  %3012 = vmatprep.mubr.bf16.mxu0 %v5621_v52  ;;  %v5646_v52 = vld [vmem:[%s8831_s0 + $0x638] ss:$36 sps:$4 sm:$0xff]  }
 0x10b   :  { %v2430_v58 = vpop.f32.mrf.mxu0  ;;  %v2622_v59 = vpop.f32.mrf.mxu1  ;;  %5297 = vmatpush3.bf16.msra.mxu0 %v5665_v47 }
 0x10c   :  { %5298 = vmatprep.subr.bf16.mxu0 %v5692_v55 }
 0x10d   :  { %v6542_v61 = vpop.f32.mrf.mxu0  ;;  %v6544_v62 = vpop.f32.mrf.mxu1 }
 0x10e   :  { %8866 = vst [vmem:[#allocation3_spill] sm:$0xff] %v6544_v62 }
 0x10f   :  { %v2433_v4 = vpop.f32.mrf.mxu0  ;;  %v2625_v5 = vpop.f32.mrf.mxu1  ;;  %5299 = vmatpush3.bf16.msra.mxu0 %v5692_v55  ;;  %v5658_v55 = vld [vmem:[%s8831_s0 + $0x20c] ss:$36 sps:$4 sm:$0xff]  }
 0x110   :  { %5300 = vmatprep.subr.bf16.mxu0 %v5719_v60  ;;  %v5653_v5 = vld [vmem:[%s8831_s0 + $0x680] ss:$36 sps:$4 sm:$0xff]  }
 0x111   :  { %v6558_v6 = vpop.f32.mrf.mxu0  ;;  %v6560_v7 = vpop.f32.mrf.mxu1  ;;  %2852 = vmatmul.mubr.bf16.gmra.mxu1 %v5623_v63  ;;  %3013 = vmatmul.mubr.bf16.gmra.mxu0 %v5624_v1 }
 0x112   :  { %8867 = vst [vmem:[#allocation4_spill] sm:$0xff] %v6560_v7  ;;  %2859 = vmatprep.mubr.bf16.mxu1 %v5626_v2  ;;  %3020 = vmatprep.mubr.bf16.mxu0 %v5628_v3 }
 0x113   :  { %v2438_v8 = vpop.f32.mrf.mxu0  ;;  %v2630_v9 = vpop.f32.mrf.mxu1  ;;  %5301 = vmatpush3.bf16.msra.mxu0 %v5719_v60 }
 0x114   :  { %5302 = vmatprep.subr.bf16.mxu0 %v5744_v33  ;;  %v5656_v8 = vld [vmem:[%s8831_s0 + $0x208] ss:$36 sps:$4 sm:$0xff]  }
 0x115   :  { %v6562_v10 = vpop.f32.mrf.mxu0  ;;  %v6564_v11 = vpop.f32.mrf.mxu1  ;;  %v5661_v9 = vld [vmem:[%s8831_s0 + $0x6cc] ss:$36 sps:$4 sm:$0xff]  }
 0x116   :  { %8868 = vst [vmem:[#allocation5_spill] sm:$0xff] %v6564_v11 }
 0x117   :  { %v2441_v16 = vpop.f32.mrf.mxu0  ;;  %v2633_v17 = vpop.f32.mrf.mxu1  ;;  %5303 = vmatpush3.bf16.msra.mxu0 %v5744_v33 }
 0x119   :  { %v6578_v18 = vpop.f32.mrf.mxu0  ;;  %v6580_v19 = vpop.f32.mrf.mxu1  ;;  %2860 = vmatmul.mubr.bf16.gmra.mxu1 %v5630_v12  ;;  %3021 = vmatmul.mubr.bf16.gmra.mxu0 %v5631_v13  ;;  %v5664_v12 = vld [vmem:[%s8831_s0 + $0x254] ss:$36 sps:$4 sm:$0xff]  }
 0x11a   :  { %8869 = vst [vmem:[#allocation6_spill] sm:$0xff] %v6580_v19  ;;  %2867 = vmatprep.mubr.bf16.mxu1 %v5634_v14  ;;  %3028 = vmatprep.mubr.bf16.mxu0 %v5637_v15 }
 0x11b   :  { %v2446_v20 = vpop.f32.mrf.mxu0  ;;  %v2638_v21 = vpop.f32.mrf.mxu1 }
 0x11d   :  { %v6582_v22 = vpop.f32.mrf.mxu0  ;;  %v6584_v23 = vpop.f32.mrf.mxu1 }
 0x11e   :  { %8870 = vst [vmem:[#allocation7_spill] sm:$0xff] %v6584_v23 }
 0x11f   :  { %v2449_v28 = vpop.f32.mrf.mxu0  ;;  %v2641_v29 = vpop.f32.mrf.mxu1 }
 0x120   :  { %v5672_v28 = vld [vmem:[%s8831_s0 + $0x29c] ss:$36 sps:$4 sm:$0xff]  }
 0x121   :  { %v6598_v30 = vpop.f32.mrf.mxu0  ;;  %v6600_v31 = vpop.f32.mrf.mxu1  ;;  %2868 = vmatmul.mubr.bf16.gmra.mxu1 %v5632_v24  ;;  %3029 = vmatmul.mubr.bf16.gmra.mxu0 %v5635_v25  ;;  %v5659_v25 = vld [vmem:[%s8831_s0 + $0x6c8] ss:$36 sps:$4 sm:$0xff]  }
 0x122   :  { %8871 = vst [vmem:[#allocation8_spill] sm:$0xff] %v6600_v31  ;;  %2875 = vmatprep.mubr.bf16.mxu1 %v5642_v26  ;;  %3036 = vmatprep.mubr.bf16.mxu0 %v5645_v27  ;;  %v5662_v26 = vld [vmem:[%s8831_s0 + $0x250] ss:$36 sps:$4 sm:$0xff]  }
 0x123   :  { %v2454_v0 = vpop.f32.mrf.mxu0  ;;  %v2646_v34 = vpop.f32.mrf.mxu1  ;;  %v5669_v27 = vld [vmem:[%s8831_s0 + $0x714] ss:$36 sps:$4 sm:$0xff]  }
 0x125   :  { %v6605_v35 = vpop.f32.mrf.mxu0  ;;  %v6607_v36 = vpop.f32.mrf.mxu1 }
 0x126   :  { %8872 = vst [vmem:[#allocation9_spill] sm:$0xff] %v6607_v36 }
 0x127   :  { %v2457_v41 = vpop.f32.mrf.mxu0  ;;  %v2649_v42 = vpop.f32.mrf.mxu1 }
 0x129   :  { %v6621_v45 = vpop.f32.mrf.mxu0  ;;  %v6623_v46 = vpop.f32.mrf.mxu1  ;;  %2876 = vmatmul.mubr.bf16.gmra.mxu1 %v5640_v37  ;;  %3037 = vmatmul.mubr.bf16.gmra.mxu0 %v5643_v38  ;;  %v5769_v38 = vld [vmem:[%s8830_s1 + $0x208] sm:$0xff]  }
 0x12a   :  { %8873 = vst [vmem:[#allocation10_spill] sm:$0xff] %v6623_v46  ;;  %2883 = vmatprep.mubr.bf16.mxu1 %v5648_v39  ;;  %3044 = vmatprep.mubr.bf16.mxu0 %v5651_v40 }
 0x12b   :  { %v2462_v47 = vpop.f32.mrf.mxu0  ;;  %v2654_v50 = vpop.f32.mrf.mxu1  ;;  %5304 = vmatprep.subr.bf16.mxu0 %v5769_v38 }
 0x12c   :  { %v5667_v47 = vld [vmem:[%s8831_s0 + $0x710] ss:$36 sps:$4 sm:$0xff]   ;;  %5305 = vmatpush3.bf16.msra.mxu0 %v5769_v38  ;;  %v5683_v38 = vld [vmem:[%s8831_s0 + $0x328] ss:$36 sps:$4 sm:$0xff]  }
 0x12d   :  { %v6625_v32 = vpop.f32.mrf.mxu0  ;;  %v6627_v51 = vpop.f32.mrf.mxu1 }
 0x12e   :  { %8874 = vst [vmem:[#allocation11_spill] sm:$0xff] %v6627_v51 }
 0x12f   :  { %v2465_v58 = vpop.f32.mrf.mxu0  ;;  %v2657_v59 = vpop.f32.mrf.mxu1 }
 0x131   :  { %v6641_v60 = vpop.f32.mrf.mxu0  ;;  %v6643_v63 = vpop.f32.mrf.mxu1  ;;  %2884 = vmatmul.mubr.bf16.gmra.mxu1 %v5646_v52  ;;  %3045 = vmatmul.mubr.bf16.gmra.mxu0 %v5649_v53  ;;  %v5675_v52 = vld [vmem:[%s8831_s0 + $0x75c] ss:$36 sps:$4 sm:$0xff]   ;;  %v5678_v53 = vld [vmem:[%s8831_s0 + $0x2e4] ss:$36 sps:$4 sm:$0xff]  }
 0x132   :  { %8875 = vst [vmem:[#allocation12_spill] sm:$0xff] %v6643_v63  ;;  %2891 = vmatprep.mubr.bf16.mxu1 %v5655_v54  ;;  %3052 = vmatprep.mubr.bf16.mxu0 %v5658_v55 }
 0x133   :  { %v2470_v1 = vpop.f32.mrf.mxu0  ;;  %v2662_v2 = vpop.f32.mrf.mxu1 }
 0x135   :  { %v6645_v3 = vpop.f32.mrf.mxu0  ;;  %v6647_v4 = vpop.f32.mrf.mxu1 }
 0x136   :  { %8876 = vst [vmem:[#allocation13_spill] sm:$0xff] %v6647_v4 }
 0x137   :  { %v2473_v13 = vpop.f32.mrf.mxu0  ;;  %v2665_v14 = vpop.f32.mrf.mxu1 }
 0x138   :  { %v5685_v14 = vld [vmem:[%s8831_s0 + $0x32c] ss:$36 sps:$4 sm:$0xff]  }
 0x139   :  { %v6661_v15 = vpop.f32.mrf.mxu0  ;;  %v6663_v16 = vpop.f32.mrf.mxu1  ;;  %2892 = vmatmul.mubr.bf16.gmra.mxu1 %v5653_v5  ;;  %3053 = vmatmul.mubr.bf16.gmra.mxu0 %v5656_v8 }
 0x13a   :  { %8877 = vst [vmem:[#allocation14_spill] sm:$0xff] %v6663_v16  ;;  %2899 = vmatprep.mubr.bf16.mxu1 %v5661_v9  ;;  %3060 = vmatprep.mubr.bf16.mxu0 %v5664_v12  ;;  %v5673_v9 = vld [vmem:[%s8831_s0 + $0x758] ss:$36 sps:$4 sm:$0xff]   ;;  %v5676_v12 = vld [vmem:[%s8831_s0 + $0x2e0] ss:$36 sps:$4 sm:$0xff]  }
 0x13b   :  { %v2478_v17 = vpop.f32.mrf.mxu0  ;;  %v2670_v20 = vpop.f32.mrf.mxu1 }
 0x13d   :  { %v6665_v21 = vpop.f32.mrf.mxu0  ;;  %v6667_v24 = vpop.f32.mrf.mxu1 }
 0x13e   :  { %8878 = vst [vmem:[#allocation15_spill] sm:$0xff] %v6667_v24 }
 0x13f   :  { %v2481_v29 = vpop.f32.mrf.mxu0  ;;  %v2673_v33 = vpop.f32.mrf.mxu1 }
 0x141   :  { %v6681_v0 = vpop.f32.mrf.mxu0  ;;  %v2709_v34 = vpop.f32.mrf.mxu1  ;;  %2900 = vmatmul.mubr.bf16.gmra.mxu1 %v5659_v25  ;;  %3061 = vmatmul.mubr.bf16.gmra.mxu0 %v5662_v26 }
 0x142   :  { %v6684_v37 = vadd.f32 %v2709_v34, %v6508_v43  ;;  %2907 = vmatprep.mubr.bf16.mxu1 %v5669_v27  ;;  %3068 = vmatprep.mubr.bf16.mxu0 %v5672_v28  ;;  %v5670_v43 = vld [vmem:[%s8831_s0 + $0x298] ss:$36 sps:$4 sm:$0xff]   ;;  %v5680_v34 = vld [vmem:[%s8831_s0 + $0x7a0] ss:$36 sps:$4 sm:$0xff]  }
 0x143   :  { %v2486_v39 = vpop.f32.mrf.mxu0  ;;  %v2711_v40 = vpop.f32.mrf.mxu1 }
 0x144   :  { %v5691_v40 = vld [vmem:[%s8831_s0 + $0x374] ss:$36 sps:$4 sm:$0xff]  }
 0x145   :  { %v6689_v41 = vpop.f32.mrf.mxu0  ;;  %v2712_v42 = vpop.f32.mrf.mxu1 }
 0x146   :  { %v6698_v50 = vadd.f32 %v2712_v42, %v6516_v48 }
 0x147   :  { %v2489_v54 = vpop.f32.mrf.mxu0  ;;  %v2714_v55 = vpop.f32.mrf.mxu1 }
 0x149   :  { %v6706_v58 = vpop.f32.mrf.mxu0  ;;  %v2717_v59 = vpop.f32.mrf.mxu1  ;;  %2908 = vmatmul.mubr.bf16.gmra.mxu1 %v5667_v47  ;;  %3069 = vmatmul.mubr.bf16.gmra.mxu0 %v5670_v43 }
 0x14a   :  { %v6709_v1 = vadd.f32 %v2717_v59, %v6535_v56  ;;  %2915 = vmatprep.mubr.bf16.mxu1 %v5675_v52  ;;  %3076 = vmatprep.mubr.bf16.mxu0 %v5678_v53  ;;  %v5682_v56 = vld [vmem:[%s8831_s0 + $0x7a4] ss:$36 sps:$4 sm:$0xff]  }
 0x14b   :  { %v2494_v48 = vpop.f32.mrf.mxu0  ;;  %v2719_v2 = vpop.f32.mrf.mxu1 }
 0x14c   :  { %v5686_v48 = vld [vmem:[%s8831_s0 + $0x7e8] ss:$36 sps:$4 sm:$0xff]   ;;  %v5689_v2 = vld [vmem:[%s8831_s0 + $0x370] ss:$36 sps:$4 sm:$0xff]  }
 0x14d   :  { %v6711_v5 = vpop.f32.mrf.mxu0  ;;  %v2720_v8 = vpop.f32.mrf.mxu1 }
 0x14e   :  { %v6720_v13 = vadd.f32 %v2720_v8, %v6542_v61 }
 0x14f   :  { %v2497_v17 = vpop.f32.mrf.mxu0  ;;  %v2722_v20 = vpop.f32.mrf.mxu1 }
 0x151   :  { %v6728_v25 = vpop.f32.mrf.mxu0  ;;  %v2725_v26 = vpop.f32.mrf.mxu1  ;;  %2916 = vmatmul.mubr.bf16.gmra.mxu1 %v5673_v9  ;;  %3077 = vmatmul.mubr.bf16.gmra.mxu0 %v5676_v12  ;;  %v5699_v9 = vld [vmem:[%s8831_s0 + $0x3bc] ss:$36 sps:$4 sm:$0xff]  }
 0x152   :  { %v6731_v27 = vadd.f32 %v2725_v26, %v6558_v6  ;;  %2923 = vmatprep.mubr.bf16.mxu1 %v5682_v56  ;;  %3084 = vmatprep.mubr.bf16.mxu0 %v5685_v14  ;;  %v5688_v6 = vld [vmem:[%s8831_s0 + $0x7ec] ss:$36 sps:$4 sm:$0xff]  }
 0x153   :  { %v2502_v61 = vpop.f32.mrf.mxu0  ;;  %v2727_v28 = vpop.f32.mrf.mxu1 }
 0x155   :  { %v6733_v29 = vpop.f32.mrf.mxu0  ;;  %v2728_v33 = vpop.f32.mrf.mxu1 }
 0x156   :  { %v6742_v39 = vadd.f32 %v2728_v33, %v6562_v10 }
 0x157   :  { %v2505_v42 = vpop.f32.mrf.mxu0  ;;  %v2730_v47 = vpop.f32.mrf.mxu1 }
 0x159   :  { %v6750_v43 = vpop.f32.mrf.mxu0  ;;  %v2733_v52 = vpop.f32.mrf.mxu1  ;;  %2924 = vmatmul.mubr.bf16.gmra.mxu1 %v5680_v34  ;;  %3085 = vmatmul.mubr.bf16.gmra.mxu0 %v5683_v38  ;;  %v5694_v34 = vld [vmem:[%s8831_s0 + $0x830] ss:$36 sps:$4 sm:$0xff]  }
 0x15a   :  { %v6753_v53 = vadd.f32 %v2733_v52, %v6578_v18  ;;  %2931 = vmatprep.mubr.bf16.mxu1 %v5688_v6  ;;  %3092 = vmatprep.mubr.bf16.mxu0 %v5691_v40  ;;  %v5696_v18 = vld [vmem:[%s8831_s0 + $0x834] ss:$36 sps:$4 sm:$0xff]   ;;  %v5702_v6 = vld [vmem:[%s8831_s0 + $0x87c] ss:$36 sps:$4 sm:$0xff]   ;;  %v5705_v40 = vld [vmem:[%s8831_s0 + $0x404] ss:$36 sps:$4 sm:$0xff]  }
 0x15b   :  { %v2510_v10 = vpop.f32.mrf.mxu0  ;;  %v2735_v54 = vpop.f32.mrf.mxu1 }
 0x15d   :  { %v6755_v55 = vpop.f32.mrf.mxu0  ;;  %v2736_v59 = vpop.f32.mrf.mxu1 }
 0x15e   :  { %v6764_v8 = vadd.f32 %v2736_v59, %v6582_v22  ;;  %v5794_v22 = vld [vmem:[%s8830_s1 + $0x200] sm:$0xff]  }
 0x15f   :  { %v2513_v12 = vpop.f32.mrf.mxu0  ;;  %v2738_v56 = vpop.f32.mrf.mxu1  ;;  %5306 = vmatprep.subr.bf16.mxu0 %v5794_v22 }
 0x160   :  { %5307 = vmatpush3.bf16.msra.mxu0 %v5794_v22  ;;  %v5712_v56 = vld [vmem:[%s8831_s0 + $0x44c] ss:$36 sps:$4 sm:$0xff]  }
 0x161   :  { %v6772_v14 = vpop.f32.mrf.mxu0  ;;  %v2741_v17 = vpop.f32.mrf.mxu1  ;;  %2932 = vmatmul.mubr.bf16.gmra.mxu1 %v5686_v48  ;;  %3093 = vmatmul.mubr.bf16.gmra.mxu0 %v5689_v2 }
 0x162   :  { %v6775_v20 = vadd.f32 %v2741_v17, %v6598_v30  ;;  %2939 = vmatprep.mubr.bf16.mxu1 %v5696_v18  ;;  %3100 = vmatprep.mubr.bf16.mxu0 %v5699_v9  ;;  %v5697_v30 = vld [vmem:[%s8831_s0 + $0x3b8] ss:$36 sps:$4 sm:$0xff]   ;;  %v5703_v9 = vld [vmem:[%s8831_s0 + $0x400] ss:$36 sps:$4 sm:$0xff]  }
 0x163   :  { %v2518_v26 = vpop.f32.mrf.mxu0  ;;  %v2743_v61 = vpop.f32.mrf.mxu1  ;;  %v5700_v18 = vld [vmem:[%s8831_s0 + $0x878] ss:$36 sps:$4 sm:$0xff]  }
 0x165   :  { %v6780_v28 = vpop.f32.mrf.mxu0  ;;  %v2744_v33 = vpop.f32.mrf.mxu1 }
 0x166   :  { %v6789_v38 = vadd.f32 %v2744_v33, %v6605_v35 }
 0x167   :  { %v2521_v42 = vpop.f32.mrf.mxu0  ;;  %v2746_v47 = vpop.f32.mrf.mxu1 }
 0x168   :  { %v5710_v42 = vld [vmem:[%s8831_s0 + $0x448] ss:$36 sps:$4 sm:$0xff]  }
 0x169   :  { %v6797_v52 = vpop.f32.mrf.mxu0  ;;  %v2749_v10 = vpop.f32.mrf.mxu1  ;;  %2940 = vmatmul.mubr.bf16.gmra.mxu1 %v5694_v34  ;;  %3101 = vmatmul.mubr.bf16.gmra.mxu0 %v5697_v30 }
 0x16a   :  { %v6800_v54 = vadd.f32 %v2749_v10, %v6621_v45  ;;  %2947 = vmatprep.mubr.bf16.mxu1 %v5702_v6  ;;  %3108 = vmatprep.mubr.bf16.mxu0 %v5705_v40  ;;  %v5709_v45 = vld [vmem:[%s8831_s0 + $0x8c4] ss:$36 sps:$4 sm:$0xff]   ;;  %v5718_v10 = vld [vmem:[%s8831_s0 + $0x1c] ss:$36 sps:$4 sm:$0xff]  }
 0x16b   :  { %v2526_v35 = vpop.f32.mrf.mxu0  ;;  %v2751_v59 = vpop.f32.mrf.mxu1  ;;  %v5707_v40 = vld [vmem:[%s8831_s0 + $0x8c0] ss:$36 sps:$4 sm:$0xff]  }
 0x16d   :  { %v6802_v48 = vpop.f32.mrf.mxu0  ;;  %v2752_v2 = vpop.f32.mrf.mxu1 }
 0x16e   :  { %v6811_v12 = vadd.f32 %v2752_v2, %v6625_v32 }
 0x16f   :  { %v2529_v17 = vpop.f32.mrf.mxu0  ;;  %v2754_v22 = vpop.f32.mrf.mxu1 }
 0x170   :  { %v5713_v22 = vld [vmem:[%s8831_s0 + $0x490] ss:$36 sps:$4 sm:$0xff]  }
 0x171   :  { %v6819_v26 = vpop.f32.mrf.mxu0  ;;  %v2757_v61 = vpop.f32.mrf.mxu1  ;;  %2948 = vmatmul.mubr.bf16.gmra.mxu1 %v5700_v18  ;;  %3109 = vmatmul.mubr.bf16.gmra.mxu0 %v5703_v9 }
 0x172   :  { %v6822_v33 = vadd.f32 %v2757_v61, %v6641_v60  ;;  %2955 = vmatprep.mubr.bf16.mxu1 %v5709_v45  ;;  %3116 = vmatprep.mubr.bf16.mxu0 %v5712_v56  ;;  %v5715_v60 = vld [vmem:[%s8831_s0 + $0x494] ss:$36 sps:$4 sm:$0xff]  }
 0x173   :  { %v2534_v32 = vpop.f32.mrf.mxu0  ;;  %v2759_v34 = vpop.f32.mrf.mxu1  ;;  %v5716_v61 = vld [vmem:[%s8831_s0 + $0x18] ss:$36 sps:$4 sm:$0xff]  }
 0x174   :  { %v5725_v34 = vld [vmem:[%s8831_s0 + $0x64] ss:$36 sps:$4 sm:$0xff]  }
 0x175   :  { %v6824_v30 = vpop.f32.mrf.mxu0  ;;  %v2760_v6 = vpop.f32.mrf.mxu1 }
 0x176   :  { %v6833_v47 = vadd.f32 %v2760_v6, %v6645_v3 }
 0x177   :  { %v2537_v35 = vpop.f32.mrf.mxu0  ;;  %v2762_v59 = vpop.f32.mrf.mxu1 }
 0x179   :  { %v6841_v2 = vpop.f32.mrf.mxu0  ;;  %v2765_v18 = vpop.f32.mrf.mxu1  ;;  %2956 = vmatmul.mubr.bf16.gmra.mxu1 %v5707_v40  ;;  %3117 = vmatmul.mubr.bf16.gmra.mxu0 %v5710_v42 }
 0x17a   :  { %v6844_v9 = vadd.f32 %v2765_v18, %v6661_v15  ;;  %3124 = vmatprep.mubr.bf16.mxu0 %v5715_v60  ;;  %3285 = vmatprep.mubr.bf16.mxu1 %v5718_v10  ;;  %v5722_v15 = vld [vmem:[%s8831_s0 + $0x4dc] ss:$36 sps:$4 sm:$0xff]  }
 0x17b   :  { %v2542_v3 = vpop.f32.mrf.mxu0  ;;  %v2767_v45 = vpop.f32.mrf.mxu1 }
 0x17c   :  { %v5720_v3 = vld [vmem:[%s8831_s0 + $0x4d8] ss:$36 sps:$4 sm:$0xff]   ;;  %v5723_v45 = vld [vmem:[%s8831_s0 + $0x60] ss:$36 sps:$4 sm:$0xff]  }
 0x17d   :  { %v6846_v56 = vpop.f32.mrf.mxu0  ;;  %v2768_v17 = vpop.f32.mrf.mxu1 }
 0x17e   :  { %v6855_v32 = vadd.f32 %v2768_v17, %v6665_v21 }
 0x17f   :  { %v2545_v6 = vpop.f32.mrf.mxu0  ;;  %v2770_v40 = vpop.f32.mrf.mxu1 }
 0x181   :  { %v6863_v42 = vpop.f32.mrf.mxu0  ;;  %v2773_v60 = vpop.f32.mrf.mxu1  ;;  %3125 = vmatmul.mubr.bf16.gmra.mxu0 %v5713_v22  ;;  %3286 = vmatmul.mubr.bf16.vlgmr.msra.gmra.mxu1 %v5716_v61  ;;  %v5731_v22 = vld [vmem:[%s8831_s0 + $0xac] ss:$36 sps:$4 sm:$0xff]  }
 0x182   :  { %v6866_v10 = vadd.f32 %v2773_v60, %v6681_v0  ;;  %3132 = vmatprep.mubr.bf16.mxu0 %v5722_v15  ;;  %3293 = vmatprep.mubr.bf16.mxu1 %v5725_v34  ;;  %v5728_v0 = vld [vmem:[%s8831_s0 + $0x524] ss:$36 sps:$4 sm:$0xff]  }
 0x183   :  { %v2550_v21 = vpop.f32.mrf.mxu0  ;;  %v2775_v35 = vpop.f32.mrf.mxu1 }
 0x185   :  { %v6868_v59 = vpop.f32.mrf.mxu0  ;;  %v2776_v18 = vpop.f32.mrf.mxu1 }
 0x186   :  { %v6877_v17 = vadd.f32 %v2776_v18, %v6689_v41  ;;  %v5726_v18 = vld [vmem:[%s8831_s0 + $0x520] ss:$36 sps:$4 sm:$0xff]  }
 0x187   :  { %v2553_v61 = vpop.f32.mrf.mxu0  ;;  %v2778_v15 = vpop.f32.mrf.mxu1 }
 0x188   :  { %v5729_v61 = vld [vmem:[%s8831_s0 + $0xa8] ss:$36 sps:$4 sm:$0xff]  }
 0x189   :  { %v6885_v34 = vpop.f32.mrf.mxu0  ;;  %v2781_v6 = vpop.f32.mrf.mxu1  ;;  %3133 = vmatmul.mubr.bf16.gmra.mxu0 %v5720_v3  ;;  %3294 = vmatmul.mubr.bf16.gmra.mxu1 %v5723_v45  ;;  %v5737_v45 = vld [vmem:[%s8831_s0 + $0xf4] ss:$36 sps:$4 sm:$0xff]  }
 0x18a   :  { %v6888_v40 = vadd.f32 %v2781_v6, %v6706_v58  ;;  %3140 = vmatprep.mubr.bf16.mxu0 %v5728_v0  ;;  %3301 = vmatprep.mubr.bf16.mxu1 %v5731_v22  ;;  %v5734_v58 = vld [vmem:[%s8831_s0 + $0x56c] ss:$36 sps:$4 sm:$0xff]  }
 0x18b   :  { %v2558_v41 = vpop.f32.mrf.mxu0  ;;  %v2783_v60 = vpop.f32.mrf.mxu1 }
 0x18d   :  { %v6890_v21 = vpop.f32.mrf.mxu0  ;;  %v2784_v35 = vpop.f32.mrf.mxu1 }
 0x18e   :  { %v6899_v3 = vadd.f32 %v2784_v35, %v6711_v5 }
 0x18f   :  { %v2561_v0 = vpop.f32.mrf.mxu0  ;;  %v2786_v22 = vpop.f32.mrf.mxu1 }
 0x190   :  { %v5732_v0 = vld [vmem:[%s8831_s0 + $0x568] ss:$36 sps:$4 sm:$0xff]   ;;  %v5735_v22 = vld [vmem:[%s8831_s0 + $0xf0] ss:$36 sps:$4 sm:$0xff]  }
 0x191   :  { %v6907_v15 = vpop.f32.mrf.mxu0  ;;  %v2789_v6 = vpop.f32.mrf.mxu1  ;;  %3141 = vmatmul.mubr.bf16.gmra.mxu0 %v5726_v18  ;;  %3302 = vmatmul.mubr.bf16.gmra.mxu1 %v5729_v61  ;;  %v5743_v61 = vld [vmem:[%s8831_s0 + $0x13c] ss:$36 sps:$4 sm:$0xff]  }
 0x192   :  { %v6910_v41 = vadd.f32 %v2789_v6, %v6728_v25  ;;  %3148 = vmatprep.mubr.bf16.mxu0 %v5734_v58  ;;  %3309 = vmatprep.mubr.bf16.mxu1 %v5737_v45  ;;  %v5740_v25 = vld [vmem:[%s8831_s0 + $0x5b4] ss:$36 sps:$4 sm:$0xff]  }
 0x193   :  { %v2566_v5 = vpop.f32.mrf.mxu0  ;;  %v2791_v60 = vpop.f32.mrf.mxu1 }
 0x195   :  { %v6912_v35 = vpop.f32.mrf.mxu0  ;;  %v2792_v24 = vpop.f32.mrf.mxu1 }
 0x196   :  { %v6921_v18 = vadd.f32 %v2792_v24, %v6733_v29 }
 0x197   :  { %v2569_v58 = vpop.f32.mrf.mxu0  ;;  %v2794_v45 = vpop.f32.mrf.mxu1 }
 0x198   :  { %v5738_v58 = vld [vmem:[%s8831_s0 + $0x5b0] ss:$36 sps:$4 sm:$0xff]   ;;  %v5741_v45 = vld [vmem:[%s8831_s0 + $0x138] ss:$36 sps:$4 sm:$0xff]  }
 0x199   :  { %v6929_v6 = vpop.f32.mrf.mxu0  ;;  %v2797_v5 = vpop.f32.mrf.mxu1  ;;  %3149 = vmatmul.mubr.bf16.gmra.mxu0 %v5732_v0  ;;  %3310 = vmatmul.mubr.bf16.gmra.mxu1 %v5735_v22  ;;  %v5750_v22 = vld [vmem:[%s8831_s0 + $0x184] ss:$36 sps:$4 sm:$0xff]  }
 0x19a   :  { %v6932_v60 = vadd.f32 %v2797_v5, %v6750_v43  ;;  %3156 = vmatprep.mubr.bf16.mxu0 %v5740_v25  ;;  %3317 = vmatprep.mubr.bf16.mxu1 %v5743_v61  ;;  %v5747_v43 = vld [vmem:[%s8831_s0 + $0x5fc] ss:$36 sps:$4 sm:$0xff]  }
 0x19b   :  { %v2574_v24 = vpop.f32.mrf.mxu0  ;;  %v2799_v29 = vpop.f32.mrf.mxu1 }
 0x19d   :  { %v6934_v16 = vpop.f32.mrf.mxu0  ;;  %v2800_v4 = vpop.f32.mrf.mxu1 }
 0x19e   :  { %v6943_v0 = vadd.f32 %v2800_v4, %v6755_v55 }
 0x19f   :  { %v2577_v25 = vpop.f32.mrf.mxu0  ;;  %v2802_v61 = vpop.f32.mrf.mxu1 }
 0x1a0   :  { %v5745_v25 = vld [vmem:[%s8831_s0 + $0x5f8] ss:$36 sps:$4 sm:$0xff]   ;;  %v5748_v61 = vld [vmem:[%s8831_s0 + $0x180] ss:$36 sps:$4 sm:$0xff]  }
 0x1a1   :  { %v6951_v5 = vpop.f32.mrf.mxu0  ;;  %v2805_v24 = vpop.f32.mrf.mxu1  ;;  %3157 = vmatmul.mubr.bf16.gmra.mxu0 %v5738_v58  ;;  %3318 = vmatmul.mubr.bf16.gmra.mxu1 %v5741_v45  ;;  %v5756_v45 = vld [vmem:[%s8831_s0 + $0x1cc] ss:$36 sps:$4 sm:$0xff]  }
 0x1a2   :  { %v6954_v29 = vadd.f32 %v2805_v24, %v6772_v14  ;;  %3164 = vmatprep.mubr.bf16.mxu0 %v5747_v43  ;;  %3325 = vmatprep.mubr.bf16.mxu1 %v5750_v22  ;;  %v5753_v14 = vld [vmem:[%s8831_s0 + $0x644] ss:$36 sps:$4 sm:$0xff]  }
 0x1a3   :  { %v2582_v4 = vpop.f32.mrf.mxu0  ;;  %v2807_v55 = vpop.f32.mrf.mxu1 }
 0x1a5   :  { %v6956_v63 = vpop.f32.mrf.mxu0  ;;  %v2808_v51 = vpop.f32.mrf.mxu1 }
 0x1a6   :  { %v6965_v58 = vadd.f32 %v2808_v51, %v6780_v28 }
 0x1a7   :  { %v2585_v43 = vpop.f32.mrf.mxu0  ;;  %v2810_v22 = vpop.f32.mrf.mxu1 }
 0x1a8   :  { %v5751_v43 = vld [vmem:[%s8831_s0 + $0x640] ss:$36 sps:$4 sm:$0xff]   ;;  %v5754_v22 = vld [vmem:[%s8831_s0 + $0x1c8] ss:$36 sps:$4 sm:$0xff]  }
 0x1a9   :  { %v6973_v24 = vpop.f32.mrf.mxu0  ;;  %v2813_v4 = vpop.f32.mrf.mxu1  ;;  %3165 = vmatmul.mubr.bf16.gmra.mxu0 %v5745_v25  ;;  %3326 = vmatmul.mubr.bf16.gmra.mxu1 %v5748_v61  ;;  %v5762_v61 = vld [vmem:[%s8831_s0 + $0x214] ss:$36 sps:$4 sm:$0xff]  }
 0x1aa   :  { %v6976_v55 = vadd.f32 %v2813_v4, %v6797_v52  ;;  %3172 = vmatprep.mubr.bf16.mxu0 %v5753_v14  ;;  %3333 = vmatprep.mubr.bf16.mxu1 %v5756_v45  ;;  %v5759_v52 = vld [vmem:[%s8831_s0 + $0x68c] ss:$36 sps:$4 sm:$0xff]  }
 0x1ab   :  { %v2590_v51 = vpop.f32.mrf.mxu0  ;;  %v2815_v28 = vpop.f32.mrf.mxu1 }
 0x1ad   :  { %v6978_v46 = vpop.f32.mrf.mxu0  ;;  %v2816_v36 = vpop.f32.mrf.mxu1 }
 0x1ae   :  { %v6987_v25 = vadd.f32 %v2816_v36, %v6802_v48 }
 0x1af   :  { %v2593_v14 = vpop.f32.mrf.mxu0  ;;  %v2818_v45 = vpop.f32.mrf.mxu1 }
 0x1b0   :  { %v5757_v14 = vld [vmem:[%s8831_s0 + $0x688] ss:$36 sps:$4 sm:$0xff]   ;;  %v5760_v45 = vld [vmem:[%s8831_s0 + $0x210] ss:$36 sps:$4 sm:$0xff]  }
 0x1b1   :  { %v6995_v4 = vpop.f32.mrf.mxu0  ;;  %v2821_v51 = vpop.f32.mrf.mxu1  ;;  %3173 = vmatmul.mubr.bf16.gmra.mxu0 %v5751_v43  ;;  %3334 = vmatmul.mubr.bf16.gmra.mxu1 %v5754_v22  ;;  %v5768_v22 = vld [vmem:[%s8831_s0 + $0x25c] ss:$36 sps:$4 sm:$0xff]  }
 0x1b2   :  { %v6998_v28 = vadd.f32 %v2821_v51, %v6819_v26  ;;  %3180 = vmatprep.mubr.bf16.mxu0 %v5759_v52  ;;  %3341 = vmatprep.mubr.bf16.mxu1 %v5762_v61  ;;  %v5765_v26 = vld [vmem:[%s8831_s0 + $0x6d4] ss:$36 sps:$4 sm:$0xff]  }
 0x1b3   :  { %v2598_v36 = vpop.f32.mrf.mxu0  ;;  %v2823_v48 = vpop.f32.mrf.mxu1 }
 0x1b5   :  { %v7000_v31 = vpop.f32.mrf.mxu0  ;;  %v2824_v23 = vpop.f32.mrf.mxu1 }
 0x1b6   :  { %v7009_v43 = vadd.f32 %v2824_v23, %v6824_v30 }
 0x1b7   :  { %v2601_v52 = vpop.f32.mrf.mxu0  ;;  %v2826_v61 = vpop.f32.mrf.mxu1 }
 0x1b8   :  { %v5763_v52 = vld [vmem:[%s8831_s0 + $0x6d0] ss:$36 sps:$4 sm:$0xff]   ;;  %v5766_v61 = vld [vmem:[%s8831_s0 + $0x258] ss:$36 sps:$4 sm:$0xff]  }
 0x1b9   :  { %v7017_v51 = vpop.f32.mrf.mxu0  ;;  %v2829_v36 = vpop.f32.mrf.mxu1  ;;  %3181 = vmatmul.mubr.bf16.gmra.mxu0 %v5757_v14  ;;  %3342 = vmatmul.mubr.bf16.gmra.mxu1 %v5760_v45  ;;  %v5775_v45 = vld [vmem:[%s8831_s0 + $0x2a4] ss:$36 sps:$4 sm:$0xff]  }
 0x1ba   :  { %v7020_v48 = vadd.f32 %v2829_v36, %v6841_v2  ;;  %3188 = vmatprep.mubr.bf16.mxu0 %v5765_v26  ;;  %3349 = vmatprep.mubr.bf16.mxu1 %v5768_v22  ;;  %v5772_v2 = vld [vmem:[%s8831_s0 + $0x71c] ss:$36 sps:$4 sm:$0xff]  }
 0x1bb   :  { %v2606_v23 = vpop.f32.mrf.mxu0  ;;  %v2831_v30 = vpop.f32.mrf.mxu1 }
 0x1bd   :  { %v7022_v19 = vpop.f32.mrf.mxu0  ;;  %v2832_v11 = vpop.f32.mrf.mxu1 }
 0x1be   :  { %v7031_v14 = vadd.f32 %v2832_v11, %v6846_v56 }
 0x1bf   :  { %v2609_v26 = vpop.f32.mrf.mxu0  ;;  %v2834_v22 = vpop.f32.mrf.mxu1 }
 0x1c0   :  { %v5770_v26 = vld [vmem:[%s8831_s0 + $0x718] ss:$36 sps:$4 sm:$0xff]  }
 0x1c1   :  { %v2837_v36 = vpop.f32.mrf.mxu1  ;;  %v2998_v23 = vpop.f32.mrf.mxu0  ;;  %3189 = vmatmul.mubr.bf16.gmra.mxu0 %v5763_v52  ;;  %3350 = vmatmul.mubr.bf16.gmra.mxu1 %v5766_v61  ;;  %v5773_v52 = vld [vmem:[%s8831_s0 + $0x2a0] ss:$36 sps:$4 sm:$0xff]   ;;  %v5781_v61 = vld [vmem:[%s8831_s0 + $0x2ec] ss:$36 sps:$4 sm:$0xff]  }
 0x1c2   :  { %v7040_v30 = vadd.f32 %v2837_v36, %v6863_v42  ;;  %v7043_v11 = vadd.f32 %v2998_v23, %v6684_v37  ;;  %3196 = vmatprep.mubr.bf16.mxu0 %v5772_v2  ;;  %3357 = vmatprep.mubr.bf16.mxu1 %v5775_v45 }
 0x1c3   :  { %v2839_v56 = vpop.f32.mrf.mxu1  ;;  %v3000_v7 = vpop.f32.mrf.mxu0 }
 0x1c4   :  { %v5778_v7 = vld [vmem:[%s8831_s0 + $0x764] ss:$36 sps:$4 sm:$0xff]  }
 0x1c5   :  { %v2840_v62 = vpop.f32.mrf.mxu1  ;;  %v3001_v57 = vpop.f32.mrf.mxu0 }
 0x1c6   :  { %v7052_v42 = vadd.f32 %v2840_v62, %v6868_v59  ;;  %v7055_v37 = vadd.f32 %v3001_v57, %v6698_v50 }
 0x1c7   :  { %v2842_v2 = vpop.f32.mrf.mxu1  ;;  %v3003_v45 = vpop.f32.mrf.mxu0 }
 0x1c8   :  { %v5776_v2 = vld [vmem:[%s8831_s0 + $0x760] ss:$36 sps:$4 sm:$0xff]  }
 0x1c9   :  { %v2845_v22 = vpop.f32.mrf.mxu1  ;;  %v3006_v36 = vpop.f32.mrf.mxu0  ;;  %3197 = vmatmul.mubr.bf16.gmra.mxu0 %v5770_v26  ;;  %3358 = vmatmul.mubr.bf16.gmra.mxu1 %v5773_v52  ;;  %v5779_v26 = vld [vmem:[%s8831_s0 + $0x2e8] ss:$36 sps:$4 sm:$0xff]  }
 0x1ca   :  { %v7064_v62 = vadd.f32 %v2845_v22, %v6885_v34  ;;  %v7067_v57 = vadd.f32 %v3006_v36, %v6709_v1  ;;  %3204 = vmatprep.mubr.bf16.mxu0 %v5778_v7  ;;  %3365 = vmatprep.mubr.bf16.mxu1 %v5781_v61  ;;  %v5784_v52 = vld [vmem:[%s8831_s0 + $0x7ac] ss:$36 sps:$4 sm:$0xff]   ;;  %v5787_v7 = vld [vmem:[%s8831_s0 + $0x334] ss:$36 sps:$4 sm:$0xff]  }
 0x1cb   :  { %v2847_v50 = vpop.f32.mrf.mxu1  ;;  %v3008_v59 = vpop.f32.mrf.mxu0 }
 0x1cd   :  { %v2848_v23 = vpop.f32.mrf.mxu1  ;;  %v3009_v56 = vpop.f32.mrf.mxu0 }
 0x1ce   :  { %v7076_v34 = vadd.f32 %v2848_v23, %v6890_v21  ;;  %v7079_v1 = vadd.f32 %v3009_v56, %v6720_v13 }
 0x1cf   :  { %v2850_v61 = vpop.f32.mrf.mxu1  ;;  %v3011_v45 = vpop.f32.mrf.mxu0 }
 0x1d0   :  { %v5782_v61 = vld [vmem:[%s8831_s0 + $0x7a8] ss:$36 sps:$4 sm:$0xff]  }
 0x1d1   :  { %v2853_v22 = vpop.f32.mrf.mxu1  ;;  %v3014_v36 = vpop.f32.mrf.mxu0  ;;  %3205 = vmatmul.mubr.bf16.gmra.mxu0 %v5776_v2  ;;  %3366 = vmatmul.mubr.bf16.gmra.mxu1 %v5779_v26  ;;  %v5785_v2 = vld [vmem:[%s8831_s0 + $0x330] ss:$36 sps:$4 sm:$0xff]  }
 0x1d2   :  { %v7088_v21 = vadd.f32 %v2853_v22, %v6907_v15  ;;  %v7091_v13 = vadd.f32 %v3014_v36, %v6731_v27  ;;  %3212 = vmatprep.mubr.bf16.mxu0 %v5784_v52  ;;  %3373 = vmatprep.mubr.bf16.mxu1 %v5787_v7  ;;  %v5790_v26 = vld [vmem:[%s8831_s0 + $0x7f4] ss:$36 sps:$4 sm:$0xff]   ;;  %v5793_v52 = vld [vmem:[%s8831_s0 + $0x37c] ss:$36 sps:$4 sm:$0xff]  }
 0x1d3   :  { %v2855_v50 = vpop.f32.mrf.mxu1  ;;  %v3016_v59 = vpop.f32.mrf.mxu0 }
 0x1d5   :  { %v2856_v23 = vpop.f32.mrf.mxu1  ;;  %v3017_v56 = vpop.f32.mrf.mxu0 }
 0x1d6   :  { %v7100_v15 = vadd.f32 %v2856_v23, %v6912_v35  ;;  %v7103_v27 = vadd.f32 %v3017_v56, %v6742_v39 }
 0x1d7   :  { %v2858_v7 = vpop.f32.mrf.mxu1  ;;  %v3019_v45 = vpop.f32.mrf.mxu0 }
 0x1d8   :  { %v5788_v7 = vld [vmem:[%s8831_s0 + $0x7f0] ss:$36 sps:$4 sm:$0xff]  }
 0x1d9   :  { %v2861_v22 = vpop.f32.mrf.mxu1  ;;  %v3022_v36 = vpop.f32.mrf.mxu0  ;;  %3213 = vmatmul.mubr.bf16.gmra.mxu0 %v5782_v61  ;;  %3374 = vmatmul.mubr.bf16.gmra.mxu1 %v5785_v2  ;;  %v5791_v61 = vld [vmem:[%s8831_s0 + $0x378] ss:$36 sps:$4 sm:$0xff]  }
 0x1da   :  { %v7112_v35 = vadd.f32 %v2861_v22, %v6929_v6  ;;  %v7115_v39 = vadd.f32 %v3022_v36, %v6753_v53  ;;  %3220 = vmatprep.mubr.bf16.mxu0 %v5790_v26  ;;  %3381 = vmatprep.mubr.bf16.mxu1 %v5793_v52  ;;  %v5797_v2 = vld [vmem:[%s8831_s0 + $0x83c] ss:$36 sps:$4 sm:$0xff]   ;;  %v5800_v26 = vld [vmem:[%s8831_s0 + $0x3c4] ss:$36 sps:$4 sm:$0xff]  }
 0x1db   :  { %v2863_v50 = vpop.f32.mrf.mxu1  ;;  %v3024_v59 = vpop.f32.mrf.mxu0 }
 0x1dd   :  { %v2864_v23 = vpop.f32.mrf.mxu1  ;;  %v3025_v56 = vpop.f32.mrf.mxu0 }
 0x1de   :  { %v7124_v6 = vadd.f32 %v2864_v23, %v6934_v16  ;;  %v7127_v53 = vadd.f32 %v3025_v56, %v6764_v8 }
 0x1df   :  { %v2866_v52 = vpop.f32.mrf.mxu1  ;;  %v3027_v45 = vpop.f32.mrf.mxu0 }
 0x1e0   :  { %v5795_v52 = vld [vmem:[%s8831_s0 + $0x838] ss:$36 sps:$4 sm:$0xff]  }
 0x1e1   :  { %v2869_v22 = vpop.f32.mrf.mxu1  ;;  %v3030_v36 = vpop.f32.mrf.mxu0  ;;  %3221 = vmatmul.mubr.bf16.gmra.mxu0 %v5788_v7  ;;  %3382 = vmatmul.mubr.bf16.gmra.mxu1 %v5791_v61  ;;  %v5798_v7 = vld [vmem:[%s8831_s0 + $0x3c0] ss:$36 sps:$4 sm:$0xff]  }
 0x1e2   :  { %v7136_v16 = vadd.f32 %v2869_v22, %v6951_v5  ;;  %v7139_v8 = vadd.f32 %v3030_v36, %v6775_v20  ;;  %3228 = vmatprep.mubr.bf16.mxu0 %v5797_v2  ;;  %3389 = vmatprep.mubr.bf16.mxu1 %v5800_v26  ;;  %v5803_v61 = vld [vmem:[%s8831_s0 + $0x884] ss:$36 sps:$4 sm:$0xff]   ;;  %v5806_v2 = vld [vmem:[%s8831_s0 + $0x40c] ss:$36 sps:$4 sm:$0xff]  }
 0x1e3   :  { %v2871_v50 = vpop.f32.mrf.mxu1  ;;  %v3032_v59 = vpop.f32.mrf.mxu0 }
 0x1e5   :  { %v2872_v23 = vpop.f32.mrf.mxu1  ;;  %v3033_v56 = vpop.f32.mrf.mxu0 }
 0x1e6   :  { %v7148_v5 = vadd.f32 %v2872_v23, %v6956_v63  ;;  %v7151_v20 = vadd.f32 %v3033_v56, %v6789_v38 }
 0x1e7   :  { %v2874_v26 = vpop.f32.mrf.mxu1  ;;  %v3035_v45 = vpop.f32.mrf.mxu0 }
 0x1e8   :  { %v5801_v26 = vld [vmem:[%s8831_s0 + $0x880] ss:$36 sps:$4 sm:$0xff]  }
 0x1e9   :  { %v2877_v22 = vpop.f32.mrf.mxu1  ;;  %v3038_v36 = vpop.f32.mrf.mxu0  ;;  %3229 = vmatmul.mubr.bf16.gmra.mxu0 %v5795_v52  ;;  %3390 = vmatmul.mubr.bf16.gmra.mxu1 %v5798_v7  ;;  %v5804_v52 = vld [vmem:[%s8831_s0 + $0x408] ss:$36 sps:$4 sm:$0xff]  }
 0x1ea   :  { %v7160_v63 = vadd.f32 %v2877_v22, %v6973_v24  ;;  %v7163_v38 = vadd.f32 %v3038_v36, %v6800_v54  ;;  %3236 = vmatprep.mubr.bf16.mxu0 %v5803_v61  ;;  %3397 = vmatprep.mubr.bf16.mxu1 %v5806_v2  ;;  %v5809_v7 = vld [vmem:[%s8831_s0 + $0x8cc] ss:$36 sps:$4 sm:$0xff]   ;;  %v5812_v61 = vld [vmem:[%s8831_s0 + $0x454] ss:$36 sps:$4 sm:$0xff]  }
 0x1eb   :  { %v2879_v50 = vpop.f32.mrf.mxu1  ;;  %v3040_v59 = vpop.f32.mrf.mxu0 }
 0x1ed   :  { %v2880_v23 = vpop.f32.mrf.mxu1  ;;  %v3041_v56 = vpop.f32.mrf.mxu0 }
 0x1ee   :  { %v7172_v24 = vadd.f32 %v2880_v23, %v6978_v46  ;;  %v7175_v54 = vadd.f32 %v3041_v56, %v6811_v12 }
 0x1ef   :  { %v2882_v2 = vpop.f32.mrf.mxu1  ;;  %v3043_v45 = vpop.f32.mrf.mxu0 }
 0x1f0   :  { %v5807_v2 = vld [vmem:[%s8831_s0 + $0x8c8] ss:$36 sps:$4 sm:$0xff]  }
 0x1f1   :  { %v2885_v22 = vpop.f32.mrf.mxu1  ;;  %v3046_v36 = vpop.f32.mrf.mxu0  ;;  %3237 = vmatmul.mubr.bf16.gmra.mxu0 %v5801_v26  ;;  %3398 = vmatmul.mubr.bf16.gmra.mxu1 %v5804_v52  ;;  %v5810_v26 = vld [vmem:[%s8831_s0 + $0x450] ss:$36 sps:$4 sm:$0xff]   ;;  %v5815_v52 = vld [vmem:[%s8831_s0 + $0x49c] ss:$36 sps:$4 sm:$0xff]  }
 0x1f2   :  { %v7184_v46 = vadd.f32 %v2885_v22, %v6995_v4  ;;  %v7187_v12 = vadd.f32 %v3046_v36, %v6822_v33  ;;  %3244 = vmatprep.mubr.bf16.mxu0 %v5809_v7  ;;  %3405 = vmatprep.mubr.bf16.mxu1 %v5812_v61  ;;  %v5816_v7 = vld [vmem:[%s8831_s0 + $0x20] ss:$36 sps:$4 sm:$0xff]  }
 0x1f3   :  { %v2887_v50 = vpop.f32.mrf.mxu1  ;;  %v3048_v59 = vpop.f32.mrf.mxu0 }
 0x1f5   :  { %v2888_v23 = vpop.f32.mrf.mxu1  ;;  %v3049_v56 = vpop.f32.mrf.mxu0 }
 0x1f6   :  { %v7196_v4 = vadd.f32 %v2888_v23, %v7000_v31  ;;  %v7199_v33 = vadd.f32 %v3049_v56, %v6833_v47 }
 0x1f7   :  { %v2890_v61 = vpop.f32.mrf.mxu1  ;;  %v3051_v45 = vpop.f32.mrf.mxu0 }
 0x1f8   :  { %v5813_v61 = vld [vmem:[%s8831_s0 + $0x498] ss:$36 sps:$4 sm:$0xff]  }
 0x1f9   :  { %v2893_v22 = vpop.f32.mrf.mxu1  ;;  %v3054_v36 = vpop.f32.mrf.mxu0  ;;  %3245 = vmatmul.mubr.bf16.gmra.mxu0 %v5807_v2  ;;  %3406 = vmatmul.mubr.bf16.gmra.mxu1 %v5810_v26  ;;  %v5817_v2 = vld [vmem:[%s8831_s0 + $0x68] ss:$36 sps:$4 sm:$0xff]  }
 0x1fa   :  { %v7208_v31 = vadd.f32 %v2893_v22, %v7017_v51  ;;  %v7211_v47 = vadd.f32 %v3054_v36, %v6844_v9  ;;  %3413 = vmatprep.mubr.bf16.mxu1 %v5815_v52  ;;  %5308 = vmatprep.mubr.bf16.mxu0 %v5816_v7  ;;  %v5820_v26 = vld [vmem:[%s8831_s0 + $0x4e4] ss:$36 sps:$4 sm:$0xff]   ;;  %v5821_v52 = vld [vmem:[%s8831_s0 + $0xb0] ss:$36 sps:$4 sm:$0xff]  }
 0x1fb   :  { %v2895_v50 = vpop.f32.mrf.mxu1  ;;  %v3056_v59 = vpop.f32.mrf.mxu0 }
 0x1fd   :  { %v2896_v23 = vpop.f32.mrf.mxu1  ;;  %v3057_v56 = vpop.f32.mrf.mxu0 }
 0x1fe   :  { %v7220_v51 = vadd.f32 %v2896_v23, %v7022_v19  ;;  %v7223_v9 = vadd.f32 %v3057_v56, %v6855_v32  ;;  %v5818_v56 = vld [vmem:[%s8831_s0 + $0x4e0] ss:$36 sps:$4 sm:$0xff]  }
 0x1ff   :  { %v2898_v7 = vpop.f32.mrf.mxu1  ;;  %v3059_v45 = vpop.f32.mrf.mxu0 }
 0x200   :  { %v5822_v7 = vld [vmem:[%s8831_s0 + $0xf8] ss:$36 sps:$4 sm:$0xff]  }
 0x201   :  { %v7231_v22 = vpop.f32.mrf.mxu1  ;;  %v3062_v36 = vpop.f32.mrf.mxu0  ;;  %3414 = vmatmul.mubr.bf16.gmra.mxu1 %v5813_v61  ;;  %5309 = vmatmul.mubr.bf16.vlgmr.msra.gmra.mxu0 %v5817_v2  ;;  %v5826_v2 = vld [vmem:[%s8831_s0 + $0x140] ss:$36 sps:$4 sm:$0xff]  }
 0x202   :  { %v7234_v19 = vadd.f32 %v3062_v36, %v6866_v10  ;;  %3421 = vmatprep.mubr.bf16.mxu1 %v5820_v26  ;;  %5312 = vmatprep.mubr.bf16.mxu0 %v5821_v52  ;;  %v5825_v10 = vld [vmem:[%s8831_s0 + $0x52c] ss:$36 sps:$4 sm:$0xff]  }
 0x203   :  { %v2903_v32 = vpop.f32.mrf.mxu1  ;;  %v3064_v50 = vpop.f32.mrf.mxu0 }
 0x205   :  { %v7236_v59 = vpop.f32.mrf.mxu1  ;;  %v3065_v23 = vpop.f32.mrf.mxu0 }
 0x206   :  { %v7245_v61 = vadd.f32 %v3065_v23, %v6877_v17 }
 0x207   :  { %v2906_v26 = vpop.f32.mrf.mxu1  ;;  %v3067_v52 = vpop.f32.mrf.mxu0 }
 0x208   :  { %8879 = vst [vmem:[#allocation16_spill] sm:$0xff] %v7245_v61  ;;  %v5823_v26 = vld [vmem:[%s8831_s0 + $0x528] ss:$36 sps:$4 sm:$0xff]  }
 0x209   :  { %v7253_v45 = vpop.f32.mrf.mxu1  ;;  %v3070_v36 = vpop.f32.mrf.mxu0  ;;  %3422 = vmatmul.mubr.bf16.gmra.mxu1 %v5818_v56  ;;  %5313 = vmatmul.mubr.bf16.gmra.mxu0 %v5822_v7  ;;  %v5827_v52 = vld [vmem:[%s8831_s0 + $0x188] ss:$36 sps:$4 sm:$0xff]   ;;  %v5831_v7 = vld [vmem:[%s8831_s0 + $0x1d0] ss:$36 sps:$4 sm:$0xff]  }
 0x20a   :  { %v7256_v32 = vadd.f32 %v3070_v36, %v6888_v40  ;;  %3429 = vmatprep.mubr.bf16.mxu1 %v5825_v10  ;;  %5316 = vmatprep.mubr.bf16.mxu0 %v5826_v2  ;;  %v5830_v40 = vld [vmem:[%s8831_s0 + $0x574] ss:$36 sps:$4 sm:$0xff]  }
 0x20b   :  { %v2911_v17 = vpop.f32.mrf.mxu1  ;;  %v3072_v50 = vpop.f32.mrf.mxu0 }
 0x20d   :  { %v7258_v23 = vpop.f32.mrf.mxu1  ;;  %v3073_v61 = vpop.f32.mrf.mxu0 }
 0x20e   :  { %8880 = vst [vmem:[#allocation17_spill] sm:$0xff] %v7258_v23  ;;  %v7267_v56 = vadd.f32 %v3073_v61, %v6899_v3 }
 0x20f   :  { %v2914_v10 = vpop.f32.mrf.mxu1  ;;  %v3075_v2 = vpop.f32.mrf.mxu0 }
 0x210   :  { %8881 = vst [vmem:[#allocation18_spill] sm:$0xff] %v7267_v56  ;;  %v5828_v10 = vld [vmem:[%s8831_s0 + $0x570] ss:$36 sps:$4 sm:$0xff]   ;;  %v5832_v2 = vld [vmem:[%s8831_s0 + $0x218] ss:$36 sps:$4 sm:$0xff]  }
 0x211   :  { %v7275_v36 = vpop.f32.mrf.mxu1  ;;  %v3078_v17 = vpop.f32.mrf.mxu0  ;;  %3430 = vmatmul.mubr.bf16.gmra.mxu1 %v5823_v26  ;;  %5317 = vmatmul.mubr.bf16.gmra.mxu0 %v5827_v52  ;;  %v5836_v52 = vld [vmem:[%s8831_s0 + $0x260] ss:$36 sps:$4 sm:$0xff]  }
 0x212   :  { %v7278_v50 = vadd.f32 %v3078_v17, %v6910_v41  ;;  %3437 = vmatprep.mubr.bf16.mxu1 %v5830_v40  ;;  %5320 = vmatprep.mubr.bf16.mxu0 %v5831_v7  ;;  %v5835_v41 = vld [vmem:[%s8831_s0 + $0x5bc] ss:$36 sps:$4 sm:$0xff]  }
 0x213   :  { %v2919_v3 = vpop.f32.mrf.mxu1  ;;  %v3080_v61 = vpop.f32.mrf.mxu0 }
 0x215   :  { %v7280_v56 = vpop.f32.mrf.mxu1  ;;  %v3081_v23 = vpop.f32.mrf.mxu0 }
 0x216   :  { %8882 = vst [vmem:[#allocation19_spill] sm:$0xff] %v7280_v56  ;;  %v7289_v26 = vadd.f32 %v3081_v23, %v6921_v18 }
 0x217   :  { %v2922_v40 = vpop.f32.mrf.mxu1  ;;  %v3083_v7 = vpop.f32.mrf.mxu0 }
 0x218   :  { %8883 = vst [vmem:[#allocation20_spill] sm:$0xff] %v7289_v26  ;;  %v5833_v40 = vld [vmem:[%s8831_s0 + $0x5b8] ss:$36 sps:$4 sm:$0xff]   ;;  %v5837_v7 = vld [vmem:[%s8831_s0 + $0x2a8] ss:$36 sps:$4 sm:$0xff]  }
 0x219   :  { %v7297_v17 = vpop.f32.mrf.mxu1  ;;  %v3086_v3 = vpop.f32.mrf.mxu0  ;;  %3438 = vmatmul.mubr.bf16.gmra.mxu1 %v5828_v10  ;;  %5321 = vmatmul.mubr.bf16.gmra.mxu0 %v5832_v2  ;;  %v5841_v2 = vld [vmem:[%s8831_s0 + $0x2f0] ss:$36 sps:$4 sm:$0xff]  }
 0x21a   :  { %v7300_v61 = vadd.f32 %v3086_v3, %v6932_v60  ;;  %3445 = vmatprep.mubr.bf16.mxu1 %v5835_v41  ;;  %5324 = vmatprep.mubr.bf16.mxu0 %v5836_v52  ;;  %v5840_v60 = vld [vmem:[%s8831_s0 + $0x604] ss:$36 sps:$4 sm:$0xff]  }
 0x21b   :  { %v2927_v18 = vpop.f32.mrf.mxu1  ;;  %v3088_v23 = vpop.f32.mrf.mxu0 }
 0x21d   :  { %v7302_v26 = vpop.f32.mrf.mxu1  ;;  %v3089_v56 = vpop.f32.mrf.mxu0 }
 0x21e   :  { %8884 = vst [vmem:[#allocation21_spill] sm:$0xff] %v7302_v26  ;;  %v7311_v10 = vadd.f32 %v3089_v56, %v6943_v0 }
 0x21f   :  { %v2930_v41 = vpop.f32.mrf.mxu1  ;;  %v3091_v52 = vpop.f32.mrf.mxu0 }
 0x220   :  { %8885 = vst [vmem:[#allocation22_spill] sm:$0xff] %v7311_v10  ;;  %v5838_v41 = vld [vmem:[%s8831_s0 + $0x600] ss:$36 sps:$4 sm:$0xff]   ;;  %v5842_v52 = vld [vmem:[%s8831_s0 + $0x338] ss:$36 sps:$4 sm:$0xff]  }
 0x221   :  { %v7319_v3 = vpop.f32.mrf.mxu1  ;;  %v3094_v18 = vpop.f32.mrf.mxu0  ;;  %3446 = vmatmul.mubr.bf16.gmra.mxu1 %v5833_v40  ;;  %5325 = vmatmul.mubr.bf16.gmra.mxu0 %v5837_v7  ;;  %v5846_v7 = vld [vmem:[%s8831_s0 + $0x380] ss:$36 sps:$4 sm:$0xff]  }
 0x222   :  { %v7322_v23 = vadd.f32 %v3094_v18, %v6954_v29  ;;  %3453 = vmatprep.mubr.bf16.mxu1 %v5840_v60  ;;  %5328 = vmatprep.mubr.bf16.mxu0 %v5841_v2  ;;  %v5845_v29 = vld [vmem:[%s8831_s0 + $0x64c] ss:$36 sps:$4 sm:$0xff]  }
 0x223   :  { %v2935_v0 = vpop.f32.mrf.mxu1  ;;  %v3096_v56 = vpop.f32.mrf.mxu0 }
 0x225   :  { %v7324_v10 = vpop.f32.mrf.mxu1  ;;  %v3097_v26 = vpop.f32.mrf.mxu0 }
 0x226   :  { %8886 = vst [vmem:[#allocation23_spill] sm:$0xff] %v7324_v10  ;;  %v7333_v40 = vadd.f32 %v3097_v26, %v6965_v58 }
 0x227   :  { %v2938_v60 = vpop.f32.mrf.mxu1  ;;  %v3099_v2 = vpop.f32.mrf.mxu0 }
 0x228   :  { %8887 = vst [vmem:[#allocation24_spill] sm:$0xff] %v7333_v40  ;;  %v5843_v60 = vld [vmem:[%s8831_s0 + $0x648] ss:$36 sps:$4 sm:$0xff]  }
 0x229   :  { %v7341_v18 = vpop.f32.mrf.mxu1  ;;  %v3102_v0 = vpop.f32.mrf.mxu0  ;;  %3454 = vmatmul.mubr.bf16.gmra.mxu1 %v5838_v41  ;;  %5329 = vmatmul.mubr.bf16.gmra.mxu0 %v5842_v52  ;;  %v5847_v2 = vld [vmem:[%s8831_s0 + $0x3c8] ss:$36 sps:$4 sm:$0xff]   ;;  %v5851_v52 = vld [vmem:[%s8831_s0 + $0x410] ss:$36 sps:$4 sm:$0xff]  }
 0x22a   :  { %v7344_v56 = vadd.f32 %v3102_v0, %v6976_v55  ;;  %3461 = vmatprep.mubr.bf16.mxu1 %v5845_v29  ;;  %5332 = vmatprep.mubr.bf16.mxu0 %v5846_v7  ;;  %v5850_v55 = vld [vmem:[%s8831_s0 + $0x694] ss:$36 sps:$4 sm:$0xff]  }
 0x22b   :  { %v2943_v58 = vpop.f32.mrf.mxu1  ;;  %v3104_v26 = vpop.f32.mrf.mxu0 }
 0x22d   :  { %v7346_v40 = vpop.f32.mrf.mxu1  ;;  %v3105_v10 = vpop.f32.mrf.mxu0 }
 0x22e   :  { %8888 = vst [vmem:[#allocation25_spill] sm:$0xff] %v7346_v40  ;;  %v7355_v41 = vadd.f32 %v3105_v10, %v6987_v25 }
 0x22f   :  { %v2946_v29 = vpop.f32.mrf.mxu1  ;;  %v3107_v7 = vpop.f32.mrf.mxu0 }
 0x230   :  { %8889 = vst [vmem:[#allocation26_spill] sm:$0xff] %v7355_v41  ;;  %v5848_v29 = vld [vmem:[%s8831_s0 + $0x690] ss:$36 sps:$4 sm:$0xff]   ;;  %v5852_v7 = vld [vmem:[%s8831_s0 + $0x458] ss:$36 sps:$4 sm:$0xff]  }
 0x231   :  { %v7363_v0 = vpop.f32.mrf.mxu1  ;;  %v3110_v58 = vpop.f32.mrf.mxu0  ;;  %3462 = vmatmul.mubr.bf16.gmra.mxu1 %v5843_v60  ;;  %5333 = vmatmul.mubr.bf16.gmra.mxu0 %v5847_v2  ;;  %v5856_v2 = vld [vmem:[%s8831_s0 + $0x4a0] ss:$36 sps:$4 sm:$0xff]  }
 0x232   :  { %v7366_v26 = vadd.f32 %v3110_v58, %v6998_v28  ;;  %3469 = vmatprep.mubr.bf16.mxu1 %v5850_v55  ;;  %5336 = vmatprep.mubr.bf16.mxu0 %v5851_v52  ;;  %v5855_v28 = vld [vmem:[%s8831_s0 + $0x6dc] ss:$36 sps:$4 sm:$0xff]  }
 0x233   :  { %v2951_v25 = vpop.f32.mrf.mxu1  ;;  %v3112_v10 = vpop.f32.mrf.mxu0 }
 0x235   :  { %v7368_v41 = vpop.f32.mrf.mxu1  ;;  %v3113_v40 = vpop.f32.mrf.mxu0 }
 0x236   :  { %8890 = vst [vmem:[#allocation27_spill] sm:$0xff] %v7368_v41  ;;  %v7377_v60 = vadd.f32 %v3113_v40, %v7009_v43 }
 0x237   :  { %v2954_v55 = vpop.f32.mrf.mxu1  ;;  %v3115_v52 = vpop.f32.mrf.mxu0 }
 0x238   :  { %8891 = vst [vmem:[#allocation28_spill] sm:$0xff] %v7377_v60  ;;  %v5853_v55 = vld [vmem:[%s8831_s0 + $0x6d8] ss:$36 sps:$4 sm:$0xff]   ;;  %v5857_v52 = vld [vmem:[%s8831_s0 + $0x4e8] ss:$36 sps:$4 sm:$0xff]  }
 0x239   :  { %v7385_v58 = vpop.f32.mrf.mxu1  ;;  %v3118_v25 = vpop.f32.mrf.mxu0  ;;  %3470 = vmatmul.mubr.bf16.gmra.mxu1 %v5848_v29  ;;  %5337 = vmatmul.mubr.bf16.gmra.mxu0 %v5852_v7  ;;  %v5861_v7 = vld [vmem:[%s8831_s0 + $0x530] ss:$36 sps:$4 sm:$0xff]  }
 0x23a   :  { %v7388_v10 = vadd.f32 %v3118_v25, %v7020_v48  ;;  %3477 = vmatprep.mubr.bf16.mxu1 %v5855_v28  ;;  %5340 = vmatprep.mubr.bf16.mxu0 %v5856_v2  ;;  %v5860_v48 = vld [vmem:[%s8831_s0 + $0x724] ss:$36 sps:$4 sm:$0xff]  }
 0x23b   :  { %v2959_v43 = vpop.f32.mrf.mxu1  ;;  %v3120_v40 = vpop.f32.mrf.mxu0 }
 0x23c   :  { %8892 = vst [vmem:[#allocation29_spill] sm:$0xff] %v7388_v10 }
 0x23d   :  { %v7390_v60 = vpop.f32.mrf.mxu1  ;;  %v3121_v41 = vpop.f32.mrf.mxu0 }
 0x23e   :  { %8893 = vst [vmem:[#allocation30_spill] sm:$0xff] %v7390_v60  ;;  %v7399_v29 = vadd.f32 %v3121_v41, %v7031_v14 }
 0x23f   :  { %v2962_v28 = vpop.f32.mrf.mxu1  ;;  %v3123_v2 = vpop.f32.mrf.mxu0 }
 0x240   :  { %8894 = vst [vmem:[#allocation31_spill] sm:$0xff] %v7399_v29  ;;  %v5858_v28 = vld [vmem:[%s8831_s0 + $0x720] ss:$36 sps:$4 sm:$0xff]  }
 0x241   :  { %v3126_v25 = vpop.f32.mrf.mxu0  ;;  %v3287_v43 = vpop.f32.mrf.mxu1  ;;  %3478 = vmatmul.mubr.bf16.gmra.mxu1 %v5853_v55  ;;  %5341 = vmatmul.mubr.bf16.gmra.mxu0 %v5857_v52  ;;  %v5862_v55 = vld [vmem:[%s8831_s0 + $0x578] ss:$36 sps:$4 sm:$0xff]   ;;  %v5865_v52 = vld [vmem:[%s8831_s0 + $0x76c] ss:$36 sps:$4 sm:$0xff]  }
 0x242   :  { %v7408_v40 = vadd.f32 %v3126_v25, %v7040_v30  ;;  %v7411_v14 = vadd.f32 %v3287_v43, %v7043_v11  ;;  %3485 = vmatprep.mubr.bf16.mxu1 %v5860_v48  ;;  %5344 = vmatprep.mubr.bf16.mxu0 %v5861_v7 }
 0x243   :  { %v3128_v41 = vpop.f32.mrf.mxu0  ;;  %v3289_v29 = vpop.f32.mrf.mxu1 }
 0x244   :  { %v5866_v29 = vld [vmem:[%s8831_s0 + $0x5c0] ss:$36 sps:$4 sm:$0xff]  }
 0x245   :  { %v3129_v60 = vpop.f32.mrf.mxu0  ;;  %v3290_v10 = vpop.f32.mrf.mxu1 }
 0x246   :  { %v7420_v30 = vadd.f32 %v3129_v60, %v7052_v42  ;;  %v7423_v11 = vadd.f32 %v3290_v10, %v7055_v37 }
 0x247   :  { %v3131_v48 = vpop.f32.mrf.mxu0  ;;  %v3292_v7 = vpop.f32.mrf.mxu1 }
 0x248   :  { %v5863_v48 = vld [vmem:[%s8831_s0 + $0x768] ss:$36 sps:$4 sm:$0xff]  }
 0x249   :  { %v3134_v2 = vpop.f32.mrf.mxu0  ;;  %v3295_v25 = vpop.f32.mrf.mxu1  ;;  %3486 = vmatmul.mubr.bf16.gmra.mxu1 %v5858_v28  ;;  %5345 = vmatmul.mubr.bf16.gmra.mxu0 %v5862_v55  ;;  %v5867_v28 = vld [vmem:[%s8831_s0 + $0x608] ss:$36 sps:$4 sm:$0xff]   ;;  %v5870_v55 = vld [vmem:[%s8831_s0 + $0x7b4] ss:$36 sps:$4 sm:$0xff]  }
 0x24a   :  { %v7432_v42 = vadd.f32 %v3134_v2, %v7064_v62  ;;  %v7435_v37 = vadd.f32 %v3295_v25, %v7067_v57  ;;  %3493 = vmatprep.mubr.bf16.mxu1 %v5865_v52  ;;  %5348 = vmatprep.mubr.bf16.mxu0 %v5866_v29  ;;  %v5871_v52 = vld [vmem:[%s8831_s0 + $0x650] ss:$36 sps:$4 sm:$0xff]  }
 0x24b   :  { %v3136_v60 = vpop.f32.mrf.mxu0  ;;  %v3297_v10 = vpop.f32.mrf.mxu1 }
 0x24d   :  { %v3137_v43 = vpop.f32.mrf.mxu0  ;;  %v3298_v41 = vpop.f32.mrf.mxu1 }
 0x24e   :  { %v7444_v62 = vadd.f32 %v3137_v43, %v7076_v34  ;;  %v7447_v57 = vadd.f32 %v3298_v41, %v7079_v1 }
 0x24f   :  { %v3139_v29 = vpop.f32.mrf.mxu0  ;;  %v3300_v7 = vpop.f32.mrf.mxu1 }
 0x250   :  { %v5868_v29 = vld [vmem:[%s8831_s0 + $0x7b0] ss:$36 sps:$4 sm:$0xff]  }
 0x251   :  { %v3142_v2 = vpop.f32.mrf.mxu0  ;;  %v3303_v25 = vpop.f32.mrf.mxu1  ;;  %3494 = vmatmul.mubr.bf16.gmra.mxu1 %v5863_v48  ;;  %5349 = vmatmul.mubr.bf16.gmra.mxu0 %v5867_v28  ;;  %v5872_v48 = vld [vmem:[%s8831_s0 + $0x698] ss:$36 sps:$4 sm:$0xff]  }
 0x252   :  { %v7456_v34 = vadd.f32 %v3142_v2, %v7088_v21  ;;  %v7459_v1 = vadd.f32 %v3303_v25, %v7091_v13  ;;  %3501 = vmatprep.mubr.bf16.mxu1 %v5870_v55  ;;  %5352 = vmatprep.mubr.bf16.mxu0 %v5871_v52  ;;  %v5875_v28 = vld [vmem:[%s8831_s0 + $0x7fc] ss:$36 sps:$4 sm:$0xff]  }
 0x253   :  { %v3144_v60 = vpop.f32.mrf.mxu0  ;;  %v3305_v10 = vpop.f32.mrf.mxu1  ;;  %v5876_v55 = vld [vmem:[%s8831_s0 + $0x6e0] ss:$36 sps:$4 sm:$0xff]  }
 0x255   :  { %v3145_v43 = vpop.f32.mrf.mxu0  ;;  %v3306_v41 = vpop.f32.mrf.mxu1 }
 0x256   :  { %v7468_v21 = vadd.f32 %v3145_v43, %v7100_v15  ;;  %v7471_v13 = vadd.f32 %v3306_v41, %v7103_v27 }
 0x257   :  { %v3147_v52 = vpop.f32.mrf.mxu0  ;;  %v3308_v7 = vpop.f32.mrf.mxu1 }
 0x258   :  { %v5873_v52 = vld [vmem:[%s8831_s0 + $0x7f8] ss:$36 sps:$4 sm:$0xff]  }
 0x259   :  { %v3150_v2 = vpop.f32.mrf.mxu0  ;;  %v3311_v25 = vpop.f32.mrf.mxu1  ;;  %3502 = vmatmul.mubr.bf16.gmra.mxu1 %v5868_v29  ;;  %5353 = vmatmul.mubr.bf16.gmra.mxu0 %v5872_v48  ;;  %v5877_v29 = vld [vmem:[%s8831_s0 + $0x728] ss:$36 sps:$4 sm:$0xff]  }
 0x25a   :  { %v7480_v15 = vadd.f32 %v3150_v2, %v7112_v35  ;;  %v7483_v27 = vadd.f32 %v3311_v25, %v7115_v39  ;;  %3509 = vmatprep.mubr.bf16.mxu1 %v5875_v28  ;;  %5356 = vmatprep.mubr.bf16.mxu0 %v5876_v55  ;;  %v5880_v48 = vld [vmem:[%s8831_s0 + $0x844] ss:$36 sps:$4 sm:$0xff]   ;;  %v5881_v28 = vld [vmem:[%s8831_s0 + $0x770] ss:$36 sps:$4 sm:$0xff]  }
 0x25b   :  { %v3152_v60 = vpop.f32.mrf.mxu0  ;;  %v3313_v10 = vpop.f32.mrf.mxu1 }
 0x25d   :  { %v3153_v43 = vpop.f32.mrf.mxu0  ;;  %v3314_v41 = vpop.f32.mrf.mxu1 }
 0x25e   :  { %v7492_v35 = vadd.f32 %v3153_v43, %v7124_v6  ;;  %v7495_v39 = vadd.f32 %v3314_v41, %v7127_v53 }
 0x25f   :  { %v3155_v55 = vpop.f32.mrf.mxu0  ;;  %v3316_v7 = vpop.f32.mrf.mxu1 }
 0x260   :  { %v5878_v55 = vld [vmem:[%s8831_s0 + $0x840] ss:$36 sps:$4 sm:$0xff]  }
 0x261   :  { %v3158_v2 = vpop.f32.mrf.mxu0  ;;  %v3319_v25 = vpop.f32.mrf.mxu1  ;;  %3510 = vmatmul.mubr.bf16.gmra.mxu1 %v5873_v52  ;;  %5357 = vmatmul.mubr.bf16.gmra.mxu0 %v5877_v29  ;;  %v5882_v52 = vld [vmem:[%s8831_s0 + $0x7b8] ss:$36 sps:$4 sm:$0xff]   ;;  %v5885_v29 = vld [vmem:[%s8831_s0 + $0x88c] ss:$36 sps:$4 sm:$0xff]  }
 0x262   :  { %v7504_v6 = vadd.f32 %v3158_v2, %v7136_v16  ;;  %v7507_v53 = vadd.f32 %v3319_v25, %v7139_v8  ;;  %3517 = vmatprep.mubr.bf16.mxu1 %v5880_v48  ;;  %5360 = vmatprep.mubr.bf16.mxu0 %v5881_v28  ;;  %v5886_v48 = vld [vmem:[%s8831_s0 + $0x800] ss:$36 sps:$4 sm:$0xff]  }
 0x263   :  { %v3160_v60 = vpop.f32.mrf.mxu0  ;;  %v3321_v10 = vpop.f32.mrf.mxu1 }
 0x265   :  { %v3161_v43 = vpop.f32.mrf.mxu0  ;;  %v3322_v41 = vpop.f32.mrf.mxu1 }
 0x266   :  { %v7516_v16 = vadd.f32 %v3161_v43, %v7148_v5  ;;  %v7519_v8 = vadd.f32 %v3322_v41, %v7151_v20 }
 0x267   :  { %v3163_v28 = vpop.f32.mrf.mxu0  ;;  %v3324_v7 = vpop.f32.mrf.mxu1 }
 0x268   :  { %v5883_v28 = vld [vmem:[%s8831_s0 + $0x888] ss:$36 sps:$4 sm:$0xff]  }
 0x269   :  { %v3166_v2 = vpop.f32.mrf.mxu0  ;;  %v3327_v25 = vpop.f32.mrf.mxu1  ;;  %3518 = vmatmul.mubr.bf16.gmra.mxu1 %v5878_v55  ;;  %5361 = vmatmul.mubr.bf16.gmra.mxu0 %v5882_v52  ;;  %v5887_v55 = vld [vmem:[%s8831_s0 + $0x848] ss:$36 sps:$4 sm:$0xff]   ;;  %v5890_v52 = vld [vmem:[%s8831_s0 + $0x8d4] ss:$36 sps:$4 sm:$0xff]  }
 0x26a   :  { %v7528_v5 = vadd.f32 %v3166_v2, %v7160_v63  ;;  %v7531_v20 = vadd.f32 %v3327_v25, %v7163_v38  ;;  %3525 = vmatprep.mubr.bf16.mxu1 %v5885_v29  ;;  %5364 = vmatprep.mubr.bf16.mxu0 %v5886_v48  ;;  %v5891_v29 = vld [vmem:[%s8831_s0 + $0x890] ss:$36 sps:$4 sm:$0xff]  }
 0x26b   :  { %v3168_v60 = vpop.f32.mrf.mxu0  ;;  %v3329_v10 = vpop.f32.mrf.mxu1 }
 0x26d   :  { %v3169_v43 = vpop.f32.mrf.mxu0  ;;  %v3330_v41 = vpop.f32.mrf.mxu1 }
 0x26e   :  { %v7540_v63 = vadd.f32 %v3169_v43, %v7172_v24  ;;  %v7543_v38 = vadd.f32 %v3330_v41, %v7175_v54 }
 0x26f   :  { %v3171_v48 = vpop.f32.mrf.mxu0  ;;  %v3332_v7 = vpop.f32.mrf.mxu1 }
 0x270   :  { %v5888_v48 = vld [vmem:[%s8831_s0 + $0x8d0] ss:$36 sps:$4 sm:$0xff]  }
 0x271   :  { %v3174_v2 = vpop.f32.mrf.mxu0  ;;  %v3335_v25 = vpop.f32.mrf.mxu1  ;;  %3526 = vmatmul.mubr.bf16.gmra.mxu1 %v5883_v28  ;;  %5365 = vmatmul.mubr.bf16.gmra.mxu0 %v5887_v55  ;;  %v5892_v28 = vld [vmem:[%s8831_s0 + $0x8d8] ss:$36 sps:$4 sm:$0xff]  }
 0x272   :  { %v7552_v24 = vadd.f32 %v3174_v2, %v7184_v46  ;;  %v7555_v54 = vadd.f32 %v3335_v25, %v7187_v12  ;;  %3533 = vmatprep.mubr.bf16.mxu1 %v5890_v52  ;;  %5368 = vmatprep.mubr.bf16.mxu0 %v5891_v29 }
 0x273   :  { %v3176_v60 = vpop.f32.mrf.mxu0  ;;  %v3337_v10 = vpop.f32.mrf.mxu1 }
 0x274   :  { %8895 = vst [vmem:[#allocation32_spill] sm:$0xff] %v7552_v24 }
 0x275   :  { %v3177_v43 = vpop.f32.mrf.mxu0  ;;  %v3338_v41 = vpop.f32.mrf.mxu1 }
 0x276   :  { %v7564_v46 = vadd.f32 %v3177_v43, %v7196_v4  ;;  %v7567_v12 = vadd.f32 %v3338_v41, %v7199_v33 }
 0x277   :  { %v3179_v55 = vpop.f32.mrf.mxu0  ;;  %v3340_v52 = vpop.f32.mrf.mxu1 }
 0x279   :  { %v3182_v29 = vpop.f32.mrf.mxu0  ;;  %v3343_v7 = vpop.f32.mrf.mxu1  ;;  %3534 = vmatmul.mubr.bf16.gmra.mxu1 %v5888_v48  ;;  %5369 = vmatmul.mubr.bf16.gmra.mxu0 %v5892_v28  ;;  %v2902_v48 = vadd.f32 %v7231_v22, %v6510_v44 }
 0x27a   :  { %v7570_v2 = vadd.f32 %v3182_v29, %v7208_v31  ;;  %v7573_v25 = vadd.f32 %v3343_v7, %v7211_v47 }
 0x27b   :  { %v3184_v60 = vpop.f32.mrf.mxu0  ;;  %v3345_v10 = vpop.f32.mrf.mxu1 }
 0x27c   :  { %v8898_v10 = vld [vmem:[#allocation16_spill] sm:$0xff] }
 0x27d   :  { %v3185_v24 = vpop.f32.mrf.mxu0  ;;  %v3346_v4 = vpop.f32.mrf.mxu1 }
 0x27e   :  { %v7576_v43 = vadd.f32 %v3185_v24, %v7220_v51  ;;  %v7579_v33 = vadd.f32 %v3346_v4, %v7223_v9  ;;  %v2905_v51 = vadd.f32 %v7236_v59, %v6518_v49 }
 0x27f   :  { %v3187_v41 = vpop.f32.mrf.mxu0  ;;  %v3348_v55 = vpop.f32.mrf.mxu1 }
 0x280   :  { %v8899_v41 = vld [vmem:[#allocation2_spill] sm:$0xff] }
 0x281   :  { %v3190_v31 = vpop.f32.mrf.mxu0  ;;  %v3351_v28 = vpop.f32.mrf.mxu1  ;;  %v2910_v55 = vadd.f32 %v7253_v45, %v8899_v41 }
 0x282   :  { %v7583_v52 = vadd.f32 %v3190_v31, %v2902_v48  ;;  %v7586_v47 = vadd.f32 %v3351_v28, %v7234_v19 }
 0x283   :  { %v3192_v29 = vpop.f32.mrf.mxu0  ;;  %v3353_v7 = vpop.f32.mrf.mxu1 }
 0x284   :  { %8896 = vst [vmem:[#allocation33_spill] sm:$0xff] %v7583_v52  ;;  %v8901_v29 = vld [vmem:[#allocation3_spill] sm:$0xff]  ;;  %v8902_v7 = vld [vmem:[#allocation17_spill] sm:$0xff] }
 0x285   :  { %v3193_v24 = vpop.f32.mrf.mxu0  ;;  %v3354_v9 = vpop.f32.mrf.mxu1 }
 0x286   :  { %v7590_v60 = vadd.f32 %v3193_v24, %v2905_v51  ;;  %v7593_v4 = vadd.f32 %v3354_v9, %v8898_v10  ;;  %v2913_v51 = vadd.f32 %v8902_v7, %v8901_v29  ;;  %v8907_v7 = vld [vmem:[#allocation5_spill] sm:$0xff] }
 0x287   :  { %v3195_v44 = vpop.f32.mrf.mxu0  ;;  %v3356_v22 = vpop.f32.mrf.mxu1 }
 0x288   :  { %8897 = vst [vmem:[#allocation34_spill] sm:$0xff] %v7590_v60  ;;  %v8904_v44 = vld [vmem:[#allocation18_spill] sm:$0xff]  ;;  %v8905_v60 = vld [vmem:[#allocation4_spill] sm:$0xff] }
 0x289   :  { %v3198_v48 = vpop.f32.mrf.mxu0  ;;  %v3359_v19 = vpop.f32.mrf.mxu1 }
 0x28a   :  { %v7597_v31 = vadd.f32 %v3198_v48, %v2910_v55  ;;  %v7600_v28 = vadd.f32 %v3359_v19, %v7256_v32  ;;  %v2918_v55 = vadd.f32 %v7275_v36, %v8905_v60 }
 0x28b   :  { %v3200_v49 = vpop.f32.mrf.mxu0  ;;  %v3361_v59 = vpop.f32.mrf.mxu1 }
 0x28c   :  { %8900 = vst [vmem:[#allocation16_spill] sm:$0xff] %v7597_v31  ;;  %v8911_v31 = vld [vmem:[#allocation6_spill] sm:$0xff] }
 0x28d   :  { %v3201_v24 = vpop.f32.mrf.mxu0  ;;  %v3362_v9 = vpop.f32.mrf.mxu1 }
 0x28e   :  { %v7604_v10 = vadd.f32 %v3201_v24, %v2913_v51  ;;  %v7607_v22 = vadd.f32 %v3362_v9, %v8904_v44  ;;  %v8908_v51 = vld [vmem:[#allocation19_spill] sm:$0xff] }
 0x28f   :  { %v3203_v45 = vpop.f32.mrf.mxu0  ;;  %v3364_v41 = vpop.f32.mrf.mxu1  ;;  %v2921_v24 = vadd.f32 %v8908_v51, %v8907_v7  ;;  %v8913_v51 = vld [vmem:[#allocation7_spill] sm:$0xff] }
 0x290   :  { %8903 = vst [vmem:[#allocation2_spill] sm:$0xff] %v7604_v10  ;;  %v8910_v45 = vld [vmem:[#allocation20_spill] sm:$0xff] }
 0x291   :  { %v3206_v48 = vpop.f32.mrf.mxu0  ;;  %v3367_v32 = vpop.f32.mrf.mxu1 }
 0x292   :  { %v7611_v19 = vadd.f32 %v3206_v48, %v2918_v55  ;;  %v7614_v49 = vadd.f32 %v3367_v32, %v7278_v50  ;;  %v2926_v55 = vadd.f32 %v7297_v17, %v8911_v31 }
 0x293   :  { %v3208_v59 = vpop.f32.mrf.mxu0  ;;  %v3369_v29 = vpop.f32.mrf.mxu1 }
 0x294   :  { %8906 = vst [vmem:[#allocation3_spill] sm:$0xff] %v7611_v19  ;;  %v8917_v19 = vld [vmem:[#allocation8_spill] sm:$0xff] }
 0x295   :  { %v3209_v10 = vpop.f32.mrf.mxu0  ;;  %v3370_v9 = vpop.f32.mrf.mxu1 }
 0x296   :  { %v7618_v44 = vadd.f32 %v3209_v10, %v2921_v24  ;;  %v7621_v41 = vadd.f32 %v3370_v9, %v8910_v45  ;;  %v8914_v10 = vld [vmem:[#allocation21_spill] sm:$0xff] }
 0x297   :  { %v3211_v36 = vpop.f32.mrf.mxu0  ;;  %v3372_v60 = vpop.f32.mrf.mxu1  ;;  %v2929_v24 = vadd.f32 %v8914_v10, %v8913_v51  ;;  %v8919_v10 = vld [vmem:[#allocation9_spill] sm:$0xff] }
 0x298   :  { %8909 = vst [vmem:[#allocation17_spill] sm:$0xff] %v7618_v44  ;;  %v8916_v36 = vld [vmem:[#allocation22_spill] sm:$0xff] }
 0x299   :  { %v3214_v48 = vpop.f32.mrf.mxu0  ;;  %v3375_v50 = vpop.f32.mrf.mxu1 }
 0x29a   :  { %v7625_v32 = vadd.f32 %v3214_v48, %v2926_v55  ;;  %v7628_v59 = vadd.f32 %v3375_v50, %v7300_v61  ;;  %v2934_v55 = vadd.f32 %v7319_v3, %v8917_v19 }
 0x29b   :  { %v3216_v29 = vpop.f32.mrf.mxu0  ;;  %v3377_v7 = vpop.f32.mrf.mxu1 }
 0x29c   :  { %8912 = vst [vmem:[#allocation18_spill] sm:$0xff] %v7625_v32  ;;  %v8923_v32 = vld [vmem:[#allocation10_spill] sm:$0xff] }
 0x29d   :  { %v3217_v44 = vpop.f32.mrf.mxu0  ;;  %v3378_v9 = vpop.f32.mrf.mxu1 }
 0x29e   :  { %v7632_v45 = vadd.f32 %v3217_v44, %v2929_v24  ;;  %v7635_v60 = vadd.f32 %v3378_v9, %v8916_v36  ;;  %v8920_v44 = vld [vmem:[#allocation23_spill] sm:$0xff] }
 0x29f   :  { %v3219_v17 = vpop.f32.mrf.mxu0  ;;  %v3380_v31 = vpop.f32.mrf.mxu1  ;;  %v2937_v24 = vadd.f32 %v8920_v44, %v8919_v10  ;;  %v8925_v44 = vld [vmem:[#allocation11_spill] sm:$0xff] }
 0x2a0   :  { %8915 = vst [vmem:[#allocation4_spill] sm:$0xff] %v7632_v45  ;;  %v8922_v17 = vld [vmem:[#allocation24_spill] sm:$0xff] }
 0x2a1   :  { %v3222_v48 = vpop.f32.mrf.mxu0  ;;  %v3383_v61 = vpop.f32.mrf.mxu1 }
 0x2a2   :  { %v7639_v50 = vadd.f32 %v3222_v48, %v2934_v55  ;;  %v7642_v29 = vadd.f32 %v3383_v61, %v7322_v23  ;;  %v2942_v55 = vadd.f32 %v7341_v18, %v8923_v32 }
 0x2a3   :  { %v3224_v7 = vpop.f32.mrf.mxu0  ;;  %v3385_v51 = vpop.f32.mrf.mxu1 }
 0x2a4   :  { %8918 = vst [vmem:[#allocation5_spill] sm:$0xff] %v7639_v50  ;;  %v8929_v50 = vld [vmem:[#allocation12_spill] sm:$0xff] }
 0x2a5   :  { %v3225_v45 = vpop.f32.mrf.mxu0  ;;  %v3386_v9 = vpop.f32.mrf.mxu1 }
 0x2a6   :  { %v7646_v36 = vadd.f32 %v3225_v45, %v2937_v24  ;;  %v7649_v31 = vadd.f32 %v3386_v9, %v8922_v17  ;;  %v8926_v45 = vld [vmem:[#allocation25_spill] sm:$0xff] }
 0x2a7   :  { %v3227_v3 = vpop.f32.mrf.mxu0  ;;  %v3388_v19 = vpop.f32.mrf.mxu1  ;;  %v2945_v24 = vadd.f32 %v8926_v45, %v8925_v44  ;;  %v8931_v45 = vld [vmem:[#allocation13_spill] sm:$0xff] }
 0x2a8   :  { %8921 = vst [vmem:[#allocation19_spill] sm:$0xff] %v7646_v36  ;;  %v8928_v3 = vld [vmem:[#allocation26_spill] sm:$0xff] }
 0x2a9   :  { %v3230_v48 = vpop.f32.mrf.mxu0  ;;  %v3391_v23 = vpop.f32.mrf.mxu1 }
 0x2aa   :  { %v7653_v61 = vadd.f32 %v3230_v48, %v2942_v55  ;;  %v7656_v7 = vadd.f32 %v3391_v23, %v7344_v56  ;;  %v2950_v55 = vadd.f32 %v7363_v0, %v8929_v50 }
 0x2ab   :  { %v3232_v51 = vpop.f32.mrf.mxu0  ;;  %v3393_v10 = vpop.f32.mrf.mxu1 }
 0x2ac   :  { %8924 = vst [vmem:[#allocation20_spill] sm:$0xff] %v7653_v61  ;;  %v8935_v61 = vld [vmem:[#allocation14_spill] sm:$0xff] }
 0x2ad   :  { %v3233_v36 = vpop.f32.mrf.mxu0  ;;  %v3394_v9 = vpop.f32.mrf.mxu1 }
 0x2ae   :  { %v7660_v17 = vadd.f32 %v3233_v36, %v2945_v24  ;;  %v7663_v19 = vadd.f32 %v3394_v9, %v8928_v3  ;;  %v8932_v36 = vld [vmem:[#allocation27_spill] sm:$0xff] }
 0x2af   :  { %v3235_v18 = vpop.f32.mrf.mxu0  ;;  %v3396_v32 = vpop.f32.mrf.mxu1  ;;  %v2953_v24 = vadd.f32 %v8932_v36, %v8931_v45 }
 0x2b0   :  { %8927 = vst [vmem:[#allocation6_spill] sm:$0xff] %v7660_v17  ;;  %v8934_v18 = vld [vmem:[#allocation28_spill] sm:$0xff] }
 0x2b1   :  { %v3238_v48 = vpop.f32.mrf.mxu0  ;;  %v3399_v56 = vpop.f32.mrf.mxu1 }
 0x2b2   :  { %v7667_v23 = vadd.f32 %v3238_v48, %v2950_v55  ;;  %v7670_v51 = vadd.f32 %v3399_v56, %v7366_v26  ;;  %v2958_v55 = vadd.f32 %v7385_v58, %v8935_v61 }
 0x2b3   :  { %v3240_v10 = vpop.f32.mrf.mxu0  ;;  %v3401_v44 = vpop.f32.mrf.mxu1 }
 0x2b4   :  { %8930 = vst [vmem:[#allocation7_spill] sm:$0xff] %v7667_v23  ;;  %v8936_v10 = vld [vmem:[#allocation29_spill] sm:$0xff]  ;;  %v8937_v23 = vld [vmem:[#allocation15_spill] sm:$0xff] }
 0x2b5   :  { %v3241_v17 = vpop.f32.mrf.mxu0  ;;  %v3402_v9 = vpop.f32.mrf.mxu1 }
 0x2b6   :  { %v7674_v3 = vadd.f32 %v3241_v17, %v2953_v24  ;;  %v7677_v32 = vadd.f32 %v3402_v9, %v8934_v18  ;;  %v8938_v17 = vld [vmem:[#allocation30_spill] sm:$0xff] }
 0x2b7   :  { %v3243_v0 = vpop.f32.mrf.mxu0  ;;  %v3404_v50 = vpop.f32.mrf.mxu1  ;;  %v2961_v24 = vadd.f32 %v8938_v17, %v8937_v23 }
 0x2b8   :  { %8933 = vst [vmem:[#allocation21_spill] sm:$0xff] %v7674_v3  ;;  %v8939_v0 = vld [vmem:[#allocation31_spill] sm:$0xff] }
 0x2b9   :  { %v3246_v48 = vpop.f32.mrf.mxu0  ;;  %v3407_v26 = vpop.f32.mrf.mxu1 }
 0x2ba   :  { %v7681_v56 = vadd.f32 %v3246_v48, %v2958_v55  ;;  %v7684_v44 = vadd.f32 %v3407_v26, %v8936_v10 }
 0x2bb   :  { %v3248_v45 = vpop.f32.mrf.mxu0  ;;  %v3409_v36 = vpop.f32.mrf.mxu1 }
 0x2bd   :  { %v3249_v3 = vpop.f32.mrf.mxu0  ;;  %v3410_v9 = vpop.f32.mrf.mxu1 }
 0x2be   :  { %v7688_v18 = vadd.f32 %v3249_v3, %v2961_v24  ;;  %v7691_v50 = vadd.f32 %v3410_v9, %v8939_v0 }
 0x2bf   :  { %v3251_v58 = vpop.f32.mrf.mxu0  ;;  %v3412_v61 = vpop.f32.mrf.mxu1 }
 0x2c1   :  { %v3415_v52 = vpop.f32.mrf.mxu1  ;;  %v5310_v55 = vpop.f32.mrf.mxu0 }
 0x2c2   :  { %v7694_v48 = vadd.f32 %v3415_v52, %v7408_v40  ;;  %v7703_v9 = vadd.f32 %v5310_v55, %v7435_v37 }
 0x2c3   :  { %v3417_v26 = vpop.f32.mrf.mxu1  ;;  %v3576_v10 = vpop.f32.mrf.mxu0 }
 0x2c4   :  { %v7697_v45 = vadd.f32 %v3576_v10, %v7411_v14  ;;  %v3903_v26 = vmul.f32 %v7703_v9, %v7703_v9 }
 0x2c5   :  { %v3418_v23 = vpop.f32.mrf.mxu1  ;;  %v5311_v36 = vpop.f32.mrf.mxu0 }
 0x2c6   :  { %8940 = vst [vmem:[#allocation22_spill] sm:$0xff] %v7697_v45  ;;  %v7700_v3 = vadd.f32 %v3418_v23, %v7420_v30  ;;  %v3901_v40 = vmul.f32 %v7697_v45, %v7697_v45  ;;  %v7711_v14 = vadd.f32 %v5311_v36, %v7447_v57 }
 0x2c7   :  { %v3420_v17 = vpop.f32.mrf.mxu1  ;;  %v3579_v24 = vpop.f32.mrf.mxu0 }
 0x2c8   :  { %v7706_v0 = vadd.f32 %v3579_v24, %v7423_v11  ;;  %v3904_v24 = vmul.f32 %v7711_v14, %v7711_v14 }
 0x2c9   :  { %v3423_v52 = vpop.f32.mrf.mxu1  ;;  %v5314_v58 = vpop.f32.mrf.mxu0 }
 0x2ca   :  { %8941 = vst [vmem:[#allocation8_spill] sm:$0xff] %v7706_v0  ;;  %v3831_v30 = vadd.f32 %v7706_v0, %v7697_v45  ;;  %v3902_v61 = vmul.f32 %v7706_v0, %v7706_v0  ;;  %v7718_v37 = vadd.f32 %v3423_v52, %v7432_v42 }
 0x2cb   :  { %v3425_v55 = vpop.f32.mrf.mxu1  ;;  %v3592_v11 = vpop.f32.mrf.mxu0 }
 0x2cc   :  { %v3832_v10 = vadd.f32 %v3831_v30, %v7703_v9  ;;  %v3965_v23 = vadd.f32 %v3902_v61, %v3901_v40  ;;  %v7724_v57 = vadd.f32 %v3592_v11, %v7459_v1  ;;  %v7733_v55 = vadd.f32 %v5314_v58, %v7483_v27 }
 0x2cd   :  { %v3426_v36 = vpop.f32.mrf.mxu1  ;;  %v5315_v17 = vpop.f32.mrf.mxu0 }
 0x2ce   :  { %v3966_v0 = vadd.f32 %v3965_v23, %v3903_v26  ;;  %v3833_v42 = vadd.f32 %v3832_v10, %v7711_v14  ;;  %v7730_v52 = vadd.f32 %v3426_v36, %v7444_v62  ;;  %v3905_v1 = vmul.f32 %v7724_v57, %v7724_v57 }
 0x2cf   :  { %v3428_v45 = vpop.f32.mrf.mxu1  ;;  %v3595_v30 = vpop.f32.mrf.mxu0  ;;  %v7742_v26 = vadd.f32 %v5315_v17, %v7495_v39 }
 0x2d0   :  { %v3834_v40 = vadd.f32 %v3833_v42, %v7724_v57  ;;  %v3967_v61 = vadd.f32 %v3966_v0, %v3904_v24  ;;  %v7739_v11 = vadd.f32 %v3595_v30, %v7471_v13  ;;  %v3907_v13 = vmul.f32 %v7733_v55, %v7733_v55 }
 0x2d1   :  { %v3431_v10 = vpop.f32.mrf.mxu1  ;;  %v5318_v62 = vpop.f32.mrf.mxu0 }
 0x2d2   :  { %v3968_v23 = vadd.f32 %v3967_v61, %v3905_v1  ;;  %v3835_v27 = vadd.f32 %v3834_v40, %v7739_v11  ;;  %v3906_v45 = vmul.f32 %v7739_v11, %v7739_v11  ;;  %v7748_v58 = vadd.f32 %v3431_v10, %v7456_v34 }
 0x2d3   :  { %v3433_v36 = vpop.f32.mrf.mxu1  ;;  %v3608_v42 = vpop.f32.mrf.mxu0  ;;  %v3908_v40 = vmul.f32 %v7742_v26, %v7742_v26  ;;  %v7763_v10 = vadd.f32 %v5318_v62, %v7531_v20 }
 0x2d4   :  { %v3836_v0 = vadd.f32 %v3835_v27, %v7733_v55  ;;  %v3969_v39 = vadd.f32 %v3968_v23, %v3906_v45  ;;  %v7754_v17 = vadd.f32 %v3608_v42, %v7507_v53 }
 0x2d5   :  { %v3434_v24 = vpop.f32.mrf.mxu1  ;;  %v5319_v30 = vpop.f32.mrf.mxu0 }
 0x2d6   :  { %v3970_v1 = vadd.f32 %v3969_v39, %v3907_v13  ;;  %v3837_v34 = vadd.f32 %v3836_v0, %v7742_v26  ;;  %v7760_v61 = vadd.f32 %v3434_v24, %v7468_v21  ;;  %v3909_v53 = vmul.f32 %v7754_v17, %v7754_v17 }
 0x2d7   :  { %v3436_v36 = vpop.f32.mrf.mxu1  ;;  %v3611_v27 = vpop.f32.mrf.mxu0  ;;  %v7772_v13 = vadd.f32 %v5319_v30, %v7543_v38 }
 0x2d8   :  { %v3838_v23 = vadd.f32 %v3837_v34, %v7754_v17  ;;  %v3971_v45 = vadd.f32 %v3970_v1, %v3908_v40  ;;  %v7769_v42 = vadd.f32 %v3611_v27, %v7519_v8  ;;  %v3911_v8 = vmul.f32 %v7763_v10, %v7763_v10 }
 0x2d9   :  { %v3439_v0 = vpop.f32.mrf.mxu1  ;;  %v5322_v21 = vpop.f32.mrf.mxu0 }
 0x2da   :  { %v3972_v39 = vadd.f32 %v3971_v45, %v3909_v53  ;;  %v3839_v20 = vadd.f32 %v3838_v23, %v7769_v42  ;;  %v3910_v62 = vmul.f32 %v7769_v42, %v7769_v42  ;;  %v7778_v24 = vadd.f32 %v3439_v0, %v7480_v15 }
 0x2db   :  { %v3441_v34 = vpop.f32.mrf.mxu1  ;;  %v3624_v36 = vpop.f32.mrf.mxu0  ;;  %v3912_v23 = vmul.f32 %v7772_v13, %v7772_v13  ;;  %v7793_v0 = vadd.f32 %v5322_v21, %v7573_v25 }
 0x2dc   :  { %v3840_v40 = vadd.f32 %v3839_v20, %v7763_v10  ;;  %v3973_v38 = vadd.f32 %v3972_v39, %v3910_v62  ;;  %v7784_v30 = vadd.f32 %v3624_v36, %v7555_v54 }
 0x2dd   :  { %v3442_v1 = vpop.f32.mrf.mxu1  ;;  %v5323_v27 = vpop.f32.mrf.mxu0 }
 0x2de   :  { %v3974_v53 = vadd.f32 %v3973_v38, %v3911_v8  ;;  %v3841_v15 = vadd.f32 %v3840_v40, %v7772_v13  ;;  %v7790_v45 = vadd.f32 %v3442_v1, %v7492_v35  ;;  %v3913_v54 = vmul.f32 %v7784_v30, %v7784_v30 }
 0x2df   :  { %v3444_v34 = vpop.f32.mrf.mxu1  ;;  %v3627_v20 = vpop.f32.mrf.mxu0  ;;  %v7802_v8 = vadd.f32 %v5323_v27, %v7579_v33 }
 0x2e0   :  { %v3842_v39 = vadd.f32 %v3841_v15, %v7784_v30  ;;  %v3975_v62 = vadd.f32 %v3974_v53, %v3912_v23  ;;  %v7799_v36 = vadd.f32 %v3627_v20, %v7567_v12  ;;  %v3915_v12 = vmul.f32 %v7793_v0, %v7793_v0 }
 0x2e1   :  { %v3447_v40 = vpop.f32.mrf.mxu1  ;;  %v5326_v35 = vpop.f32.mrf.mxu0 }
 0x2e2   :  { %v3976_v38 = vadd.f32 %v3975_v62, %v3913_v54  ;;  %v3843_v25 = vadd.f32 %v3842_v39, %v7799_v36  ;;  %v3914_v21 = vmul.f32 %v7799_v36, %v7799_v36  ;;  %v7808_v1 = vadd.f32 %v3447_v40, %v7504_v6 }
 0x2e3   :  { %v3449_v15 = vpop.f32.mrf.mxu1  ;;  %v3640_v34 = vpop.f32.mrf.mxu0  ;;  %v3916_v39 = vmul.f32 %v7802_v8, %v7802_v8  ;;  %v7823_v40 = vadd.f32 %v5326_v35, %v7600_v28 }
 0x2e4   :  { %v3844_v23 = vadd.f32 %v3843_v25, %v7793_v0  ;;  %v3977_v33 = vadd.f32 %v3976_v38, %v3914_v21  ;;  %v7814_v27 = vadd.f32 %v3640_v34, %v7586_v47 }
 0x2e5   :  { %v3450_v53 = vpop.f32.mrf.mxu1  ;;  %v5327_v20 = vpop.f32.mrf.mxu0 }
 0x2e6   :  { %v3978_v54 = vadd.f32 %v3977_v33, %v3915_v12  ;;  %v3845_v6 = vadd.f32 %v3844_v23, %v7802_v8  ;;  %v7820_v62 = vadd.f32 %v3450_v53, %v7516_v16  ;;  %v3917_v47 = vmul.f32 %v7814_v27, %v7814_v27 }
 0x2e7   :  { %v3452_v15 = vpop.f32.mrf.mxu1  ;;  %v3643_v25 = vpop.f32.mrf.mxu0  ;;  %v7832_v12 = vadd.f32 %v5327_v20, %v7607_v22 }
 0x2e8   :  { %v3846_v38 = vadd.f32 %v3845_v6, %v7814_v27  ;;  %v3979_v21 = vadd.f32 %v3978_v54, %v3916_v39  ;;  %v7829_v34 = vadd.f32 %v3643_v25, %v7593_v4  ;;  %v3919_v4 = vmul.f32 %v7823_v40, %v7823_v40 }
 0x2e9   :  { %v3455_v23 = vpop.f32.mrf.mxu1  ;;  %v5330_v16 = vpop.f32.mrf.mxu0 }
 0x2ea   :  { %v3980_v33 = vadd.f32 %v3979_v21, %v3917_v47  ;;  %v3847_v28 = vadd.f32 %v3846_v38, %v7829_v34  ;;  %v3918_v35 = vmul.f32 %v7829_v34, %v7829_v34  ;;  %v7838_v53 = vadd.f32 %v3455_v23, %v7528_v5 }
 0x2eb   :  { %v3457_v6 = vpop.f32.mrf.mxu1  ;;  %v3656_v15 = vpop.f32.mrf.mxu0  ;;  %v3920_v38 = vmul.f32 %v7832_v12, %v7832_v12  ;;  %v7853_v23 = vadd.f32 %v5330_v16, %v7628_v59 }
 0x2ec   :  { %v3848_v39 = vadd.f32 %v3847_v28, %v7823_v40  ;;  %v3981_v22 = vadd.f32 %v3980_v33, %v3918_v35  ;;  %v7844_v20 = vadd.f32 %v3656_v15, %v7614_v49 }
 0x2ed   :  { %v3458_v54 = vpop.f32.mrf.mxu1  ;;  %v5331_v25 = vpop.f32.mrf.mxu0 }
 0x2ee   :  { %8942 = vst [vmem:[#allocation9_spill] sm:$0xff] %v7844_v20  ;;  %v3982_v47 = vadd.f32 %v3981_v22, %v3919_v4  ;;  %v3849_v5 = vadd.f32 %v3848_v39, %v7832_v12  ;;  %v7850_v21 = vadd.f32 %v3458_v54, %v7540_v63  ;;  %v3921_v49 = vmul.f32 %v7844_v20, %v7844_v20  ;;  %v8943_v54 = vld [vmem:[#allocation32_spill] sm:$0xff] }
 0x2ef   :  { %v3460_v6 = vpop.f32.mrf.mxu1  ;;  %v3659_v28 = vpop.f32.mrf.mxu0  ;;  %v7862_v4 = vadd.f32 %v5331_v25, %v7635_v60 }
 0x2f0   :  { %v3850_v33 = vadd.f32 %v3849_v5, %v7844_v20  ;;  %v3983_v35 = vadd.f32 %v3982_v47, %v3920_v38  ;;  %v7859_v15 = vadd.f32 %v3659_v28, %v7621_v41  ;;  %v3923_v41 = vmul.f32 %v7853_v23, %v7853_v23 }
 0x2f1   :  { %v3463_v39 = vpop.f32.mrf.mxu1  ;;  %v5334_v63 = vpop.f32.mrf.mxu0 }
 0x2f2   :  { %v3984_v22 = vadd.f32 %v3983_v35, %v3921_v49  ;;  %v3851_v59 = vadd.f32 %v3850_v33, %v7859_v15  ;;  %v3922_v16 = vmul.f32 %v7859_v15, %v7859_v15  ;;  %v7868_v5 = vadd.f32 %v3463_v39, %v8943_v54 }
 0x2f3   :  { %v3465_v6 = vpop.f32.mrf.mxu1  ;;  %v3672_v20 = vpop.f32.mrf.mxu0  ;;  %v3924_v33 = vmul.f32 %v7862_v4, %v7862_v4  ;;  %v7883_v54 = vadd.f32 %v5334_v63, %v7656_v7 }
 0x2f4   :  { %v3852_v38 = vadd.f32 %v3851_v59, %v7853_v23  ;;  %v3985_v60 = vadd.f32 %v3984_v22, %v3922_v16  ;;  %v7874_v25 = vadd.f32 %v3672_v20, %v7642_v29 }
 0x2f5   :  { %v3466_v47 = vpop.f32.mrf.mxu1  ;;  %v5335_v28 = vpop.f32.mrf.mxu0 }
 0x2f6   :  { %v3986_v49 = vadd.f32 %v3985_v60, %v3923_v41  ;;  %v3853_v35 = vadd.f32 %v3852_v38, %v7862_v4  ;;  %v7880_v39 = vadd.f32 %v3466_v47, %v7564_v46  ;;  %v3925_v29 = vmul.f32 %v7874_v25, %v7874_v25 }
 0x2f7   :  { %v3468_v6 = vpop.f32.mrf.mxu1  ;;  %v3675_v59 = vpop.f32.mrf.mxu0  ;;  %v7892_v41 = vadd.f32 %v5335_v28, %v7663_v19 }
 0x2f8   :  { %v3854_v22 = vadd.f32 %v3853_v35, %v7874_v25  ;;  %v3987_v20 = vadd.f32 %v3986_v49, %v3924_v33  ;;  %v7889_v16 = vadd.f32 %v3675_v59, %v7649_v31  ;;  %v3927_v31 = vmul.f32 %v7883_v54, %v7883_v54 }
 0x2f9   :  { %v3471_v38 = vpop.f32.mrf.mxu1  ;;  %v5338_v46 = vpop.f32.mrf.mxu0 }
 0x2fa   :  { %v3988_v60 = vadd.f32 %v3987_v20, %v3925_v29  ;;  %v3855_v7 = vadd.f32 %v3854_v22, %v7889_v16  ;;  %v3926_v63 = vmul.f32 %v7889_v16, %v7889_v16  ;;  %v7898_v47 = vadd.f32 %v3471_v38, %v7570_v2 }
 0x2fb   :  { %v3473_v35 = vpop.f32.mrf.mxu1  ;;  %v3688_v6 = vpop.f32.mrf.mxu0  ;;  %v3928_v22 = vmul.f32 %v7892_v41, %v7892_v41  ;;  %v7913_v38 = vadd.f32 %v5338_v46, %v7684_v44 }
 0x2fc   :  { %v3856_v33 = vadd.f32 %v3855_v7, %v7883_v54  ;;  %v3989_v19 = vadd.f32 %v3988_v60, %v3926_v63  ;;  %v7904_v28 = vadd.f32 %v3688_v6, %v7670_v51 }
 0x2fd   :  { %v3474_v49 = vpop.f32.mrf.mxu1  ;;  %v5339_v59 = vpop.f32.mrf.mxu0 }
 0x2fe   :  { %8944 = vst [vmem:[#allocation23_spill] sm:$0xff] %v7904_v28  ;;  %v3990_v29 = vadd.f32 %v3989_v19, %v3927_v31  ;;  %v3857_v2 = vadd.f32 %v3856_v33, %v7892_v41  ;;  %v7910_v20 = vadd.f32 %v3474_v49, %v7576_v43  ;;  %v3929_v51 = vmul.f32 %v7904_v28, %v7904_v28  ;;  %v8946_v49 = vld [vmem:[#allocation33_spill] sm:$0xff] }
 0x2ff   :  { %v3476_v35 = vpop.f32.mrf.mxu1  ;;  %v3691_v7 = vpop.f32.mrf.mxu0  ;;  %v7922_v31 = vadd.f32 %v5339_v59, %v7691_v50 }
 0x300   :  { %v3858_v60 = vadd.f32 %v3857_v2, %v7904_v28  ;;  %v3991_v63 = vadd.f32 %v3990_v29, %v3928_v22  ;;  %v7919_v6 = vadd.f32 %v3691_v7, %v7677_v32  ;;  %v3931_v32 = vmul.f32 %v7913_v38, %v7913_v38 }
 0x301   :  { %v3479_v33 = vpop.f32.mrf.mxu1  ;;  %v5342_v43 = vpop.f32.mrf.mxu0 }
 0x302   :  { %8945 = vst [vmem:[#allocation24_spill] sm:$0xff] %v7919_v6  ;;  %v3992_v19 = vadd.f32 %v3991_v63, %v3929_v51  ;;  %v3859_v44 = vadd.f32 %v3858_v60, %v7919_v6  ;;  %v3930_v46 = vmul.f32 %v7919_v6, %v7919_v6  ;;  %v7928_v2 = vadd.f32 %v3479_v33, %v8946_v49  ;;  %v8948_v33 = vld [vmem:[#allocation34_spill] sm:$0xff] }
 0x303   :  { %v3481_v35 = vpop.f32.mrf.mxu1  ;;  %v3704_v28 = vpop.f32.mrf.mxu0  ;;  %v3932_v60 = vmul.f32 %v7922_v31, %v7922_v31 }
 0x304   :  { %v3860_v22 = vadd.f32 %v3859_v44, %v7913_v38  ;;  %v3993_v50 = vadd.f32 %v3992_v19, %v3930_v46  ;;  %v7934_v59 = vadd.f32 %v3704_v28, %v7694_v48  ;;  %v7943_v35 = vadd.f32 %v5342_v43, %v7718_v37  ;;  %v8950_v43 = vld [vmem:[#allocation16_spill] sm:$0xff] }
 0x305   :  { %v3482_v29 = vpop.f32.mrf.mxu1  ;;  %v5343_v7 = vpop.f32.mrf.mxu0 }
 0x306   :  { %8947 = vst [vmem:[#allocation10_spill] sm:$0xff] %v7934_v59  ;;  %v3994_v51 = vadd.f32 %v3993_v50, %v3931_v32  ;;  %v3861_v63 = vadd.f32 %v3860_v22, %v7922_v31  ;;  %v7940_v49 = vadd.f32 %v3482_v29, %v8948_v33  ;;  %v3933_v48 = vmul.f32 %v7934_v59, %v7934_v59 }
 0x307   :  { %v3484_v6 = vpop.f32.mrf.mxu1  ;;  %v3707_v44 = vpop.f32.mrf.mxu0  ;;  %v7952_v32 = vadd.f32 %v5343_v7, %v7730_v52 }
 0x308   :  { %v3862_v19 = vadd.f32 %v3861_v63, %v7934_v59  ;;  %v3995_v28 = vadd.f32 %v3994_v51, %v3932_v60  ;;  %v7949_v46 = vadd.f32 %v3707_v44, %v7700_v3  ;;  %v3935_v3 = vmul.f32 %v7943_v35, %v7943_v35 }
 0x309   :  { %v3487_v22 = vpop.f32.mrf.mxu1  ;;  %v5346_v50 = vpop.f32.mrf.mxu0 }
 0x30a   :  { %8949 = vst [vmem:[#allocation11_spill] sm:$0xff] %v7949_v46  ;;  %v3996_v29 = vadd.f32 %v3995_v28, %v3933_v48  ;;  %v3863_v37 = vadd.f32 %v3862_v19, %v7949_v46  ;;  %v3934_v6 = vmul.f32 %v7949_v46, %v7949_v46  ;;  %v7958_v63 = vadd.f32 %v3487_v22, %v8950_v43  ;;  %v8952_v22 = vld [vmem:[#allocation2_spill] sm:$0xff] }
 0x30b   :  { %v3489_v33 = vpop.f32.mrf.mxu1  ;;  %v3720_v59 = vpop.f32.mrf.mxu0  ;;  %v3936_v19 = vmul.f32 %v7952_v32, %v7952_v32 }
 0x30c   :  { %v3864_v60 = vadd.f32 %v3863_v37, %v7943_v35  ;;  %v3997_v52 = vadd.f32 %v3996_v29, %v3934_v6  ;;  %v7964_v7 = vadd.f32 %v3720_v59, %v7748_v58  ;;  %v7973_v33 = vadd.f32 %v5346_v50, %v7778_v24  ;;  %v8955_v50 = vld [vmem:[#allocation3_spill] sm:$0xff] }
 0x30d   :  { %v3490_v51 = vpop.f32.mrf.mxu1  ;;  %v5347_v44 = vpop.f32.mrf.mxu0 }
 0x30e   :  { %8951 = vst [vmem:[#allocation25_spill] sm:$0xff] %v7964_v7  ;;  %v3998_v48 = vadd.f32 %v3997_v52, %v3935_v3  ;;  %v3865_v28 = vadd.f32 %v3864_v60, %v7952_v32  ;;  %v7970_v43 = vadd.f32 %v3490_v51, %v8952_v22  ;;  %v3937_v58 = vmul.f32 %v7964_v7, %v7964_v7 }
 0x30f   :  { %v3492_v46 = vpop.f32.mrf.mxu1  ;;  %v3723_v37 = vpop.f32.mrf.mxu0  ;;  %v7982_v3 = vadd.f32 %v5347_v44, %v7790_v45 }
 0x310   :  { %v3866_v29 = vadd.f32 %v3865_v28, %v7964_v7  ;;  %v3999_v59 = vadd.f32 %v3998_v48, %v3936_v19  ;;  %v7979_v6 = vadd.f32 %v3723_v37, %v7760_v61  ;;  %v3939_v61 = vmul.f32 %v7973_v33, %v7973_v33 }
 0x311   :  { %8954 = vst [vmem:[#allocation12_spill] sm:$0xff] %v7982_v3  ;;  %v3495_v60 = vpop.f32.mrf.mxu1  ;;  %v5350_v52 = vpop.f32.mrf.mxu0 }
 0x312   :  { %8953 = vst [vmem:[#allocation26_spill] sm:$0xff] %v7979_v6  ;;  %v4000_v51 = vadd.f32 %v3999_v59, %v3937_v58  ;;  %v3867_v24 = vadd.f32 %v3866_v29, %v7979_v6  ;;  %v3938_v46 = vmul.f32 %v7979_v6, %v7979_v6  ;;  %v7988_v28 = vadd.f32 %v3495_v60, %v8955_v50  ;;  %v8956_v60 = vld [vmem:[#allocation17_spill] sm:$0xff] }
 0x313   :  { %v3497_v22 = vpop.f32.mrf.mxu1  ;;  %v3736_v7 = vpop.f32.mrf.mxu0  ;;  %v3940_v29 = vmul.f32 %v7982_v3, %v7982_v3 }
 0x314   :  { %v3868_v19 = vadd.f32 %v3867_v24, %v7973_v33  ;;  %v4001_v45 = vadd.f32 %v4000_v51, %v3938_v46  ;;  %v7994_v44 = vadd.f32 %v3736_v7, %v7808_v1  ;;  %v8003_v22 = vadd.f32 %v5350_v52, %v7838_v53  ;;  %v8959_v52 = vld [vmem:[#allocation18_spill] sm:$0xff] }
 0x315   :  { %v3498_v48 = vpop.f32.mrf.mxu1  ;;  %v5351_v37 = vpop.f32.mrf.mxu0 }
 0x316   :  { %v4002_v58 = vadd.f32 %v4001_v45, %v3939_v61  ;;  %v3869_v59 = vadd.f32 %v3868_v19, %v7982_v3  ;;  %v8000_v50 = vadd.f32 %v3498_v48, %v8956_v60  ;;  %8957 = vst [vmem:[#allocation13_spill] sm:$0xff] %v8003_v22  ;;  %v3941_v1 = vmul.f32 %v7994_v44, %v7994_v44 }
 0x317   :  { %v3500_v6 = vpop.f32.mrf.mxu1  ;;  %v3739_v24 = vpop.f32.mrf.mxu0  ;;  %v8012_v61 = vadd.f32 %v5351_v37, %v7850_v21 }
 0x318   :  { %v3870_v51 = vadd.f32 %v3869_v59, %v7994_v44  ;;  %v4003_v7 = vadd.f32 %v4002_v58, %v3940_v29  ;;  %v8009_v46 = vadd.f32 %v3739_v24, %v7820_v62  ;;  %v3943_v29 = vmul.f32 %v8003_v22, %v8003_v22 }
 0x319   :  { %v3503_v19 = vpop.f32.mrf.mxu1  ;;  %v5354_v45 = vpop.f32.mrf.mxu0 }
 0x31a   :  { %8958 = vst [vmem:[#allocation27_spill] sm:$0xff] %v8009_v46  ;;  %v4004_v48 = vadd.f32 %v4003_v7, %v3941_v1  ;;  %v3871_v53 = vadd.f32 %v3870_v51, %v8009_v46  ;;  %v3942_v6 = vmul.f32 %v8009_v46, %v8009_v46  ;;  %v3504_v59 = vadd.f32 %v3503_v19, %v8959_v52 }
 0x31b   :  { %v3505_v60 = vpop.f32.mrf.mxu1  ;;  %v3752_v3 = vpop.f32.mrf.mxu0  ;;  %v3944_v51 = vmul.f32 %v8012_v61, %v8012_v61  ;;  %v8028_v19 = vadd.f32 %v5354_v45, %v7898_v47 }
 0x31c   :  { %v3872_v62 = vadd.f32 %v3871_v53, %v8003_v22  ;;  %v4005_v58 = vadd.f32 %v4004_v48, %v3942_v6  ;;  %v8022_v21 = vadd.f32 %v3752_v3, %v7868_v5 }
 0x31d   :  { %v3506_v37 = vpop.f32.mrf.mxu1  ;;  %v5355_v24 = vpop.f32.mrf.mxu0  ;;  %8960 = vst [vmem:[#allocation28_spill] sm:$0xff] %v8028_v19 }
 0x31e   :  { %v4006_v1 = vadd.f32 %v4005_v58, %v3943_v29  ;;  %v3873_v7 = vadd.f32 %v3872_v62, %v8012_v61  ;;  %v3945_v48 = vmul.f32 %v8022_v21, %v8022_v21  ;;  %v8037_v29 = vadd.f32 %v5355_v24, %v7910_v20 }
 0x31f   :  { %v3508_v52 = vpop.f32.mrf.mxu1  ;;  %v3755_v60 = vpop.f32.mrf.mxu0 }
 0x320   :  { %v3874_v46 = vadd.f32 %v3873_v7, %v8022_v21  ;;  %v4007_v5 = vadd.f32 %v4006_v1, %v3944_v51  ;;  %v8034_v3 = vadd.f32 %v3755_v60, %v7880_v39  ;;  %v3947_v7 = vmul.f32 %v8028_v19, %v8028_v19 }
 0x321   :  { %v3511_v53 = vpop.f32.mrf.mxu1  ;;  %v5358_v6 = vpop.f32.mrf.mxu0  ;;  %v3948_v20 = vmul.f32 %v8037_v29, %v8037_v29 }
 0x322   :  { %8961 = vst [vmem:[#allocation14_spill] sm:$0xff] %v8034_v3  ;;  %v4008_v22 = vadd.f32 %v4007_v5, %v3945_v48  ;;  %v3875_v47 = vadd.f32 %v3874_v46, %v8034_v3  ;;  %v3946_v45 = vmul.f32 %v8034_v3, %v8034_v3  ;;  %v8052_v48 = vadd.f32 %v5358_v6, %v7958_v63 }
 0x323   :  { %v3513_v62 = vpop.f32.mrf.mxu1  ;;  %v3768_v58 = vpop.f32.mrf.mxu0 }
 0x324   :  { %v3876_v51 = vadd.f32 %v3875_v47, %v8028_v19  ;;  %v4009_v39 = vadd.f32 %v4008_v22, %v3946_v45  ;;  %v8046_v1 = vadd.f32 %v3768_v58, %v7928_v2  ;;  %8963 = vst [vmem:[#allocation15_spill] sm:$0xff] %v8052_v48 }
 0x325   :  { %v3514_v52 = vpop.f32.mrf.mxu1  ;;  %v5359_v60 = vpop.f32.mrf.mxu0 }
 0x326   :  { %8962 = vst [vmem:[#allocation29_spill] sm:$0xff] %v8046_v1  ;;  %v4010_v46 = vadd.f32 %v4009_v39, %v3947_v7  ;;  %v3877_v24 = vadd.f32 %v3876_v51, %v8037_v29  ;;  %v3949_v22 = vmul.f32 %v8046_v1, %v8046_v1  ;;  %v8061_v7 = vadd.f32 %v5359_v60, %v7970_v43 }
 0x327   :  { %v3516_v5 = vpop.f32.mrf.mxu1  ;;  %v3771_v62 = vpop.f32.mrf.mxu0 }
 0x328   :  { %v3878_v3 = vadd.f32 %v3877_v24, %v8046_v1  ;;  %v4011_v2 = vadd.f32 %v4010_v46, %v3948_v20  ;;  %v8058_v47 = vadd.f32 %v3771_v62, %v7940_v49  ;;  %8965 = vst [vmem:[#allocation31_spill] sm:$0xff] %v8061_v7  ;;  %v3951_v24 = vmul.f32 %v8052_v48, %v8052_v48 }
 0x329   :  { %v3519_v45 = vpop.f32.mrf.mxu1  ;;  %v5362_v58 = vpop.f32.mrf.mxu0  ;;  %v3952_v43 = vmul.f32 %v8061_v7, %v8061_v7 }
 0x32a   :  { %8964 = vst [vmem:[#allocation30_spill] sm:$0xff] %v8058_v47  ;;  %v4012_v19 = vadd.f32 %v4011_v2, %v3949_v22  ;;  %v3879_v63 = vadd.f32 %v3878_v3, %v8058_v47  ;;  %v3950_v6 = vmul.f32 %v8058_v47, %v8058_v47  ;;  %v8967_v22 = vld [vmem:[#allocation4_spill] sm:$0xff] }
 0x32b   :  { %v3521_v51 = vpop.f32.mrf.mxu1  ;;  %v3784_v39 = vpop.f32.mrf.mxu0  ;;  %v3507_v2 = vadd.f32 %v3506_v37, %v8967_v22 }
 0x32c   :  { %v3880_v20 = vadd.f32 %v3879_v63, %v8052_v48  ;;  %v4013_v49 = vadd.f32 %v4012_v19, %v3950_v6  ;;  %v8070_v46 = vadd.f32 %v3784_v39, %v7988_v28  ;;  %v8076_v51 = vadd.f32 %v5362_v58, %v3504_v59  ;;  %v8970_v39 = vld [vmem:[#allocation5_spill] sm:$0xff] }
 0x32d   :  { %v3522_v5 = vpop.f32.mrf.mxu1  ;;  %v5363_v62 = vpop.f32.mrf.mxu0  ;;  %v3512_v48 = vadd.f32 %v3511_v53, %v8970_v39  ;;  %v8973_v53 = vld [vmem:[#allocation20_spill] sm:$0xff] }
 0x32e   :  { %8966 = vst [vmem:[#allocation32_spill] sm:$0xff] %v8070_v46  ;;  %v4014_v3 = vadd.f32 %v4013_v49, %v3951_v24  ;;  %v3881_v60 = vadd.f32 %v3880_v20, %v8061_v7  ;;  %8968 = vst [vmem:[#allocation33_spill] sm:$0xff] %v8076_v51  ;;  %v3953_v28 = vmul.f32 %v8070_v46, %v8070_v46 }
 0x32f   :  { %v3524_v47 = vpop.f32.mrf.mxu1  ;;  %v3787_v1 = vpop.f32.mrf.mxu0  ;;  %v8085_v7 = vadd.f32 %v5363_v62, %v3507_v2  ;;  %v8974_v2 = vld [vmem:[#allocation19_spill] sm:$0xff] }
 0x330   :  { %v3882_v63 = vadd.f32 %v3881_v60, %v8070_v46  ;;  %v4015_v19 = vadd.f32 %v4014_v3, %v3952_v43  ;;  %v8082_v6 = vadd.f32 %v3787_v1, %v8000_v50  ;;  %v3955_v43 = vmul.f32 %v8076_v51, %v8076_v51 }
 0x331   :  { %v3527_v24 = vpop.f32.mrf.mxu1  ;;  %v5366_v49 = vpop.f32.mrf.mxu0  ;;  %8971 = vst [vmem:[#allocation16_spill] sm:$0xff] %v8085_v7  ;;  %v3520_v60 = vadd.f32 %v3519_v45, %v8973_v53 }
 0x332   :  { %8969 = vst [vmem:[#allocation34_spill] sm:$0xff] %v8082_v6  ;;  %v4016_v20 = vadd.f32 %v4015_v19, %v3953_v28  ;;  %v3883_v59 = vadd.f32 %v3882_v63, %v8082_v6  ;;  %v3954_v37 = vmul.f32 %v8082_v6, %v8082_v6  ;;  %v3515_v28 = vadd.f32 %v3514_v52, %v8974_v2  ;;  %v8976_v52 = vld [vmem:[#allocation7_spill] sm:$0xff] }
 0x333   :  { %v3529_v47 = vpop.f32.mrf.mxu1  ;;  %v3800_v58 = vpop.f32.mrf.mxu0  ;;  %v3956_v63 = vmul.f32 %v8085_v7, %v8085_v7  ;;  %v8101_v46 = vadd.f32 %v5366_v49, %v3520_v60  ;;  %v3528_v53 = vadd.f32 %v3527_v24, %v8976_v52 }
 0x334   :  { %v3884_v50 = vadd.f32 %v3883_v59, %v8076_v51  ;;  %v4017_v1 = vadd.f32 %v4016_v20, %v3954_v37  ;;  %v8093_v3 = vadd.f32 %v3800_v58, %v3512_v48  ;;  %v8975_v47 = vld [vmem:[#allocation6_spill] sm:$0xff] }
 0x335   :  { %v3530_v22 = vpop.f32.mrf.mxu1  ;;  %v5367_v62 = vpop.f32.mrf.mxu0  ;;  %v3523_v6 = vadd.f32 %v3522_v5, %v8975_v47 }
 0x336   :  { %8972 = vst [vmem:[#allocation2_spill] sm:$0xff] %v8093_v3  ;;  %v4018_v19 = vadd.f32 %v4017_v1, %v3955_v43  ;;  %v3885_v39 = vadd.f32 %v3884_v50, %v8085_v7  ;;  %v3957_v45 = vmul.f32 %v8093_v3, %v8093_v3 }
 0x337   :  { %v3532_v59 = vpop.f32.mrf.mxu1  ;;  %v3803_v20 = vpop.f32.mrf.mxu0  ;;  %v8109_v50 = vadd.f32 %v5367_v62, %v3523_v6  ;;  %v8977_v62 = vld [vmem:[#allocation21_spill] sm:$0xff] }
 0x338   :  { %v3886_v48 = vadd.f32 %v3885_v39, %v8093_v3  ;;  %v4019_v37 = vadd.f32 %v4018_v19, %v3956_v63  ;;  %v8106_v58 = vadd.f32 %v3803_v20, %v3515_v28  ;;  %v3959_v28 = vmul.f32 %v8101_v46, %v8101_v46 }
 0x339   :  { %v3535_v2 = vpop.f32.mrf.mxu1  ;;  %v5370_v43 = vpop.f32.mrf.mxu0  ;;  %v3531_v20 = vadd.f32 %v3530_v22, %v8977_v62 }
 0x33a   :  { %v4020_v1 = vadd.f32 %v4019_v37, %v3957_v45  ;;  %v3887_v5 = vadd.f32 %v3886_v48, %v8106_v58  ;;  %v3958_v49 = vmul.f32 %v8106_v58, %v8106_v58  ;;  %v3536_v60 = vadd.f32 %v3535_v2, %v7681_v56 }
 0x33b   :  { %v3537_v39 = vpop.f32.mrf.mxu1  ;;  %v3816_v47 = vpop.f32.mrf.mxu0  ;;  %v3960_v48 = vmul.f32 %v8109_v50, %v8109_v50 }
 0x33c   :  { %v3888_v63 = vadd.f32 %v3887_v5, %v8101_v46  ;;  %v4021_v24 = vadd.f32 %v4020_v1, %v3958_v49  ;;  %v8118_v19 = vadd.f32 %v3816_v47, %v3528_v53  ;;  %v8124_v37 = vadd.f32 %v5370_v43, %v3536_v60 }
 0x33d   :  { %v3538_v59 = vpop.f32.mrf.mxu1  ;;  %v5371_v6 = vpop.f32.mrf.mxu0 }
 0x33e   :  { %v4022_v45 = vadd.f32 %v4021_v24, %v3959_v28  ;;  %v3889_v56 = vadd.f32 %v3888_v63, %v8109_v50  ;;  %8978 = vst [vmem:[#allocation3_spill] sm:$0xff] %v8124_v37  ;;  %v3539_v52 = vadd.f32 %v3538_v59, %v7688_v18  ;;  %v3961_v53 = vmul.f32 %v8118_v19, %v8118_v19 }
 0x33f   :  { %v3540_v2 = vpop.f32.mrf.mxu1  ;;  %v3819_v39 = vpop.f32.mrf.mxu0  ;;  %v3963_v18 = vmul.f32 %v8124_v37, %v8124_v37 }
 0x340   :  { %v3890_v1 = vadd.f32 %v3889_v56, %v8118_v19  ;;  %v4023_v5 = vadd.f32 %v4022_v45, %v3960_v48  ;;  %v8130_v49 = vadd.f32 %v3819_v39, %v3531_v20  ;;  %v8132_v47 = vadd.f32 %v5371_v6, %v3539_v52 }
 0x342   :  { %v4024_v22 = vadd.f32 %v4023_v5, %v3961_v53  ;;  %v3891_v28 = vadd.f32 %v3890_v1, %v8130_v49  ;;  %v3962_v43 = vmul.f32 %v8130_v49, %v8130_v49  ;;  %v3964_v24 = vmul.f32 %v8132_v47, %v8132_v47 }
 0x344   :  { %v3892_v60 = vadd.f32 %v3891_v28, %v8124_v37  ;;  %v4025_v63 = vadd.f32 %v4024_v22, %v3962_v43 }
 0x346   :  { %v3893_v59 = vadd.f32 %v3892_v60, %v8132_v47  ;;  %v4026_v62 = vadd.f32 %v4025_v63, %v3963_v18  ;;  %v4046_v18 = vlaneseq }
 0x348   :  { %v3894_v20 = vrot.slane %v3893_v59, 4  ;;  %v4027_v6 = vadd.f32 %v4026_v62, %v3964_v24  ;;  %v8143_v63 = vshrl.u32 %v4046_v18, 7  ;;  %v4038_v24 = vld [vmem:[%s8832_s2] sm:$0x1]  ;;  %v8985_v18 = vld [vmem:[#allocation11_spill] sm:$0xff] }
 0x34a   :  { %v3895_v48 = vadd.f32 %v3894_v20, %v3893_v59  ;;  %v4028_v45 = vrot.slane %v4027_v6, 4  ;;  %v8859_v59 = vsub.s32 0, %v8143_v63 }
 0x34c   :  { %v3896_v56 = vrot.slane %v3895_v48, 2  ;;  %v4029_v52 = vadd.f32 %v4028_v45, %v4027_v6  ;;  %v8979_v6 = vld [vmem:[#allocation22_spill] sm:$0xff]  ;;  %v8980_v45 = vld [vmem:[#allocation8_spill] sm:$0xff] }
 0x34e   :  { %v3897_v2 = vadd.f32 %v3896_v56, %v3895_v48  ;;  %v4030_v39 = vrot.slane %v4029_v52, 2 }
 0x350   :  { %v3898_v1 = vrot.slane %v3897_v2, 1  ;;  %v4031_v53 = vadd.f32 %v4030_v39, %v4029_v52 }
 0x352   :  { %v3899_v5 = vadd.f32 %v3898_v1, %v3897_v2  ;;  %v4032_v3 = vrot.slane %v4031_v53, 1 }
 0x354   :  { %v3900_v28 = vmul.f32 0.001953125, %v3899_v5  ;;  %v4033_v22 = vadd.f32 %v4032_v3, %v4031_v53  ;;  %v8152_v3 = vld [vmem:[%s8833_s3] sm:$0x1]  ;;  %v8981_v5 = vld [vmem:[#allocation9_spill] sm:$0xff] }
 0x356   :  { %v4034_v43 = vmul.f32 0.001953125, %v4033_v22  ;;  %v4035_v7 = vmul.f32 %v3900_v28, %v3900_v28  ;;  %v8982_v22 = vld [vmem:[#allocation23_spill] sm:$0xff] }
 0x358   :  { %v4036_v51 = vsub.f32 %v4034_v43, %v4035_v7  ;;  %v8983_v43 = vld [vmem:[#allocation24_spill] sm:$0xff] }
 0x35a   :  { %v4037_v37 = vmax.f32 %v4036_v51, 0.0 }
 0x35c   :  { %v4039_v60 = vadd.f32 1e-05, %v4037_v37 }
 0x35e   :  { %5893 = vrsqrt.f32 %v4039_v60  ;;  %v8984_v60 = vld [vmem:[#allocation10_spill] sm:$0xff] }
 0x36b   :  { %v5894_v62 = vpop.eup %5893 }
 0x36c   :  { %v4041_v20 = vmul.f32 %v5894_v62, %v4038_v24 }
 0x36e   :  { %v8154_v7 = vmul.f32 %v4041_v20, %v3900_v28  ;;  %v8158_v51 = vrot.slane %v4041_v20, %v8859_v59  ;;  %v8986_v20 = vld [vmem:[#allocation25_spill] sm:$0xff]  ;;  %v8996_v59 = vld [vmem:[#allocation30_spill] sm:$0xff] }
 0x370   :  { %v4044_v37 = vsub.f32 %v8152_v3, %v8154_v7  ;;  %v8164_v48 = vmul.f32 %v8158_v51, %v8979_v6  ;;  %v8168_v56 = vmul.f32 %v8158_v51, %v8980_v45  ;;  %v8172_v52 = vmul.f32 %v8158_v51, %v7703_v9  ;;  %v8987_v3 = vld [vmem:[#allocation26_spill] sm:$0xff]  ;;  %v8988_v45 = vld [vmem:[#allocation12_spill] sm:$0xff] }
 0x371   :  { %v8176_v2 = vmul.f32 %v8158_v51, %v7711_v14  ;;  %v8180_v39 = vmul.f32 %v8158_v51, %v7724_v57  ;;  %v8184_v1 = vmul.f32 %v8158_v51, %v7739_v11  ;;  %v8188_v53 = vmul.f32 %v8158_v51, %v7733_v55 }
 0x372   :  { %v8192_v9 = vmul.f32 %v8158_v51, %v7742_v26  ;;  %v8196_v14 = vmul.f32 %v8158_v51, %v7754_v17  ;;  %v8200_v57 = vmul.f32 %v8158_v51, %v7769_v42  ;;  %v8204_v11 = vmul.f32 %v8158_v51, %v7763_v10 }
 0x373   :  { %v8208_v55 = vmul.f32 %v8158_v51, %v7772_v13  ;;  %v8212_v26 = vmul.f32 %v8158_v51, %v7784_v30  ;;  %v8216_v17 = vmul.f32 %v8158_v51, %v7799_v36  ;;  %v8220_v42 = vmul.f32 %v8158_v51, %v7793_v0 }
 0x374   :  { %v8224_v10 = vmul.f32 %v8158_v51, %v7802_v8  ;;  %v8228_v13 = vmul.f32 %v8158_v51, %v7814_v27  ;;  %v8232_v30 = vmul.f32 %v8158_v51, %v7829_v34  ;;  %v8236_v36 = vmul.f32 %v8158_v51, %v7823_v40 }
 0x375   :  { %v8240_v0 = vmul.f32 %v8158_v51, %v7832_v12  ;;  %v8244_v8 = vmul.f32 %v8158_v51, %v8981_v5  ;;  %v8248_v27 = vmul.f32 %v8158_v51, %v7859_v15  ;;  %v8252_v34 = vmul.f32 %v8158_v51, %v7853_v23  ;;  %v8989_v5 = vld [vmem:[#allocation27_spill] sm:$0xff] }
 0x376   :  { %v8256_v40 = vmul.f32 %v8158_v51, %v7862_v4  ;;  %v8260_v12 = vmul.f32 %v8158_v51, %v7874_v25  ;;  %v8264_v28 = vmul.f32 %v8158_v51, %v7889_v16  ;;  %v8268_v15 = vmul.f32 %v8158_v51, %v7883_v54 }
 0x377   :  { %v8272_v23 = vmul.f32 %v8158_v51, %v7892_v41  ;;  %v8276_v4 = vmul.f32 %v8158_v51, %v8982_v22  ;;  %v8280_v25 = vmul.f32 %v8158_v51, %v8983_v43  ;;  %v8284_v16 = vmul.f32 %v8158_v51, %v7913_v38  ;;  %v8990_v43 = vld [vmem:[#allocation13_spill] sm:$0xff] }
 0x378   :  { %v8288_v54 = vmul.f32 %v8158_v51, %v7922_v31  ;;  %v8292_v41 = vmul.f32 %v8158_v51, %v8984_v60  ;;  %v8296_v24 = vmul.f32 %v8158_v51, %v8985_v18  ;;  %v8300_v62 = vmul.f32 %v8158_v51, %v7943_v35 }
 0x379   :  { %v8304_v38 = vmul.f32 %v8158_v51, %v7952_v32  ;;  %v8308_v31 = vmul.f32 %v8158_v51, %v8986_v20  ;;  %v8312_v7 = vmul.f32 %v8158_v51, %v8987_v3  ;;  %v8316_v6 = vmul.f32 %v8158_v51, %v7973_v33  ;;  %v8992_v20 = vld [vmem:[#allocation14_spill] sm:$0xff]  ;;  %v8993_v3 = vld [vmem:[#allocation28_spill] sm:$0xff] }
 0x37a   :  { %v8320_v35 = vmul.f32 %v8158_v51, %v8988_v45  ;;  %v8324_v32 = vmul.f32 %v8158_v51, %v7994_v44  ;;  %v8328_v22 = vmul.f32 %v8158_v51, %v8989_v5  ;;  %v8332_v60 = vmul.f32 %v8158_v51, %v8990_v43  ;;  %v8994_v43 = vld [vmem:[#allocation29_spill] sm:$0xff] }
 0x37b   :  { %v8336_v33 = vmul.f32 %v8158_v51, %v8012_v61  ;;  %v8340_v18 = vmul.f32 %v8158_v51, %v8022_v21  ;;  %v8344_v44 = vmul.f32 %v8158_v51, %v8992_v20  ;;  %v8348_v45 = vmul.f32 %v8158_v51, %v8993_v3 }
 0x37c   :  { %v8352_v5 = vmul.f32 %v8158_v51, %v8037_v29  ;;  %v8356_v61 = vmul.f32 %v8158_v51, %v8994_v43  ;;  %v8360_v21 = vmul.f32 %v8158_v51, %v8996_v59  ;;  %v8368_v3 = vmul.f32 %v8158_v51, %v8106_v58 }
 0x37d   :  { %8991 = vst [vmem:[#allocation17_spill] sm:$0xff] %v8340_v18  ;;  %v8998_v18 = vld [vmem:[#allocation15_spill] sm:$0xff]  ;;  %v8372_v29 = vmul.f32 %v8158_v51, %v8101_v46  ;;  %v8376_v43 = vmul.f32 %v8158_v51, %v8109_v50  ;;  %v8380_v59 = vmul.f32 %v8158_v51, %v8118_v19  ;;  %v8396_v50 = vmul.f32 %v8158_v51, %v8132_v47 }
 0x37e   :  { %8995 = vst [vmem:[#allocation18_spill] sm:$0xff] %v8356_v61  ;;  %8997 = vst [vmem:[#allocation4_spill] sm:$0xff] %v8360_v21  ;;  %v8364_v20 = vmul.f32 %v8158_v51, %v8998_v18  ;;  %v8384_v18 = vmul.f32 %v8158_v51, %v8130_v49  ;;  %v9009_v19 = vsub.s32 0, %v8143_v63  ;;  %v9010_v49 = vld [vmem:[#allocation34_spill] sm:$0xff] }
 0x37f   :  { %9000 = vst [vmem:[#allocation20_spill] sm:$0xff] %v8368_v3  ;;  %9001 = vst [vmem:[#allocation19_spill] sm:$0xff] %v8372_v29  ;;  %v9007_v3 = vld [vmem:[#allocation31_spill] sm:$0xff]  ;;  %v9008_v29 = vld [vmem:[#allocation32_spill] sm:$0xff] }
 0x380   :  { %8999 = vst [vmem:[#allocation5_spill] sm:$0xff] %v8364_v20  ;;  %9002 = vst [vmem:[#allocation6_spill] sm:$0xff] %v8376_v43  ;;  %v9005_v20 = vld [vmem:[#allocation3_spill] sm:$0xff]  ;;  %v4102_v46 = vmul.f32 %v8158_v51, %v9007_v3  ;;  %v4103_v21 = vmul.f32 %v8158_v51, %v9008_v29  ;;  %v9011_v43 = vld [vmem:[#allocation33_spill] sm:$0xff] }
 0x381   :  { %9003 = vst [vmem:[#allocation7_spill] sm:$0xff] %v8380_v59  ;;  %9004 = vst [vmem:[#allocation21_spill] sm:$0xff] %v8384_v18  ;;  %v8388_v58 = vmul.f32 %v8158_v51, %v9005_v20  ;;  %v8400_v59 = vrot.slane %v4044_v37, %v9009_v19  ;;  %v4104_v18 = vmul.f32 %v8158_v51, %v9010_v49  ;;  %v9013_v61 = vld [vmem:[#allocation2_spill] sm:$0xff] }
 0x382   :  { %v4105_v20 = vmul.f32 %v8158_v51, %v9011_v43  ;;  %v4107_v29 = vmul.f32 %v8158_v51, %v9013_v61 }
 0x383   :  { %9006 = vst [vmem:[#allocation22_spill] sm:$0xff] %v8388_v58  ;;  %v9012_v58 = vld [vmem:[#allocation16_spill] sm:$0xff]  ;;  %v8412_v47 = vadd.f32 %v8400_v59, %v8164_v48  ;;  %v8416_v63 = vadd.f32 %v8400_v59, %v8168_v56  ;;  %v8420_v37 = vadd.f32 %v8400_v59, %v8172_v52  ;;  %v8424_v43 = vadd.f32 %v8400_v59, %v8176_v2 }
 0x384   :  { %v4106_v3 = vmul.f32 %v8158_v51, %v9012_v58  ;;  %v8428_v58 = vadd.f32 %v8400_v59, %v8180_v39  ;;  %v8432_v51 = vadd.f32 %v8400_v59, %v8184_v1  ;;  %v8436_v48 = vadd.f32 %v8400_v59, %v8188_v53 }
 0x385   :  { %9014 = vst [vmem:[#allocation8_spill] sm:$0xff] %v8412_v47  ;;  %9015 = vst [vmem:[#allocation9_spill] sm:$0xff] %v8416_v63  ;;  %v8440_v56 = vadd.f32 %v8400_v59, %v8192_v9  ;;  %v8444_v52 = vadd.f32 %v8400_v59, %v8196_v14  ;;  %v8448_v2 = vadd.f32 %v8400_v59, %v8200_v57  ;;  %v9021_v61 = vld [vmem:[#allocation18_spill] sm:$0xff]  ;;  %v9023_v19 = vld [vmem:[#allocation4_spill] sm:$0xff] }
 0x386   :  { %9016 = vst [vmem:[#allocation23_spill] sm:$0xff] %v8420_v37  ;;  %9017 = vst [vmem:[#allocation24_spill] sm:$0xff] %v8424_v43  ;;  %v8452_v39 = vadd.f32 %v8400_v59, %v8204_v11  ;;  %v8456_v1 = vadd.f32 %v8400_v59, %v8208_v55  ;;  %v8460_v53 = vadd.f32 %v8400_v59, %v8212_v26 }
 0x387   :  { %9018 = vst [vmem:[#allocation10_spill] sm:$0xff] %v8428_v58  ;;  %v8464_v9 = vadd.f32 %v8400_v59, %v8216_v17  ;;  %v8468_v14 = vadd.f32 %v8400_v59, %v8220_v42  ;;  %v8472_v57 = vadd.f32 %v8400_v59, %v8224_v10  ;;  %v8476_v11 = vadd.f32 %v8400_v59, %v8228_v13 }
 0x388   :  { %v8480_v55 = vadd.f32 %v8400_v59, %v8232_v30  ;;  %v8484_v26 = vadd.f32 %v8400_v59, %v8236_v36  ;;  %v8488_v17 = vadd.f32 %v8400_v59, %v8240_v0  ;;  %v8492_v42 = vadd.f32 %v8400_v59, %v8244_v8 }
 0x389   :  { %v8496_v10 = vadd.f32 %v8400_v59, %v8248_v27  ;;  %v8500_v13 = vadd.f32 %v8400_v59, %v8252_v34  ;;  %v8504_v30 = vadd.f32 %v8400_v59, %v8256_v40  ;;  %v8508_v36 = vadd.f32 %v8400_v59, %v8260_v12 }
 0x38a   :  { %v8512_v0 = vadd.f32 %v8400_v59, %v8264_v28  ;;  %v8516_v8 = vadd.f32 %v8400_v59, %v8268_v15  ;;  %v8520_v27 = vadd.f32 %v8400_v59, %v8272_v23  ;;  %v8524_v34 = vadd.f32 %v8400_v59, %v8276_v4 }
 0x38b   :  { %v8528_v40 = vadd.f32 %v8400_v59, %v8280_v25  ;;  %v8532_v12 = vadd.f32 %v8400_v59, %v8284_v16  ;;  %v8536_v28 = vadd.f32 %v8400_v59, %v8288_v54  ;;  %v8540_v15 = vadd.f32 %v8400_v59, %v8292_v41 }
 0x38c   :  { %v8544_v23 = vadd.f32 %v8400_v59, %v8296_v24  ;;  %v8548_v4 = vadd.f32 %v8400_v59, %v8300_v62  ;;  %v8552_v25 = vadd.f32 %v8400_v59, %v8304_v38  ;;  %v8556_v16 = vadd.f32 %v8400_v59, %v8308_v31 }
 0x38d   :  { %v8560_v54 = vadd.f32 %v8400_v59, %v8312_v7  ;;  %v8564_v41 = vadd.f32 %v8400_v59, %v8316_v6  ;;  %v8568_v24 = vadd.f32 %v8400_v59, %v8320_v35  ;;  %v8572_v62 = vadd.f32 %v8400_v59, %v8324_v32  ;;  %v9019_v6 = vld [vmem:[#allocation17_spill] sm:$0xff] }
 0x38e   :  { %v8576_v38 = vadd.f32 %v8400_v59, %v8328_v22  ;;  %v8580_v31 = vadd.f32 %v8400_v59, %v8332_v60  ;;  %v8584_v7 = vadd.f32 %v8400_v59, %v8336_v33  ;;  %v8588_v35 = vadd.f32 %v8400_v59, %v9019_v6  ;;  %v9024_v6 = vld [vmem:[#allocation5_spill] sm:$0xff] }
 0x38f   :  { %v8592_v32 = vadd.f32 %v8400_v59, %v8344_v44  ;;  %v8596_v22 = vadd.f32 %v8400_v59, %v8348_v45  ;;  %v8600_v60 = vadd.f32 %v8400_v59, %v8352_v5  ;;  %v8604_v33 = vadd.f32 %v8400_v59, %v9021_v61 }
 0x390   :  { %v8608_v49 = vadd.f32 %v8400_v59, %v9023_v19  ;;  %v8612_v44 = vadd.f32 %v8400_v59, %v9024_v6  ;;  %v8618_v45 = vadd.f32 %v8400_v59, %v4103_v21  ;;  %v8621_v5 = vadd.f32 %v8400_v59, %v4104_v18  ;;  %v9029_v6 = vld [vmem:[#allocation20_spill] sm:$0xff] }
 0x391   :  { %9020 = vst [vmem:[#allocation11_spill] sm:$0xff] %v8592_v32  ;;  %9022 = vst [vmem:[#allocation25_spill] sm:$0xff] %v8604_v33  ;;  %v8615_v32 = vadd.f32 %v8400_v59, %v4102_v46  ;;  %v8624_v61 = vadd.f32 %v8400_v59, %v4105_v20  ;;  %v8627_v33 = vadd.f32 %v8400_v59, %v4106_v3  ;;  %v9030_v46 = vld [vmem:[#allocation19_spill] sm:$0xff]  ;;  %v9036_v3 = vld [vmem:[#allocation21_spill] sm:$0xff] }
 0x392   :  { %9025 = vst [vmem:[#allocation26_spill] sm:$0xff] %v8612_v44  ;;  %9026 = vst [vmem:[#allocation12_spill] sm:$0xff] %v8618_v45  ;;  %v8630_v19 = vadd.f32 %v8400_v59, %v4107_v29  ;;  %v8634_v44 = vadd.f32 %v8400_v59, %v9029_v6  ;;  %v8638_v21 = vadd.f32 %v8400_v59, %v9030_v46  ;;  %v9032_v45 = vld [vmem:[#allocation6_spill] sm:$0xff]  ;;  %v9034_v20 = vld [vmem:[#allocation7_spill] sm:$0xff] }
 0x393   :  { %9027 = vst [vmem:[#allocation27_spill] sm:$0xff] %v8624_v61  ;;  %v8642_v18 = vadd.f32 %v8400_v59, %v9032_v45  ;;  %v8646_v61 = vadd.f32 %v8400_v59, %v9034_v20  ;;  %v8650_v29 = vadd.f32 %v8400_v59, %v9036_v3  ;;  %v8658_v46 = vadd.f32 %v8400_v59, %v8396_v50 }
 0x394   :  { %9028 = vst [vmem:[#allocation13_spill] sm:$0xff] %v8630_v19  ;;  %9031 = vst [vmem:[#allocation14_spill] sm:$0xff] %v8638_v21  ;;  %v9038_v19 = vld [vmem:[#allocation22_spill] sm:$0xff]  ;;  %v4190_v3 = vmax.f32 %v8432_v51, 0.0  ;;  %v4195_v50 = vmax.f32 %v8452_v39, 0.0  ;;  %v4196_v45 = vmax.f32 %v8456_v1, 0.0 }
 0x395   :  { %9033 = vst [vmem:[#allocation28_spill] sm:$0xff] %v8642_v18  ;;  %9035 = vst [vmem:[#allocation29_spill] sm:$0xff] %v8646_v61  ;;  %v8654_v6 = vadd.f32 %v8400_v59, %v9038_v19  ;;  %v4192_v19 = vmax.f32 %v8440_v56, 0.0  ;;  %v4194_v59 = vmax.f32 %v8448_v2, 0.0  ;;  %v4197_v18 = vmax.f32 %v8460_v53, 0.0 }
 0x396   :  { %9037 = vst [vmem:[#allocation30_spill] sm:$0xff] %v8650_v29  ;;  %9040 = vst [vmem:[#allocation3_spill] sm:$0xff] %v8658_v46  ;;  %v4191_v29 = vmax.f32 %v8436_v48, 0.0  ;;  %v4198_v20 = vmax.f32 %v8464_v9, 0.0  ;;  %v4199_v61 = vmax.f32 %v8468_v14, 0.0  ;;  %v4200_v51 = vmax.f32 %v8472_v57, 0.0 }
 0x397   :  { %9039 = vst [vmem:[#allocation15_spill] sm:$0xff] %v8654_v6  ;;  %v4193_v6 = vmax.f32 %v8444_v52, 0.0  ;;  %v4201_v48 = vmax.f32 %v8476_v11, 0.0  ;;  %v4202_v56 = vmax.f32 %v8480_v55, 0.0  ;;  %v4203_v52 = vmax.f32 %v8484_v26, 0.0 }
 0x398   :  { %v4204_v2 = vmax.f32 %v8488_v17, 0.0  ;;  %v4205_v39 = vmax.f32 %v8492_v42, 0.0  ;;  %v4206_v1 = vmax.f32 %v8496_v10, 0.0  ;;  %v4207_v53 = vmax.f32 %v8500_v13, 0.0  ;;  %v9041_v21 = vld [vmem:[#allocation11_spill] sm:$0xff]  ;;  %v9042_v58 = vld [vmem:[#allocation25_spill] sm:$0xff] }
 0x399   :  { %v4208_v9 = vmax.f32 %v8504_v30, 0.0  ;;  %v4209_v14 = vmax.f32 %v8508_v36, 0.0  ;;  %v4210_v57 = vmax.f32 %v8512_v0, 0.0  ;;  %v4211_v11 = vmax.f32 %v8516_v8, 0.0  ;;  %v9043_v43 = vld [vmem:[#allocation26_spill] sm:$0xff]  ;;  %v9044_v37 = vld [vmem:[#allocation12_spill] sm:$0xff] }
 0x39a   :  { %v4212_v55 = vmax.f32 %v8520_v27, 0.0  ;;  %v4213_v26 = vmax.f32 %v8524_v34, 0.0  ;;  %v4214_v17 = vmax.f32 %v8528_v40, 0.0  ;;  %v4215_v42 = vmax.f32 %v8532_v12, 0.0  ;;  %v9045_v63 = vld [vmem:[#allocation27_spill] sm:$0xff] }
 0x39b   :  { %v4216_v10 = vmax.f32 %v8536_v28, 0.0  ;;  %v4217_v13 = vmax.f32 %v8540_v15, 0.0  ;;  %v4218_v30 = vmax.f32 %v8544_v23, 0.0  ;;  %v4219_v36 = vmax.f32 %v8548_v4, 0.0  ;;  %v9046_v47 = vld [vmem:[#allocation13_spill] sm:$0xff]  ;;  %v9047_v46 = vld [vmem:[#allocation14_spill] sm:$0xff] }
 0x39c   :  { %v4220_v0 = vmax.f32 %v8552_v25, 0.0  ;;  %v4221_v8 = vmax.f32 %v8556_v16, 0.0  ;;  %v4222_v27 = vmax.f32 %v8560_v54, 0.0  ;;  %v4223_v34 = vmax.f32 %v8564_v41, 0.0 }
 0x39d   :  { %v4224_v40 = vmax.f32 %v8568_v24, 0.0  ;;  %v4225_v12 = vmax.f32 %v8572_v62, 0.0  ;;  %v4226_v28 = vmax.f32 %v8576_v38, 0.0  ;;  %v4227_v15 = vmax.f32 %v8580_v31, 0.0 }
 0x39e   :  { %v4228_v23 = vmax.f32 %v8584_v7, 0.0  ;;  %v4229_v4 = vmax.f32 %v8588_v35, 0.0  ;;  %v4230_v25 = vmax.f32 %v9041_v21, 0.0  ;;  %v4231_v16 = vmax.f32 %v8596_v22, 0.0 }
 0x39f   :  { %v4232_v54 = vmax.f32 %v8600_v60, 0.0  ;;  %v4233_v41 = vmax.f32 %v9042_v58, 0.0  ;;  %v4234_v24 = vmax.f32 %v8608_v49, 0.0  ;;  %v4235_v62 = vmax.f32 %v9043_v43, 0.0  ;;  %v9048_v49 = vld [vmem:[#allocation28_spill] sm:$0xff] }
 0x3a0   :  { %v4236_v38 = vmax.f32 %v8615_v32, 0.0  ;;  %v4237_v31 = vmax.f32 %v9044_v37, 0.0  ;;  %v4238_v7 = vmax.f32 %v8621_v5, 0.0  ;;  %v4239_v35 = vmax.f32 %v9045_v63, 0.0  ;;  %v9049_v32 = vld [vmem:[#allocation29_spill] sm:$0xff]  ;;  %v9050_v5 = vld [vmem:[#allocation30_spill] sm:$0xff] }
 0x3a1   :  { %v4240_v21 = vmax.f32 %v8627_v33, 0.0  ;;  %v4241_v22 = vmax.f32 %v9046_v47, 0.0  ;;  %v4242_v60 = vmax.f32 %v8634_v44, 0.0  ;;  %v4243_v58 = vmax.f32 %v9047_v46, 0.0  ;;  %v9051_v33 = vld [vmem:[#allocation15_spill] sm:$0xff] }
 0x3a2   :  { %v4244_v43 = vmax.f32 %v9048_v49, 0.0  ;;  %v4245_v37 = vmax.f32 %v9049_v32, 0.0  ;;  %v4246_v63 = vmax.f32 %v9050_v5, 0.0  ;;  %v4247_v47 = vmax.f32 %v9051_v33, 0.0  ;;  %v9052_v44 = vld [vmem:[#allocation3_spill] sm:$0xff]  ;;  %v9053_v49 = vld [vmem:[#allocation8_spill] sm:$0xff] }
 0x3a3   :  { %v4248_v46 = vmax.f32 %v9052_v44, 0.0  ;;  %v9054_v32 = vmax.f32 %v9053_v49, 0.0  ;;  %v9055_v5 = vld [vmem:[#allocation9_spill] sm:$0xff]  ;;  %v9057_v49 = vld [vmem:[#allocation23_spill] sm:$0xff] }
 0x3a4   :  { %v9056_v33 = vmax.f32 %v9055_v5, 0.0  ;;  %v9058_v5 = vmax.f32 %v9057_v49, 0.0 }
 0x3a6   :  { %v5064_v44 = vpack.c.bf16 %v9056_v33, %v9054_v32  ;;  %v9059_v32 = vld [vmem:[#allocation24_spill] sm:$0xff] }
 0x3a7   :  { %v9060_v33 = vmax.f32 %v9059_v32, 0.0  ;;  %v9061_v32 = vld [vmem:[#allocation10_spill] sm:$0xff] }
 0x3a8   :  { %5065 = vst [vmem:[%s8834_s4] sm:$0xff] %v5064_v44  }
 0x3a9   :  { %v5069_v49 = vpack.c.bf16 %v9060_v33, %v9058_v5  ;;  %v9062_v5 = vmax.f32 %v9061_v32, 0.0  ;;  %v5079_v32 = vpack.c.bf16 %v4192_v19, %v4191_v29  ;;  %v5094_v19 = vpack.c.bf16 %v4198_v20, %v4197_v18 }
 0x3aa   :  { %v5099_v29 = vpack.c.bf16 %v4200_v51, %v4199_v61  ;;  %v5114_v18 = vpack.c.bf16 %v4206_v1, %v4205_v39  ;;  %v5119_v61 = vpack.c.bf16 %v4208_v9, %v4207_v53  ;;  %v5124_v20 = vpack.c.bf16 %v4210_v57, %v4209_v14 }
 0x3ab   :  { %v5074_v33 = vpack.c.bf16 %v4190_v3, %v9062_v5  ;;  %v5084_v3 = vpack.c.bf16 %v4194_v59, %v4193_v6  ;;  %v5089_v5 = vpack.c.bf16 %v4196_v45, %v4195_v50  ;;  %5221 = vst [vmem:[%s8834_s4 + $0x8] sm:$0xff] %v5069_v49   ;;  %5223 = vst [vmem:[%s8834_s4 + $0x18] sm:$0xff] %v5079_v32  }
 0x3ac   :  { %v5104_v6 = vpack.c.bf16 %v4202_v56, %v4201_v48  ;;  %v5109_v45 = vpack.c.bf16 %v4204_v2, %v4203_v52  ;;  %5226 = vst [vmem:[%s8834_s4 + $0x30] sm:$0xff] %v5094_v19   ;;  %5227 = vst [vmem:[%s8834_s4 + $0x38] sm:$0xff] %v5099_v29   ;;  %v5129_v59 = vpack.c.bf16 %v4212_v55, %v4211_v11 }
 0x3ad   :  { %5222 = vst [vmem:[%s8834_s4 + $0x10] sm:$0xff] %v5074_v33   ;;  %5224 = vst [vmem:[%s8834_s4 + $0x20] sm:$0xff] %v5084_v3   ;;  %v5134_v50 = vpack.c.bf16 %v4214_v17, %v4213_v26  ;;  %v5139_v51 = vpack.c.bf16 %v4216_v10, %v4215_v42  ;;  %v5144_v48 = vpack.c.bf16 %v4218_v30, %v4217_v13 }
 0x3ae   :  { %5225 = vst [vmem:[%s8834_s4 + $0x28] sm:$0xff] %v5089_v5   ;;  %5228 = vst [vmem:[%s8834_s4 + $0x40] sm:$0xff] %v5104_v6   ;;  %v5149_v56 = vpack.c.bf16 %v4220_v0, %v4219_v36  ;;  %v5154_v52 = vpack.c.bf16 %v4222_v27, %v4221_v8  ;;  %v5159_v2 = vpack.c.bf16 %v4224_v40, %v4223_v34 }
 0x3af   :  { %5229 = vst [vmem:[%s8834_s4 + $0x48] sm:$0xff] %v5109_v45   ;;  %5230 = vst [vmem:[%s8834_s4 + $0x50] sm:$0xff] %v5114_v18   ;;  %v5164_v39 = vpack.c.bf16 %v4226_v28, %v4225_v12  ;;  %v5169_v1 = vpack.c.bf16 %v4228_v23, %v4227_v15  ;;  %v5174_v53 = vpack.c.bf16 %v4230_v25, %v4229_v4 }
 0x3b0   :  { %5231 = vst [vmem:[%s8834_s4 + $0x58] sm:$0xff] %v5119_v61   ;;  %5232 = vst [vmem:[%s8834_s4 + $0x60] sm:$0xff] %v5124_v20   ;;  %v5179_v9 = vpack.c.bf16 %v4232_v54, %v4231_v16  ;;  %v5184_v14 = vpack.c.bf16 %v4234_v24, %v4233_v41  ;;  %v5189_v57 = vpack.c.bf16 %v4236_v38, %v4235_v62 }
 0x3b1   :  { %5233 = vst [vmem:[%s8834_s4 + $0x68] sm:$0xff] %v5129_v59   ;;  %5234 = vst [vmem:[%s8834_s4 + $0x70] sm:$0xff] %v5134_v50   ;;  %v5194_v11 = vpack.c.bf16 %v4238_v7, %v4237_v31  ;;  %v5199_v55 = vpack.c.bf16 %v4240_v21, %v4239_v35  ;;  %v5204_v26 = vpack.c.bf16 %v4242_v60, %v4241_v22 }
 0x3b2   :  { %5235 = vst [vmem:[%s8834_s4 + $0x78] sm:$0xff] %v5139_v51   ;;  %5236 = vst [vmem:[%s8834_s4 + $0x80] sm:$0xff] %v5144_v48   ;;  %v5209_v17 = vpack.c.bf16 %v4244_v43, %v4243_v58  ;;  %v5214_v42 = vpack.c.bf16 %v4246_v63, %v4245_v37  ;;  %v5219_v10 = vpack.c.bf16 %v4248_v46, %v4247_v47 }
 0x3b3   :  { %5237 = vst [vmem:[%s8834_s4 + $0x88] sm:$0xff] %v5149_v56   ;;  %5238 = vst [vmem:[%s8834_s4 + $0x90] sm:$0xff] %v5154_v52  }
 0x3b4   :  { %5239 = vst [vmem:[%s8834_s4 + $0x98] sm:$0xff] %v5159_v2   ;;  %5240 = vst [vmem:[%s8834_s4 + $0xa0] sm:$0xff] %v5164_v39  }
 0x3b5   :  { %5241 = vst [vmem:[%s8834_s4 + $0xa8] sm:$0xff] %v5169_v1   ;;  %5242 = vst [vmem:[%s8834_s4 + $0xb0] sm:$0xff] %v5174_v53  }
 0x3b6   :  { %5243 = vst [vmem:[%s8834_s4 + $0xb8] sm:$0xff] %v5179_v9   ;;  %5244 = vst [vmem:[%s8834_s4 + $0xc0] sm:$0xff] %v5184_v14  }
 0x3b7   :  { %5245 = vst [vmem:[%s8834_s4 + $0xc8] sm:$0xff] %v5189_v57   ;;  %5246 = vst [vmem:[%s8834_s4 + $0xd0] sm:$0xff] %v5194_v11  }
 0x3b8   :  { %5247 = vst [vmem:[%s8834_s4 + $0xd8] sm:$0xff] %v5199_v55   ;;  %5248 = vst [vmem:[%s8834_s4 + $0xe0] sm:$0xff] %v5204_v26  }
 0x3b9   :  { %5249 = vst [vmem:[%s8834_s4 + $0xe8] sm:$0xff] %v5209_v17   ;;  %5250 = vst [vmem:[%s8834_s4 + $0xf0] sm:$0xff] %v5214_v42  }
 0x3ba   :  { %5251 = vst [vmem:[%s8834_s4 + $0xf8] sm:$0xff] %v5219_v10  }

// kernel: student_resnet_forward.10
= control target key start
LH: loop header
LB: loop body
LE: loop exit
PB: predicated region body
PF: predicated region fallthrough
CT: control target
= control target key end

     0   :  { %s3222_s1 = inlined_call_operand.vmem [shape: bf16[1152,128], index: 1, kind: input, shape index: {}]   ;;  %s3223_s0 = inlined_call_operand.vmem [shape: bf16[128,1152], index: 0, kind: input, shape index: {}]   ;;  %s3224_s2 = inlined_call_operand.vmem [shape: f32[1,128], index: 2, kind: input, shape index: {}]   ;;  %s3225_s3 = inlined_call_operand.vmem [shape: f32[1,128], index: 3, kind: input, shape index: {}]   ;;  %s3226_s4 = inlined_call_operand.vmem [shape: bf16[128,128], index: 4, kind: output, shape index: {}]  }
   0x1   :  { %v2284_v0 = vld [vmem:[%s3222_s1 + $0x78] sm:$0xff]   ;;  %v2288_v4 = vld [vmem:[%s3222_s1 + $0x70] sm:$0xff]   ;;  %v2292_v8 = vld [vmem:[%s3222_s1 + $0x68] sm:$0xff]  }
   0x2   :  { %v2285_v1 = vld [vmem:[%s3222_s1 + $0xf8] sm:$0xff]   ;;  %1964 = vmatprep.subr.bf16.mxu0 %v2284_v0  ;;  %v2289_v5 = vld [vmem:[%s3222_s1 + $0xf0] sm:$0xff]   ;;  %v2293_v9 = vld [vmem:[%s3222_s1 + $0xe8] sm:$0xff]  }
   0x3   :  { %v2286_v2 = vld [vmem:[%s3222_s1 + $0x38] sm:$0xff]   ;;  %2028 = vmatprep.subr.bf16.mxu1 %v2285_v1  ;;  %v2290_v6 = vld [vmem:[%s3222_s1 + $0x30] sm:$0xff]   ;;  %v2294_v10 = vld [vmem:[%s3222_s1 + $0x28] sm:$0xff]  }
   0x4   :  { %v2287_v3 = vld [vmem:[%s3222_s1 + $0xb8] sm:$0xff]   ;;  %1965 = vmatpush3.bf16.msra.mxu0 %v2286_v2  ;;  %v2291_v7 = vld [vmem:[%s3222_s1 + $0xb0] sm:$0xff]   ;;  %v2295_v11 = vld [vmem:[%s3222_s1 + $0xa8] sm:$0xff]  }
   0x5   :  { %2029 = vmatpush3.bf16.msra.mxu1 %v2287_v3  ;;  %1966 = vmatprep.subr.bf16.mxu0 %v2288_v4  ;;  %v2296_v12 = vld [vmem:[%s3222_s1 + $0x60] sm:$0xff]   ;;  %v2300_v16 = vld [vmem:[%s3222_s1 + $0x58] sm:$0xff]   ;;  %v2304_v20 = vld [vmem:[%s3222_s1 + $0x50] sm:$0xff]  }
   0x6   :  { %2030 = vmatprep.subr.bf16.mxu1 %v2289_v5  ;;  %v2297_v13 = vld [vmem:[%s3222_s1 + $0xe0] sm:$0xff]   ;;  %v2301_v17 = vld [vmem:[%s3222_s1 + $0xd8] sm:$0xff]   ;;  %v2305_v21 = vld [vmem:[%s3222_s1 + $0xd0] sm:$0xff]  }
   0x7   :  { %v2298_v14 = vld [vmem:[%s3222_s1 + $0x20] sm:$0xff]   ;;  %v2302_v18 = vld [vmem:[%s3222_s1 + $0x18] sm:$0xff]   ;;  %v2306_v22 = vld [vmem:[%s3222_s1 + $0x10] sm:$0xff]  }
   0x8   :  { %1967 = vmatpush3.bf16.msra.mxu0 %v2290_v6  ;;  %v2299_v15 = vld [vmem:[%s3222_s1 + $0xa0] sm:$0xff]   ;;  %v2303_v19 = vld [vmem:[%s3222_s1 + $0x98] sm:$0xff]   ;;  %v2307_v23 = vld [vmem:[%s3222_s1 + $0x90] sm:$0xff]  }
   0x9   :  { %2031 = vmatpush3.bf16.msra.mxu1 %v2291_v7  ;;  %1968 = vmatprep.subr.bf16.mxu0 %v2292_v8  ;;  %v2308_v24 = vld [vmem:[%s3222_s1 + $0x48] sm:$0xff]   ;;  %v2312_v28 = vld [vmem:[%s3222_s1 + $0x40] sm:$0xff]   ;;  %v2322_v36 = vld [vmem:[%s3222_s1 + $0x178] sm:$0xff]  }
   0xa   :  { %2032 = vmatprep.subr.bf16.mxu1 %v2293_v9  ;;  %v2309_v25 = vld [vmem:[%s3222_s1 + $0xc8] sm:$0xff]   ;;  %v2313_v29 = vld [vmem:[%s3222_s1 + $0xc0] sm:$0xff]   ;;  %v2323_v37 = vld [vmem:[%s3222_s1 + $0x138] sm:$0xff]  }
   0xb   :  { %v2310_v26 = vld [vmem:[%s3222_s1 + $0x8] sm:$0xff]   ;;  %v2314_v30 = vld [vmem:[%s3222_s1] sm:$0xff]   ;;  %v2326_v39 = vld [vmem:[%s3223_s0 + $0x54] ss:$36 sps:$4 sm:$0xff]  }
   0xc   :  { %1969 = vmatpush3.bf16.msra.mxu0 %v2294_v10  ;;  %v2311_v27 = vld [vmem:[%s3222_s1 + $0x88] sm:$0xff]   ;;  %v2315_v31 = vld [vmem:[%s3222_s1 + $0x80] sm:$0xff]   ;;  %v2329_v41 = vld [vmem:[%s3223_s0 + $0x50] ss:$36 sps:$4 sm:$0xff]  }
   0xd   :  { %2033 = vmatpush3.bf16.msra.mxu1 %v2295_v11  ;;  %1970 = vmatprep.subr.bf16.mxu0 %v2296_v12  ;;  %v2316_v32 = vld [vmem:[%s3223_s0] ss:$36 sps:$4 sm:$0xff]   ;;  %v2319_v34 = vld [vmem:[%s3223_s0 + $0x8] ss:$36 sps:$4 sm:$0xff]   ;;  %v2330_v42 = vld [vmem:[%s3222_s1 + $0x170] sm:$0xff]  }
   0xe   :  { %2034 = vmatprep.subr.bf16.mxu1 %v2297_v13  ;;  %v2318_v33 = vld [vmem:[%s3223_s0 + $0x4] ss:$36 sps:$4 sm:$0xff]   ;;  %v2321_v35 = vld [vmem:[%s3223_s0 + $0xc] ss:$36 sps:$4 sm:$0xff]   ;;  %v2332_v44 = vld [vmem:[%s3223_s0 + $0x94] ss:$36 sps:$4 sm:$0xff]  }
   0xf   :  { %1074 = vmatprep.mubr.bf16.mxu0 %v2318_v33  ;;  %1171 = vmatprep.mubr.bf16.mxu1 %v2321_v35  ;;  %v2324_v38 = vld [vmem:[%s3223_s0 + $0x4c] ss:$36 sps:$4 sm:$0xff]   ;;  %v2334_v45 = vld [vmem:[%s3223_s0 + $0x9c] ss:$36 sps:$4 sm:$0xff]   ;;  %v2344_v53 = vld [vmem:[%s3223_s0 + $0xe4] ss:$36 sps:$4 sm:$0xff]  }
  0x10   :  { %1971 = vmatpush3.bf16.msra.mxu0 %v2298_v14  ;;  %v2328_v40 = vld [vmem:[%s3223_s0 + $0x48] ss:$36 sps:$4 sm:$0xff]   ;;  %v2331_v43 = vld [vmem:[%s3222_s1 + $0x130] sm:$0xff]   ;;  %v2339_v47 = vld [vmem:[%s3222_s1 + $0x1f8] sm:$0xff]  }
  0x11   :  { %2035 = vmatpush3.bf16.msra.mxu1 %v2299_v15  ;;  %1972 = vmatprep.subr.bf16.mxu0 %v2300_v16  ;;  %v2338_v46 = vld [vmem:[%s3222_s1 + $0x168] sm:$0xff]   ;;  %v2336_v48 = vld [vmem:[%s3223_s0 + $0x90] ss:$36 sps:$4 sm:$0xff]   ;;  %v2341_v50 = vld [vmem:[%s3222_s1 + $0x1b8] sm:$0xff]  }
  0x12   :  { %2036 = vmatprep.subr.bf16.mxu1 %v2301_v17  ;;  %v2340_v49 = vld [vmem:[%s3222_s1 + $0x128] sm:$0xff]   ;;  %v2337_v51 = vld [vmem:[%s3223_s0 + $0x98] ss:$36 sps:$4 sm:$0xff]   ;;  %v2348_v54 = vld [vmem:[%s3222_s1 + $0x160] sm:$0xff]  }
  0x13   :  { %v2342_v52 = vld [vmem:[%s3223_s0 + $0xdc] ss:$36 sps:$4 sm:$0xff]   ;;  %v2349_v55 = vld [vmem:[%s3222_s1 + $0x1f0] sm:$0xff]   ;;  %v2352_v60 = vld [vmem:[%s3223_s0 + $0x124] ss:$36 sps:$4 sm:$0xff]  }
  0x14   :  { %1973 = vmatpush3.bf16.msra.mxu0 %v2302_v18  ;;  %v2350_v56 = vld [vmem:[%s3222_s1 + $0x120] sm:$0xff]   ;;  %v2351_v57 = vld [vmem:[%s3222_s1 + $0x1b0] sm:$0xff]   ;;  %v2346_v58 = vld [vmem:[%s3223_s0 + $0xd8] ss:$36 sps:$4 sm:$0xff]  }
  0x15   :  { %2037 = vmatpush3.bf16.msra.mxu1 %v2303_v19  ;;  %1974 = vmatprep.subr.bf16.mxu0 %v2304_v20  ;;  %v2347_v59 = vld [vmem:[%s3223_s0 + $0xe0] ss:$36 sps:$4 sm:$0xff]   ;;  %v2354_v61 = vld [vmem:[%s3223_s0 + $0x12c] ss:$36 sps:$4 sm:$0xff]   ;;  %v2358_v62 = vld [vmem:[%s3222_s1 + $0x158] sm:$0xff]  }
  0x16   :  { %2038 = vmatprep.subr.bf16.mxu1 %v2305_v21  ;;  %v2359_v63 = vld [vmem:[%s3222_s1 + $0x1e8] sm:$0xff]   ;;  %v2360_v0 = vld [vmem:[%s3222_s1 + $0x118] sm:$0xff]   ;;  %v2356_v2 = vld [vmem:[%s3223_s0 + $0x120] ss:$36 sps:$4 sm:$0xff]  }
  0x17   :  { %v2361_v1 = vld [vmem:[%s3222_s1 + $0x1a8] sm:$0xff]   ;;  %v2364_v5 = vld [vmem:[%s3223_s0 + $0x174] ss:$36 sps:$4 sm:$0xff]   ;;  %v2369_v7 = vld [vmem:[%s3222_s1 + $0x1e0] sm:$0xff]  }
  0x18   :  { %1975 = vmatpush3.bf16.msra.mxu0 %v2306_v22  ;;  %v2357_v3 = vld [vmem:[%s3223_s0 + $0x128] ss:$36 sps:$4 sm:$0xff]   ;;  %v2368_v6 = vld [vmem:[%s3222_s1 + $0x150] sm:$0xff]   ;;  %v2371_v9 = vld [vmem:[%s3222_s1 + $0x1a0] sm:$0xff]  }
  0x19   :  { %2039 = vmatpush3.bf16.msra.mxu1 %v2307_v23  ;;  %1976 = vmatprep.subr.bf16.mxu0 %v2308_v24  ;;  %v2362_v4 = vld [vmem:[%s3223_s0 + $0x16c] ss:$36 sps:$4 sm:$0xff]   ;;  %v2372_v12 = vld [vmem:[%s3223_s0 + $0x1b4] ss:$36 sps:$4 sm:$0xff]   ;;  %v2374_v14 = vld [vmem:[%s3223_s0 + $0x1bc] ss:$36 sps:$4 sm:$0xff]  }
  0x1a   :  { %2040 = vmatprep.subr.bf16.mxu1 %v2309_v25  ;;  %v2370_v8 = vld [vmem:[%s3222_s1 + $0x110] sm:$0xff]   ;;  %v2366_v10 = vld [vmem:[%s3223_s0 + $0x168] ss:$36 sps:$4 sm:$0xff]   ;;  %v2379_v15 = vld [vmem:[%s3222_s1 + $0x1d8] sm:$0xff]  }
  0x1b   :  { %v2367_v11 = vld [vmem:[%s3223_s0 + $0x170] ss:$36 sps:$4 sm:$0xff]   ;;  %v2378_v13 = vld [vmem:[%s3222_s1 + $0x148] sm:$0xff]   ;;  %v2381_v17 = vld [vmem:[%s3222_s1 + $0x198] sm:$0xff]  }
  0x1c   :  { %1977 = vmatpush3.bf16.msra.mxu0 %v2310_v26  ;;  %v2380_v16 = vld [vmem:[%s3222_s1 + $0x108] sm:$0xff]   ;;  %v2382_v18 = vld [vmem:[%s3222_s1 + $0x1d0] sm:$0xff]   ;;  %v2377_v21 = vld [vmem:[%s3223_s0 + $0x1b8] ss:$36 sps:$4 sm:$0xff]  }
  0x1d   :  { %2041 = vmatpush3.bf16.msra.mxu1 %v2311_v27  ;;  %1978 = vmatprep.subr.bf16.mxu0 %v2312_v28  ;;  %v2383_v19 = vld [vmem:[%s3222_s1 + $0x190] sm:$0xff]   ;;  %v2384_v22 = vld [vmem:[%s3223_s0 + $0x1fc] ss:$36 sps:$4 sm:$0xff]   ;;  %v2386_v23 = vld [vmem:[%s3223_s0 + $0x204] ss:$36 sps:$4 sm:$0xff]  }
  0x1e   :  { %2042 = vmatprep.subr.bf16.mxu1 %v2313_v29  ;;  %v2376_v20 = vld [vmem:[%s3223_s0 + $0x1b0] ss:$36 sps:$4 sm:$0xff]   ;;  %v2390_v24 = vld [vmem:[%s3222_s1 + $0x140] sm:$0xff]   ;;  %v2391_v25 = vld [vmem:[%s3222_s1 + $0x1c8] sm:$0xff]  }
  0x1f   :  { %v2392_v26 = vld [vmem:[%s3222_s1 + $0x100] sm:$0xff]   ;;  %v2393_v27 = vld [vmem:[%s3222_s1 + $0x188] sm:$0xff]   ;;  %v2388_v29 = vld [vmem:[%s3223_s0 + $0x1f8] ss:$36 sps:$4 sm:$0xff]  }
  0x20   :  { %1979 = vmatpush3.bf16.msra.mxu0 %v2314_v30  ;;  %v2394_v28 = vld [vmem:[%s3222_s1 + $0x1c0] sm:$0xff]   ;;  %v2398_v33 = vld [vmem:[%s3223_s0 + $0x14] ss:$36 sps:$4 sm:$0xff]  }
  0x21   :  { %2043 = vmatpush3.bf16.msra.mxu1 %v2315_v31  ;;  %2092 = vmatprep.subr.bf16.mxu0 %v2322_v36  ;;  %v2389_v30 = vld [vmem:[%s3223_s0 + $0x200] ss:$36 sps:$4 sm:$0xff]   ;;  %v2396_v35 = vld [vmem:[%s3223_s0 + $0x10] ss:$36 sps:$4 sm:$0xff]   ;;  %v2399_v36 = vld [vmem:[%s3223_s0 + $0x18] ss:$36 sps:$4 sm:$0xff]  }
  0x22   :  { %2156 = vmatprep.subr.bf16.mxu1 %v2339_v47  ;;  %v2395_v31 = vld [vmem:[%s3222_s1 + $0x180] sm:$0xff]  }
  0x23   :  { %1075 = vmatmul.mubr.bf16.vlgmr.msra.gmra.mxu0 %v2316_v32  ;;  %v2402_v32 = vld [vmem:[%s3222_s1 + $0x238] sm:$0xff]   ;;  %v2414_v47 = vld [vmem:[%s3223_s0 + $0xa0] ss:$36 sps:$4 sm:$0xff]  }
  0x24   :  { %1172 = vmatmul.mubr.bf16.vlgmr.msra.gmra.mxu1 %v2319_v34  ;;  %2093 = vmatpush3.bf16.msra.mxu0 %v2323_v37  ;;  %v2401_v34 = vld [vmem:[%s3223_s0 + $0x1c] ss:$36 sps:$4 sm:$0xff]  }
  0x25   :  { %1082 = vmatprep.mubr.bf16.mxu0 %v2324_v38  ;;  %1179 = vmatprep.mubr.bf16.mxu1 %v2326_v39  ;;  %v2403_v37 = vld [vmem:[%s3223_s0 + $0x5c] ss:$36 sps:$4 sm:$0xff]   ;;  %v2405_v38 = vld [vmem:[%s3223_s0 + $0x64] ss:$36 sps:$4 sm:$0xff]   ;;  %v2409_v39 = vld [vmem:[%s3222_s1 + $0x230] sm:$0xff]  }
  0x26   :  { %2094 = vmatprep.subr.bf16.mxu0 %v2330_v42  ;;  %2157 = vmatpush3.bf16.msra.mxu1 %v2341_v50  ;;  %v2408_v42 = vld [vmem:[%s3223_s0 + $0x60] ss:$36 sps:$4 sm:$0xff]   ;;  %v2419_v50 = vld [vmem:[%s3223_s0 + $0xf4] ss:$36 sps:$4 sm:$0xff]  }
  0x27   :  { %2158 = vmatprep.subr.bf16.mxu1 %v2349_v55  ;;  %v2424_v55 = vld [vmem:[%s3223_s0 + $0x134] ss:$36 sps:$4 sm:$0xff]  }
  0x28   :  { %2095 = vmatpush3.bf16.msra.mxu0 %v2331_v43  ;;  %v2410_v43 = vld [vmem:[%s3223_s0 + $0xa4] ss:$36 sps:$4 sm:$0xff]  }
  0x29   :  { %2096 = vmatprep.subr.bf16.mxu0 %v2338_v46  ;;  %v2430_v46 = vld [vmem:[%s3222_s1 + $0x218] sm:$0xff]  }
  0x2a   :  { %2159 = vmatpush3.bf16.msra.mxu1 %v2351_v57  ;;  %v2451_v57 = vld [vmem:[%s3222_s1 + $0x200] sm:$0xff]  }
  0x2b   :  { %1083 = vmatmul.mubr.bf16.gmra.mxu0 %v2328_v40  ;;  %2160 = vmatprep.subr.bf16.mxu1 %v2359_v63  ;;  %v2416_v40 = vld [vmem:[%s3222_s1 + $0x228] sm:$0xff]   ;;  %v2436_v63 = vld [vmem:[%s3223_s0 + $0x180] ss:$36 sps:$4 sm:$0xff]  }
  0x2c   :  { %1180 = vmatmul.mubr.bf16.gmra.mxu1 %v2329_v41  ;;  %1090 = vmatprep.mubr.bf16.mxu0 %v2332_v44  ;;  %v2407_v41 = vld [vmem:[%s3223_s0 + $0x58] ss:$36 sps:$4 sm:$0xff]   ;;  %v2412_v44 = vld [vmem:[%s3223_s0 + $0xac] ss:$36 sps:$4 sm:$0xff]  }
  0x2d   :  { %1187 = vmatprep.mubr.bf16.mxu1 %v2334_v45  ;;  %2097 = vmatpush3.bf16.msra.mxu0 %v2340_v49  ;;  %v2423_v45 = vld [vmem:[%s3222_s1 + $0x220] sm:$0xff]   ;;  %v2417_v49 = vld [vmem:[%s3223_s0 + $0xec] ss:$36 sps:$4 sm:$0xff]  }
  0x2e   :  { %2098 = vmatprep.subr.bf16.mxu0 %v2348_v54  ;;  %2161 = vmatpush3.bf16.msra.mxu1 %v2361_v1  ;;  %v2422_v54 = vld [vmem:[%s3223_s0 + $0xf0] ss:$36 sps:$4 sm:$0xff]  }
  0x2f   :  { %2162 = vmatprep.subr.bf16.mxu1 %v2369_v7  ;;  %v2440_v1 = vld [vmem:[%s3223_s0 + $0x1cc] ss:$36 sps:$4 sm:$0xff]  }
  0x30   :  { %v2450_v7 = vld [vmem:[%s3223_s0 + $0x210] ss:$36 sps:$4 sm:$0xff]  }
  0x31   :  { %2099 = vmatpush3.bf16.msra.mxu0 %v2350_v56  ;;  %v2426_v56 = vld [vmem:[%s3223_s0 + $0x13c] ss:$36 sps:$4 sm:$0xff]  }
  0x32   :  { %2100 = vmatprep.subr.bf16.mxu0 %v2358_v62  ;;  %2163 = vmatpush3.bf16.msra.mxu1 %v2371_v9  ;;  %v2435_v62 = vld [vmem:[%s3223_s0 + $0x178] ss:$36 sps:$4 sm:$0xff]   ;;  %v2453_v9 = vld [vmem:[%s3223_s0 + $0x140] ss:$36 sps:$4 sm:$0xff]  }
  0x33   :  { %1091 = vmatmul.mubr.bf16.gmra.mxu0 %v2336_v48  ;;  %2164 = vmatprep.subr.bf16.mxu1 %v2379_v15  ;;  %v2415_v48 = vld [vmem:[%s3223_s0 + $0xa8] ss:$36 sps:$4 sm:$0xff]   ;;  %v2459_v15 = vld [vmem:[%s3223_s0 + $0x218] ss:$36 sps:$4 sm:$0xff]  }
  0x34   :  { %1188 = vmatmul.mubr.bf16.gmra.mxu1 %v2337_v51  ;;  %1098 = vmatprep.mubr.bf16.mxu0 %v2342_v52  ;;  %v2437_v51 = vld [vmem:[%s3222_s1 + $0x210] sm:$0xff]   ;;  %v2421_v52 = vld [vmem:[%s3223_s0 + $0xe8] ss:$36 sps:$4 sm:$0xff]  }
  0x35   :  { %1195 = vmatprep.mubr.bf16.mxu1 %v2344_v53  ;;  %2101 = vmatpush3.bf16.msra.mxu0 %v2360_v0  ;;  %v2444_v53 = vld [vmem:[%s3222_s1 + $0x208] sm:$0xff]  }
  0x36   :  { %2102 = vmatprep.subr.bf16.mxu0 %v2368_v6  ;;  %2165 = vmatpush3.bf16.msra.mxu1 %v2381_v17  ;;  %v2438_v0 = vld [vmem:[%s3223_s0 + $0x1c4] ss:$36 sps:$4 sm:$0xff]  }
  0x37   :  { %2166 = vmatprep.subr.bf16.mxu1 %v2382_v18  ;;  %v2449_v6 = vld [vmem:[%s3223_s0 + $0x208] ss:$36 sps:$4 sm:$0xff]  }
  0x39   :  { %2103 = vmatpush3.bf16.msra.mxu0 %v2370_v8  ;;  %v2452_v8 = vld [vmem:[%s3223_s0 + $0x20] ss:$36 sps:$4 sm:$0xff]  }
  0x3a   :  { %2104 = vmatprep.subr.bf16.mxu0 %v2378_v13  ;;  %2167 = vmatpush3.bf16.msra.mxu1 %v2383_v19  ;;  %v2457_v13 = vld [vmem:[%s3223_s0 + $0x1d0] ss:$36 sps:$4 sm:$0xff]  }
  0x3b   :  { %1099 = vmatmul.mubr.bf16.gmra.mxu0 %v2346_v58  ;;  %2168 = vmatprep.subr.bf16.mxu1 %v2391_v25  ;;  %v2428_v58 = vld [vmem:[%s3223_s0 + $0x130] ss:$36 sps:$4 sm:$0xff]  }
  0x3c   :  { %1196 = vmatmul.mubr.bf16.gmra.mxu1 %v2347_v59  ;;  %1106 = vmatprep.mubr.bf16.mxu0 %v2352_v60  ;;  %v2429_v59 = vld [vmem:[%s3223_s0 + $0x138] ss:$36 sps:$4 sm:$0xff]  }
  0x3d   :  { %1203 = vmatprep.mubr.bf16.mxu1 %v2354_v61  ;;  %2105 = vmatpush3.bf16.msra.mxu0 %v2380_v16  ;;  %v2431_v60 = vld [vmem:[%s3223_s0 + $0x17c] ss:$36 sps:$4 sm:$0xff]   ;;  %v2433_v61 = vld [vmem:[%s3223_s0 + $0x184] ss:$36 sps:$4 sm:$0xff]  }
  0x3e   :  { %2106 = vmatprep.subr.bf16.mxu0 %v2390_v24  ;;  %2169 = vmatpush3.bf16.msra.mxu1 %v2393_v27 }
  0x3f   :  { %2170 = vmatprep.subr.bf16.mxu1 %v2394_v28 }
  0x41   :  { %2107 = vmatpush3.bf16.msra.mxu0 %v2392_v26 }
  0x42   :  { %2236 = vmatprep.subr.bf16.mxu0 %v2402_v32  ;;  %2171 = vmatpush3.bf16.msra.mxu1 %v2395_v31 }
  0x43   :  { %1107 = vmatmul.mubr.bf16.gmra.mxu0 %v2356_v2  ;;  %2268 = vmatprep.subr.bf16.mxu1 %v2402_v32  ;;  %v2442_v2 = vld [vmem:[%s3223_s0 + $0x1c0] ss:$36 sps:$4 sm:$0xff]  }
  0x44   :  { %1204 = vmatmul.mubr.bf16.gmra.mxu1 %v2357_v3  ;;  %1114 = vmatprep.mubr.bf16.mxu0 %v2362_v4  ;;  %v2443_v3 = vld [vmem:[%s3223_s0 + $0x1c8] ss:$36 sps:$4 sm:$0xff]  }
  0x45   :  { %1211 = vmatprep.mubr.bf16.mxu1 %v2364_v5  ;;  %v2445_v4 = vld [vmem:[%s3223_s0 + $0x20c] ss:$36 sps:$4 sm:$0xff]   ;;  %v2447_v5 = vld [vmem:[%s3223_s0 + $0x214] ss:$36 sps:$4 sm:$0xff]  }
  0x4b   :  { %1115 = vmatmul.mubr.bf16.gmra.mxu0 %v2366_v10  ;;  %v2454_v10 = vld [vmem:[%s3223_s0 + $0x68] ss:$36 sps:$4 sm:$0xff]  }
  0x4c   :  { %1212 = vmatmul.mubr.bf16.gmra.mxu1 %v2367_v11  ;;  %1122 = vmatprep.mubr.bf16.mxu0 %v2372_v12  ;;  %v2455_v11 = vld [vmem:[%s3223_s0 + $0x188] ss:$36 sps:$4 sm:$0xff]   ;;  %v2456_v12 = vld [vmem:[%s3223_s0 + $0xb0] ss:$36 sps:$4 sm:$0xff]  }
  0x4d   :  { %1219 = vmatprep.mubr.bf16.mxu1 %v2374_v14  ;;  %v2458_v14 = vld [vmem:[%s3223_s0 + $0xf8] ss:$36 sps:$4 sm:$0xff]  }
  0x53   :  { %1123 = vmatmul.mubr.bf16.gmra.mxu0 %v2376_v20 }
  0x54   :  { %1220 = vmatmul.mubr.bf16.gmra.mxu1 %v2377_v21  ;;  %1130 = vmatprep.mubr.bf16.mxu0 %v2384_v22 }
  0x55   :  { %1227 = vmatprep.mubr.bf16.mxu1 %v2386_v23 }
  0x5b   :  { %1131 = vmatmul.mubr.bf16.gmra.mxu0 %v2388_v29 }
  0x5c   :  { %1228 = vmatmul.mubr.bf16.gmra.mxu1 %v2389_v30  ;;  %1268 = vmatprep.mubr.bf16.mxu0 %v2398_v33 }
  0x5d   :  { %1365 = vmatprep.mubr.bf16.mxu1 %v2401_v34 }
  0x63   :  { %1269 = vmatmul.mubr.bf16.vlgmr.msra.gmra.mxu0 %v2396_v35 }
  0x64   :  { %1366 = vmatmul.mubr.bf16.vlgmr.msra.gmra.mxu1 %v2399_v36  ;;  %2237 = vmatpush3.bf16.msra.mxu0 %v2402_v32 }
  0x65   :  { %1276 = vmatprep.mubr.bf16.mxu0 %v2403_v37  ;;  %1373 = vmatprep.mubr.bf16.mxu1 %v2405_v38 }
  0x66   :  { %2238 = vmatprep.subr.bf16.mxu0 %v2409_v39  ;;  %2276 = vmatpush3.bf16.msra.mxu1 %v2402_v32 }
  0x67   :  { %2269 = vmatprep.subr.bf16.mxu1 %v2409_v39 }
  0x68   :  { %2239 = vmatpush3.bf16.msra.mxu0 %v2409_v39 }
  0x69   :  { %2240 = vmatprep.subr.bf16.mxu0 %v2416_v40 }
  0x6a   :  { %2277 = vmatpush3.bf16.msra.mxu1 %v2409_v39 }
  0x6b   :  { %1277 = vmatmul.mubr.bf16.gmra.mxu0 %v2407_v41  ;;  %2270 = vmatprep.subr.bf16.mxu1 %v2416_v40 }
  0x6c   :  { %1374 = vmatmul.mubr.bf16.gmra.mxu1 %v2408_v42  ;;  %1284 = vmatprep.mubr.bf16.mxu0 %v2410_v43 }
  0x6d   :  { %1381 = vmatprep.mubr.bf16.mxu1 %v2412_v44  ;;  %2241 = vmatpush3.bf16.msra.mxu0 %v2416_v40 }
  0x6e   :  { %2242 = vmatprep.subr.bf16.mxu0 %v2423_v45  ;;  %2278 = vmatpush3.bf16.msra.mxu1 %v2416_v40 }
  0x6f   :  { %2271 = vmatprep.subr.bf16.mxu1 %v2423_v45 }
  0x71   :  { %2243 = vmatpush3.bf16.msra.mxu0 %v2423_v45 }
  0x72   :  { %2244 = vmatprep.subr.bf16.mxu0 %v2430_v46  ;;  %2279 = vmatpush3.bf16.msra.mxu1 %v2423_v45 }
  0x73   :  { %1285 = vmatmul.mubr.bf16.gmra.mxu0 %v2414_v47  ;;  %2272 = vmatprep.subr.bf16.mxu1 %v2430_v46 }
  0x74   :  { %1382 = vmatmul.mubr.bf16.gmra.mxu1 %v2415_v48  ;;  %1292 = vmatprep.mubr.bf16.mxu0 %v2417_v49 }
  0x75   :  { %1389 = vmatprep.mubr.bf16.mxu1 %v2419_v50  ;;  %2245 = vmatpush3.bf16.msra.mxu0 %v2430_v46 }
  0x76   :  { %2246 = vmatprep.subr.bf16.mxu0 %v2437_v51  ;;  %2280 = vmatpush3.bf16.msra.mxu1 %v2430_v46 }
  0x77   :  { %2273 = vmatprep.subr.bf16.mxu1 %v2437_v51 }
  0x79   :  { %2247 = vmatpush3.bf16.msra.mxu0 %v2437_v51 }
  0x7a   :  { %2248 = vmatprep.subr.bf16.mxu0 %v2444_v53  ;;  %2281 = vmatpush3.bf16.msra.mxu1 %v2437_v51 }
  0x7b   :  { %1293 = vmatmul.mubr.bf16.gmra.mxu0 %v2421_v52  ;;  %2274 = vmatprep.subr.bf16.mxu1 %v2444_v53 }
  0x7c   :  { %1390 = vmatmul.mubr.bf16.gmra.mxu1 %v2422_v54  ;;  %1300 = vmatprep.mubr.bf16.mxu0 %v2424_v55 }
  0x7d   :  { %1397 = vmatprep.mubr.bf16.mxu1 %v2426_v56  ;;  %2249 = vmatpush3.bf16.msra.mxu0 %v2444_v53 }
  0x7e   :  { %2250 = vmatprep.subr.bf16.mxu0 %v2451_v57  ;;  %2282 = vmatpush3.bf16.msra.mxu1 %v2444_v53 }
  0x7f   :  { %2275 = vmatprep.subr.bf16.mxu1 %v2451_v57 }
  0x81   :  { %2251 = vmatpush3.bf16.msra.mxu0 %v2451_v57 }
  0x82   :  { %2283 = vmatpush3.bf16.msra.mxu1 %v2451_v57 }
  0x83   :  { %1301 = vmatmul.mubr.bf16.gmra.mxu0 %v2428_v58 }
  0x84   :  { %1398 = vmatmul.mubr.bf16.gmra.mxu1 %v2429_v59  ;;  %1308 = vmatprep.mubr.bf16.mxu0 %v2431_v60 }
  0x85   :  { %1405 = vmatprep.mubr.bf16.mxu1 %v2433_v61 }
  0x8b   :  { %1309 = vmatmul.mubr.bf16.gmra.mxu0 %v2435_v62 }
  0x8c   :  { %1406 = vmatmul.mubr.bf16.gmra.mxu1 %v2436_v63  ;;  %1316 = vmatprep.mubr.bf16.mxu0 %v2438_v0 }
  0x8d   :  { %1413 = vmatprep.mubr.bf16.mxu1 %v2440_v1 }
  0x93   :  { %1317 = vmatmul.mubr.bf16.gmra.mxu0 %v2442_v2 }
  0x94   :  { %1414 = vmatmul.mubr.bf16.gmra.mxu1 %v2443_v3  ;;  %1324 = vmatprep.mubr.bf16.mxu0 %v2445_v4 }
  0x95   :  { %1421 = vmatprep.mubr.bf16.mxu1 %v2447_v5 }
  0x9b   :  { %1325 = vmatmul.mubr.bf16.gmra.mxu0 %v2449_v6 }
  0x9c   :  { %1422 = vmatmul.mubr.bf16.gmra.mxu1 %v2450_v7  ;;  %2252 = vmatprep.mubr.bf16.mxu0 %v2452_v8 }
  0x9d   :  { %2260 = vmatprep.mubr.bf16.mxu1 %v2453_v9 }
  0xa3   :  { %2253 = vmatmul.mubr.bf16.vlgmr.msra.gmra.mxu0 %v2454_v10 }
  0xa4   :  { %2261 = vmatmul.mubr.bf16.vlgmr.msra.gmra.mxu1 %v2455_v11  ;;  %2256 = vmatprep.mubr.bf16.mxu0 %v2456_v12 }
  0xa5   :  { %2264 = vmatprep.mubr.bf16.mxu1 %v2457_v13 }
  0xab   :  { %2257 = vmatmul.mubr.bf16.gmra.mxu0 %v2458_v14 }
  0xac   :  { %2265 = vmatmul.mubr.bf16.gmra.mxu1 %v2459_v15 }
  0xe3   :  { %v1980_v16 = vpop.f32.mrf.mxu0 }
  0xe4   :  { %v2044_v17 = vpop.f32.mrf.mxu1 }
  0xe5   :  { %v1981_v18 = vpop.f32.mrf.mxu0 }
  0xe6   :  { %v1982_v19 = vadd.f32 %v1981_v18, %v1980_v16  ;;  %v2045_v20 = vpop.f32.mrf.mxu1 }
  0xe7   :  { %v2046_v21 = vadd.f32 %v2045_v20, %v2044_v17  ;;  %v1983_v22 = vpop.f32.mrf.mxu0 }
  0xe8   :  { %v2047_v23 = vpop.f32.mrf.mxu1 }
  0xe9   :  { %v2919_v24 = vadd.f32 %v2046_v21, %v1982_v19  ;;  %v1984_v25 = vpop.f32.mrf.mxu0 }
  0xea   :  { %v1985_v26 = vadd.f32 %v1984_v25, %v1983_v22  ;;  %v2048_v27 = vpop.f32.mrf.mxu1 }
  0xeb   :  { %v2049_v28 = vadd.f32 %v2048_v27, %v2047_v23  ;;  %v1986_v29 = vpop.f32.mrf.mxu0 }
  0xec   :  { %v2050_v30 = vpop.f32.mrf.mxu1 }
  0xed   :  { %v2921_v31 = vadd.f32 %v2049_v28, %v1985_v26  ;;  %v1987_v32 = vpop.f32.mrf.mxu0 }
  0xee   :  { %v1988_v33 = vadd.f32 %v1987_v32, %v1986_v29  ;;  %v2051_v34 = vpop.f32.mrf.mxu1 }
  0xef   :  { %v2052_v35 = vadd.f32 %v2051_v34, %v2050_v30  ;;  %v1989_v36 = vpop.f32.mrf.mxu0 }
  0xf0   :  { %v2053_v37 = vpop.f32.mrf.mxu1 }
  0xf1   :  { %v2923_v38 = vadd.f32 %v2052_v35, %v1988_v33  ;;  %v1990_v39 = vpop.f32.mrf.mxu0 }
  0xf2   :  { %v1991_v40 = vadd.f32 %v1990_v39, %v1989_v36  ;;  %v2054_v41 = vpop.f32.mrf.mxu1 }
  0xf3   :  { %v2055_v42 = vadd.f32 %v2054_v41, %v2053_v37  ;;  %v1992_v43 = vpop.f32.mrf.mxu0 }
  0xf4   :  { %v2056_v44 = vpop.f32.mrf.mxu1 }
  0xf5   :  { %v2925_v45 = vadd.f32 %v2055_v42, %v1991_v40  ;;  %v1993_v46 = vpop.f32.mrf.mxu0 }
  0xf6   :  { %v1994_v47 = vadd.f32 %v1993_v46, %v1992_v43  ;;  %v2057_v48 = vpop.f32.mrf.mxu1 }
  0xf7   :  { %v2058_v49 = vadd.f32 %v2057_v48, %v2056_v44  ;;  %v1995_v50 = vpop.f32.mrf.mxu0 }
  0xf8   :  { %v2059_v51 = vpop.f32.mrf.mxu1 }
  0xf9   :  { %v2927_v52 = vadd.f32 %v2058_v49, %v1994_v47  ;;  %v1996_v53 = vpop.f32.mrf.mxu0 }
  0xfa   :  { %v1997_v54 = vadd.f32 %v1996_v53, %v1995_v50  ;;  %v2060_v55 = vpop.f32.mrf.mxu1 }
  0xfb   :  { %v2061_v56 = vadd.f32 %v2060_v55, %v2059_v51  ;;  %v1998_v57 = vpop.f32.mrf.mxu0 }
  0xfc   :  { %v2062_v58 = vpop.f32.mrf.mxu1 }
  0xfd   :  { %v2929_v59 = vadd.f32 %v2061_v56, %v1997_v54  ;;  %v1999_v60 = vpop.f32.mrf.mxu0 }
  0xfe   :  { %v2000_v61 = vadd.f32 %v1999_v60, %v1998_v57  ;;  %v2063_v62 = vpop.f32.mrf.mxu1 }
  0xff   :  { %v2064_v63 = vadd.f32 %v2063_v62, %v2062_v58  ;;  %v2001_v0 = vpop.f32.mrf.mxu0 }
 0x100   :  { %v2065_v1 = vpop.f32.mrf.mxu1 }
 0x101   :  { %v2931_v2 = vadd.f32 %v2064_v63, %v2000_v61  ;;  %v2002_v3 = vpop.f32.mrf.mxu0 }
 0x102   :  { %v2003_v4 = vadd.f32 %v2002_v3, %v2001_v0  ;;  %v2066_v5 = vpop.f32.mrf.mxu1 }
 0x103   :  { %v2067_v6 = vadd.f32 %v2066_v5, %v2065_v1  ;;  %v2004_v7 = vpop.f32.mrf.mxu0 }
 0x104   :  { %v2068_v8 = vpop.f32.mrf.mxu1 }
 0x105   :  { %v2933_v9 = vadd.f32 %v2067_v6, %v2003_v4  ;;  %v2005_v10 = vpop.f32.mrf.mxu0 }
 0x106   :  { %v2006_v11 = vadd.f32 %v2005_v10, %v2004_v7  ;;  %v2069_v12 = vpop.f32.mrf.mxu1 }
 0x107   :  { %v2070_v13 = vadd.f32 %v2069_v12, %v2068_v8  ;;  %v2007_v14 = vpop.f32.mrf.mxu0 }
 0x108   :  { %v2071_v15 = vpop.f32.mrf.mxu1 }
 0x109   :  { %v2935_v16 = vadd.f32 %v2070_v13, %v2006_v11  ;;  %v2008_v17 = vpop.f32.mrf.mxu0 }
 0x10a   :  { %v2009_v18 = vadd.f32 %v2008_v17, %v2007_v14  ;;  %v2072_v19 = vpop.f32.mrf.mxu1 }
 0x10b   :  { %v2073_v20 = vadd.f32 %v2072_v19, %v2071_v15  ;;  %v2010_v21 = vpop.f32.mrf.mxu0 }
 0x10c   :  { %v2074_v22 = vpop.f32.mrf.mxu1 }
 0x10d   :  { %v2937_v23 = vadd.f32 %v2073_v20, %v2009_v18  ;;  %v2011_v25 = vpop.f32.mrf.mxu0 }
 0x10e   :  { %v2012_v26 = vadd.f32 %v2011_v25, %v2010_v21  ;;  %v2075_v27 = vpop.f32.mrf.mxu1 }
 0x10f   :  { %v2076_v28 = vadd.f32 %v2075_v27, %v2074_v22  ;;  %v2013_v29 = vpop.f32.mrf.mxu0 }
 0x110   :  { %v2077_v30 = vpop.f32.mrf.mxu1 }
 0x111   :  { %v2939_v32 = vadd.f32 %v2076_v28, %v2012_v26  ;;  %v2014_v33 = vpop.f32.mrf.mxu0 }
 0x112   :  { %v2015_v34 = vadd.f32 %v2014_v33, %v2013_v29  ;;  %v2078_v35 = vpop.f32.mrf.mxu1 }
 0x113   :  { %3227 = vst [vmem:[#allocation2_spill] sm:$0xff] %v2939_v32  ;;  %v2079_v36 = vadd.f32 %v2078_v35, %v2077_v30  ;;  %v2016_v37 = vpop.f32.mrf.mxu0 }
 0x114   :  { %v2080_v39 = vpop.f32.mrf.mxu1 }
 0x115   :  { %v2941_v40 = vadd.f32 %v2079_v36, %v2015_v34  ;;  %v2017_v41 = vpop.f32.mrf.mxu0 }
 0x116   :  { %v2018_v42 = vadd.f32 %v2017_v41, %v2016_v37  ;;  %v2081_v43 = vpop.f32.mrf.mxu1 }
 0x117   :  { %3228 = vst [vmem:[#allocation3_spill] sm:$0xff] %v2941_v40  ;;  %v2082_v44 = vadd.f32 %v2081_v43, %v2080_v39  ;;  %v2019_v46 = vpop.f32.mrf.mxu0 }
 0x118   :  { %v2083_v47 = vpop.f32.mrf.mxu1 }
 0x119   :  { %v2943_v48 = vadd.f32 %v2082_v44, %v2018_v42  ;;  %v2020_v49 = vpop.f32.mrf.mxu0 }
 0x11a   :  { %v2021_v50 = vadd.f32 %v2020_v49, %v2019_v46  ;;  %v2084_v51 = vpop.f32.mrf.mxu1 }
 0x11b   :  { %3229 = vst [vmem:[#allocation4_spill] sm:$0xff] %v2943_v48  ;;  %v2085_v53 = vadd.f32 %v2084_v51, %v2083_v47  ;;  %v2022_v54 = vpop.f32.mrf.mxu0 }
 0x11c   :  { %v2086_v55 = vpop.f32.mrf.mxu1 }
 0x11d   :  { %v2945_v56 = vadd.f32 %v2085_v53, %v2021_v50  ;;  %v2023_v57 = vpop.f32.mrf.mxu0 }
 0x11e   :  { %v2024_v58 = vadd.f32 %v2023_v57, %v2022_v54  ;;  %v2087_v60 = vpop.f32.mrf.mxu1 }
 0x11f   :  { %3230 = vst [vmem:[#allocation5_spill] sm:$0xff] %v2945_v56  ;;  %v2088_v61 = vadd.f32 %v2087_v60, %v2086_v55  ;;  %v2025_v62 = vpop.f32.mrf.mxu0 }
 0x120   :  { %v2089_v63 = vpop.f32.mrf.mxu1 }
 0x121   :  { %v2947_v0 = vadd.f32 %v2088_v61, %v2024_v58  ;;  %v2026_v1 = vpop.f32.mrf.mxu0 }
 0x122   :  { %v2027_v3 = vadd.f32 %v2026_v1, %v2025_v62  ;;  %v2090_v4 = vpop.f32.mrf.mxu1 }
 0x123   :  { %3231 = vst [vmem:[#allocation6_spill] sm:$0xff] %v2947_v0  ;;  %v2091_v5 = vadd.f32 %v2090_v4, %v2089_v63  ;;  %v2108_v6 = vpop.f32.mrf.mxu0 }
 0x124   :  { %v2949_v7 = vpop.f32.mrf.mxu1 }
 0x125   :  { %v2951_v8 = vadd.f32 %v2091_v5, %v2027_v3  ;;  %v2109_v10 = vpop.f32.mrf.mxu0 }
 0x126   :  { %v2110_v11 = vadd.f32 %v2109_v10, %v2108_v6  ;;  %v2953_v12 = vpop.f32.mrf.mxu1 }
 0x127   :  { %3232 = vst [vmem:[#allocation7_spill] sm:$0xff] %v2951_v8  ;;  %v2111_v13 = vpop.f32.mrf.mxu0 }
 0x128   :  { %v2956_v14 = vadd.f32 %v2110_v11, %v2919_v24  ;;  %v2958_v15 = vpop.f32.mrf.mxu1 }
 0x129   :  { %v2112_v17 = vpop.f32.mrf.mxu0 }
 0x12a   :  { %v2960_v18 = vpop.f32.mrf.mxu1 }
 0x12b   :  { %v2114_v19 = vpop.f32.mrf.mxu0 }
 0x12c   :  { %v2962_v20 = vpop.f32.mrf.mxu1 }
 0x12d   :  { %v2115_v21 = vpop.f32.mrf.mxu0 }
 0x12e   :  { %v2179_v22 = vpop.f32.mrf.mxu1 }
 0x12f   :  { %v2117_v25 = vpop.f32.mrf.mxu0 }
 0x130   :  { %v2964_v26 = vpop.f32.mrf.mxu1 }
 0x131   :  { %v2118_v27 = vpop.f32.mrf.mxu0 }
 0x132   :  { %v2182_v28 = vpop.f32.mrf.mxu1 }
 0x133   :  { %v2120_v29 = vpop.f32.mrf.mxu0 }
 0x134   :  { %v2966_v30 = vpop.f32.mrf.mxu1 }
 0x135   :  { %v2121_v24 = vpop.f32.mrf.mxu0 }
 0x136   :  { %v2185_v33 = vpop.f32.mrf.mxu1 }
 0x137   :  { %v2123_v34 = vpop.f32.mrf.mxu0 }
 0x138   :  { %v2968_v35 = vpop.f32.mrf.mxu1 }
 0x139   :  { %v2124_v36 = vpop.f32.mrf.mxu0 }
 0x13a   :  { %v2970_v37 = vpop.f32.mrf.mxu1 }
 0x13b   :  { %v2126_v39 = vpop.f32.mrf.mxu0 }
 0x13c   :  { %v2972_v41 = vpop.f32.mrf.mxu1 }
 0x13d   :  { %v2127_v42 = vpop.f32.mrf.mxu0 }
 0x13e   :  { %v2974_v43 = vpop.f32.mrf.mxu1 }
 0x13f   :  { %v2129_v44 = vpop.f32.mrf.mxu0 }
 0x140   :  { %v2976_v46 = vpop.f32.mrf.mxu1 }
 0x141   :  { %v2130_v47 = vpop.f32.mrf.mxu0 }
 0x142   :  { %v2978_v49 = vpop.f32.mrf.mxu1 }
 0x143   :  { %v2980_v50 = vpop.f32.mrf.mxu0 }
 0x144   :  { %v2982_v51 = vpop.f32.mrf.mxu1 }
 0x145   :  { %v2984_v53 = vpop.f32.mrf.mxu0 }
 0x146   :  { %v2986_v54 = vpop.f32.mrf.mxu1 }
 0x147   :  { %v2988_v55 = vpop.f32.mrf.mxu0 }
 0x148   :  { %v2990_v57 = vpop.f32.mrf.mxu1 }
 0x149   :  { %v2992_v58 = vpop.f32.mrf.mxu0 }
 0x14a   :  { %v2994_v60 = vpop.f32.mrf.mxu1 }
 0x14b   :  { %v2996_v61 = vpop.f32.mrf.mxu0 }
 0x14c   :  { %v2998_v62 = vpop.f32.mrf.mxu1 }
 0x14d   :  { %3233 = vst [vmem:[#allocation8_spill] sm:$0xff] %v2998_v62  ;;  %v3000_v63 = vpop.f32.mrf.mxu0 }
 0x14e   :  { %v3002_v1 = vpop.f32.mrf.mxu1 }
 0x14f   :  { %3234 = vst [vmem:[#allocation9_spill] sm:$0xff] %v3002_v1  ;;  %v3004_v3 = vpop.f32.mrf.mxu0 }
 0x150   :  { %v3006_v4 = vpop.f32.mrf.mxu1 }
 0x151   :  { %3235 = vst [vmem:[#allocation10_spill] sm:$0xff] %v3006_v4  ;;  %v3008_v5 = vpop.f32.mrf.mxu0 }
 0x152   :  { %v3010_v6 = vpop.f32.mrf.mxu1 }
 0x153   :  { %3236 = vst [vmem:[#allocation11_spill] sm:$0xff] %v3010_v6  ;;  %v3012_v10 = vpop.f32.mrf.mxu0 }
 0x154   :  { %3237 = vst [vmem:[#allocation12_spill] sm:$0xff] %v3012_v10  ;;  %v3014_v11 = vpop.f32.mrf.mxu1 }
 0x155   :  { %3238 = vst [vmem:[#allocation13_spill] sm:$0xff] %v3014_v11  ;;  %v3016_v8 = vpop.f32.mrf.mxu0 }
 0x156   :  { %3239 = vst [vmem:[#allocation14_spill] sm:$0xff] %v3016_v8  ;;  %v3018_v0 = vpop.f32.mrf.mxu1  ;;  %v2113_v8 = vadd.f32 %v2112_v17, %v2111_v13  ;;  %v2180_v17 = vadd.f32 %v2179_v22, %v2962_v20 }
 0x157   :  { %3240 = vst [vmem:[#allocation15_spill] sm:$0xff] %v3018_v0  ;;  %v3020_v56 = vpop.f32.mrf.mxu0  ;;  %v2116_v0 = vadd.f32 %v2115_v21, %v2114_v19 }
 0x158   :  { %3241 = vst [vmem:[#allocation16_spill] sm:$0xff] %v3020_v56  ;;  %v3022_v48 = vpop.f32.mrf.mxu1  ;;  %v2119_v56 = vadd.f32 %v2118_v27, %v2117_v25  ;;  %v2183_v25 = vadd.f32 %v2182_v28, %v2964_v26 }
 0x159   :  { %3242 = vst [vmem:[#allocation17_spill] sm:$0xff] %v3022_v48  ;;  %v3024_v40 = vpop.f32.mrf.mxu0  ;;  %v1279_v13 = vadd.f32 %v2116_v0, %v2923_v38  ;;  %v2131_v38 = vadd.f32 %v2130_v47, %v2129_v44 }
 0x15a   :  { %3243 = vst [vmem:[#allocation18_spill] sm:$0xff] %v3024_v40  ;;  %v3026_v1 = vpop.f32.mrf.mxu1  ;;  %v2122_v40 = vadd.f32 %v2121_v24, %v2120_v29  ;;  %v1282_v21 = vadd.f32 %v2119_v56, %v2925_v45  ;;  %v2186_v29 = vadd.f32 %v2185_v33, %v2966_v30  ;;  %v2189_v56 = vadd.f32 %v2970_v37, %v2968_v35 }
 0x15b   :  { %3244 = vst [vmem:[#allocation19_spill] sm:$0xff] %v3026_v1  ;;  %v3028_v4 = vpop.f32.mrf.mxu0  ;;  %v2174_v1 = vadd.f32 %v2953_v12, %v2949_v7  ;;  %v2125_v7 = vadd.f32 %v2124_v36, %v2123_v34  ;;  %v1298_v34 = vadd.f32 %v2131_v38, %v2933_v9  ;;  %v2134_v35 = vadd.f32 %v2984_v53, %v2980_v50 }
 0x15c   :  { %3245 = vst [vmem:[#allocation20_spill] sm:$0xff] %v3028_v4  ;;  %v3030_v62 = vpop.f32.mrf.mxu1  ;;  %v1287_v27 = vadd.f32 %v2122_v40, %v2927_v52  ;;  %v1379_v26 = vadd.f32 %v2183_v25, %v1282_v21  ;;  %v2137_v9 = vadd.f32 %v2992_v58, %v2988_v55 }
 0x15d   :  { %3246 = vst [vmem:[#allocation21_spill] sm:$0xff] %v3030_v62  ;;  %v3032_v6 = vpop.f32.mrf.mxu0  ;;  %v1290_v45 = vadd.f32 %v2125_v7, %v2929_v59  ;;  %v2195_v59 = vadd.f32 %v2978_v49, %v2976_v46  ;;  %v1303_v53 = vadd.f32 %v2134_v35, %v2935_v16  ;;  %v2201_v16 = vadd.f32 %v2994_v60, %v2990_v57  ;;  %v3252_v60 = vld [vmem:[#allocation12_spill] sm:$0xff]  ;;  %v3253_v38 = vld [vmem:[#allocation14_spill] sm:$0xff] }
 0x15e   :  { %3247 = vst [vmem:[#allocation22_spill] sm:$0xff] %v3032_v6  ;;  %v3034_v10 = vpop.f32.mrf.mxu1  ;;  %v1274_v6 = vadd.f32 %v2113_v8, %v2921_v31  ;;  %v1368_v31 = vadd.f32 %v2174_v1, %v2956_v14  ;;  %v2192_v14 = vadd.f32 %v2974_v43, %v2972_v41  ;;  %v1384_v24 = vadd.f32 %v2186_v29, %v1287_v27  ;;  %v3249_v29 = vld [vmem:[#allocation2_spill] sm:$0xff] }
 0x15f   :  { %3248 = vst [vmem:[#allocation23_spill] sm:$0xff] %v3034_v10  ;;  %v3036_v11 = vpop.f32.mrf.mxu0  ;;  %v2177_v10 = vadd.f32 %v2960_v18, %v2958_v15  ;;  %v2128_v15 = vadd.f32 %v2127_v42, %v2126_v39  ;;  %v1376_v18 = vadd.f32 %v2180_v17, %v1279_v13  ;;  %v1387_v44 = vadd.f32 %v2189_v56, %v1290_v45  ;;  %v3254_v56 = vld [vmem:[#allocation3_spill] sm:$0xff] }
 0x160   :  { %v3038_v32 = vpop.f32.mrf.mxu1  ;;  %v2140_v1 = vadd.f32 %v3000_v63, %v2996_v61  ;;  %v1395_v17 = vadd.f32 %v2195_v59, %v1298_v34  ;;  %v1306_v21 = vadd.f32 %v2137_v9, %v2937_v23 }
 0x161   :  { %v3040_v48 = vpop.f32.mrf.mxu0  ;;  %v1371_v22 = vadd.f32 %v2177_v10, %v1274_v6  ;;  %v1295_v33 = vadd.f32 %v2128_v15, %v2931_v2  ;;  %v3251_v15 = vld [vmem:[#allocation9_spill] sm:$0xff]  ;;  %v3258_v34 = vld [vmem:[#allocation18_spill] sm:$0xff] }
 0x162   :  { %v3044_v4 = vpop.f32.mrf.mxu1  ;;  %v1311_v23 = vadd.f32 %v2140_v1, %v3249_v29  ;;  %v1403_v35 = vadd.f32 %v2201_v16, %v1306_v21  ;;  %v3265_v21 = vld [vmem:[#allocation17_spill] sm:$0xff]  ;;  %v3266_v16 = vld [vmem:[#allocation19_spill] sm:$0xff] }
 0x163   :  { %v2254_v62 = vpop.f32.mrf.mxu0  ;;  %v1392_v55 = vadd.f32 %v2192_v14, %v1295_v33  ;;  %v3256_v14 = vld [vmem:[#allocation11_spill] sm:$0xff]  ;;  %v3257_v33 = vld [vmem:[#allocation16_spill] sm:$0xff] }
 0x164   :  { %v3051_v19 = vpop.f32.mrf.mxu1  ;;  %v3069_v28 = vadd.f32 %v2254_v62, %v1376_v18  ;;  %v2198_v62 = vadd.f32 %v2986_v54, %v2982_v51  ;;  %v2143_v51 = vadd.f32 %v3008_v5, %v3004_v3  ;;  %v2146_v3 = vadd.f32 %v3253_v38, %v3252_v60 }
 0x165   :  { %v1464_v12 = vpop.f32.mrf.mxu0  ;;  %v2149_v59 = vadd.f32 %v3258_v34, %v3257_v33 }
 0x166   :  { %v3058_v8 = vpop.f32.mrf.mxu1  ;;  %v3060_v20 = vadd.f32 %v1464_v12, %v1368_v31  ;;  %v1551_v46 = vmul.f32 %v3069_v28, %v3069_v28  ;;  %v3250_v31 = vld [vmem:[#allocation8_spill] sm:$0xff]  ;;  %v1400_v5 = vadd.f32 %v2198_v62, %v1303_v53  ;;  %v3263_v62 = vld [vmem:[#allocation22_spill] sm:$0xff]  ;;  %v3269_v60 = vld [vmem:[#allocation23_spill] sm:$0xff] }
 0x167   :  { %v2255_v0 = vpop.f32.mrf.mxu0  ;;  %v2204_v57 = vadd.f32 %v3251_v15, %v3250_v31  ;;  %v3262_v53 = vld [vmem:[#allocation20_spill] sm:$0xff]  ;;  %v3267_v31 = vld [vmem:[#allocation6_spill] sm:$0xff] }
 0x168   :  { %v3065_v52 = vpop.f32.mrf.mxu1  ;;  %v1549_v37 = vmul.f32 %v3060_v20, %v3060_v20  ;;  %v3081_v39 = vadd.f32 %v2255_v0, %v1379_v26  ;;  %v1314_v26 = vadd.f32 %v2143_v51, %v3254_v56  ;;  %v2152_v1 = vadd.f32 %v3263_v62, %v3262_v53 }
 0x169   :  { %v1467_v40 = vpop.f32.mrf.mxu0  ;;  %v2213_v51 = vadd.f32 %v3266_v16, %v3265_v21 }
 0x16a   :  { %v3071_v30 = vadd.f32 %v1467_v40, %v1371_v22  ;;  %v1499_v42 = vpop.f32.mrf.mxu1  ;;  %v1552_v6 = vmul.f32 %v3081_v39, %v3081_v39  ;;  %v3255_v40 = vld [vmem:[#allocation10_spill] sm:$0xff]  ;;  %v1327_v15 = vadd.f32 %v2152_v1, %v3267_v31 }
 0x16b   :  { %v2258_v36 = vpop.f32.mrf.mxu0 }
 0x16c   :  { %v1527_v41 = vadd.f32 %v3071_v30, %v3060_v20  ;;  %v1550_v2 = vmul.f32 %v3071_v30, %v3071_v30  ;;  %v3107_v54 = vadd.f32 %v2258_v36, %v1392_v55  ;;  %v2266_v61 = vpop.f32.mrf.mxu1  ;;  %v1408_v55 = vadd.f32 %v2204_v57, %v1311_v23  ;;  %v3268_v57 = vld [vmem:[#allocation21_spill] sm:$0xff] }
 0x16d   :  { %v1480_v43 = vpop.f32.mrf.mxu0  ;;  %v2216_v38 = vadd.f32 %v3269_v60, %v3268_v57 }
 0x16e   :  { %v1528_v47 = vadd.f32 %v1527_v41, %v3069_v28  ;;  %v1565_v49 = vadd.f32 %v1550_v2, %v1549_v37  ;;  %v3092_v50 = vadd.f32 %v1480_v43, %v1384_v24  ;;  %v2207_v24 = vadd.f32 %v3256_v14, %v3255_v40  ;;  %v1512_v36 = vpop.f32.mrf.mxu1  ;;  %v3259_v43 = vld [vmem:[#allocation4_spill] sm:$0xff] }
 0x16f   :  { %v2259_v58 = vpop.f32.mrf.mxu0  ;;  %v3130_v37 = vadd.f32 %v3058_v8, %v1400_v5  ;;  %v1555_v41 = vmul.f32 %v3107_v54, %v3107_v54  ;;  %v1424_v33 = vadd.f32 %v2216_v38, %v1327_v15 }
 0x170   :  { %v1566_v10 = vadd.f32 %v1565_v49, %v1551_v46  ;;  %v1529_v13 = vadd.f32 %v1528_v47, %v3081_v39  ;;  %v1553_v7 = vmul.f32 %v3092_v50, %v3092_v50  ;;  %v3119_v18 = vadd.f32 %v2259_v58, %v1395_v17  ;;  %v3260_v46 = vld [vmem:[#allocation13_spill] sm:$0xff]  ;;  %v3261_v47 = vld [vmem:[#allocation15_spill] sm:$0xff] }
 0x171   :  { %v1483_v63 = vpop.f32.mrf.mxu0  ;;  %v2210_v49 = vadd.f32 %v3261_v47, %v3260_v46  ;;  %v3140_v58 = vadd.f32 %v1499_v42, %v1403_v35  ;;  %v1557_v42 = vmul.f32 %v3130_v37, %v3130_v37 }
 0x172   :  { %v1530_v25 = vadd.f32 %v1529_v13, %v3092_v50  ;;  %v1567_v12 = vadd.f32 %v1566_v10, %v1552_v6  ;;  %v3112_v27 = vadd.f32 %v1483_v63, %v1387_v44  ;;  %v1319_v44 = vadd.f32 %v2146_v3, %v3259_v43  ;;  %v3264_v13 = vld [vmem:[#allocation5_spill] sm:$0xff] }
 0x173   :  { %v1556_v8 = vmul.f32 %v3119_v18, %v3119_v18  ;;  %v1322_v17 = vadd.f32 %v2149_v59, %v3264_v13  ;;  %v2155_v63 = vadd.f32 %v3040_v48, %v3036_v11  ;;  %v1558_v48 = vmul.f32 %v3140_v58, %v3140_v58 }
 0x174   :  { %v1568_v0 = vadd.f32 %v1567_v12, %v1553_v7  ;;  %v1531_v22 = vadd.f32 %v1530_v25, %v3112_v27  ;;  %v1554_v45 = vmul.f32 %v3112_v27, %v3112_v27  ;;  %v1411_v25 = vadd.f32 %v2207_v24, %v1314_v26  ;;  %v2267_v7 = vpop.f32.mrf.mxu1 }
 0x175   :  { %v3151_v12 = vadd.f32 %v3051_v19, %v1408_v55  ;;  %v1416_v3 = vadd.f32 %v2210_v49, %v1319_v44  ;;  %v1419_v56 = vadd.f32 %v2213_v51, %v1322_v17 }
 0x176   :  { %v1532_v2 = vadd.f32 %v1531_v22, %v3107_v54  ;;  %v1569_v9 = vadd.f32 %v1568_v0, %v1554_v45  ;;  %v3160_v5 = vadd.f32 %v3065_v52, %v1411_v25  ;;  %v3270_v0 = vld [vmem:[#allocation7_spill] sm:$0xff]  ;;  %v2219_v45 = vadd.f32 %v3044_v4, %v3038_v32  ;;  %v1515_v26 = vpop.f32.mrf.mxu1 }
 0x177   :  { %v1330_v22 = vadd.f32 %v2155_v63, %v3270_v0  ;;  %v1559_v40 = vmul.f32 %v3151_v12, %v3151_v12  ;;  %v3170_v14 = vadd.f32 %v1512_v36, %v1416_v3  ;;  %v1516_v59 = vadd.f32 %v1515_v26, %v1419_v56 }
 0x178   :  { %v1533_v6 = vadd.f32 %v1532_v2, %v3119_v18  ;;  %v1570_v10 = vadd.f32 %v1569_v9, %v1555_v41  ;;  %v1560_v34 = vmul.f32 %v3160_v5, %v3160_v5  ;;  %v1521_v32 = vadd.f32 %v2266_v61, %v1424_v33 }
 0x179   :  { %v1427_v2 = vadd.f32 %v2219_v45, %v1330_v22  ;;  %v1561_v4 = vmul.f32 %v3170_v14, %v3170_v14  ;;  %v1562_v46 = vmul.f32 %v1516_v59, %v1516_v59  ;;  %v1598_v3 = vlaneseq  ;;  %v1594_v45 = vld [vmem:[%s3225_s3] sm:$0x1] }
 0x17a   :  { %v1534_v29 = vadd.f32 %v1533_v6, %v3130_v37  ;;  %v1571_v23 = vadd.f32 %v1570_v10, %v1556_v8  ;;  %v1563_v49 = vmul.f32 %v1521_v32, %v1521_v32 }
 0x17b   :  { %v1524_v43 = vadd.f32 %v2267_v7, %v1427_v2 }
 0x17c   :  { %v1572_v11 = vadd.f32 %v1571_v23, %v1557_v42  ;;  %v1535_v19 = vadd.f32 %v1534_v29, %v3140_v58 }
 0x17d   :  { %v1564_v1 = vmul.f32 %v1524_v43, %v1524_v43 }
 0x17e   :  { %v1536_v52 = vadd.f32 %v1535_v19, %v3151_v12  ;;  %v1573_v24 = vadd.f32 %v1572_v11, %v1558_v48  ;;  %v1599_v48 = vshrl.u32 %v1598_v3, 7  ;;  %v1590_v11 = vld [vmem:[%s3224_s2] sm:$0x1] }
 0x180   :  { %v1537_v35 = vadd.f32 %v1536_v52, %v3160_v5  ;;  %v1574_v41 = vadd.f32 %v1573_v24, %v1559_v40  ;;  %v1600_v19 = vsub.s32 0, %v1599_v48 }
 0x182   :  { %v1538_v9 = vadd.f32 %v1537_v35, %v3170_v14  ;;  %v1575_v36 = vadd.f32 %v1574_v41, %v1560_v34 }
 0x184   :  { %v1539_v44 = vadd.f32 %v1538_v9, %v1516_v59  ;;  %v1576_v47 = vadd.f32 %v1575_v36, %v1561_v4 }
 0x186   :  { %v1540_v53 = vadd.f32 %v1539_v44, %v1521_v32  ;;  %v1577_v62 = vadd.f32 %v1576_v47, %v1562_v46 }
 0x188   :  { %v1541_v55 = vadd.f32 %v1540_v53, %v1524_v43  ;;  %v1578_v8 = vadd.f32 %v1577_v62, %v1563_v49 }
 0x18a   :  { %v1542_v6 = vrot.slane %v1541_v55, 4  ;;  %v1579_v10 = vadd.f32 %v1578_v8, %v1564_v1 }
 0x18c   :  { %v1543_v13 = vadd.f32 %v1542_v6, %v1541_v55  ;;  %v1580_v61 = vrot.slane %v1579_v10, 4 }
 0x18e   :  { %v1544_v17 = vrot.slane %v1543_v13, 2  ;;  %v1581_v21 = vadd.f32 %v1580_v61, %v1579_v10 }
 0x190   :  { %v1545_v16 = vadd.f32 %v1544_v17, %v1543_v13  ;;  %v1582_v51 = vrot.slane %v1581_v21, 2 }
 0x192   :  { %v1546_v63 = vrot.slane %v1545_v16, 1  ;;  %v1583_v25 = vadd.f32 %v1582_v51, %v1581_v21 }
 0x194   :  { %v1547_v7 = vadd.f32 %v1546_v63, %v1545_v16  ;;  %v1584_v42 = vrot.slane %v1583_v25, 1 }
 0x196   :  { %v1548_v29 = vmul.f32 0.0078125, %v1547_v7  ;;  %v1585_v23 = vadd.f32 %v1584_v42, %v1583_v25 }
 0x198   :  { %v1586_v31 = vmul.f32 0.0078125, %v1585_v23  ;;  %v1587_v15 = vmul.f32 %v1548_v29, %v1548_v29 }
 0x19a   :  { %v1588_v57 = vsub.f32 %v1586_v31, %v1587_v15 }
 0x19c   :  { %v1589_v60 = vmax.f32 %v1588_v57, 0.0 }
 0x19e   :  { %v1591_v38 = vadd.f32 1e-05, %v1589_v60 }
 0x1a0   :  { %2460 = vrsqrt.f32 %v1591_v38 }
 0x1ad   :  { %v2461_v0 = vpop.eup %2460 }
 0x1ae   :  { %v1593_v22 = vmul.f32 %v2461_v0, %v1590_v11 }
 0x1b0   :  { %v1595_v56 = vmul.f32 %v1593_v22, %v1548_v29  ;;  %v1601_v26 = vrot.slane %v1593_v22, %v1600_v19 }
 0x1b2   :  { %v1596_v40 = vsub.f32 %v1594_v45, %v1595_v56  ;;  %v1603_v52 = vmul.f32 %v1601_v26, %v3060_v20  ;;  %v1604_v24 = vmul.f32 %v1601_v26, %v3071_v30  ;;  %v1608_v33 = vmul.f32 %v1601_v26, %v3112_v27 }
 0x1b3   :  { %v1609_v34 = vmul.f32 %v1601_v26, %v3107_v54  ;;  %v1610_v35 = vmul.f32 %v1601_v26, %v3119_v18  ;;  %v1611_v41 = vmul.f32 %v1601_v26, %v3130_v37  ;;  %v1612_v2 = vmul.f32 %v1601_v26, %v3140_v58 }
 0x1b4   :  { %v1613_v4 = vmul.f32 %v1601_v26, %v3151_v12  ;;  %v1614_v9 = vmul.f32 %v1601_v26, %v3160_v5  ;;  %v1615_v36 = vmul.f32 %v1601_v26, %v3170_v14  ;;  %v1616_v44 = vmul.f32 %v1601_v26, %v1516_v59 }
 0x1b5   :  { %v1617_v20 = vmul.f32 %v1601_v26, %v1521_v32  ;;  %v1605_v30 = vmul.f32 %v1601_v26, %v3069_v28  ;;  %v1606_v27 = vmul.f32 %v1601_v26, %v3081_v39  ;;  %v1618_v46 = vmul.f32 %v1601_v26, %v1524_v43 }
 0x1b6   :  { %v1623_v54 = vrot.slane %v1596_v40, %v1600_v19  ;;  %v1607_v18 = vmul.f32 %v1601_v26, %v3092_v50 }
 0x1b8   :  { %v1625_v47 = vadd.f32 %v1623_v54, %v1603_v52  ;;  %v1626_v37 = vadd.f32 %v1623_v54, %v1604_v24  ;;  %v1627_v49 = vadd.f32 %v1623_v54, %v1605_v30  ;;  %v1628_v58 = vadd.f32 %v1623_v54, %v1606_v27 }
 0x1b9   :  { %v1629_v53 = vadd.f32 %v1623_v54, %v1607_v18  ;;  %v1630_v12 = vadd.f32 %v1623_v54, %v1608_v33  ;;  %v1631_v62 = vadd.f32 %v1623_v54, %v1609_v34  ;;  %v1632_v5 = vadd.f32 %v1623_v54, %v1610_v35 }
 0x1ba   :  { %v1633_v1 = vadd.f32 %v1623_v54, %v1611_v41  ;;  %v1634_v14 = vadd.f32 %v1623_v54, %v1612_v2  ;;  %v1635_v59 = vadd.f32 %v1623_v54, %v1613_v4  ;;  %v1636_v32 = vadd.f32 %v1623_v54, %v1614_v9 }
 0x1bb   :  { %v1637_v55 = vadd.f32 %v1623_v54, %v1615_v36  ;;  %v1638_v28 = vadd.f32 %v1623_v54, %v1616_v44  ;;  %v1639_v8 = vadd.f32 %v1623_v54, %v1617_v20  ;;  %v1640_v39 = vadd.f32 %v1623_v54, %v1618_v46 }
 0x1bc   :  { %v1641_v43 = vmax.f32 %v1625_v47, 0.0  ;;  %v1642_v6 = vmax.f32 %v1626_v37, 0.0  ;;  %v1643_v10 = vmax.f32 %v1627_v49, 0.0  ;;  %v1644_v50 = vmax.f32 %v1628_v58, 0.0 }
 0x1bd   :  { %v1645_v13 = vmax.f32 %v1629_v53, 0.0  ;;  %v1646_v61 = vmax.f32 %v1630_v12, 0.0  ;;  %v1647_v17 = vmax.f32 %v1631_v62, 0.0  ;;  %v1648_v21 = vmax.f32 %v1632_v5, 0.0 }
 0x1be   :  { %v1649_v16 = vmax.f32 %v1633_v1, 0.0  ;;  %v1650_v51 = vmax.f32 %v1634_v14, 0.0  ;;  %v1651_v63 = vmax.f32 %v1635_v59, 0.0  ;;  %v1652_v25 = vmax.f32 %v1636_v32, 0.0 }
 0x1bf   :  { %v1653_v7 = vmax.f32 %v1637_v55, 0.0  ;;  %v1654_v42 = vmax.f32 %v1638_v28, 0.0  ;;  %v1655_v29 = vmax.f32 %v1639_v8, 0.0  ;;  %v1656_v23 = vmax.f32 %v1640_v39, 0.0 }
 0x1c0   :  { %v1920_v31 = vpack.c.bf16 %v1642_v6, %v1641_v43  ;;  %v1925_v15 = vpack.c.bf16 %v1644_v50, %v1643_v10  ;;  %v1930_v57 = vpack.c.bf16 %v1646_v61, %v1645_v13  ;;  %v1935_v60 = vpack.c.bf16 %v1648_v21, %v1647_v17 }
 0x1c1   :  { %v1940_v38 = vpack.c.bf16 %v1650_v51, %v1649_v16  ;;  %v1945_v3 = vpack.c.bf16 %v1652_v25, %v1651_v63  ;;  %v1950_v48 = vpack.c.bf16 %v1654_v42, %v1653_v7  ;;  %v1955_v11 = vpack.c.bf16 %v1656_v23, %v1655_v29 }
 0x1c2   :  { %1921 = vst [vmem:[%s3226_s4] sm:$0xff] %v1920_v31   ;;  %1957 = vst [vmem:[%s3226_s4 + $0x8] sm:$0xff] %v1925_v15  }
 0x1c3   :  { %1958 = vst [vmem:[%s3226_s4 + $0x10] sm:$0xff] %v1930_v57   ;;  %1959 = vst [vmem:[%s3226_s4 + $0x18] sm:$0xff] %v1935_v60  }
 0x1c4   :  { %1960 = vst [vmem:[%s3226_s4 + $0x20] sm:$0xff] %v1940_v38   ;;  %1961 = vst [vmem:[%s3226_s4 + $0x28] sm:$0xff] %v1945_v3  }
 0x1c5   :  { %1962 = vst [vmem:[%s3226_s4 + $0x30] sm:$0xff] %v1950_v48   ;;  %1963 = vst [vmem:[%s3226_s4 + $0x38] sm:$0xff] %v1955_v11  }

// kernel: student_resnet_forward.9
= control target key start
LH: loop header
LB: loop body
LE: loop exit
PB: predicated region body
PF: predicated region fallthrough
CT: control target
= control target key end

     0   :  { %v6249_v0 = vmov 0   ;;  %s9744_s1 = inlined_call_operand.vmem [shape: bf16[1152,128], index: 1, kind: input, shape index: {}]   ;;  %s9745_s0 = inlined_call_operand.vmem [shape: bf16[512,1152], index: 0, kind: input, shape index: {}]   ;;  %s9746_s4 = inlined_call_operand.vmem [shape: bf16[512,128], index: 4, kind: input, shape index: {}]   ;;  %s9747_s2 = inlined_call_operand.vmem [shape: f32[1,128], index: 2, kind: input, shape index: {}]   ;;  %s9748_s3 = inlined_call_operand.vmem [shape: f32[1,128], index: 3, kind: input, shape index: {}]   ;;  %s9749_s5 = inlined_call_operand.vmem [shape: bf16[512,128], index: 5, kind: output, shape index: {}]  }
   0x1   :  { %2389 = vmatprep.subr.bf16.mxu0 %v6249_v0  ;;  %5726 = vmatprep.subr.bf16.mxu1 %v6249_v0  ;;  %v5759_v1 = vld [vmem:[%s9744_s1 + $0x38] sm:$0xff]   ;;  %v5760_v2 = vld [vmem:[%s9744_s1 + $0x30] sm:$0xff]   ;;  %v5761_v3 = vld [vmem:[%s9744_s1 + $0x28] sm:$0xff]  }
   0x2   :  { %2390 = vmatpush1.bf16.msra.mxu0 %v5759_v1  ;;  %5742 = vmatpush1.bf16.msra.mxu1 %v5759_v1  ;;  %v5762_v4 = vld [vmem:[%s9744_s1 + $0x20] sm:$0xff]   ;;  %v5763_v5 = vld [vmem:[%s9744_s1 + $0x18] sm:$0xff]   ;;  %v5764_v7 = vld [vmem:[%s9744_s1 + $0x10] sm:$0xff]  }
   0x3   :  { %2391 = vmatprep.subr.bf16.mxu0 %v6249_v0  ;;  %5727 = vmatprep.subr.bf16.mxu1 %v6249_v0  ;;  %v5777_v6 = vld [vmem:[%s9745_s0 + $0x4] ss:$36 sps:$4 sm:$0xff]   ;;  %v5767_v11 = vld [vmem:[%s9744_s1 + $0x78] sm:$0xff]   ;;  %v5768_v12 = vld [vmem:[%s9744_s1 + $0x70] sm:$0xff]  }
   0x4   :  { %v5780_v8 = vld [vmem:[%s9745_s0 + $0x6c4] ss:$36 sps:$4 sm:$0xff]   ;;  %2421 = vmatprep.mubr.bf16.mxu0 %v5777_v6  ;;  %v5771_v15 = vld [vmem:[%s9744_s1 + $0x58] sm:$0xff]   ;;  %v5772_v16 = vld [vmem:[%s9744_s1 + $0x50] sm:$0xff]  }
   0x5   :  { %2613 = vmatprep.mubr.bf16.mxu1 %v5780_v8  ;;  %v5765_v9 = vld [vmem:[%s9744_s1 + $0x8] sm:$0xff]   ;;  %v5766_v10 = vld [vmem:[%s9744_s1] sm:$0xff]   ;;  %v5781_v21 = vld [vmem:[%s9744_s1 + $0xb8] sm:$0xff]  }
   0x6   :  { %2392 = vmatpush1.bf16.msra.mxu0 %v5760_v2  ;;  %5743 = vmatpush1.bf16.msra.mxu1 %v5760_v2  ;;  %v5769_v13 = vld [vmem:[%s9744_s1 + $0x68] sm:$0xff]   ;;  %v5770_v14 = vld [vmem:[%s9744_s1 + $0x60] sm:$0xff]   ;;  %v5782_v22 = vld [vmem:[%s9744_s1 + $0x138] sm:$0xff]  }
   0x7   :  { %2393 = vmatprep.subr.bf16.mxu0 %v6249_v0  ;;  %5728 = vmatprep.subr.bf16.mxu1 %v6249_v0  ;;  %v5773_v17 = vld [vmem:[%s9744_s1 + $0x48] sm:$0xff]   ;;  %v5774_v18 = vld [vmem:[%s9744_s1 + $0x40] sm:$0xff]   ;;  %v5783_v25 = vld [vmem:[%s9744_s1 + $0xb0] sm:$0xff]  }
   0x8   :  { %v5775_v19 = vld [vmem:[%s9745_s0] ss:$36 sps:$4 sm:$0xff]   ;;  %v5784_v23 = vld [vmem:[%s9745_s0 + $0x4c] ss:$36 sps:$4 sm:$0xff]   ;;  %v5793_v30 = vld [vmem:[%s9745_s0 + $0x94] ss:$36 sps:$4 sm:$0xff]  }
   0x9   :  { %v5778_v20 = vld [vmem:[%s9745_s0 + $0x6c0] ss:$36 sps:$4 sm:$0xff]   ;;  %v5786_v24 = vld [vmem:[%s9745_s0 + $0x70c] ss:$36 sps:$4 sm:$0xff]   ;;  %v5795_v31 = vld [vmem:[%s9745_s0 + $0x754] ss:$36 sps:$4 sm:$0xff]  }
   0xa   :  { %2394 = vmatpush1.bf16.msra.mxu0 %v5761_v3  ;;  %5744 = vmatpush1.bf16.msra.mxu1 %v5761_v3  ;;  %v5792_v26 = vld [vmem:[%s9744_s1 + $0x130] sm:$0xff]   ;;  %v5788_v27 = vld [vmem:[%s9745_s0 + $0x48] ss:$36 sps:$4 sm:$0xff]   ;;  %v5791_v33 = vld [vmem:[%s9744_s1 + $0xa0] sm:$0xff]  }
   0xb   :  { %2395 = vmatprep.subr.bf16.mxu0 %v6249_v0  ;;  %5729 = vmatprep.subr.bf16.mxu1 %v6249_v0  ;;  %v5789_v28 = vld [vmem:[%s9745_s0 + $0x708] ss:$36 sps:$4 sm:$0xff]   ;;  %v5797_v34 = vld [vmem:[%s9745_s0 + $0x90] ss:$36 sps:$4 sm:$0xff]   ;;  %v5818_v36 = vld [vmem:[%s9744_s1 + $0x120] sm:$0xff]  }
   0xc   :  { %v5790_v29 = vld [vmem:[%s9744_s1 + $0xa8] sm:$0xff]   ;;  %v5798_v35 = vld [vmem:[%s9745_s0 + $0x750] ss:$36 sps:$4 sm:$0xff]   ;;  %v5799_v37 = vld [vmem:[%s9744_s1 + $0x98] sm:$0xff]  }
   0xd   :  { %v5808_v32 = vld [vmem:[%s9744_s1 + $0x128] sm:$0xff]   ;;  %v5801_v38 = vld [vmem:[%s9745_s0 + $0xdc] ss:$36 sps:$4 sm:$0xff]   ;;  %v5800_v41 = vld [vmem:[%s9744_s1 + $0x90] sm:$0xff]  }
   0xe   :  { %2396 = vmatpush1.bf16.msra.mxu0 %v5762_v4  ;;  %5745 = vmatpush1.bf16.msra.mxu1 %v5762_v4  ;;  %v5803_v39 = vld [vmem:[%s9745_s0 + $0x79c] ss:$36 sps:$4 sm:$0xff]   ;;  %v5807_v44 = vld [vmem:[%s9744_s1 + $0x88] sm:$0xff]   ;;  %v5844_v47 = vld [vmem:[%s9744_s1 + $0x110] sm:$0xff]  }
   0xf   :  { %2397 = vmatprep.subr.bf16.mxu0 %v6249_v0  ;;  %5730 = vmatprep.subr.bf16.mxu1 %v6249_v0  ;;  %v5834_v40 = vld [vmem:[%s9744_s1 + $0x118] sm:$0xff]   ;;  %v5810_v45 = vld [vmem:[%s9745_s0 + $0x124] ss:$36 sps:$4 sm:$0xff]   ;;  %v5819_v53 = vld [vmem:[%s9745_s0 + $0x16c] ss:$36 sps:$4 sm:$0xff]  }
  0x10   :  { %v5805_v42 = vld [vmem:[%s9745_s0 + $0xd8] ss:$36 sps:$4 sm:$0xff]   ;;  %v5812_v46 = vld [vmem:[%s9745_s0 + $0x7e4] ss:$36 sps:$4 sm:$0xff]   ;;  %v5821_v54 = vld [vmem:[%s9745_s0 + $0x82c] ss:$36 sps:$4 sm:$0xff]  }
  0x11   :  { %v5806_v43 = vld [vmem:[%s9745_s0 + $0x798] ss:$36 sps:$4 sm:$0xff]   ;;  %v5809_v48 = vld [vmem:[%s9744_s1 + $0x80] sm:$0xff]   ;;  %v5858_v51 = vld [vmem:[%s9744_s1 + $0x108] sm:$0xff]  }
  0x12   :  { %2398 = vmatpush1.bf16.msra.mxu0 %v5763_v5  ;;  %5746 = vmatpush1.bf16.msra.mxu1 %v5763_v5  ;;  %v5814_v49 = vld [vmem:[%s9745_s0 + $0x120] ss:$36 sps:$4 sm:$0xff]   ;;  %v5816_v52 = vld [vmem:[%s9744_s1 + $0xf8] sm:$0xff]   ;;  %v5817_v56 = vld [vmem:[%s9744_s1 + $0xf0] sm:$0xff]  }
  0x13   :  { %2399 = vmatprep.subr.bf16.mxu0 %v6249_v0  ;;  %5731 = vmatprep.subr.bf16.mxu1 %v6249_v0  ;;  %v5815_v50 = vld [vmem:[%s9745_s0 + $0x7e0] ss:$36 sps:$4 sm:$0xff]   ;;  %v5823_v57 = vld [vmem:[%s9745_s0 + $0x168] ss:$36 sps:$4 sm:$0xff]   ;;  %v5827_v60 = vld [vmem:[%s9745_s0 + $0x1b4] ss:$36 sps:$4 sm:$0xff]  }
  0x14   :  { %v5865_v55 = vld [vmem:[%s9744_s1 + $0x100] sm:$0xff]   ;;  %v5824_v58 = vld [vmem:[%s9745_s0 + $0x828] ss:$36 sps:$4 sm:$0xff]   ;;  %v5829_v61 = vld [vmem:[%s9745_s0 + $0x874] ss:$36 sps:$4 sm:$0xff]  }
  0x15   :  { %v5825_v59 = vld [vmem:[%s9744_s1 + $0xe8] sm:$0xff]   ;;  %v5879_v62 = vld [vmem:[%s9744_s1 + $0x178] sm:$0xff]   ;;  %v5826_v63 = vld [vmem:[%s9744_s1 + $0xe0] sm:$0xff]  }
  0x16   :  { %2400 = vmatpush1.bf16.msra.mxu0 %v5764_v7  ;;  %5747 = vmatpush1.bf16.msra.mxu1 %v5764_v7  ;;  %v5831_v1 = vld [vmem:[%s9745_s0 + $0x1b0] ss:$36 sps:$4 sm:$0xff]   ;;  %v5833_v4 = vld [vmem:[%s9744_s1 + $0xd8] sm:$0xff]   ;;  %v5901_v7 = vld [vmem:[%s9744_s1 + $0x168] sm:$0xff]  }
  0x17   :  { %2401 = vmatprep.subr.bf16.mxu0 %v6249_v0  ;;  %5732 = vmatprep.subr.bf16.mxu1 %v6249_v0  ;;  %v5832_v2 = vld [vmem:[%s9745_s0 + $0x870] ss:$36 sps:$4 sm:$0xff]   ;;  %v5836_v5 = vld [vmem:[%s9745_s0 + $0x1fc] ss:$36 sps:$4 sm:$0xff]  }
  0x18   :  { %v5887_v3 = vld [vmem:[%s9744_s1 + $0x170] sm:$0xff]   ;;  %v5838_v6 = vld [vmem:[%s9745_s0 + $0x8bc] ss:$36 sps:$4 sm:$0xff]  }
  0x19   :  { %v5835_v8 = vld [vmem:[%s9744_s1 + $0xd0] sm:$0xff]  }
  0x1a   :  { %2402 = vmatpush1.bf16.msra.mxu0 %v5765_v9  ;;  %5748 = vmatpush1.bf16.msra.mxu1 %v5765_v9  ;;  %v5840_v9 = vld [vmem:[%s9745_s0 + $0x1f8] ss:$36 sps:$4 sm:$0xff]  }
  0x1b   :  { %2403 = vmatprep.subr.bf16.mxu0 %v6249_v0  ;;  %5733 = vmatprep.subr.bf16.mxu1 %v6249_v0 }
  0x1e   :  { %2404 = vmatpush1.bf16.msra.mxu0 %v5766_v10  ;;  %5749 = vmatpush1.bf16.msra.mxu1 %v5766_v10  ;;  %v5841_v10 = vld [vmem:[%s9745_s0 + $0x8b8] ss:$36 sps:$4 sm:$0xff]  }
  0x1f   :  { %2405 = vmatprep.subr.bf16.mxu0 %v6249_v0  ;;  %5734 = vmatprep.subr.bf16.mxu1 %v6249_v0 }
  0x22   :  { %2406 = vmatpush2.bf16.msra.mxu0 %v5767_v11  ;;  %5750 = vmatpush2.bf16.msra.mxu1 %v5767_v11  ;;  %v5842_v11 = vld [vmem:[%s9744_s1 + $0xc8] sm:$0xff]  }
  0x23   :  { %2407 = vmatprep.subr.bf16.mxu0 %v6249_v0  ;;  %5735 = vmatprep.subr.bf16.mxu1 %v6249_v0 }
  0x26   :  { %2408 = vmatpush2.bf16.msra.mxu0 %v5768_v12  ;;  %5751 = vmatpush2.bf16.msra.mxu1 %v5768_v12  ;;  %v5845_v12 = vld [vmem:[%s9745_s0 + $0x244] ss:$36 sps:$4 sm:$0xff]  }
  0x27   :  { %2409 = vmatprep.subr.bf16.mxu0 %v6249_v0  ;;  %5736 = vmatprep.subr.bf16.mxu1 %v6249_v0 }
  0x2a   :  { %2410 = vmatpush2.bf16.msra.mxu0 %v5769_v13  ;;  %5752 = vmatpush2.bf16.msra.mxu1 %v5769_v13  ;;  %v5849_v13 = vld [vmem:[%s9745_s0 + $0xc] ss:$36 sps:$4 sm:$0xff]  }
  0x2b   :  { %2411 = vmatprep.subr.bf16.mxu0 %v6249_v0  ;;  %5737 = vmatprep.subr.bf16.mxu1 %v6249_v0 }
  0x2e   :  { %2412 = vmatpush2.bf16.msra.mxu0 %v5770_v14  ;;  %5753 = vmatpush2.bf16.msra.mxu1 %v5770_v14  ;;  %v5908_v14 = vld [vmem:[%s9744_s1 + $0x160] sm:$0xff]  }
  0x2f   :  { %2413 = vmatprep.subr.bf16.mxu0 %v6249_v0  ;;  %5738 = vmatprep.subr.bf16.mxu1 %v6249_v0 }
  0x32   :  { %2414 = vmatpush2.bf16.msra.mxu0 %v5771_v15  ;;  %5754 = vmatpush2.bf16.msra.mxu1 %v5771_v15  ;;  %v5843_v15 = vld [vmem:[%s9744_s1 + $0xc0] sm:$0xff]  }
  0x33   :  { %2415 = vmatprep.subr.bf16.mxu0 %v6249_v0  ;;  %5739 = vmatprep.subr.bf16.mxu1 %v6249_v0 }
  0x36   :  { %2416 = vmatpush2.bf16.msra.mxu0 %v5772_v16  ;;  %5755 = vmatpush2.bf16.msra.mxu1 %v5772_v16  ;;  %v5922_v16 = vld [vmem:[%s9744_s1 + $0x158] sm:$0xff]  }
  0x37   :  { %2417 = vmatprep.subr.bf16.mxu0 %v6249_v0  ;;  %5740 = vmatprep.subr.bf16.mxu1 %v6249_v0 }
  0x3a   :  { %2418 = vmatpush2.bf16.msra.mxu0 %v5773_v17  ;;  %5756 = vmatpush2.bf16.msra.mxu1 %v5773_v17  ;;  %v5847_v17 = vld [vmem:[%s9745_s0 + $0x8] ss:$36 sps:$4 sm:$0xff]  }
  0x3b   :  { %2419 = vmatprep.subr.bf16.mxu0 %v6249_v0  ;;  %5741 = vmatprep.subr.bf16.mxu1 %v6249_v0 }
  0x3e   :  { %2420 = vmatpush2.bf16.msra.mxu0 %v5774_v18  ;;  %5757 = vmatpush2.bf16.msra.mxu1 %v5774_v18  ;;  %v5850_v18 = vld [vmem:[%s9745_s0 + $0x240] ss:$36 sps:$4 sm:$0xff]  }
  0x3f   :  { %2678 = vmatprep.subr.bf16.mxu1 %v6249_v0  ;;  %2967 = vmatprep.subr.bf16.mxu0 %v6249_v0 }
  0x41   :  { %2422 = vmatmul.mubr.bf16.vlgmr.msra.gmra.mxu0 %v5775_v19  ;;  %2614 = vmatmul.mubr.bf16.vlgmr.msra.gmra.mxu1 %v5778_v20  ;;  %v5851_v19 = vld [vmem:[%s9744_s1 + $0x1b8] sm:$0xff]   ;;  %v5852_v20 = vld [vmem:[%s9745_s0 + $0x28c] ss:$36 sps:$4 sm:$0xff]  }
  0x42   :  { %2679 = vmatpush1.bf16.msra.mxu1 %v5781_v21  ;;  %2968 = vmatpush1.bf16.msra.mxu0 %v5782_v22  ;;  %v5854_v21 = vld [vmem:[%s9745_s0 + $0x54] ss:$36 sps:$4 sm:$0xff]  }
  0x43   :  { %2680 = vmatprep.subr.bf16.mxu1 %v6249_v0  ;;  %2429 = vmatprep.mubr.bf16.mxu0 %v5784_v23  ;;  %v5866_v22 = vld [vmem:[%s9744_s1 + $0x1b0] sm:$0xff]  }
  0x44   :  { %2621 = vmatprep.mubr.bf16.mxu1 %v5786_v24  ;;  %2969 = vmatprep.subr.bf16.mxu0 %v6249_v0  ;;  %v5930_v23 = vld [vmem:[%s9744_s1 + $0x150] sm:$0xff]   ;;  %v5856_v24 = vld [vmem:[%s9745_s0 + $0x288] ss:$36 sps:$4 sm:$0xff]  }
  0x46   :  { %2681 = vmatpush1.bf16.msra.mxu1 %v5783_v25  ;;  %2970 = vmatpush1.bf16.msra.mxu0 %v5792_v26  ;;  %v5857_v25 = vld [vmem:[%s9745_s0 + $0x50] ss:$36 sps:$4 sm:$0xff]  }
  0x47   :  { %2682 = vmatprep.subr.bf16.mxu1 %v6249_v0  ;;  %2971 = vmatprep.subr.bf16.mxu0 %v6249_v0  ;;  %v5859_v26 = vld [vmem:[%s9745_s0 + $0x2d4] ss:$36 sps:$4 sm:$0xff]  }
  0x49   :  { %2430 = vmatmul.mubr.bf16.gmra.mxu0 %v5788_v27  ;;  %2622 = vmatmul.mubr.bf16.gmra.mxu1 %v5789_v28  ;;  %v5861_v27 = vld [vmem:[%s9745_s0 + $0x9c] ss:$36 sps:$4 sm:$0xff]   ;;  %v5880_v28 = vld [vmem:[%s9744_s1 + $0x1a8] sm:$0xff]  }
  0x4a   :  { %2683 = vmatpush1.bf16.msra.mxu1 %v5790_v29  ;;  %2437 = vmatprep.mubr.bf16.mxu0 %v5793_v30  ;;  %v5944_v29 = vld [vmem:[%s9744_s1 + $0x148] sm:$0xff]   ;;  %v5894_v30 = vld [vmem:[%s9744_s1 + $0x1a0] sm:$0xff]  }
  0x4b   :  { %2684 = vmatprep.subr.bf16.mxu1 %v6249_v0  ;;  %2629 = vmatprep.mubr.bf16.mxu1 %v5795_v31  ;;  %v5951_v31 = vld [vmem:[%s9744_s1 + $0x140] sm:$0xff]  }
  0x4c   :  { %2972 = vmatpush1.bf16.msra.mxu0 %v5808_v32  ;;  %v6631_v32 = vld [vmem:[%s9744_s1 + $0x238] sm:$0xff]  }
  0x4d   :  { %2973 = vmatprep.subr.bf16.mxu0 %v6249_v0 }
  0x4e   :  { %2685 = vmatpush1.bf16.msra.mxu1 %v5791_v33  ;;  %v5863_v33 = vld [vmem:[%s9745_s0 + $0x2d0] ss:$36 sps:$4 sm:$0xff]  }
  0x4f   :  { %2686 = vmatprep.subr.bf16.mxu1 %v6249_v0 }
  0x50   :  { %2974 = vmatpush1.bf16.msra.mxu0 %v5818_v36  ;;  %v5869_v36 = vld [vmem:[%s9745_s0 + $0xe4] ss:$36 sps:$4 sm:$0xff]  }
  0x51   :  { %2438 = vmatmul.mubr.bf16.gmra.mxu0 %v5797_v34  ;;  %2630 = vmatmul.mubr.bf16.gmra.mxu1 %v5798_v35  ;;  %v5864_v34 = vld [vmem:[%s9745_s0 + $0x98] ss:$36 sps:$4 sm:$0xff]  }
  0x52   :  { %2687 = vmatpush1.bf16.msra.mxu1 %v5799_v37  ;;  %2445 = vmatprep.mubr.bf16.mxu0 %v5801_v38  ;;  %v5867_v35 = vld [vmem:[%s9745_s0 + $0x31c] ss:$36 sps:$4 sm:$0xff]   ;;  %v5923_v38 = vld [vmem:[%s9744_s1 + $0x190] sm:$0xff]  }
  0x53   :  { %2688 = vmatprep.subr.bf16.mxu1 %v6249_v0  ;;  %2637 = vmatprep.mubr.bf16.mxu1 %v5803_v39  ;;  %v5909_v37 = vld [vmem:[%s9744_s1 + $0x198] sm:$0xff]  }
  0x54   :  { %2975 = vmatprep.subr.bf16.mxu0 %v6249_v0  ;;  %v5871_v39 = vld [vmem:[%s9745_s0 + $0x318] ss:$36 sps:$4 sm:$0xff]  }
  0x55   :  { %2976 = vmatpush1.bf16.msra.mxu0 %v5834_v40  ;;  %v5872_v40 = vld [vmem:[%s9745_s0 + $0xe0] ss:$36 sps:$4 sm:$0xff]  }
  0x56   :  { %2689 = vmatpush1.bf16.msra.mxu1 %v5800_v41  ;;  %2977 = vmatprep.subr.bf16.mxu0 %v6249_v0  ;;  %v5873_v41 = vld [vmem:[%s9745_s0 + $0x364] ss:$36 sps:$4 sm:$0xff]  }
  0x57   :  { %2690 = vmatprep.subr.bf16.mxu1 %v6249_v0 }
  0x59   :  { %2446 = vmatmul.mubr.bf16.gmra.mxu0 %v5805_v42  ;;  %2638 = vmatmul.mubr.bf16.gmra.mxu1 %v5806_v43  ;;  %v5875_v42 = vld [vmem:[%s9745_s0 + $0x12c] ss:$36 sps:$4 sm:$0xff]  }
  0x5a   :  { %2691 = vmatpush1.bf16.msra.mxu1 %v5807_v44  ;;  %2453 = vmatprep.mubr.bf16.mxu0 %v5810_v45  ;;  %v5937_v43 = vld [vmem:[%s9744_s1 + $0x188] sm:$0xff]   ;;  %v5952_v44 = vld [vmem:[%s9744_s1 + $0x180] sm:$0xff]  }
  0x5b   :  { %2692 = vmatprep.subr.bf16.mxu1 %v6249_v0  ;;  %2645 = vmatprep.mubr.bf16.mxu1 %v5812_v46  ;;  %v5877_v45 = vld [vmem:[%s9745_s0 + $0x360] ss:$36 sps:$4 sm:$0xff]   ;;  %v5878_v46 = vld [vmem:[%s9745_s0 + $0x128] ss:$36 sps:$4 sm:$0xff]  }
  0x5c   :  { %2978 = vmatpush1.bf16.msra.mxu0 %v5844_v47  ;;  %v5881_v47 = vld [vmem:[%s9745_s0 + $0x3ac] ss:$36 sps:$4 sm:$0xff]  }
  0x5d   :  { %2979 = vmatprep.subr.bf16.mxu0 %v6249_v0 }
  0x5e   :  { %2693 = vmatpush1.bf16.msra.mxu1 %v5809_v48  ;;  %v5883_v48 = vld [vmem:[%s9745_s0 + $0x174] ss:$36 sps:$4 sm:$0xff]  }
  0x5f   :  { %2694 = vmatprep.subr.bf16.mxu1 %v6249_v0 }
  0x60   :  { %2980 = vmatpush1.bf16.msra.mxu0 %v5858_v51  ;;  %v5885_v51 = vld [vmem:[%s9745_s0 + $0x3a8] ss:$36 sps:$4 sm:$0xff]  }
  0x61   :  { %2454 = vmatmul.mubr.bf16.gmra.mxu0 %v5814_v49  ;;  %2646 = vmatmul.mubr.bf16.gmra.mxu1 %v5815_v50  ;;  %v5966_v49 = vld [vmem:[%s9744_s1 + $0x1f8] sm:$0xff]   ;;  %v5979_v50 = vld [vmem:[%s9744_s1 + $0x1f0] sm:$0xff]  }
  0x62   :  { %2695 = vmatpush2.bf16.msra.mxu1 %v5816_v52  ;;  %2461 = vmatprep.mubr.bf16.mxu0 %v5819_v53  ;;  %v5886_v52 = vld [vmem:[%s9745_s0 + $0x170] ss:$36 sps:$4 sm:$0xff]  }
  0x63   :  { %2696 = vmatprep.subr.bf16.mxu1 %v6249_v0  ;;  %2653 = vmatprep.mubr.bf16.mxu1 %v5821_v54  ;;  %v5888_v53 = vld [vmem:[%s9745_s0 + $0x3f4] ss:$36 sps:$4 sm:$0xff]   ;;  %v5890_v54 = vld [vmem:[%s9745_s0 + $0x1bc] ss:$36 sps:$4 sm:$0xff]  }
  0x64   :  { %2981 = vmatprep.subr.bf16.mxu0 %v6249_v0 }
  0x65   :  { %2982 = vmatpush1.bf16.msra.mxu0 %v5865_v55  ;;  %v5993_v55 = vld [vmem:[%s9744_s1 + $0x1e8] sm:$0xff]  }
  0x66   :  { %2697 = vmatpush2.bf16.msra.mxu1 %v5817_v56  ;;  %2983 = vmatprep.subr.bf16.mxu0 %v6249_v0  ;;  %v5892_v56 = vld [vmem:[%s9745_s0 + $0x3f0] ss:$36 sps:$4 sm:$0xff]  }
  0x67   :  { %2698 = vmatprep.subr.bf16.mxu1 %v6249_v0 }
  0x69   :  { %2462 = vmatmul.mubr.bf16.gmra.mxu0 %v5823_v57  ;;  %2654 = vmatmul.mubr.bf16.gmra.mxu1 %v5824_v58  ;;  %v5893_v57 = vld [vmem:[%s9745_s0 + $0x1b8] ss:$36 sps:$4 sm:$0xff]  }
  0x6a   :  { %2699 = vmatpush2.bf16.msra.mxu1 %v5825_v59  ;;  %2469 = vmatprep.mubr.bf16.mxu0 %v5827_v60  ;;  %v5895_v58 = vld [vmem:[%s9745_s0 + $0x43c] ss:$36 sps:$4 sm:$0xff]   ;;  %v5897_v59 = vld [vmem:[%s9745_s0 + $0x204] ss:$36 sps:$4 sm:$0xff]  }
  0x6b   :  { %2700 = vmatprep.subr.bf16.mxu1 %v6249_v0  ;;  %2661 = vmatprep.mubr.bf16.mxu1 %v5829_v61  ;;  %v5899_v60 = vld [vmem:[%s9745_s0 + $0x438] ss:$36 sps:$4 sm:$0xff]   ;;  %v5900_v61 = vld [vmem:[%s9745_s0 + $0x200] ss:$36 sps:$4 sm:$0xff]  }
  0x6c   :  { %2984 = vmatpush2.bf16.msra.mxu0 %v5879_v62  ;;  %v6006_v62 = vld [vmem:[%s9744_s1 + $0x1e0] sm:$0xff]  }
  0x6d   :  { %2985 = vmatprep.subr.bf16.mxu0 %v6249_v0 }
  0x6e   :  { %2701 = vmatpush2.bf16.msra.mxu1 %v5826_v63  ;;  %v5902_v63 = vld [vmem:[%s9745_s0 + $0x484] ss:$36 sps:$4 sm:$0xff]  }
  0x6f   :  { %2702 = vmatprep.subr.bf16.mxu1 %v6249_v0 }
  0x70   :  { %2986 = vmatpush2.bf16.msra.mxu0 %v5887_v3  ;;  %v5907_v3 = vld [vmem:[%s9745_s0 + $0x248] ss:$36 sps:$4 sm:$0xff]  }
  0x71   :  { %2470 = vmatmul.mubr.bf16.gmra.mxu0 %v5831_v1  ;;  %2662 = vmatmul.mubr.bf16.gmra.mxu1 %v5832_v2  ;;  %v5904_v1 = vld [vmem:[%s9745_s0 + $0x24c] ss:$36 sps:$4 sm:$0xff]   ;;  %v5906_v2 = vld [vmem:[%s9745_s0 + $0x480] ss:$36 sps:$4 sm:$0xff]  }
  0x72   :  { %2703 = vmatpush2.bf16.msra.mxu1 %v5833_v4  ;;  %2477 = vmatprep.mubr.bf16.mxu0 %v5836_v5  ;;  %v5910_v4 = vld [vmem:[%s9745_s0 + $0x4cc] ss:$36 sps:$4 sm:$0xff]   ;;  %v5912_v5 = vld [vmem:[%s9745_s0 + $0x294] ss:$36 sps:$4 sm:$0xff]  }
  0x73   :  { %2704 = vmatprep.subr.bf16.mxu1 %v6249_v0  ;;  %2669 = vmatprep.mubr.bf16.mxu1 %v5838_v6  ;;  %v5914_v6 = vld [vmem:[%s9745_s0 + $0x4c8] ss:$36 sps:$4 sm:$0xff]  }
  0x74   :  { %2987 = vmatprep.subr.bf16.mxu0 %v6249_v0 }
  0x75   :  { %2988 = vmatpush2.bf16.msra.mxu0 %v5901_v7  ;;  %v5915_v7 = vld [vmem:[%s9745_s0 + $0x290] ss:$36 sps:$4 sm:$0xff]  }
  0x76   :  { %2705 = vmatpush2.bf16.msra.mxu1 %v5835_v8  ;;  %2989 = vmatprep.subr.bf16.mxu0 %v6249_v0  ;;  %v5916_v8 = vld [vmem:[%s9745_s0 + $0x514] ss:$36 sps:$4 sm:$0xff]  }
  0x77   :  { %2706 = vmatprep.subr.bf16.mxu1 %v6249_v0 }
  0x79   :  { %2478 = vmatmul.mubr.bf16.gmra.mxu0 %v5840_v9  ;;  %2670 = vmatmul.mubr.bf16.gmra.mxu1 %v5841_v10  ;;  %v5918_v9 = vld [vmem:[%s9745_s0 + $0x2dc] ss:$36 sps:$4 sm:$0xff]  }
  0x7a   :  { %2707 = vmatpush2.bf16.msra.mxu1 %v5842_v11  ;;  %2485 = vmatprep.mubr.bf16.mxu0 %v5845_v12  ;;  %v6020_v10 = vld [vmem:[%s9744_s1 + $0x1d8] sm:$0xff]   ;;  %v5920_v11 = vld [vmem:[%s9745_s0 + $0x510] ss:$36 sps:$4 sm:$0xff]  }
  0x7b   :  { %2708 = vmatprep.subr.bf16.mxu1 %v6249_v0  ;;  %2710 = vmatprep.mubr.bf16.mxu1 %v5849_v13  ;;  %v5921_v12 = vld [vmem:[%s9745_s0 + $0x2d8] ss:$36 sps:$4 sm:$0xff]  }
  0x7c   :  { %2990 = vmatpush2.bf16.msra.mxu0 %v5908_v14  ;;  %v5924_v13 = vld [vmem:[%s9745_s0 + $0x55c] ss:$36 sps:$4 sm:$0xff]   ;;  %v5926_v14 = vld [vmem:[%s9745_s0 + $0x324] ss:$36 sps:$4 sm:$0xff]  }
  0x7d   :  { %2991 = vmatprep.subr.bf16.mxu0 %v6249_v0 }
  0x7e   :  { %2709 = vmatpush2.bf16.msra.mxu1 %v5843_v15  ;;  %v5928_v15 = vld [vmem:[%s9745_s0 + $0x558] ss:$36 sps:$4 sm:$0xff]  }
  0x7f   :  { %3256 = vmatprep.subr.bf16.mxu1 %v6249_v0 }
  0x80   :  { %2992 = vmatpush2.bf16.msra.mxu0 %v5922_v16  ;;  %v5929_v16 = vld [vmem:[%s9745_s0 + $0x320] ss:$36 sps:$4 sm:$0xff]  }
  0x81   :  { %2486 = vmatmul.mubr.bf16.gmra.mxu0 %v5850_v18  ;;  %2711 = vmatmul.mubr.bf16.vlgmr.msra.gmra.mxu1 %v5847_v17  ;;  %v5931_v17 = vld [vmem:[%s9745_s0 + $0x5a4] ss:$36 sps:$4 sm:$0xff]   ;;  %v5933_v18 = vld [vmem:[%s9745_s0 + $0x36c] ss:$36 sps:$4 sm:$0xff]  }
  0x82   :  { %3257 = vmatpush1.bf16.msra.mxu1 %v5851_v19  ;;  %2493 = vmatprep.mubr.bf16.mxu0 %v5852_v20  ;;  %v6033_v19 = vld [vmem:[%s9744_s1 + $0x1d0] sm:$0xff]   ;;  %v5935_v20 = vld [vmem:[%s9745_s0 + $0x5a0] ss:$36 sps:$4 sm:$0xff]  }
  0x83   :  { %2718 = vmatprep.mubr.bf16.mxu1 %v5854_v21  ;;  %3258 = vmatprep.subr.bf16.mxu1 %v6249_v0  ;;  %v5936_v21 = vld [vmem:[%s9745_s0 + $0x368] ss:$36 sps:$4 sm:$0xff]  }
  0x84   :  { %2993 = vmatprep.subr.bf16.mxu0 %v6249_v0 }
  0x85   :  { %2994 = vmatpush2.bf16.msra.mxu0 %v5930_v23  ;;  %v5940_v23 = vld [vmem:[%s9745_s0 + $0x3b4] ss:$36 sps:$4 sm:$0xff]  }
  0x86   :  { %3259 = vmatpush1.bf16.msra.mxu1 %v5866_v22  ;;  %2995 = vmatprep.subr.bf16.mxu0 %v6249_v0  ;;  %v5938_v22 = vld [vmem:[%s9745_s0 + $0x5ec] ss:$36 sps:$4 sm:$0xff]  }
  0x87   :  { %3260 = vmatprep.subr.bf16.mxu1 %v6249_v0 }
  0x89   :  { %2494 = vmatmul.mubr.bf16.gmra.mxu0 %v5856_v24  ;;  %2719 = vmatmul.mubr.bf16.gmra.mxu1 %v5857_v25  ;;  %v5942_v24 = vld [vmem:[%s9745_s0 + $0x5e8] ss:$36 sps:$4 sm:$0xff]   ;;  %v5943_v25 = vld [vmem:[%s9745_s0 + $0x3b0] ss:$36 sps:$4 sm:$0xff]  }
  0x8a   :  { %2501 = vmatprep.mubr.bf16.mxu0 %v5859_v26  ;;  %2726 = vmatprep.mubr.bf16.mxu1 %v5861_v27  ;;  %v5945_v26 = vld [vmem:[%s9745_s0 + $0x634] ss:$36 sps:$4 sm:$0xff]   ;;  %v5947_v27 = vld [vmem:[%s9745_s0 + $0x3fc] ss:$36 sps:$4 sm:$0xff]  }
  0x8b   :  { %3261 = vmatpush1.bf16.msra.mxu1 %v5880_v28  ;;  %2996 = vmatpush2.bf16.msra.mxu0 %v5944_v29  ;;  %v6047_v28 = vld [vmem:[%s9744_s1 + $0x1c8] sm:$0xff]   ;;  %v5949_v29 = vld [vmem:[%s9745_s0 + $0x630] ss:$36 sps:$4 sm:$0xff]  }
  0x8c   :  { %3262 = vmatprep.subr.bf16.mxu1 %v6249_v0  ;;  %2997 = vmatprep.subr.bf16.mxu0 %v6249_v0 }
  0x8f   :  { %3263 = vmatpush1.bf16.msra.mxu1 %v5894_v30  ;;  %2998 = vmatpush2.bf16.msra.mxu0 %v5951_v31  ;;  %v5950_v30 = vld [vmem:[%s9745_s0 + $0x3f8] ss:$36 sps:$4 sm:$0xff]  }
  0x90   :  { %3264 = vmatprep.subr.bf16.mxu1 %v6249_v0  ;;  %5646 = vmatprep.subr.bf16.mxu0 %v6631_v32  ;;  %v5953_v31 = vld [vmem:[%s9745_s0 + $0x67c] ss:$36 sps:$4 sm:$0xff]  }
  0x91   :  { %2502 = vmatmul.mubr.bf16.gmra.mxu0 %v5863_v33  ;;  %2727 = vmatmul.mubr.bf16.gmra.mxu1 %v5864_v34  ;;  %v5955_v33 = vld [vmem:[%s9745_s0 + $0x444] ss:$36 sps:$4 sm:$0xff]  }
  0x92   :  { %2509 = vmatprep.mubr.bf16.mxu0 %v5867_v35  ;;  %2734 = vmatprep.mubr.bf16.mxu1 %v5869_v36  ;;  %v5958_v34 = vld [vmem:[%s9745_s0 + $0x440] ss:$36 sps:$4 sm:$0xff]   ;;  %v5959_v35 = vld [vmem:[%s9745_s0 + $0x48c] ss:$36 sps:$4 sm:$0xff]   ;;  %v5963_v36 = vld [vmem:[%s9745_s0 + $0x14] ss:$36 sps:$4 sm:$0xff]  }
  0x93   :  { %3265 = vmatpush1.bf16.msra.mxu1 %v5909_v37  ;;  %v6060_v37 = vld [vmem:[%s9744_s1 + $0x1c0] sm:$0xff]  }
  0x94   :  { %3266 = vmatprep.subr.bf16.mxu1 %v6249_v0 }
  0x97   :  { %3267 = vmatpush1.bf16.msra.mxu1 %v5923_v38  ;;  %v5961_v38 = vld [vmem:[%s9745_s0 + $0x10] ss:$36 sps:$4 sm:$0xff]  }
  0x98   :  { %3268 = vmatprep.subr.bf16.mxu1 %v6249_v0 }
  0x99   :  { %2510 = vmatmul.mubr.bf16.gmra.mxu0 %v5871_v39  ;;  %2735 = vmatmul.mubr.bf16.gmra.mxu1 %v5872_v40  ;;  %v5964_v39 = vld [vmem:[%s9745_s0 + $0x488] ss:$36 sps:$4 sm:$0xff]   ;;  %v5967_v40 = vld [vmem:[%s9745_s0 + $0x4d4] ss:$36 sps:$4 sm:$0xff]  }
  0x9a   :  { %2517 = vmatprep.mubr.bf16.mxu0 %v5873_v41  ;;  %2742 = vmatprep.mubr.bf16.mxu1 %v5875_v42  ;;  %v5969_v41 = vld [vmem:[%s9745_s0 + $0x5c] ss:$36 sps:$4 sm:$0xff]   ;;  %v5992_v42 = vld [vmem:[%s9744_s1 + $0x230] sm:$0xff]  }
  0x9b   :  { %3269 = vmatpush1.bf16.msra.mxu1 %v5937_v43 }
  0x9c   :  { %3270 = vmatprep.subr.bf16.mxu1 %v6249_v0 }
  0x9f   :  { %3271 = vmatpush1.bf16.msra.mxu1 %v5952_v44 }
  0xa0   :  { %3272 = vmatprep.subr.bf16.mxu1 %v6249_v0 }
  0xa1   :  { %2518 = vmatmul.mubr.bf16.gmra.mxu0 %v5877_v45  ;;  %2743 = vmatmul.mubr.bf16.gmra.mxu1 %v5878_v46 }
  0xa2   :  { %2525 = vmatprep.mubr.bf16.mxu0 %v5881_v47  ;;  %2750 = vmatprep.mubr.bf16.mxu1 %v5883_v48  ;;  %v6019_v47 = vld [vmem:[%s9744_s1 + $0x228] sm:$0xff]  }
  0xa3   :  { %3273 = vmatpush2.bf16.msra.mxu1 %v5966_v49 }
  0xa4   :  { %3274 = vmatprep.subr.bf16.mxu1 %v6249_v0 }
  0xa7   :  { %3275 = vmatpush2.bf16.msra.mxu1 %v5979_v50  ;;  %v5971_v50 = vld [vmem:[%s9745_s0 + $0x4d0] ss:$36 sps:$4 sm:$0xff]  }
  0xa8   :  { %3276 = vmatprep.subr.bf16.mxu1 %v6249_v0 }
  0xa9   :  { %2526 = vmatmul.mubr.bf16.gmra.mxu0 %v5885_v51  ;;  %2751 = vmatmul.mubr.bf16.gmra.mxu1 %v5886_v52  ;;  %v5973_v51 = vld [vmem:[%s9745_s0 + $0x51c] ss:$36 sps:$4 sm:$0xff]   ;;  %v5975_v52 = vld [vmem:[%s9745_s0 + $0xa4] ss:$36 sps:$4 sm:$0xff]  }
  0xaa   :  { %2533 = vmatprep.mubr.bf16.mxu0 %v5888_v53  ;;  %2758 = vmatprep.mubr.bf16.mxu1 %v5890_v54 }
  0xab   :  { %3277 = vmatpush2.bf16.msra.mxu1 %v5993_v55  ;;  %v6046_v55 = vld [vmem:[%s9744_s1 + $0x220] sm:$0xff]  }
  0xac   :  { %3278 = vmatprep.subr.bf16.mxu1 %v6249_v0 }
  0xaf   :  { %3279 = vmatpush2.bf16.msra.mxu1 %v6006_v62 }
  0xb0   :  { %3280 = vmatprep.subr.bf16.mxu1 %v6249_v0 }
  0xb1   :  { %2534 = vmatmul.mubr.bf16.gmra.mxu0 %v5892_v56  ;;  %2759 = vmatmul.mubr.bf16.gmra.mxu1 %v5893_v57 }
  0xb2   :  { %2541 = vmatprep.mubr.bf16.mxu0 %v5895_v58  ;;  %2766 = vmatprep.mubr.bf16.mxu1 %v5897_v59 }
  0xb3   :  { %3281 = vmatpush2.bf16.msra.mxu1 %v6020_v10 }
  0xb4   :  { %3282 = vmatprep.subr.bf16.mxu1 %v6249_v0 }
  0xb7   :  { %3283 = vmatpush2.bf16.msra.mxu1 %v6033_v19 }
  0xb8   :  { %3284 = vmatprep.subr.bf16.mxu1 %v6249_v0 }
  0xb9   :  { %2542 = vmatmul.mubr.bf16.gmra.mxu0 %v5899_v60  ;;  %2767 = vmatmul.mubr.bf16.gmra.mxu1 %v5900_v61  ;;  %v6073_v60 = vld [vmem:[%s9744_s1 + $0x218] sm:$0xff]  }
  0xba   :  { %2549 = vmatprep.mubr.bf16.mxu0 %v5902_v63  ;;  %2774 = vmatprep.mubr.bf16.mxu1 %v5904_v1  ;;  %v5977_v63 = vld [vmem:[%s9745_s0 + $0x518] ss:$36 sps:$4 sm:$0xff]   ;;  %v5978_v1 = vld [vmem:[%s9745_s0 + $0xa0] ss:$36 sps:$4 sm:$0xff]  }
  0xbb   :  { %3285 = vmatpush2.bf16.msra.mxu1 %v6047_v28 }
  0xbc   :  { %3286 = vmatprep.subr.bf16.mxu1 %v6249_v0  ;;  %v5957_v0 = vld [vmem:[%s9745_s0 + $0x678] ss:$36 sps:$4 sm:$0xff]  }
  0xbf   :  { %3287 = vmatpush2.bf16.msra.mxu1 %v6060_v37  ;;  %v5994_v37 = vld [vmem:[%s9745_s0 + $0x5f0] ss:$36 sps:$4 sm:$0xff]  }
  0xc1   :  { %2550 = vmatmul.mubr.bf16.gmra.mxu0 %v5906_v2  ;;  %2775 = vmatmul.mubr.bf16.gmra.mxu1 %v5907_v3  ;;  %v5980_v2 = vld [vmem:[%s9745_s0 + $0x564] ss:$36 sps:$4 sm:$0xff]   ;;  %v5982_v3 = vld [vmem:[%s9745_s0 + $0xec] ss:$36 sps:$4 sm:$0xff]  }
  0xc2   :  { %2557 = vmatprep.mubr.bf16.mxu0 %v5910_v4  ;;  %2782 = vmatprep.mubr.bf16.mxu1 %v5912_v5 }
  0xc9   :  { %2558 = vmatmul.mubr.bf16.gmra.mxu0 %v5914_v6  ;;  %2783 = vmatmul.mubr.bf16.gmra.mxu1 %v5915_v7 }
  0xca   :  { %2565 = vmatprep.mubr.bf16.mxu0 %v5916_v8  ;;  %2790 = vmatprep.mubr.bf16.mxu1 %v5918_v9 }
  0xd1   :  { %2566 = vmatmul.mubr.bf16.gmra.mxu0 %v5920_v11  ;;  %2791 = vmatmul.mubr.bf16.gmra.mxu1 %v5921_v12  ;;  %v5984_v12 = vld [vmem:[%s9745_s0 + $0x560] ss:$36 sps:$4 sm:$0xff]  }
  0xd2   :  { %2573 = vmatprep.mubr.bf16.mxu0 %v5924_v13  ;;  %2798 = vmatprep.mubr.bf16.mxu1 %v5926_v14  ;;  %v5985_v13 = vld [vmem:[%s9745_s0 + $0xe8] ss:$36 sps:$4 sm:$0xff]  }
  0xd3   :  { %v5988_v14 = vld [vmem:[%s9745_s0 + $0x5ac] ss:$36 sps:$4 sm:$0xff]  }
  0xd9   :  { %2574 = vmatmul.mubr.bf16.gmra.mxu0 %v5928_v15  ;;  %2799 = vmatmul.mubr.bf16.gmra.mxu1 %v5929_v16  ;;  %v5991_v15 = vld [vmem:[%s9745_s0 + $0x134] ss:$36 sps:$4 sm:$0xff]  }
  0xda   :  { %2581 = vmatprep.mubr.bf16.mxu0 %v5931_v17  ;;  %2806 = vmatprep.mubr.bf16.mxu1 %v5933_v18 }
  0xe1   :  { %2582 = vmatmul.mubr.bf16.gmra.mxu0 %v5935_v20  ;;  %2807 = vmatmul.mubr.bf16.gmra.mxu1 %v5936_v21 }
  0xe2   :  { %2589 = vmatprep.mubr.bf16.mxu0 %v5938_v22  ;;  %2814 = vmatprep.mubr.bf16.mxu1 %v5940_v23 }
  0xe9   :  { %2590 = vmatmul.mubr.bf16.gmra.mxu0 %v5942_v24  ;;  %2815 = vmatmul.mubr.bf16.gmra.mxu1 %v5943_v25  ;;  %v5986_v24 = vld [vmem:[%s9745_s0 + $0x5a8] ss:$36 sps:$4 sm:$0xff]   ;;  %v5989_v25 = vld [vmem:[%s9745_s0 + $0x130] ss:$36 sps:$4 sm:$0xff]  }
  0xea   :  { %2597 = vmatprep.mubr.bf16.mxu0 %v5945_v26  ;;  %2822 = vmatprep.mubr.bf16.mxu1 %v5947_v27  ;;  %v5996_v26 = vld [vmem:[%s9745_s0 + $0x5f4] ss:$36 sps:$4 sm:$0xff]   ;;  %v5999_v27 = vld [vmem:[%s9745_s0 + $0x17c] ss:$36 sps:$4 sm:$0xff]  }
  0xf1   :  { %2598 = vmatmul.mubr.bf16.gmra.mxu0 %v5949_v29  ;;  %2823 = vmatmul.mubr.bf16.gmra.mxu1 %v5950_v30 }
  0xf2   :  { %2605 = vmatprep.mubr.bf16.mxu0 %v5953_v31  ;;  %2830 = vmatprep.mubr.bf16.mxu1 %v5955_v33  ;;  %v6098_v33 = vld [vmem:[%s9744_s1 + $0x210] sm:$0xff]  }
  0xf9   :  { %2606 = vmatmul.mubr.bf16.gmra.mxu0 %v5957_v0  ;;  %2831 = vmatmul.mubr.bf16.gmra.mxu1 %v5958_v34 }
  0xfa   :  { %2838 = vmatprep.mubr.bf16.mxu1 %v5959_v35  ;;  %2999 = vmatprep.mubr.bf16.mxu0 %v5963_v36 }
 0x101   :  { %v6867_v43 = vpop.f32.mrf.mxu0  ;;  %v6869_v44 = vpop.f32.mrf.mxu1  ;;  %2839 = vmatmul.mubr.bf16.gmra.mxu1 %v5964_v39  ;;  %3000 = vmatmul.mubr.bf16.vlgmr.msra.gmra.mxu0 %v5961_v38  ;;  %v5997_v38 = vld [vmem:[%s9745_s0 + $0x178] ss:$36 sps:$4 sm:$0xff]  }
 0x102   :  { %5647 = vmatpush3.bf16.msra.mxu0 %v6631_v32  ;;  %2846 = vmatprep.mubr.bf16.mxu1 %v5967_v40  ;;  %v5972_v32 = vld [vmem:[%s9745_s0 + $0x58] ss:$36 sps:$4 sm:$0xff]   ;;  %v6005_v40 = vld [vmem:[%s9745_s0 + $0x1c4] ss:$36 sps:$4 sm:$0xff]  }
 0x103   :  { %v2425_v45 = vpop.f32.mrf.mxu0  ;;  %v2617_v46 = vpop.f32.mrf.mxu1  ;;  %3007 = vmatprep.mubr.bf16.mxu0 %v5969_v41  ;;  %5648 = vmatprep.subr.bf16.mxu0 %v5992_v42  ;;  %v6002_v39 = vld [vmem:[%s9745_s0 + $0x63c] ss:$36 sps:$4 sm:$0xff]  }
 0x105   :  { %v6875_v48 = vpop.f32.mrf.mxu0  ;;  %v6877_v49 = vpop.f32.mrf.mxu1 }
 0x106   :  { %5649 = vmatpush3.bf16.msra.mxu0 %v5992_v42 }
 0x107   :  { %v2428_v53 = vpop.f32.mrf.mxu0  ;;  %v2620_v54 = vpop.f32.mrf.mxu1  ;;  %5650 = vmatprep.subr.bf16.mxu0 %v6019_v47 }
 0x108   :  { %v6003_v53 = vld [vmem:[%s9745_s0 + $0x1c0] ss:$36 sps:$4 sm:$0xff]  }
 0x109   :  { %v6894_v56 = vpop.f32.mrf.mxu0  ;;  %v6896_v57 = vpop.f32.mrf.mxu1  ;;  %2847 = vmatmul.mubr.bf16.gmra.mxu1 %v5971_v50  ;;  %3008 = vmatmul.mubr.bf16.gmra.mxu0 %v5972_v32  ;;  %v6009_v54 = vld [vmem:[%s9745_s0 + $0x684] ss:$36 sps:$4 sm:$0xff]  }
 0x10a   :  { %9840 = vst [vmem:[#allocation2_spill] sm:$0xff] %v6896_v57  ;;  %2854 = vmatprep.mubr.bf16.mxu1 %v5973_v51  ;;  %3015 = vmatprep.mubr.bf16.mxu0 %v5975_v52  ;;  %v6000_v52 = vld [vmem:[%s9745_s0 + $0x638] ss:$36 sps:$4 sm:$0xff]  }
 0x10b   :  { %v2433_v58 = vpop.f32.mrf.mxu0  ;;  %v2625_v59 = vpop.f32.mrf.mxu1  ;;  %5651 = vmatpush3.bf16.msra.mxu0 %v6019_v47 }
 0x10c   :  { %5652 = vmatprep.subr.bf16.mxu0 %v6046_v55 }
 0x10d   :  { %v6901_v61 = vpop.f32.mrf.mxu0  ;;  %v6903_v62 = vpop.f32.mrf.mxu1 }
 0x10e   :  { %9841 = vst [vmem:[#allocation3_spill] sm:$0xff] %v6903_v62 }
 0x10f   :  { %v2436_v4 = vpop.f32.mrf.mxu0  ;;  %v2628_v5 = vpop.f32.mrf.mxu1  ;;  %5653 = vmatpush3.bf16.msra.mxu0 %v6046_v55  ;;  %v6012_v55 = vld [vmem:[%s9745_s0 + $0x20c] ss:$36 sps:$4 sm:$0xff]  }
 0x110   :  { %5654 = vmatprep.subr.bf16.mxu0 %v6073_v60  ;;  %v6007_v5 = vld [vmem:[%s9745_s0 + $0x680] ss:$36 sps:$4 sm:$0xff]  }
 0x111   :  { %v6917_v6 = vpop.f32.mrf.mxu0  ;;  %v6919_v7 = vpop.f32.mrf.mxu1  ;;  %2855 = vmatmul.mubr.bf16.gmra.mxu1 %v5977_v63  ;;  %3016 = vmatmul.mubr.bf16.gmra.mxu0 %v5978_v1 }
 0x112   :  { %9842 = vst [vmem:[#allocation4_spill] sm:$0xff] %v6919_v7  ;;  %2862 = vmatprep.mubr.bf16.mxu1 %v5980_v2  ;;  %3023 = vmatprep.mubr.bf16.mxu0 %v5982_v3 }
 0x113   :  { %v2441_v8 = vpop.f32.mrf.mxu0  ;;  %v2633_v9 = vpop.f32.mrf.mxu1  ;;  %5655 = vmatpush3.bf16.msra.mxu0 %v6073_v60 }
 0x114   :  { %5656 = vmatprep.subr.bf16.mxu0 %v6098_v33  ;;  %v6010_v8 = vld [vmem:[%s9745_s0 + $0x208] ss:$36 sps:$4 sm:$0xff]  }
 0x115   :  { %v6921_v10 = vpop.f32.mrf.mxu0  ;;  %v6923_v11 = vpop.f32.mrf.mxu1  ;;  %v6015_v9 = vld [vmem:[%s9745_s0 + $0x6cc] ss:$36 sps:$4 sm:$0xff]  }
 0x116   :  { %9843 = vst [vmem:[#allocation5_spill] sm:$0xff] %v6923_v11 }
 0x117   :  { %v2444_v16 = vpop.f32.mrf.mxu0  ;;  %v2636_v17 = vpop.f32.mrf.mxu1  ;;  %5657 = vmatpush3.bf16.msra.mxu0 %v6098_v33 }
 0x119   :  { %v6937_v18 = vpop.f32.mrf.mxu0  ;;  %v6939_v19 = vpop.f32.mrf.mxu1  ;;  %2863 = vmatmul.mubr.bf16.gmra.mxu1 %v5984_v12  ;;  %3024 = vmatmul.mubr.bf16.gmra.mxu0 %v5985_v13  ;;  %v6018_v12 = vld [vmem:[%s9745_s0 + $0x254] ss:$36 sps:$4 sm:$0xff]  }
 0x11a   :  { %9844 = vst [vmem:[#allocation6_spill] sm:$0xff] %v6939_v19  ;;  %2870 = vmatprep.mubr.bf16.mxu1 %v5988_v14  ;;  %3031 = vmatprep.mubr.bf16.mxu0 %v5991_v15 }
 0x11b   :  { %v2449_v20 = vpop.f32.mrf.mxu0  ;;  %v2641_v21 = vpop.f32.mrf.mxu1 }
 0x11d   :  { %v6941_v22 = vpop.f32.mrf.mxu0  ;;  %v6943_v23 = vpop.f32.mrf.mxu1 }
 0x11e   :  { %9845 = vst [vmem:[#allocation7_spill] sm:$0xff] %v6943_v23 }
 0x11f   :  { %v2452_v28 = vpop.f32.mrf.mxu0  ;;  %v2644_v29 = vpop.f32.mrf.mxu1 }
 0x120   :  { %v6026_v28 = vld [vmem:[%s9745_s0 + $0x29c] ss:$36 sps:$4 sm:$0xff]  }
 0x121   :  { %v6957_v30 = vpop.f32.mrf.mxu0  ;;  %v6959_v31 = vpop.f32.mrf.mxu1  ;;  %2871 = vmatmul.mubr.bf16.gmra.mxu1 %v5986_v24  ;;  %3032 = vmatmul.mubr.bf16.gmra.mxu0 %v5989_v25  ;;  %v6013_v25 = vld [vmem:[%s9745_s0 + $0x6c8] ss:$36 sps:$4 sm:$0xff]  }
 0x122   :  { %9846 = vst [vmem:[#allocation8_spill] sm:$0xff] %v6959_v31  ;;  %2878 = vmatprep.mubr.bf16.mxu1 %v5996_v26  ;;  %3039 = vmatprep.mubr.bf16.mxu0 %v5999_v27  ;;  %v6016_v26 = vld [vmem:[%s9745_s0 + $0x250] ss:$36 sps:$4 sm:$0xff]  }
 0x123   :  { %v2457_v0 = vpop.f32.mrf.mxu0  ;;  %v2649_v34 = vpop.f32.mrf.mxu1  ;;  %v6023_v27 = vld [vmem:[%s9745_s0 + $0x714] ss:$36 sps:$4 sm:$0xff]  }
 0x125   :  { %v6964_v35 = vpop.f32.mrf.mxu0  ;;  %v6966_v36 = vpop.f32.mrf.mxu1 }
 0x126   :  { %9847 = vst [vmem:[#allocation9_spill] sm:$0xff] %v6966_v36 }
 0x127   :  { %v2460_v41 = vpop.f32.mrf.mxu0  ;;  %v2652_v42 = vpop.f32.mrf.mxu1 }
 0x129   :  { %v6980_v45 = vpop.f32.mrf.mxu0  ;;  %v6982_v46 = vpop.f32.mrf.mxu1  ;;  %2879 = vmatmul.mubr.bf16.gmra.mxu1 %v5994_v37  ;;  %3040 = vmatmul.mubr.bf16.gmra.mxu0 %v5997_v38  ;;  %v6123_v38 = vld [vmem:[%s9744_s1 + $0x208] sm:$0xff]  }
 0x12a   :  { %9848 = vst [vmem:[#allocation10_spill] sm:$0xff] %v6982_v46  ;;  %2886 = vmatprep.mubr.bf16.mxu1 %v6002_v39  ;;  %3047 = vmatprep.mubr.bf16.mxu0 %v6005_v40 }
 0x12b   :  { %v2465_v47 = vpop.f32.mrf.mxu0  ;;  %v2657_v50 = vpop.f32.mrf.mxu1  ;;  %5658 = vmatprep.subr.bf16.mxu0 %v6123_v38 }
 0x12c   :  { %v6021_v47 = vld [vmem:[%s9745_s0 + $0x710] ss:$36 sps:$4 sm:$0xff]   ;;  %5659 = vmatpush3.bf16.msra.mxu0 %v6123_v38  ;;  %v6037_v38 = vld [vmem:[%s9745_s0 + $0x328] ss:$36 sps:$4 sm:$0xff]  }
 0x12d   :  { %v6984_v32 = vpop.f32.mrf.mxu0  ;;  %v6986_v51 = vpop.f32.mrf.mxu1 }
 0x12e   :  { %9849 = vst [vmem:[#allocation11_spill] sm:$0xff] %v6986_v51 }
 0x12f   :  { %v2468_v58 = vpop.f32.mrf.mxu0  ;;  %v2660_v59 = vpop.f32.mrf.mxu1 }
 0x131   :  { %v7000_v60 = vpop.f32.mrf.mxu0  ;;  %v7002_v63 = vpop.f32.mrf.mxu1  ;;  %2887 = vmatmul.mubr.bf16.gmra.mxu1 %v6000_v52  ;;  %3048 = vmatmul.mubr.bf16.gmra.mxu0 %v6003_v53  ;;  %v6029_v52 = vld [vmem:[%s9745_s0 + $0x75c] ss:$36 sps:$4 sm:$0xff]   ;;  %v6032_v53 = vld [vmem:[%s9745_s0 + $0x2e4] ss:$36 sps:$4 sm:$0xff]  }
 0x132   :  { %9850 = vst [vmem:[#allocation12_spill] sm:$0xff] %v7002_v63  ;;  %2894 = vmatprep.mubr.bf16.mxu1 %v6009_v54  ;;  %3055 = vmatprep.mubr.bf16.mxu0 %v6012_v55 }
 0x133   :  { %v2473_v1 = vpop.f32.mrf.mxu0  ;;  %v2665_v2 = vpop.f32.mrf.mxu1 }
 0x135   :  { %v7004_v3 = vpop.f32.mrf.mxu0  ;;  %v7006_v4 = vpop.f32.mrf.mxu1 }
 0x136   :  { %9851 = vst [vmem:[#allocation13_spill] sm:$0xff] %v7006_v4 }
 0x137   :  { %v2476_v13 = vpop.f32.mrf.mxu0  ;;  %v2668_v14 = vpop.f32.mrf.mxu1 }
 0x138   :  { %v6039_v14 = vld [vmem:[%s9745_s0 + $0x32c] ss:$36 sps:$4 sm:$0xff]  }
 0x139   :  { %v7020_v15 = vpop.f32.mrf.mxu0  ;;  %v7022_v16 = vpop.f32.mrf.mxu1  ;;  %2895 = vmatmul.mubr.bf16.gmra.mxu1 %v6007_v5  ;;  %3056 = vmatmul.mubr.bf16.gmra.mxu0 %v6010_v8 }
 0x13a   :  { %9852 = vst [vmem:[#allocation14_spill] sm:$0xff] %v7022_v16  ;;  %2902 = vmatprep.mubr.bf16.mxu1 %v6015_v9  ;;  %3063 = vmatprep.mubr.bf16.mxu0 %v6018_v12  ;;  %v6027_v9 = vld [vmem:[%s9745_s0 + $0x758] ss:$36 sps:$4 sm:$0xff]   ;;  %v6030_v12 = vld [vmem:[%s9745_s0 + $0x2e0] ss:$36 sps:$4 sm:$0xff]  }
 0x13b   :  { %v2481_v17 = vpop.f32.mrf.mxu0  ;;  %v2673_v20 = vpop.f32.mrf.mxu1 }
 0x13d   :  { %v7024_v21 = vpop.f32.mrf.mxu0  ;;  %v7026_v24 = vpop.f32.mrf.mxu1 }
 0x13e   :  { %9853 = vst [vmem:[#allocation15_spill] sm:$0xff] %v7026_v24 }
 0x13f   :  { %v2484_v29 = vpop.f32.mrf.mxu0  ;;  %v2676_v33 = vpop.f32.mrf.mxu1 }
 0x141   :  { %v7040_v0 = vpop.f32.mrf.mxu0  ;;  %v2712_v34 = vpop.f32.mrf.mxu1  ;;  %2903 = vmatmul.mubr.bf16.gmra.mxu1 %v6013_v25  ;;  %3064 = vmatmul.mubr.bf16.gmra.mxu0 %v6016_v26 }
 0x142   :  { %v7043_v37 = vadd.f32 %v2712_v34, %v6867_v43  ;;  %2910 = vmatprep.mubr.bf16.mxu1 %v6023_v27  ;;  %3071 = vmatprep.mubr.bf16.mxu0 %v6026_v28  ;;  %v6024_v43 = vld [vmem:[%s9745_s0 + $0x298] ss:$36 sps:$4 sm:$0xff]   ;;  %v6034_v34 = vld [vmem:[%s9745_s0 + $0x7a0] ss:$36 sps:$4 sm:$0xff]  }
 0x143   :  { %v2489_v39 = vpop.f32.mrf.mxu0  ;;  %v2714_v40 = vpop.f32.mrf.mxu1 }
 0x144   :  { %v6045_v40 = vld [vmem:[%s9745_s0 + $0x374] ss:$36 sps:$4 sm:$0xff]  }
 0x145   :  { %v7048_v41 = vpop.f32.mrf.mxu0  ;;  %v2715_v42 = vpop.f32.mrf.mxu1 }
 0x146   :  { %v7057_v50 = vadd.f32 %v2715_v42, %v6875_v48 }
 0x147   :  { %v2492_v54 = vpop.f32.mrf.mxu0  ;;  %v2717_v55 = vpop.f32.mrf.mxu1 }
 0x149   :  { %v7065_v58 = vpop.f32.mrf.mxu0  ;;  %v2720_v59 = vpop.f32.mrf.mxu1  ;;  %2911 = vmatmul.mubr.bf16.gmra.mxu1 %v6021_v47  ;;  %3072 = vmatmul.mubr.bf16.gmra.mxu0 %v6024_v43 }
 0x14a   :  { %v7068_v1 = vadd.f32 %v2720_v59, %v6894_v56  ;;  %2918 = vmatprep.mubr.bf16.mxu1 %v6029_v52  ;;  %3079 = vmatprep.mubr.bf16.mxu0 %v6032_v53  ;;  %v6036_v56 = vld [vmem:[%s9745_s0 + $0x7a4] ss:$36 sps:$4 sm:$0xff]  }
 0x14b   :  { %v2497_v48 = vpop.f32.mrf.mxu0  ;;  %v2722_v2 = vpop.f32.mrf.mxu1 }
 0x14c   :  { %v6040_v48 = vld [vmem:[%s9745_s0 + $0x7e8] ss:$36 sps:$4 sm:$0xff]   ;;  %v6043_v2 = vld [vmem:[%s9745_s0 + $0x370] ss:$36 sps:$4 sm:$0xff]  }
 0x14d   :  { %v7070_v5 = vpop.f32.mrf.mxu0  ;;  %v2723_v8 = vpop.f32.mrf.mxu1 }
 0x14e   :  { %v7079_v13 = vadd.f32 %v2723_v8, %v6901_v61 }
 0x14f   :  { %v2500_v17 = vpop.f32.mrf.mxu0  ;;  %v2725_v20 = vpop.f32.mrf.mxu1 }
 0x151   :  { %v7087_v25 = vpop.f32.mrf.mxu0  ;;  %v2728_v26 = vpop.f32.mrf.mxu1  ;;  %2919 = vmatmul.mubr.bf16.gmra.mxu1 %v6027_v9  ;;  %3080 = vmatmul.mubr.bf16.gmra.mxu0 %v6030_v12  ;;  %v6053_v9 = vld [vmem:[%s9745_s0 + $0x3bc] ss:$36 sps:$4 sm:$0xff]  }
 0x152   :  { %v7090_v27 = vadd.f32 %v2728_v26, %v6917_v6  ;;  %2926 = vmatprep.mubr.bf16.mxu1 %v6036_v56  ;;  %3087 = vmatprep.mubr.bf16.mxu0 %v6039_v14  ;;  %v6042_v6 = vld [vmem:[%s9745_s0 + $0x7ec] ss:$36 sps:$4 sm:$0xff]  }
 0x153   :  { %v2505_v61 = vpop.f32.mrf.mxu0  ;;  %v2730_v28 = vpop.f32.mrf.mxu1 }
 0x155   :  { %v7092_v29 = vpop.f32.mrf.mxu0  ;;  %v2731_v33 = vpop.f32.mrf.mxu1 }
 0x156   :  { %v7101_v39 = vadd.f32 %v2731_v33, %v6921_v10 }
 0x157   :  { %v2508_v42 = vpop.f32.mrf.mxu0  ;;  %v2733_v47 = vpop.f32.mrf.mxu1 }
 0x159   :  { %v7109_v43 = vpop.f32.mrf.mxu0  ;;  %v2736_v52 = vpop.f32.mrf.mxu1  ;;  %2927 = vmatmul.mubr.bf16.gmra.mxu1 %v6034_v34  ;;  %3088 = vmatmul.mubr.bf16.gmra.mxu0 %v6037_v38  ;;  %v6048_v34 = vld [vmem:[%s9745_s0 + $0x830] ss:$36 sps:$4 sm:$0xff]  }
 0x15a   :  { %v7112_v53 = vadd.f32 %v2736_v52, %v6937_v18  ;;  %2934 = vmatprep.mubr.bf16.mxu1 %v6042_v6  ;;  %3095 = vmatprep.mubr.bf16.mxu0 %v6045_v40  ;;  %v6050_v18 = vld [vmem:[%s9745_s0 + $0x834] ss:$36 sps:$4 sm:$0xff]   ;;  %v6056_v6 = vld [vmem:[%s9745_s0 + $0x87c] ss:$36 sps:$4 sm:$0xff]   ;;  %v6059_v40 = vld [vmem:[%s9745_s0 + $0x404] ss:$36 sps:$4 sm:$0xff]  }
 0x15b   :  { %v2513_v10 = vpop.f32.mrf.mxu0  ;;  %v2738_v54 = vpop.f32.mrf.mxu1 }
 0x15d   :  { %v7114_v55 = vpop.f32.mrf.mxu0  ;;  %v2739_v59 = vpop.f32.mrf.mxu1 }
 0x15e   :  { %v7123_v8 = vadd.f32 %v2739_v59, %v6941_v22  ;;  %v6148_v22 = vld [vmem:[%s9744_s1 + $0x200] sm:$0xff]  }
 0x15f   :  { %v2516_v12 = vpop.f32.mrf.mxu0  ;;  %v2741_v56 = vpop.f32.mrf.mxu1  ;;  %5660 = vmatprep.subr.bf16.mxu0 %v6148_v22 }
 0x160   :  { %5661 = vmatpush3.bf16.msra.mxu0 %v6148_v22  ;;  %v6066_v56 = vld [vmem:[%s9745_s0 + $0x44c] ss:$36 sps:$4 sm:$0xff]  }
 0x161   :  { %v7131_v14 = vpop.f32.mrf.mxu0  ;;  %v2744_v17 = vpop.f32.mrf.mxu1  ;;  %2935 = vmatmul.mubr.bf16.gmra.mxu1 %v6040_v48  ;;  %3096 = vmatmul.mubr.bf16.gmra.mxu0 %v6043_v2 }
 0x162   :  { %v7134_v20 = vadd.f32 %v2744_v17, %v6957_v30  ;;  %2942 = vmatprep.mubr.bf16.mxu1 %v6050_v18  ;;  %3103 = vmatprep.mubr.bf16.mxu0 %v6053_v9  ;;  %v6051_v30 = vld [vmem:[%s9745_s0 + $0x3b8] ss:$36 sps:$4 sm:$0xff]   ;;  %v6057_v9 = vld [vmem:[%s9745_s0 + $0x400] ss:$36 sps:$4 sm:$0xff]  }
 0x163   :  { %v2521_v26 = vpop.f32.mrf.mxu0  ;;  %v2746_v61 = vpop.f32.mrf.mxu1  ;;  %v6054_v18 = vld [vmem:[%s9745_s0 + $0x878] ss:$36 sps:$4 sm:$0xff]  }
 0x165   :  { %v7139_v28 = vpop.f32.mrf.mxu0  ;;  %v2747_v33 = vpop.f32.mrf.mxu1 }
 0x166   :  { %v7148_v38 = vadd.f32 %v2747_v33, %v6964_v35 }
 0x167   :  { %v2524_v42 = vpop.f32.mrf.mxu0  ;;  %v2749_v47 = vpop.f32.mrf.mxu1 }
 0x168   :  { %v6064_v42 = vld [vmem:[%s9745_s0 + $0x448] ss:$36 sps:$4 sm:$0xff]  }
 0x169   :  { %v7156_v52 = vpop.f32.mrf.mxu0  ;;  %v2752_v10 = vpop.f32.mrf.mxu1  ;;  %2943 = vmatmul.mubr.bf16.gmra.mxu1 %v6048_v34  ;;  %3104 = vmatmul.mubr.bf16.gmra.mxu0 %v6051_v30 }
 0x16a   :  { %v7159_v54 = vadd.f32 %v2752_v10, %v6980_v45  ;;  %2950 = vmatprep.mubr.bf16.mxu1 %v6056_v6  ;;  %3111 = vmatprep.mubr.bf16.mxu0 %v6059_v40  ;;  %v6063_v45 = vld [vmem:[%s9745_s0 + $0x8c4] ss:$36 sps:$4 sm:$0xff]   ;;  %v6072_v10 = vld [vmem:[%s9745_s0 + $0x1c] ss:$36 sps:$4 sm:$0xff]  }
 0x16b   :  { %v2529_v35 = vpop.f32.mrf.mxu0  ;;  %v2754_v59 = vpop.f32.mrf.mxu1  ;;  %v6061_v40 = vld [vmem:[%s9745_s0 + $0x8c0] ss:$36 sps:$4 sm:$0xff]  }
 0x16d   :  { %v7161_v48 = vpop.f32.mrf.mxu0  ;;  %v2755_v2 = vpop.f32.mrf.mxu1 }
 0x16e   :  { %v7170_v12 = vadd.f32 %v2755_v2, %v6984_v32 }
 0x16f   :  { %v2532_v17 = vpop.f32.mrf.mxu0  ;;  %v2757_v22 = vpop.f32.mrf.mxu1 }
 0x170   :  { %v6067_v22 = vld [vmem:[%s9745_s0 + $0x490] ss:$36 sps:$4 sm:$0xff]  }
 0x171   :  { %v7178_v26 = vpop.f32.mrf.mxu0  ;;  %v2760_v61 = vpop.f32.mrf.mxu1  ;;  %2951 = vmatmul.mubr.bf16.gmra.mxu1 %v6054_v18  ;;  %3112 = vmatmul.mubr.bf16.gmra.mxu0 %v6057_v9 }
 0x172   :  { %v7181_v33 = vadd.f32 %v2760_v61, %v7000_v60  ;;  %2958 = vmatprep.mubr.bf16.mxu1 %v6063_v45  ;;  %3119 = vmatprep.mubr.bf16.mxu0 %v6066_v56  ;;  %v6069_v60 = vld [vmem:[%s9745_s0 + $0x494] ss:$36 sps:$4 sm:$0xff]  }
 0x173   :  { %v2537_v32 = vpop.f32.mrf.mxu0  ;;  %v2762_v34 = vpop.f32.mrf.mxu1  ;;  %v6070_v61 = vld [vmem:[%s9745_s0 + $0x18] ss:$36 sps:$4 sm:$0xff]  }
 0x174   :  { %v6079_v34 = vld [vmem:[%s9745_s0 + $0x64] ss:$36 sps:$4 sm:$0xff]  }
 0x175   :  { %v7183_v30 = vpop.f32.mrf.mxu0  ;;  %v2763_v6 = vpop.f32.mrf.mxu1 }
 0x176   :  { %v7192_v47 = vadd.f32 %v2763_v6, %v7004_v3 }
 0x177   :  { %v2540_v35 = vpop.f32.mrf.mxu0  ;;  %v2765_v59 = vpop.f32.mrf.mxu1 }
 0x179   :  { %v7200_v2 = vpop.f32.mrf.mxu0  ;;  %v2768_v18 = vpop.f32.mrf.mxu1  ;;  %2959 = vmatmul.mubr.bf16.gmra.mxu1 %v6061_v40  ;;  %3120 = vmatmul.mubr.bf16.gmra.mxu0 %v6064_v42 }
 0x17a   :  { %v7203_v9 = vadd.f32 %v2768_v18, %v7020_v15  ;;  %3127 = vmatprep.mubr.bf16.mxu0 %v6069_v60  ;;  %3288 = vmatprep.mubr.bf16.mxu1 %v6072_v10  ;;  %v6076_v15 = vld [vmem:[%s9745_s0 + $0x4dc] ss:$36 sps:$4 sm:$0xff]  }
 0x17b   :  { %v2545_v3 = vpop.f32.mrf.mxu0  ;;  %v2770_v45 = vpop.f32.mrf.mxu1 }
 0x17c   :  { %v6074_v3 = vld [vmem:[%s9745_s0 + $0x4d8] ss:$36 sps:$4 sm:$0xff]   ;;  %v6077_v45 = vld [vmem:[%s9745_s0 + $0x60] ss:$36 sps:$4 sm:$0xff]  }
 0x17d   :  { %v7205_v56 = vpop.f32.mrf.mxu0  ;;  %v2771_v17 = vpop.f32.mrf.mxu1 }
 0x17e   :  { %v7214_v32 = vadd.f32 %v2771_v17, %v7024_v21 }
 0x17f   :  { %v2548_v6 = vpop.f32.mrf.mxu0  ;;  %v2773_v40 = vpop.f32.mrf.mxu1 }
 0x181   :  { %v7222_v42 = vpop.f32.mrf.mxu0  ;;  %v2776_v60 = vpop.f32.mrf.mxu1  ;;  %3128 = vmatmul.mubr.bf16.gmra.mxu0 %v6067_v22  ;;  %3289 = vmatmul.mubr.bf16.vlgmr.msra.gmra.mxu1 %v6070_v61  ;;  %v6085_v22 = vld [vmem:[%s9745_s0 + $0xac] ss:$36 sps:$4 sm:$0xff]  }
 0x182   :  { %v7225_v10 = vadd.f32 %v2776_v60, %v7040_v0  ;;  %3135 = vmatprep.mubr.bf16.mxu0 %v6076_v15  ;;  %3296 = vmatprep.mubr.bf16.mxu1 %v6079_v34  ;;  %v6082_v0 = vld [vmem:[%s9745_s0 + $0x524] ss:$36 sps:$4 sm:$0xff]  }
 0x183   :  { %v2553_v21 = vpop.f32.mrf.mxu0  ;;  %v2778_v35 = vpop.f32.mrf.mxu1 }
 0x185   :  { %v7227_v59 = vpop.f32.mrf.mxu0  ;;  %v2779_v18 = vpop.f32.mrf.mxu1 }
 0x186   :  { %v7236_v17 = vadd.f32 %v2779_v18, %v7048_v41  ;;  %v6080_v18 = vld [vmem:[%s9745_s0 + $0x520] ss:$36 sps:$4 sm:$0xff]  }
 0x187   :  { %v2556_v61 = vpop.f32.mrf.mxu0  ;;  %v2781_v15 = vpop.f32.mrf.mxu1 }
 0x188   :  { %v6083_v61 = vld [vmem:[%s9745_s0 + $0xa8] ss:$36 sps:$4 sm:$0xff]  }
 0x189   :  { %v7244_v34 = vpop.f32.mrf.mxu0  ;;  %v2784_v6 = vpop.f32.mrf.mxu1  ;;  %3136 = vmatmul.mubr.bf16.gmra.mxu0 %v6074_v3  ;;  %3297 = vmatmul.mubr.bf16.gmra.mxu1 %v6077_v45  ;;  %v6091_v45 = vld [vmem:[%s9745_s0 + $0xf4] ss:$36 sps:$4 sm:$0xff]  }
 0x18a   :  { %v7247_v40 = vadd.f32 %v2784_v6, %v7065_v58  ;;  %3143 = vmatprep.mubr.bf16.mxu0 %v6082_v0  ;;  %3304 = vmatprep.mubr.bf16.mxu1 %v6085_v22  ;;  %v6088_v58 = vld [vmem:[%s9745_s0 + $0x56c] ss:$36 sps:$4 sm:$0xff]  }
 0x18b   :  { %v2561_v41 = vpop.f32.mrf.mxu0  ;;  %v2786_v60 = vpop.f32.mrf.mxu1 }
 0x18d   :  { %v7249_v21 = vpop.f32.mrf.mxu0  ;;  %v2787_v35 = vpop.f32.mrf.mxu1 }
 0x18e   :  { %v7258_v3 = vadd.f32 %v2787_v35, %v7070_v5 }
 0x18f   :  { %v2564_v0 = vpop.f32.mrf.mxu0  ;;  %v2789_v22 = vpop.f32.mrf.mxu1 }
 0x190   :  { %v6086_v0 = vld [vmem:[%s9745_s0 + $0x568] ss:$36 sps:$4 sm:$0xff]   ;;  %v6089_v22 = vld [vmem:[%s9745_s0 + $0xf0] ss:$36 sps:$4 sm:$0xff]  }
 0x191   :  { %v7266_v15 = vpop.f32.mrf.mxu0  ;;  %v2792_v6 = vpop.f32.mrf.mxu1  ;;  %3144 = vmatmul.mubr.bf16.gmra.mxu0 %v6080_v18  ;;  %3305 = vmatmul.mubr.bf16.gmra.mxu1 %v6083_v61  ;;  %v6097_v61 = vld [vmem:[%s9745_s0 + $0x13c] ss:$36 sps:$4 sm:$0xff]  }
 0x192   :  { %v7269_v41 = vadd.f32 %v2792_v6, %v7087_v25  ;;  %3151 = vmatprep.mubr.bf16.mxu0 %v6088_v58  ;;  %3312 = vmatprep.mubr.bf16.mxu1 %v6091_v45  ;;  %v6094_v25 = vld [vmem:[%s9745_s0 + $0x5b4] ss:$36 sps:$4 sm:$0xff]  }
 0x193   :  { %v2569_v5 = vpop.f32.mrf.mxu0  ;;  %v2794_v60 = vpop.f32.mrf.mxu1 }
 0x195   :  { %v7271_v35 = vpop.f32.mrf.mxu0  ;;  %v2795_v24 = vpop.f32.mrf.mxu1 }
 0x196   :  { %v7280_v18 = vadd.f32 %v2795_v24, %v7092_v29 }
 0x197   :  { %v2572_v58 = vpop.f32.mrf.mxu0  ;;  %v2797_v45 = vpop.f32.mrf.mxu1 }
 0x198   :  { %v6092_v58 = vld [vmem:[%s9745_s0 + $0x5b0] ss:$36 sps:$4 sm:$0xff]   ;;  %v6095_v45 = vld [vmem:[%s9745_s0 + $0x138] ss:$36 sps:$4 sm:$0xff]  }
 0x199   :  { %v7288_v6 = vpop.f32.mrf.mxu0  ;;  %v2800_v5 = vpop.f32.mrf.mxu1  ;;  %3152 = vmatmul.mubr.bf16.gmra.mxu0 %v6086_v0  ;;  %3313 = vmatmul.mubr.bf16.gmra.mxu1 %v6089_v22  ;;  %v6104_v22 = vld [vmem:[%s9745_s0 + $0x184] ss:$36 sps:$4 sm:$0xff]  }
 0x19a   :  { %v7291_v60 = vadd.f32 %v2800_v5, %v7109_v43  ;;  %3159 = vmatprep.mubr.bf16.mxu0 %v6094_v25  ;;  %3320 = vmatprep.mubr.bf16.mxu1 %v6097_v61  ;;  %v6101_v43 = vld [vmem:[%s9745_s0 + $0x5fc] ss:$36 sps:$4 sm:$0xff]  }
 0x19b   :  { %v2577_v24 = vpop.f32.mrf.mxu0  ;;  %v2802_v29 = vpop.f32.mrf.mxu1 }
 0x19d   :  { %v7293_v16 = vpop.f32.mrf.mxu0  ;;  %v2803_v4 = vpop.f32.mrf.mxu1 }
 0x19e   :  { %v7302_v0 = vadd.f32 %v2803_v4, %v7114_v55 }
 0x19f   :  { %v2580_v25 = vpop.f32.mrf.mxu0  ;;  %v2805_v61 = vpop.f32.mrf.mxu1 }
 0x1a0   :  { %v6099_v25 = vld [vmem:[%s9745_s0 + $0x5f8] ss:$36 sps:$4 sm:$0xff]   ;;  %v6102_v61 = vld [vmem:[%s9745_s0 + $0x180] ss:$36 sps:$4 sm:$0xff]  }
 0x1a1   :  { %v7310_v5 = vpop.f32.mrf.mxu0  ;;  %v2808_v24 = vpop.f32.mrf.mxu1  ;;  %3160 = vmatmul.mubr.bf16.gmra.mxu0 %v6092_v58  ;;  %3321 = vmatmul.mubr.bf16.gmra.mxu1 %v6095_v45  ;;  %v6110_v45 = vld [vmem:[%s9745_s0 + $0x1cc] ss:$36 sps:$4 sm:$0xff]  }
 0x1a2   :  { %v7313_v29 = vadd.f32 %v2808_v24, %v7131_v14  ;;  %3167 = vmatprep.mubr.bf16.mxu0 %v6101_v43  ;;  %3328 = vmatprep.mubr.bf16.mxu1 %v6104_v22  ;;  %v6107_v14 = vld [vmem:[%s9745_s0 + $0x644] ss:$36 sps:$4 sm:$0xff]  }
 0x1a3   :  { %v2585_v4 = vpop.f32.mrf.mxu0  ;;  %v2810_v55 = vpop.f32.mrf.mxu1 }
 0x1a5   :  { %v7315_v63 = vpop.f32.mrf.mxu0  ;;  %v2811_v51 = vpop.f32.mrf.mxu1 }
 0x1a6   :  { %v7324_v58 = vadd.f32 %v2811_v51, %v7139_v28 }
 0x1a7   :  { %v2588_v43 = vpop.f32.mrf.mxu0  ;;  %v2813_v22 = vpop.f32.mrf.mxu1 }
 0x1a8   :  { %v6105_v43 = vld [vmem:[%s9745_s0 + $0x640] ss:$36 sps:$4 sm:$0xff]   ;;  %v6108_v22 = vld [vmem:[%s9745_s0 + $0x1c8] ss:$36 sps:$4 sm:$0xff]  }
 0x1a9   :  { %v7332_v24 = vpop.f32.mrf.mxu0  ;;  %v2816_v4 = vpop.f32.mrf.mxu1  ;;  %3168 = vmatmul.mubr.bf16.gmra.mxu0 %v6099_v25  ;;  %3329 = vmatmul.mubr.bf16.gmra.mxu1 %v6102_v61  ;;  %v6116_v61 = vld [vmem:[%s9745_s0 + $0x214] ss:$36 sps:$4 sm:$0xff]  }
 0x1aa   :  { %v7335_v55 = vadd.f32 %v2816_v4, %v7156_v52  ;;  %3175 = vmatprep.mubr.bf16.mxu0 %v6107_v14  ;;  %3336 = vmatprep.mubr.bf16.mxu1 %v6110_v45  ;;  %v6113_v52 = vld [vmem:[%s9745_s0 + $0x68c] ss:$36 sps:$4 sm:$0xff]  }
 0x1ab   :  { %v2593_v51 = vpop.f32.mrf.mxu0  ;;  %v2818_v28 = vpop.f32.mrf.mxu1 }
 0x1ad   :  { %v7337_v46 = vpop.f32.mrf.mxu0  ;;  %v2819_v36 = vpop.f32.mrf.mxu1 }
 0x1ae   :  { %v7346_v25 = vadd.f32 %v2819_v36, %v7161_v48 }
 0x1af   :  { %v2596_v14 = vpop.f32.mrf.mxu0  ;;  %v2821_v45 = vpop.f32.mrf.mxu1 }
 0x1b0   :  { %v6111_v14 = vld [vmem:[%s9745_s0 + $0x688] ss:$36 sps:$4 sm:$0xff]   ;;  %v6114_v45 = vld [vmem:[%s9745_s0 + $0x210] ss:$36 sps:$4 sm:$0xff]  }
 0x1b1   :  { %v7354_v4 = vpop.f32.mrf.mxu0  ;;  %v2824_v51 = vpop.f32.mrf.mxu1  ;;  %3176 = vmatmul.mubr.bf16.gmra.mxu0 %v6105_v43  ;;  %3337 = vmatmul.mubr.bf16.gmra.mxu1 %v6108_v22  ;;  %v6122_v22 = vld [vmem:[%s9745_s0 + $0x25c] ss:$36 sps:$4 sm:$0xff]  }
 0x1b2   :  { %v7357_v28 = vadd.f32 %v2824_v51, %v7178_v26  ;;  %3183 = vmatprep.mubr.bf16.mxu0 %v6113_v52  ;;  %3344 = vmatprep.mubr.bf16.mxu1 %v6116_v61  ;;  %v6119_v26 = vld [vmem:[%s9745_s0 + $0x6d4] ss:$36 sps:$4 sm:$0xff]  }
 0x1b3   :  { %v2601_v36 = vpop.f32.mrf.mxu0  ;;  %v2826_v48 = vpop.f32.mrf.mxu1 }
 0x1b5   :  { %v7359_v31 = vpop.f32.mrf.mxu0  ;;  %v2827_v23 = vpop.f32.mrf.mxu1 }
 0x1b6   :  { %v7368_v43 = vadd.f32 %v2827_v23, %v7183_v30 }
 0x1b7   :  { %v2604_v52 = vpop.f32.mrf.mxu0  ;;  %v2829_v61 = vpop.f32.mrf.mxu1 }
 0x1b8   :  { %v6117_v52 = vld [vmem:[%s9745_s0 + $0x6d0] ss:$36 sps:$4 sm:$0xff]   ;;  %v6120_v61 = vld [vmem:[%s9745_s0 + $0x258] ss:$36 sps:$4 sm:$0xff]  }
 0x1b9   :  { %v7376_v51 = vpop.f32.mrf.mxu0  ;;  %v2832_v36 = vpop.f32.mrf.mxu1  ;;  %3184 = vmatmul.mubr.bf16.gmra.mxu0 %v6111_v14  ;;  %3345 = vmatmul.mubr.bf16.gmra.mxu1 %v6114_v45  ;;  %v6129_v45 = vld [vmem:[%s9745_s0 + $0x2a4] ss:$36 sps:$4 sm:$0xff]  }
 0x1ba   :  { %v7379_v48 = vadd.f32 %v2832_v36, %v7200_v2  ;;  %3191 = vmatprep.mubr.bf16.mxu0 %v6119_v26  ;;  %3352 = vmatprep.mubr.bf16.mxu1 %v6122_v22  ;;  %v6126_v2 = vld [vmem:[%s9745_s0 + $0x71c] ss:$36 sps:$4 sm:$0xff]  }
 0x1bb   :  { %v2609_v23 = vpop.f32.mrf.mxu0  ;;  %v2834_v30 = vpop.f32.mrf.mxu1 }
 0x1bd   :  { %v7381_v19 = vpop.f32.mrf.mxu0  ;;  %v2835_v11 = vpop.f32.mrf.mxu1 }
 0x1be   :  { %v7390_v14 = vadd.f32 %v2835_v11, %v7205_v56 }
 0x1bf   :  { %v2612_v26 = vpop.f32.mrf.mxu0  ;;  %v2837_v22 = vpop.f32.mrf.mxu1 }
 0x1c0   :  { %v6124_v26 = vld [vmem:[%s9745_s0 + $0x718] ss:$36 sps:$4 sm:$0xff]  }
 0x1c1   :  { %v2840_v36 = vpop.f32.mrf.mxu1  ;;  %v3001_v23 = vpop.f32.mrf.mxu0  ;;  %3192 = vmatmul.mubr.bf16.gmra.mxu0 %v6117_v52  ;;  %3353 = vmatmul.mubr.bf16.gmra.mxu1 %v6120_v61  ;;  %v6127_v52 = vld [vmem:[%s9745_s0 + $0x2a0] ss:$36 sps:$4 sm:$0xff]   ;;  %v6135_v61 = vld [vmem:[%s9745_s0 + $0x2ec] ss:$36 sps:$4 sm:$0xff]  }
 0x1c2   :  { %v7399_v30 = vadd.f32 %v2840_v36, %v7222_v42  ;;  %v7402_v11 = vadd.f32 %v3001_v23, %v7043_v37  ;;  %3199 = vmatprep.mubr.bf16.mxu0 %v6126_v2  ;;  %3360 = vmatprep.mubr.bf16.mxu1 %v6129_v45 }
 0x1c3   :  { %v2842_v56 = vpop.f32.mrf.mxu1  ;;  %v3003_v7 = vpop.f32.mrf.mxu0 }
 0x1c4   :  { %v6132_v7 = vld [vmem:[%s9745_s0 + $0x764] ss:$36 sps:$4 sm:$0xff]  }
 0x1c5   :  { %v2843_v62 = vpop.f32.mrf.mxu1  ;;  %v3004_v57 = vpop.f32.mrf.mxu0 }
 0x1c6   :  { %v7411_v42 = vadd.f32 %v2843_v62, %v7227_v59  ;;  %v7414_v37 = vadd.f32 %v3004_v57, %v7057_v50 }
 0x1c7   :  { %v2845_v2 = vpop.f32.mrf.mxu1  ;;  %v3006_v45 = vpop.f32.mrf.mxu0 }
 0x1c8   :  { %v6130_v2 = vld [vmem:[%s9745_s0 + $0x760] ss:$36 sps:$4 sm:$0xff]  }
 0x1c9   :  { %v2848_v22 = vpop.f32.mrf.mxu1  ;;  %v3009_v36 = vpop.f32.mrf.mxu0  ;;  %3200 = vmatmul.mubr.bf16.gmra.mxu0 %v6124_v26  ;;  %3361 = vmatmul.mubr.bf16.gmra.mxu1 %v6127_v52  ;;  %v6133_v26 = vld [vmem:[%s9745_s0 + $0x2e8] ss:$36 sps:$4 sm:$0xff]  }
 0x1ca   :  { %v7423_v62 = vadd.f32 %v2848_v22, %v7244_v34  ;;  %v7426_v57 = vadd.f32 %v3009_v36, %v7068_v1  ;;  %3207 = vmatprep.mubr.bf16.mxu0 %v6132_v7  ;;  %3368 = vmatprep.mubr.bf16.mxu1 %v6135_v61  ;;  %v6138_v52 = vld [vmem:[%s9745_s0 + $0x7ac] ss:$36 sps:$4 sm:$0xff]   ;;  %v6141_v7 = vld [vmem:[%s9745_s0 + $0x334] ss:$36 sps:$4 sm:$0xff]  }
 0x1cb   :  { %v2850_v50 = vpop.f32.mrf.mxu1  ;;  %v3011_v59 = vpop.f32.mrf.mxu0 }
 0x1cd   :  { %v2851_v23 = vpop.f32.mrf.mxu1  ;;  %v3012_v56 = vpop.f32.mrf.mxu0 }
 0x1ce   :  { %v7435_v34 = vadd.f32 %v2851_v23, %v7249_v21  ;;  %v7438_v1 = vadd.f32 %v3012_v56, %v7079_v13 }
 0x1cf   :  { %v2853_v61 = vpop.f32.mrf.mxu1  ;;  %v3014_v45 = vpop.f32.mrf.mxu0 }
 0x1d0   :  { %v6136_v61 = vld [vmem:[%s9745_s0 + $0x7a8] ss:$36 sps:$4 sm:$0xff]  }
 0x1d1   :  { %v2856_v22 = vpop.f32.mrf.mxu1  ;;  %v3017_v36 = vpop.f32.mrf.mxu0  ;;  %3208 = vmatmul.mubr.bf16.gmra.mxu0 %v6130_v2  ;;  %3369 = vmatmul.mubr.bf16.gmra.mxu1 %v6133_v26  ;;  %v6139_v2 = vld [vmem:[%s9745_s0 + $0x330] ss:$36 sps:$4 sm:$0xff]  }
 0x1d2   :  { %v7447_v21 = vadd.f32 %v2856_v22, %v7266_v15  ;;  %v7450_v13 = vadd.f32 %v3017_v36, %v7090_v27  ;;  %3215 = vmatprep.mubr.bf16.mxu0 %v6138_v52  ;;  %3376 = vmatprep.mubr.bf16.mxu1 %v6141_v7  ;;  %v6144_v26 = vld [vmem:[%s9745_s0 + $0x7f4] ss:$36 sps:$4 sm:$0xff]   ;;  %v6147_v52 = vld [vmem:[%s9745_s0 + $0x37c] ss:$36 sps:$4 sm:$0xff]  }
 0x1d3   :  { %v2858_v50 = vpop.f32.mrf.mxu1  ;;  %v3019_v59 = vpop.f32.mrf.mxu0 }
 0x1d5   :  { %v2859_v23 = vpop.f32.mrf.mxu1  ;;  %v3020_v56 = vpop.f32.mrf.mxu0 }
 0x1d6   :  { %v7459_v15 = vadd.f32 %v2859_v23, %v7271_v35  ;;  %v7462_v27 = vadd.f32 %v3020_v56, %v7101_v39 }
 0x1d7   :  { %v2861_v7 = vpop.f32.mrf.mxu1  ;;  %v3022_v45 = vpop.f32.mrf.mxu0 }
 0x1d8   :  { %v6142_v7 = vld [vmem:[%s9745_s0 + $0x7f0] ss:$36 sps:$4 sm:$0xff]  }
 0x1d9   :  { %v2864_v22 = vpop.f32.mrf.mxu1  ;;  %v3025_v36 = vpop.f32.mrf.mxu0  ;;  %3216 = vmatmul.mubr.bf16.gmra.mxu0 %v6136_v61  ;;  %3377 = vmatmul.mubr.bf16.gmra.mxu1 %v6139_v2  ;;  %v6145_v61 = vld [vmem:[%s9745_s0 + $0x378] ss:$36 sps:$4 sm:$0xff]  }
 0x1da   :  { %v7471_v35 = vadd.f32 %v2864_v22, %v7288_v6  ;;  %v7474_v39 = vadd.f32 %v3025_v36, %v7112_v53  ;;  %3223 = vmatprep.mubr.bf16.mxu0 %v6144_v26  ;;  %3384 = vmatprep.mubr.bf16.mxu1 %v6147_v52  ;;  %v6151_v2 = vld [vmem:[%s9745_s0 + $0x83c] ss:$36 sps:$4 sm:$0xff]   ;;  %v6154_v26 = vld [vmem:[%s9745_s0 + $0x3c4] ss:$36 sps:$4 sm:$0xff]  }
 0x1db   :  { %v2866_v50 = vpop.f32.mrf.mxu1  ;;  %v3027_v59 = vpop.f32.mrf.mxu0 }
 0x1dd   :  { %v2867_v23 = vpop.f32.mrf.mxu1  ;;  %v3028_v56 = vpop.f32.mrf.mxu0 }
 0x1de   :  { %v7483_v6 = vadd.f32 %v2867_v23, %v7293_v16  ;;  %v7486_v53 = vadd.f32 %v3028_v56, %v7123_v8 }
 0x1df   :  { %v2869_v52 = vpop.f32.mrf.mxu1  ;;  %v3030_v45 = vpop.f32.mrf.mxu0 }
 0x1e0   :  { %v6149_v52 = vld [vmem:[%s9745_s0 + $0x838] ss:$36 sps:$4 sm:$0xff]  }
 0x1e1   :  { %v2872_v22 = vpop.f32.mrf.mxu1  ;;  %v3033_v36 = vpop.f32.mrf.mxu0  ;;  %3224 = vmatmul.mubr.bf16.gmra.mxu0 %v6142_v7  ;;  %3385 = vmatmul.mubr.bf16.gmra.mxu1 %v6145_v61  ;;  %v6152_v7 = vld [vmem:[%s9745_s0 + $0x3c0] ss:$36 sps:$4 sm:$0xff]  }
 0x1e2   :  { %v7495_v16 = vadd.f32 %v2872_v22, %v7310_v5  ;;  %v7498_v8 = vadd.f32 %v3033_v36, %v7134_v20  ;;  %3231 = vmatprep.mubr.bf16.mxu0 %v6151_v2  ;;  %3392 = vmatprep.mubr.bf16.mxu1 %v6154_v26  ;;  %v6157_v61 = vld [vmem:[%s9745_s0 + $0x884] ss:$36 sps:$4 sm:$0xff]   ;;  %v6160_v2 = vld [vmem:[%s9745_s0 + $0x40c] ss:$36 sps:$4 sm:$0xff]  }
 0x1e3   :  { %v2874_v50 = vpop.f32.mrf.mxu1  ;;  %v3035_v59 = vpop.f32.mrf.mxu0 }
 0x1e5   :  { %v2875_v23 = vpop.f32.mrf.mxu1  ;;  %v3036_v56 = vpop.f32.mrf.mxu0 }
 0x1e6   :  { %v7507_v5 = vadd.f32 %v2875_v23, %v7315_v63  ;;  %v7510_v20 = vadd.f32 %v3036_v56, %v7148_v38 }
 0x1e7   :  { %v2877_v26 = vpop.f32.mrf.mxu1  ;;  %v3038_v45 = vpop.f32.mrf.mxu0 }
 0x1e8   :  { %v6155_v26 = vld [vmem:[%s9745_s0 + $0x880] ss:$36 sps:$4 sm:$0xff]  }
 0x1e9   :  { %v2880_v22 = vpop.f32.mrf.mxu1  ;;  %v3041_v36 = vpop.f32.mrf.mxu0  ;;  %3232 = vmatmul.mubr.bf16.gmra.mxu0 %v6149_v52  ;;  %3393 = vmatmul.mubr.bf16.gmra.mxu1 %v6152_v7  ;;  %v6158_v52 = vld [vmem:[%s9745_s0 + $0x408] ss:$36 sps:$4 sm:$0xff]  }
 0x1ea   :  { %v7519_v63 = vadd.f32 %v2880_v22, %v7332_v24  ;;  %v7522_v38 = vadd.f32 %v3041_v36, %v7159_v54  ;;  %3239 = vmatprep.mubr.bf16.mxu0 %v6157_v61  ;;  %3400 = vmatprep.mubr.bf16.mxu1 %v6160_v2  ;;  %v6163_v7 = vld [vmem:[%s9745_s0 + $0x8cc] ss:$36 sps:$4 sm:$0xff]   ;;  %v6166_v61 = vld [vmem:[%s9745_s0 + $0x454] ss:$36 sps:$4 sm:$0xff]  }
 0x1eb   :  { %v2882_v50 = vpop.f32.mrf.mxu1  ;;  %v3043_v59 = vpop.f32.mrf.mxu0 }
 0x1ed   :  { %v2883_v23 = vpop.f32.mrf.mxu1  ;;  %v3044_v56 = vpop.f32.mrf.mxu0 }
 0x1ee   :  { %v7531_v24 = vadd.f32 %v2883_v23, %v7337_v46  ;;  %v7534_v54 = vadd.f32 %v3044_v56, %v7170_v12 }
 0x1ef   :  { %v2885_v2 = vpop.f32.mrf.mxu1  ;;  %v3046_v45 = vpop.f32.mrf.mxu0 }
 0x1f0   :  { %v6161_v2 = vld [vmem:[%s9745_s0 + $0x8c8] ss:$36 sps:$4 sm:$0xff]  }
 0x1f1   :  { %v2888_v22 = vpop.f32.mrf.mxu1  ;;  %v3049_v36 = vpop.f32.mrf.mxu0  ;;  %3240 = vmatmul.mubr.bf16.gmra.mxu0 %v6155_v26  ;;  %3401 = vmatmul.mubr.bf16.gmra.mxu1 %v6158_v52  ;;  %v6164_v26 = vld [vmem:[%s9745_s0 + $0x450] ss:$36 sps:$4 sm:$0xff]   ;;  %v6169_v52 = vld [vmem:[%s9745_s0 + $0x49c] ss:$36 sps:$4 sm:$0xff]  }
 0x1f2   :  { %v7543_v46 = vadd.f32 %v2888_v22, %v7354_v4  ;;  %v7546_v12 = vadd.f32 %v3049_v36, %v7181_v33  ;;  %3247 = vmatprep.mubr.bf16.mxu0 %v6163_v7  ;;  %3408 = vmatprep.mubr.bf16.mxu1 %v6166_v61  ;;  %v6170_v7 = vld [vmem:[%s9745_s0 + $0x20] ss:$36 sps:$4 sm:$0xff]  }
 0x1f3   :  { %v2890_v50 = vpop.f32.mrf.mxu1  ;;  %v3051_v59 = vpop.f32.mrf.mxu0 }
 0x1f5   :  { %v2891_v23 = vpop.f32.mrf.mxu1  ;;  %v3052_v56 = vpop.f32.mrf.mxu0 }
 0x1f6   :  { %v7555_v4 = vadd.f32 %v2891_v23, %v7359_v31  ;;  %v7558_v33 = vadd.f32 %v3052_v56, %v7192_v47 }
 0x1f7   :  { %v2893_v61 = vpop.f32.mrf.mxu1  ;;  %v3054_v45 = vpop.f32.mrf.mxu0 }
 0x1f8   :  { %v6167_v61 = vld [vmem:[%s9745_s0 + $0x498] ss:$36 sps:$4 sm:$0xff]  }
 0x1f9   :  { %v2896_v22 = vpop.f32.mrf.mxu1  ;;  %v3057_v36 = vpop.f32.mrf.mxu0  ;;  %3248 = vmatmul.mubr.bf16.gmra.mxu0 %v6161_v2  ;;  %3409 = vmatmul.mubr.bf16.gmra.mxu1 %v6164_v26  ;;  %v6171_v2 = vld [vmem:[%s9745_s0 + $0x68] ss:$36 sps:$4 sm:$0xff]  }
 0x1fa   :  { %v7567_v31 = vadd.f32 %v2896_v22, %v7376_v51  ;;  %v7570_v47 = vadd.f32 %v3057_v36, %v7203_v9  ;;  %3416 = vmatprep.mubr.bf16.mxu1 %v6169_v52  ;;  %5662 = vmatprep.mubr.bf16.mxu0 %v6170_v7  ;;  %v6174_v26 = vld [vmem:[%s9745_s0 + $0x4e4] ss:$36 sps:$4 sm:$0xff]   ;;  %v6175_v52 = vld [vmem:[%s9745_s0 + $0xb0] ss:$36 sps:$4 sm:$0xff]  }
 0x1fb   :  { %v2898_v50 = vpop.f32.mrf.mxu1  ;;  %v3059_v59 = vpop.f32.mrf.mxu0 }
 0x1fd   :  { %v2899_v23 = vpop.f32.mrf.mxu1  ;;  %v3060_v56 = vpop.f32.mrf.mxu0 }
 0x1fe   :  { %v7579_v51 = vadd.f32 %v2899_v23, %v7381_v19  ;;  %v7582_v9 = vadd.f32 %v3060_v56, %v7214_v32  ;;  %v6172_v56 = vld [vmem:[%s9745_s0 + $0x4e0] ss:$36 sps:$4 sm:$0xff]  }
 0x1ff   :  { %v2901_v7 = vpop.f32.mrf.mxu1  ;;  %v3062_v45 = vpop.f32.mrf.mxu0 }
 0x200   :  { %v6176_v7 = vld [vmem:[%s9745_s0 + $0xf8] ss:$36 sps:$4 sm:$0xff]  }
 0x201   :  { %v7590_v22 = vpop.f32.mrf.mxu1  ;;  %v3065_v36 = vpop.f32.mrf.mxu0  ;;  %3417 = vmatmul.mubr.bf16.gmra.mxu1 %v6167_v61  ;;  %5663 = vmatmul.mubr.bf16.vlgmr.msra.gmra.mxu0 %v6171_v2  ;;  %v6180_v2 = vld [vmem:[%s9745_s0 + $0x140] ss:$36 sps:$4 sm:$0xff]  }
 0x202   :  { %v7593_v19 = vadd.f32 %v3065_v36, %v7225_v10  ;;  %3424 = vmatprep.mubr.bf16.mxu1 %v6174_v26  ;;  %5666 = vmatprep.mubr.bf16.mxu0 %v6175_v52  ;;  %v6179_v10 = vld [vmem:[%s9745_s0 + $0x52c] ss:$36 sps:$4 sm:$0xff]  }
 0x203   :  { %v2906_v32 = vpop.f32.mrf.mxu1  ;;  %v3067_v50 = vpop.f32.mrf.mxu0 }
 0x205   :  { %v7595_v59 = vpop.f32.mrf.mxu1  ;;  %v3068_v23 = vpop.f32.mrf.mxu0 }
 0x206   :  { %v7604_v61 = vadd.f32 %v3068_v23, %v7236_v17 }
 0x207   :  { %v2909_v26 = vpop.f32.mrf.mxu1  ;;  %v3070_v52 = vpop.f32.mrf.mxu0 }
 0x208   :  { %9854 = vst [vmem:[#allocation16_spill] sm:$0xff] %v7604_v61  ;;  %v6177_v26 = vld [vmem:[%s9745_s0 + $0x528] ss:$36 sps:$4 sm:$0xff]  }
 0x209   :  { %v7612_v45 = vpop.f32.mrf.mxu1  ;;  %v3073_v36 = vpop.f32.mrf.mxu0  ;;  %3425 = vmatmul.mubr.bf16.gmra.mxu1 %v6172_v56  ;;  %5667 = vmatmul.mubr.bf16.gmra.mxu0 %v6176_v7  ;;  %v6181_v52 = vld [vmem:[%s9745_s0 + $0x188] ss:$36 sps:$4 sm:$0xff]   ;;  %v6185_v7 = vld [vmem:[%s9745_s0 + $0x1d0] ss:$36 sps:$4 sm:$0xff]  }
 0x20a   :  { %v7615_v32 = vadd.f32 %v3073_v36, %v7247_v40  ;;  %3432 = vmatprep.mubr.bf16.mxu1 %v6179_v10  ;;  %5670 = vmatprep.mubr.bf16.mxu0 %v6180_v2  ;;  %v6184_v40 = vld [vmem:[%s9745_s0 + $0x574] ss:$36 sps:$4 sm:$0xff]  }
 0x20b   :  { %v2914_v17 = vpop.f32.mrf.mxu1  ;;  %v3075_v50 = vpop.f32.mrf.mxu0 }
 0x20d   :  { %v7617_v23 = vpop.f32.mrf.mxu1  ;;  %v3076_v61 = vpop.f32.mrf.mxu0 }
 0x20e   :  { %9855 = vst [vmem:[#allocation17_spill] sm:$0xff] %v7617_v23  ;;  %v7626_v56 = vadd.f32 %v3076_v61, %v7258_v3 }
 0x20f   :  { %v2917_v10 = vpop.f32.mrf.mxu1  ;;  %v3078_v2 = vpop.f32.mrf.mxu0 }
 0x210   :  { %9856 = vst [vmem:[#allocation18_spill] sm:$0xff] %v7626_v56  ;;  %v6182_v10 = vld [vmem:[%s9745_s0 + $0x570] ss:$36 sps:$4 sm:$0xff]   ;;  %v6186_v2 = vld [vmem:[%s9745_s0 + $0x218] ss:$36 sps:$4 sm:$0xff]  }
 0x211   :  { %v7634_v36 = vpop.f32.mrf.mxu1  ;;  %v3081_v17 = vpop.f32.mrf.mxu0  ;;  %3433 = vmatmul.mubr.bf16.gmra.mxu1 %v6177_v26  ;;  %5671 = vmatmul.mubr.bf16.gmra.mxu0 %v6181_v52  ;;  %v6190_v52 = vld [vmem:[%s9745_s0 + $0x260] ss:$36 sps:$4 sm:$0xff]  }
 0x212   :  { %v7637_v50 = vadd.f32 %v3081_v17, %v7269_v41  ;;  %3440 = vmatprep.mubr.bf16.mxu1 %v6184_v40  ;;  %5674 = vmatprep.mubr.bf16.mxu0 %v6185_v7  ;;  %v6189_v41 = vld [vmem:[%s9745_s0 + $0x5bc] ss:$36 sps:$4 sm:$0xff]  }
 0x213   :  { %v2922_v3 = vpop.f32.mrf.mxu1  ;;  %v3083_v61 = vpop.f32.mrf.mxu0 }
 0x215   :  { %v7639_v56 = vpop.f32.mrf.mxu1  ;;  %v3084_v23 = vpop.f32.mrf.mxu0 }
 0x216   :  { %9857 = vst [vmem:[#allocation19_spill] sm:$0xff] %v7639_v56  ;;  %v7648_v26 = vadd.f32 %v3084_v23, %v7280_v18 }
 0x217   :  { %v2925_v40 = vpop.f32.mrf.mxu1  ;;  %v3086_v7 = vpop.f32.mrf.mxu0 }
 0x218   :  { %9858 = vst [vmem:[#allocation20_spill] sm:$0xff] %v7648_v26  ;;  %v6187_v40 = vld [vmem:[%s9745_s0 + $0x5b8] ss:$36 sps:$4 sm:$0xff]   ;;  %v6191_v7 = vld [vmem:[%s9745_s0 + $0x2a8] ss:$36 sps:$4 sm:$0xff]  }
 0x219   :  { %v7656_v17 = vpop.f32.mrf.mxu1  ;;  %v3089_v3 = vpop.f32.mrf.mxu0  ;;  %3441 = vmatmul.mubr.bf16.gmra.mxu1 %v6182_v10  ;;  %5675 = vmatmul.mubr.bf16.gmra.mxu0 %v6186_v2  ;;  %v6195_v2 = vld [vmem:[%s9745_s0 + $0x2f0] ss:$36 sps:$4 sm:$0xff]  }
 0x21a   :  { %v7659_v61 = vadd.f32 %v3089_v3, %v7291_v60  ;;  %3448 = vmatprep.mubr.bf16.mxu1 %v6189_v41  ;;  %5678 = vmatprep.mubr.bf16.mxu0 %v6190_v52  ;;  %v6194_v60 = vld [vmem:[%s9745_s0 + $0x604] ss:$36 sps:$4 sm:$0xff]  }
 0x21b   :  { %v2930_v18 = vpop.f32.mrf.mxu1  ;;  %v3091_v23 = vpop.f32.mrf.mxu0 }
 0x21d   :  { %v7661_v26 = vpop.f32.mrf.mxu1  ;;  %v3092_v56 = vpop.f32.mrf.mxu0 }
 0x21e   :  { %9859 = vst [vmem:[#allocation21_spill] sm:$0xff] %v7661_v26  ;;  %v7670_v10 = vadd.f32 %v3092_v56, %v7302_v0 }
 0x21f   :  { %v2933_v41 = vpop.f32.mrf.mxu1  ;;  %v3094_v52 = vpop.f32.mrf.mxu0 }
 0x220   :  { %9860 = vst [vmem:[#allocation22_spill] sm:$0xff] %v7670_v10  ;;  %v6192_v41 = vld [vmem:[%s9745_s0 + $0x600] ss:$36 sps:$4 sm:$0xff]   ;;  %v6196_v52 = vld [vmem:[%s9745_s0 + $0x338] ss:$36 sps:$4 sm:$0xff]  }
 0x221   :  { %v7678_v3 = vpop.f32.mrf.mxu1  ;;  %v3097_v18 = vpop.f32.mrf.mxu0  ;;  %3449 = vmatmul.mubr.bf16.gmra.mxu1 %v6187_v40  ;;  %5679 = vmatmul.mubr.bf16.gmra.mxu0 %v6191_v7  ;;  %v6200_v7 = vld [vmem:[%s9745_s0 + $0x380] ss:$36 sps:$4 sm:$0xff]  }
 0x222   :  { %v7681_v23 = vadd.f32 %v3097_v18, %v7313_v29  ;;  %3456 = vmatprep.mubr.bf16.mxu1 %v6194_v60  ;;  %5682 = vmatprep.mubr.bf16.mxu0 %v6195_v2  ;;  %v6199_v29 = vld [vmem:[%s9745_s0 + $0x64c] ss:$36 sps:$4 sm:$0xff]  }
 0x223   :  { %v2938_v0 = vpop.f32.mrf.mxu1  ;;  %v3099_v56 = vpop.f32.mrf.mxu0 }
 0x225   :  { %v7683_v10 = vpop.f32.mrf.mxu1  ;;  %v3100_v26 = vpop.f32.mrf.mxu0 }
 0x226   :  { %9861 = vst [vmem:[#allocation23_spill] sm:$0xff] %v7683_v10  ;;  %v7692_v40 = vadd.f32 %v3100_v26, %v7324_v58 }
 0x227   :  { %v2941_v60 = vpop.f32.mrf.mxu1  ;;  %v3102_v2 = vpop.f32.mrf.mxu0 }
 0x228   :  { %9862 = vst [vmem:[#allocation24_spill] sm:$0xff] %v7692_v40  ;;  %v6197_v60 = vld [vmem:[%s9745_s0 + $0x648] ss:$36 sps:$4 sm:$0xff]  }
 0x229   :  { %v7700_v18 = vpop.f32.mrf.mxu1  ;;  %v3105_v0 = vpop.f32.mrf.mxu0  ;;  %3457 = vmatmul.mubr.bf16.gmra.mxu1 %v6192_v41  ;;  %5683 = vmatmul.mubr.bf16.gmra.mxu0 %v6196_v52  ;;  %v6201_v2 = vld [vmem:[%s9745_s0 + $0x3c8] ss:$36 sps:$4 sm:$0xff]   ;;  %v6205_v52 = vld [vmem:[%s9745_s0 + $0x410] ss:$36 sps:$4 sm:$0xff]  }
 0x22a   :  { %v7703_v56 = vadd.f32 %v3105_v0, %v7335_v55  ;;  %3464 = vmatprep.mubr.bf16.mxu1 %v6199_v29  ;;  %5686 = vmatprep.mubr.bf16.mxu0 %v6200_v7  ;;  %v6204_v55 = vld [vmem:[%s9745_s0 + $0x694] ss:$36 sps:$4 sm:$0xff]  }
 0x22b   :  { %v2946_v58 = vpop.f32.mrf.mxu1  ;;  %v3107_v26 = vpop.f32.mrf.mxu0 }
 0x22d   :  { %v7705_v40 = vpop.f32.mrf.mxu1  ;;  %v3108_v10 = vpop.f32.mrf.mxu0 }
 0x22e   :  { %9863 = vst [vmem:[#allocation25_spill] sm:$0xff] %v7705_v40  ;;  %v7714_v41 = vadd.f32 %v3108_v10, %v7346_v25 }
 0x22f   :  { %v2949_v29 = vpop.f32.mrf.mxu1  ;;  %v3110_v7 = vpop.f32.mrf.mxu0 }
 0x230   :  { %9864 = vst [vmem:[#allocation26_spill] sm:$0xff] %v7714_v41  ;;  %v6202_v29 = vld [vmem:[%s9745_s0 + $0x690] ss:$36 sps:$4 sm:$0xff]   ;;  %v6206_v7 = vld [vmem:[%s9745_s0 + $0x458] ss:$36 sps:$4 sm:$0xff]  }
 0x231   :  { %v7722_v0 = vpop.f32.mrf.mxu1  ;;  %v3113_v58 = vpop.f32.mrf.mxu0  ;;  %3465 = vmatmul.mubr.bf16.gmra.mxu1 %v6197_v60  ;;  %5687 = vmatmul.mubr.bf16.gmra.mxu0 %v6201_v2  ;;  %v6210_v2 = vld [vmem:[%s9745_s0 + $0x4a0] ss:$36 sps:$4 sm:$0xff]  }
 0x232   :  { %v7725_v26 = vadd.f32 %v3113_v58, %v7357_v28  ;;  %3472 = vmatprep.mubr.bf16.mxu1 %v6204_v55  ;;  %5690 = vmatprep.mubr.bf16.mxu0 %v6205_v52  ;;  %v6209_v28 = vld [vmem:[%s9745_s0 + $0x6dc] ss:$36 sps:$4 sm:$0xff]  }
 0x233   :  { %v2954_v25 = vpop.f32.mrf.mxu1  ;;  %v3115_v10 = vpop.f32.mrf.mxu0 }
 0x235   :  { %v7727_v41 = vpop.f32.mrf.mxu1  ;;  %v3116_v40 = vpop.f32.mrf.mxu0 }
 0x236   :  { %9865 = vst [vmem:[#allocation27_spill] sm:$0xff] %v7727_v41  ;;  %v7736_v60 = vadd.f32 %v3116_v40, %v7368_v43 }
 0x237   :  { %v2957_v55 = vpop.f32.mrf.mxu1  ;;  %v3118_v52 = vpop.f32.mrf.mxu0 }
 0x238   :  { %9866 = vst [vmem:[#allocation28_spill] sm:$0xff] %v7736_v60  ;;  %v6207_v55 = vld [vmem:[%s9745_s0 + $0x6d8] ss:$36 sps:$4 sm:$0xff]   ;;  %v6211_v52 = vld [vmem:[%s9745_s0 + $0x4e8] ss:$36 sps:$4 sm:$0xff]  }
 0x239   :  { %v7744_v58 = vpop.f32.mrf.mxu1  ;;  %v3121_v25 = vpop.f32.mrf.mxu0  ;;  %3473 = vmatmul.mubr.bf16.gmra.mxu1 %v6202_v29  ;;  %5691 = vmatmul.mubr.bf16.gmra.mxu0 %v6206_v7  ;;  %v6215_v7 = vld [vmem:[%s9745_s0 + $0x530] ss:$36 sps:$4 sm:$0xff]  }
 0x23a   :  { %v7747_v10 = vadd.f32 %v3121_v25, %v7379_v48  ;;  %3480 = vmatprep.mubr.bf16.mxu1 %v6209_v28  ;;  %5694 = vmatprep.mubr.bf16.mxu0 %v6210_v2  ;;  %v6214_v48 = vld [vmem:[%s9745_s0 + $0x724] ss:$36 sps:$4 sm:$0xff]  }
 0x23b   :  { %v2962_v43 = vpop.f32.mrf.mxu1  ;;  %v3123_v40 = vpop.f32.mrf.mxu0 }
 0x23c   :  { %9867 = vst [vmem:[#allocation29_spill] sm:$0xff] %v7747_v10 }
 0x23d   :  { %v7749_v60 = vpop.f32.mrf.mxu1  ;;  %v3124_v41 = vpop.f32.mrf.mxu0 }
 0x23e   :  { %9868 = vst [vmem:[#allocation30_spill] sm:$0xff] %v7749_v60  ;;  %v7758_v29 = vadd.f32 %v3124_v41, %v7390_v14 }
 0x23f   :  { %v2965_v28 = vpop.f32.mrf.mxu1  ;;  %v3126_v2 = vpop.f32.mrf.mxu0 }
 0x240   :  { %9869 = vst [vmem:[#allocation31_spill] sm:$0xff] %v7758_v29  ;;  %v6212_v28 = vld [vmem:[%s9745_s0 + $0x720] ss:$36 sps:$4 sm:$0xff]  }
 0x241   :  { %v3129_v25 = vpop.f32.mrf.mxu0  ;;  %v3290_v43 = vpop.f32.mrf.mxu1  ;;  %3481 = vmatmul.mubr.bf16.gmra.mxu1 %v6207_v55  ;;  %5695 = vmatmul.mubr.bf16.gmra.mxu0 %v6211_v52  ;;  %v6216_v55 = vld [vmem:[%s9745_s0 + $0x578] ss:$36 sps:$4 sm:$0xff]   ;;  %v6219_v52 = vld [vmem:[%s9745_s0 + $0x76c] ss:$36 sps:$4 sm:$0xff]  }
 0x242   :  { %v7767_v40 = vadd.f32 %v3129_v25, %v7399_v30  ;;  %v7770_v14 = vadd.f32 %v3290_v43, %v7402_v11  ;;  %3488 = vmatprep.mubr.bf16.mxu1 %v6214_v48  ;;  %5698 = vmatprep.mubr.bf16.mxu0 %v6215_v7 }
 0x243   :  { %v3131_v41 = vpop.f32.mrf.mxu0  ;;  %v3292_v29 = vpop.f32.mrf.mxu1 }
 0x244   :  { %v6220_v29 = vld [vmem:[%s9745_s0 + $0x5c0] ss:$36 sps:$4 sm:$0xff]  }
 0x245   :  { %v3132_v60 = vpop.f32.mrf.mxu0  ;;  %v3293_v10 = vpop.f32.mrf.mxu1 }
 0x246   :  { %v7779_v30 = vadd.f32 %v3132_v60, %v7411_v42  ;;  %v7782_v11 = vadd.f32 %v3293_v10, %v7414_v37 }
 0x247   :  { %v3134_v48 = vpop.f32.mrf.mxu0  ;;  %v3295_v7 = vpop.f32.mrf.mxu1 }
 0x248   :  { %v6217_v48 = vld [vmem:[%s9745_s0 + $0x768] ss:$36 sps:$4 sm:$0xff]  }
 0x249   :  { %v3137_v2 = vpop.f32.mrf.mxu0  ;;  %v3298_v25 = vpop.f32.mrf.mxu1  ;;  %3489 = vmatmul.mubr.bf16.gmra.mxu1 %v6212_v28  ;;  %5699 = vmatmul.mubr.bf16.gmra.mxu0 %v6216_v55  ;;  %v6221_v28 = vld [vmem:[%s9745_s0 + $0x608] ss:$36 sps:$4 sm:$0xff]   ;;  %v6224_v55 = vld [vmem:[%s9745_s0 + $0x7b4] ss:$36 sps:$4 sm:$0xff]  }
 0x24a   :  { %v7791_v42 = vadd.f32 %v3137_v2, %v7423_v62  ;;  %v7794_v37 = vadd.f32 %v3298_v25, %v7426_v57  ;;  %3496 = vmatprep.mubr.bf16.mxu1 %v6219_v52  ;;  %5702 = vmatprep.mubr.bf16.mxu0 %v6220_v29  ;;  %v6225_v52 = vld [vmem:[%s9745_s0 + $0x650] ss:$36 sps:$4 sm:$0xff]  }
 0x24b   :  { %v3139_v60 = vpop.f32.mrf.mxu0  ;;  %v3300_v10 = vpop.f32.mrf.mxu1 }
 0x24d   :  { %v3140_v43 = vpop.f32.mrf.mxu0  ;;  %v3301_v41 = vpop.f32.mrf.mxu1 }
 0x24e   :  { %v7803_v62 = vadd.f32 %v3140_v43, %v7435_v34  ;;  %v7806_v57 = vadd.f32 %v3301_v41, %v7438_v1 }
 0x24f   :  { %v3142_v29 = vpop.f32.mrf.mxu0  ;;  %v3303_v7 = vpop.f32.mrf.mxu1 }
 0x250   :  { %v6222_v29 = vld [vmem:[%s9745_s0 + $0x7b0] ss:$36 sps:$4 sm:$0xff]  }
 0x251   :  { %v3145_v2 = vpop.f32.mrf.mxu0  ;;  %v3306_v25 = vpop.f32.mrf.mxu1  ;;  %3497 = vmatmul.mubr.bf16.gmra.mxu1 %v6217_v48  ;;  %5703 = vmatmul.mubr.bf16.gmra.mxu0 %v6221_v28  ;;  %v6226_v48 = vld [vmem:[%s9745_s0 + $0x698] ss:$36 sps:$4 sm:$0xff]  }
 0x252   :  { %v7815_v34 = vadd.f32 %v3145_v2, %v7447_v21  ;;  %v7818_v1 = vadd.f32 %v3306_v25, %v7450_v13  ;;  %3504 = vmatprep.mubr.bf16.mxu1 %v6224_v55  ;;  %5706 = vmatprep.mubr.bf16.mxu0 %v6225_v52  ;;  %v6229_v28 = vld [vmem:[%s9745_s0 + $0x7fc] ss:$36 sps:$4 sm:$0xff]  }
 0x253   :  { %v3147_v60 = vpop.f32.mrf.mxu0  ;;  %v3308_v10 = vpop.f32.mrf.mxu1  ;;  %v6230_v55 = vld [vmem:[%s9745_s0 + $0x6e0] ss:$36 sps:$4 sm:$0xff]  }
 0x255   :  { %v3148_v43 = vpop.f32.mrf.mxu0  ;;  %v3309_v41 = vpop.f32.mrf.mxu1 }
 0x256   :  { %v7827_v21 = vadd.f32 %v3148_v43, %v7459_v15  ;;  %v7830_v13 = vadd.f32 %v3309_v41, %v7462_v27 }
 0x257   :  { %v3150_v52 = vpop.f32.mrf.mxu0  ;;  %v3311_v7 = vpop.f32.mrf.mxu1 }
 0x258   :  { %v6227_v52 = vld [vmem:[%s9745_s0 + $0x7f8] ss:$36 sps:$4 sm:$0xff]  }
 0x259   :  { %v3153_v2 = vpop.f32.mrf.mxu0  ;;  %v3314_v25 = vpop.f32.mrf.mxu1  ;;  %3505 = vmatmul.mubr.bf16.gmra.mxu1 %v6222_v29  ;;  %5707 = vmatmul.mubr.bf16.gmra.mxu0 %v6226_v48  ;;  %v6231_v29 = vld [vmem:[%s9745_s0 + $0x728] ss:$36 sps:$4 sm:$0xff]  }
 0x25a   :  { %v7839_v15 = vadd.f32 %v3153_v2, %v7471_v35  ;;  %v7842_v27 = vadd.f32 %v3314_v25, %v7474_v39  ;;  %3512 = vmatprep.mubr.bf16.mxu1 %v6229_v28  ;;  %5710 = vmatprep.mubr.bf16.mxu0 %v6230_v55  ;;  %v6234_v48 = vld [vmem:[%s9745_s0 + $0x844] ss:$36 sps:$4 sm:$0xff]   ;;  %v6235_v28 = vld [vmem:[%s9745_s0 + $0x770] ss:$36 sps:$4 sm:$0xff]  }
 0x25b   :  { %v3155_v60 = vpop.f32.mrf.mxu0  ;;  %v3316_v10 = vpop.f32.mrf.mxu1 }
 0x25d   :  { %v3156_v43 = vpop.f32.mrf.mxu0  ;;  %v3317_v41 = vpop.f32.mrf.mxu1 }
 0x25e   :  { %v7851_v35 = vadd.f32 %v3156_v43, %v7483_v6  ;;  %v7854_v39 = vadd.f32 %v3317_v41, %v7486_v53 }
 0x25f   :  { %v3158_v55 = vpop.f32.mrf.mxu0  ;;  %v3319_v7 = vpop.f32.mrf.mxu1 }
 0x260   :  { %v6232_v55 = vld [vmem:[%s9745_s0 + $0x840] ss:$36 sps:$4 sm:$0xff]  }
 0x261   :  { %v3161_v2 = vpop.f32.mrf.mxu0  ;;  %v3322_v25 = vpop.f32.mrf.mxu1  ;;  %3513 = vmatmul.mubr.bf16.gmra.mxu1 %v6227_v52  ;;  %5711 = vmatmul.mubr.bf16.gmra.mxu0 %v6231_v29  ;;  %v6236_v52 = vld [vmem:[%s9745_s0 + $0x7b8] ss:$36 sps:$4 sm:$0xff]   ;;  %v6239_v29 = vld [vmem:[%s9745_s0 + $0x88c] ss:$36 sps:$4 sm:$0xff]  }
 0x262   :  { %v7863_v6 = vadd.f32 %v3161_v2, %v7495_v16  ;;  %v7866_v53 = vadd.f32 %v3322_v25, %v7498_v8  ;;  %3520 = vmatprep.mubr.bf16.mxu1 %v6234_v48  ;;  %5714 = vmatprep.mubr.bf16.mxu0 %v6235_v28  ;;  %v6240_v48 = vld [vmem:[%s9745_s0 + $0x800] ss:$36 sps:$4 sm:$0xff]  }
 0x263   :  { %v3163_v60 = vpop.f32.mrf.mxu0  ;;  %v3324_v10 = vpop.f32.mrf.mxu1 }
 0x265   :  { %v3164_v43 = vpop.f32.mrf.mxu0  ;;  %v3325_v41 = vpop.f32.mrf.mxu1 }
 0x266   :  { %v7875_v16 = vadd.f32 %v3164_v43, %v7507_v5  ;;  %v7878_v8 = vadd.f32 %v3325_v41, %v7510_v20 }
 0x267   :  { %v3166_v28 = vpop.f32.mrf.mxu0  ;;  %v3327_v7 = vpop.f32.mrf.mxu1 }
 0x268   :  { %v6237_v28 = vld [vmem:[%s9745_s0 + $0x888] ss:$36 sps:$4 sm:$0xff]  }
 0x269   :  { %v3169_v2 = vpop.f32.mrf.mxu0  ;;  %v3330_v25 = vpop.f32.mrf.mxu1  ;;  %3521 = vmatmul.mubr.bf16.gmra.mxu1 %v6232_v55  ;;  %5715 = vmatmul.mubr.bf16.gmra.mxu0 %v6236_v52  ;;  %v6241_v55 = vld [vmem:[%s9745_s0 + $0x848] ss:$36 sps:$4 sm:$0xff]   ;;  %v6244_v52 = vld [vmem:[%s9745_s0 + $0x8d4] ss:$36 sps:$4 sm:$0xff]  }
 0x26a   :  { %v7887_v5 = vadd.f32 %v3169_v2, %v7519_v63  ;;  %v7890_v20 = vadd.f32 %v3330_v25, %v7522_v38  ;;  %3528 = vmatprep.mubr.bf16.mxu1 %v6239_v29  ;;  %5718 = vmatprep.mubr.bf16.mxu0 %v6240_v48  ;;  %v6245_v29 = vld [vmem:[%s9745_s0 + $0x890] ss:$36 sps:$4 sm:$0xff]  }
 0x26b   :  { %v3171_v60 = vpop.f32.mrf.mxu0  ;;  %v3332_v10 = vpop.f32.mrf.mxu1 }
 0x26d   :  { %v3172_v43 = vpop.f32.mrf.mxu0  ;;  %v3333_v41 = vpop.f32.mrf.mxu1 }
 0x26e   :  { %v7899_v63 = vadd.f32 %v3172_v43, %v7531_v24  ;;  %v7902_v38 = vadd.f32 %v3333_v41, %v7534_v54 }
 0x26f   :  { %v3174_v48 = vpop.f32.mrf.mxu0  ;;  %v3335_v7 = vpop.f32.mrf.mxu1 }
 0x270   :  { %v6242_v48 = vld [vmem:[%s9745_s0 + $0x8d0] ss:$36 sps:$4 sm:$0xff]  }
 0x271   :  { %v3177_v2 = vpop.f32.mrf.mxu0  ;;  %v3338_v25 = vpop.f32.mrf.mxu1  ;;  %3529 = vmatmul.mubr.bf16.gmra.mxu1 %v6237_v28  ;;  %5719 = vmatmul.mubr.bf16.gmra.mxu0 %v6241_v55  ;;  %v6246_v28 = vld [vmem:[%s9745_s0 + $0x8d8] ss:$36 sps:$4 sm:$0xff]  }
 0x272   :  { %v7911_v24 = vadd.f32 %v3177_v2, %v7543_v46  ;;  %v7914_v54 = vadd.f32 %v3338_v25, %v7546_v12  ;;  %3536 = vmatprep.mubr.bf16.mxu1 %v6244_v52  ;;  %5722 = vmatprep.mubr.bf16.mxu0 %v6245_v29 }
 0x273   :  { %v3179_v60 = vpop.f32.mrf.mxu0  ;;  %v3340_v10 = vpop.f32.mrf.mxu1 }
 0x274   :  { %9870 = vst [vmem:[#allocation32_spill] sm:$0xff] %v7911_v24 }
 0x275   :  { %v3180_v43 = vpop.f32.mrf.mxu0  ;;  %v3341_v41 = vpop.f32.mrf.mxu1 }
 0x276   :  { %v7923_v46 = vadd.f32 %v3180_v43, %v7555_v4  ;;  %v7926_v12 = vadd.f32 %v3341_v41, %v7558_v33 }
 0x277   :  { %v3182_v55 = vpop.f32.mrf.mxu0  ;;  %v3343_v52 = vpop.f32.mrf.mxu1 }
 0x279   :  { %v3185_v29 = vpop.f32.mrf.mxu0  ;;  %v3346_v7 = vpop.f32.mrf.mxu1  ;;  %3537 = vmatmul.mubr.bf16.gmra.mxu1 %v6242_v48  ;;  %5723 = vmatmul.mubr.bf16.gmra.mxu0 %v6246_v28  ;;  %v2905_v48 = vadd.f32 %v7590_v22, %v6869_v44 }
 0x27a   :  { %v7929_v2 = vadd.f32 %v3185_v29, %v7567_v31  ;;  %v7932_v25 = vadd.f32 %v3346_v7, %v7570_v47 }
 0x27b   :  { %v3187_v60 = vpop.f32.mrf.mxu0  ;;  %v3348_v10 = vpop.f32.mrf.mxu1 }
 0x27c   :  { %v9873_v10 = vld [vmem:[#allocation16_spill] sm:$0xff] }
 0x27d   :  { %v3188_v24 = vpop.f32.mrf.mxu0  ;;  %v3349_v4 = vpop.f32.mrf.mxu1 }
 0x27e   :  { %v7935_v43 = vadd.f32 %v3188_v24, %v7579_v51  ;;  %v7938_v33 = vadd.f32 %v3349_v4, %v7582_v9  ;;  %v2908_v51 = vadd.f32 %v7595_v59, %v6877_v49 }
 0x27f   :  { %v3190_v41 = vpop.f32.mrf.mxu0  ;;  %v3351_v55 = vpop.f32.mrf.mxu1 }
 0x280   :  { %v9874_v41 = vld [vmem:[#allocation2_spill] sm:$0xff] }
 0x281   :  { %v3193_v31 = vpop.f32.mrf.mxu0  ;;  %v3354_v28 = vpop.f32.mrf.mxu1  ;;  %v2913_v55 = vadd.f32 %v7612_v45, %v9874_v41 }
 0x282   :  { %v7942_v52 = vadd.f32 %v3193_v31, %v2905_v48  ;;  %v7945_v47 = vadd.f32 %v3354_v28, %v7593_v19 }
 0x283   :  { %v3195_v29 = vpop.f32.mrf.mxu0  ;;  %v3356_v7 = vpop.f32.mrf.mxu1 }
 0x284   :  { %9871 = vst [vmem:[#allocation33_spill] sm:$0xff] %v7942_v52  ;;  %v9876_v29 = vld [vmem:[#allocation3_spill] sm:$0xff]  ;;  %v9877_v7 = vld [vmem:[#allocation17_spill] sm:$0xff] }
 0x285   :  { %v3196_v24 = vpop.f32.mrf.mxu0  ;;  %v3357_v9 = vpop.f32.mrf.mxu1 }
 0x286   :  { %v7949_v60 = vadd.f32 %v3196_v24, %v2908_v51  ;;  %v7952_v4 = vadd.f32 %v3357_v9, %v9873_v10  ;;  %v2916_v51 = vadd.f32 %v9877_v7, %v9876_v29  ;;  %v9882_v7 = vld [vmem:[#allocation5_spill] sm:$0xff] }
 0x287   :  { %v3198_v44 = vpop.f32.mrf.mxu0  ;;  %v3359_v22 = vpop.f32.mrf.mxu1 }
 0x288   :  { %9872 = vst [vmem:[#allocation34_spill] sm:$0xff] %v7949_v60  ;;  %v9879_v44 = vld [vmem:[#allocation18_spill] sm:$0xff]  ;;  %v9880_v60 = vld [vmem:[#allocation4_spill] sm:$0xff] }
 0x289   :  { %v3201_v48 = vpop.f32.mrf.mxu0  ;;  %v3362_v19 = vpop.f32.mrf.mxu1 }
 0x28a   :  { %v7956_v31 = vadd.f32 %v3201_v48, %v2913_v55  ;;  %v7959_v28 = vadd.f32 %v3362_v19, %v7615_v32  ;;  %v2921_v55 = vadd.f32 %v7634_v36, %v9880_v60 }
 0x28b   :  { %v3203_v49 = vpop.f32.mrf.mxu0  ;;  %v3364_v59 = vpop.f32.mrf.mxu1 }
 0x28c   :  { %9875 = vst [vmem:[#allocation16_spill] sm:$0xff] %v7956_v31  ;;  %v9886_v31 = vld [vmem:[#allocation6_spill] sm:$0xff] }
 0x28d   :  { %v3204_v24 = vpop.f32.mrf.mxu0  ;;  %v3365_v9 = vpop.f32.mrf.mxu1 }
 0x28e   :  { %v7963_v10 = vadd.f32 %v3204_v24, %v2916_v51  ;;  %v7966_v22 = vadd.f32 %v3365_v9, %v9879_v44  ;;  %v9883_v51 = vld [vmem:[#allocation19_spill] sm:$0xff] }
 0x28f   :  { %v3206_v45 = vpop.f32.mrf.mxu0  ;;  %v3367_v41 = vpop.f32.mrf.mxu1  ;;  %v2924_v24 = vadd.f32 %v9883_v51, %v9882_v7  ;;  %v9888_v51 = vld [vmem:[#allocation7_spill] sm:$0xff] }
 0x290   :  { %9878 = vst [vmem:[#allocation2_spill] sm:$0xff] %v7963_v10  ;;  %v9885_v45 = vld [vmem:[#allocation20_spill] sm:$0xff] }
 0x291   :  { %v3209_v48 = vpop.f32.mrf.mxu0  ;;  %v3370_v32 = vpop.f32.mrf.mxu1 }
 0x292   :  { %v7970_v19 = vadd.f32 %v3209_v48, %v2921_v55  ;;  %v7973_v49 = vadd.f32 %v3370_v32, %v7637_v50  ;;  %v2929_v55 = vadd.f32 %v7656_v17, %v9886_v31 }
 0x293   :  { %v3211_v59 = vpop.f32.mrf.mxu0  ;;  %v3372_v29 = vpop.f32.mrf.mxu1 }
 0x294   :  { %9881 = vst [vmem:[#allocation3_spill] sm:$0xff] %v7970_v19  ;;  %v9892_v19 = vld [vmem:[#allocation8_spill] sm:$0xff] }
 0x295   :  { %v3212_v10 = vpop.f32.mrf.mxu0  ;;  %v3373_v9 = vpop.f32.mrf.mxu1 }
 0x296   :  { %v7977_v44 = vadd.f32 %v3212_v10, %v2924_v24  ;;  %v7980_v41 = vadd.f32 %v3373_v9, %v9885_v45  ;;  %v9889_v10 = vld [vmem:[#allocation21_spill] sm:$0xff] }
 0x297   :  { %v3214_v36 = vpop.f32.mrf.mxu0  ;;  %v3375_v60 = vpop.f32.mrf.mxu1  ;;  %v2932_v24 = vadd.f32 %v9889_v10, %v9888_v51  ;;  %v9894_v10 = vld [vmem:[#allocation9_spill] sm:$0xff] }
 0x298   :  { %9884 = vst [vmem:[#allocation17_spill] sm:$0xff] %v7977_v44  ;;  %v9891_v36 = vld [vmem:[#allocation22_spill] sm:$0xff] }
 0x299   :  { %v3217_v48 = vpop.f32.mrf.mxu0  ;;  %v3378_v50 = vpop.f32.mrf.mxu1 }
 0x29a   :  { %v7984_v32 = vadd.f32 %v3217_v48, %v2929_v55  ;;  %v7987_v59 = vadd.f32 %v3378_v50, %v7659_v61  ;;  %v2937_v55 = vadd.f32 %v7678_v3, %v9892_v19 }
 0x29b   :  { %v3219_v29 = vpop.f32.mrf.mxu0  ;;  %v3380_v7 = vpop.f32.mrf.mxu1 }
 0x29c   :  { %9887 = vst [vmem:[#allocation18_spill] sm:$0xff] %v7984_v32  ;;  %v9898_v32 = vld [vmem:[#allocation10_spill] sm:$0xff] }
 0x29d   :  { %v3220_v44 = vpop.f32.mrf.mxu0  ;;  %v3381_v9 = vpop.f32.mrf.mxu1 }
 0x29e   :  { %v7991_v45 = vadd.f32 %v3220_v44, %v2932_v24  ;;  %v7994_v60 = vadd.f32 %v3381_v9, %v9891_v36  ;;  %v9895_v44 = vld [vmem:[#allocation23_spill] sm:$0xff] }
 0x29f   :  { %v3222_v17 = vpop.f32.mrf.mxu0  ;;  %v3383_v31 = vpop.f32.mrf.mxu1  ;;  %v2940_v24 = vadd.f32 %v9895_v44, %v9894_v10  ;;  %v9900_v44 = vld [vmem:[#allocation11_spill] sm:$0xff] }
 0x2a0   :  { %9890 = vst [vmem:[#allocation4_spill] sm:$0xff] %v7991_v45  ;;  %v9897_v17 = vld [vmem:[#allocation24_spill] sm:$0xff] }
 0x2a1   :  { %v3225_v48 = vpop.f32.mrf.mxu0  ;;  %v3386_v61 = vpop.f32.mrf.mxu1 }
 0x2a2   :  { %v7998_v50 = vadd.f32 %v3225_v48, %v2937_v55  ;;  %v8001_v29 = vadd.f32 %v3386_v61, %v7681_v23  ;;  %v2945_v55 = vadd.f32 %v7700_v18, %v9898_v32 }
 0x2a3   :  { %v3227_v7 = vpop.f32.mrf.mxu0  ;;  %v3388_v51 = vpop.f32.mrf.mxu1 }
 0x2a4   :  { %9893 = vst [vmem:[#allocation5_spill] sm:$0xff] %v7998_v50  ;;  %v9904_v50 = vld [vmem:[#allocation12_spill] sm:$0xff] }
 0x2a5   :  { %v3228_v45 = vpop.f32.mrf.mxu0  ;;  %v3389_v9 = vpop.f32.mrf.mxu1 }
 0x2a6   :  { %v8005_v36 = vadd.f32 %v3228_v45, %v2940_v24  ;;  %v8008_v31 = vadd.f32 %v3389_v9, %v9897_v17  ;;  %v9901_v45 = vld [vmem:[#allocation25_spill] sm:$0xff] }
 0x2a7   :  { %v3230_v3 = vpop.f32.mrf.mxu0  ;;  %v3391_v19 = vpop.f32.mrf.mxu1  ;;  %v2948_v24 = vadd.f32 %v9901_v45, %v9900_v44  ;;  %v9906_v45 = vld [vmem:[#allocation13_spill] sm:$0xff] }
 0x2a8   :  { %9896 = vst [vmem:[#allocation19_spill] sm:$0xff] %v8005_v36  ;;  %v9903_v3 = vld [vmem:[#allocation26_spill] sm:$0xff] }
 0x2a9   :  { %v3233_v48 = vpop.f32.mrf.mxu0  ;;  %v3394_v23 = vpop.f32.mrf.mxu1 }
 0x2aa   :  { %v8012_v61 = vadd.f32 %v3233_v48, %v2945_v55  ;;  %v8015_v7 = vadd.f32 %v3394_v23, %v7703_v56  ;;  %v2953_v55 = vadd.f32 %v7722_v0, %v9904_v50 }
 0x2ab   :  { %v3235_v51 = vpop.f32.mrf.mxu0  ;;  %v3396_v10 = vpop.f32.mrf.mxu1 }
 0x2ac   :  { %9899 = vst [vmem:[#allocation20_spill] sm:$0xff] %v8012_v61  ;;  %v9910_v61 = vld [vmem:[#allocation14_spill] sm:$0xff] }
 0x2ad   :  { %v3236_v36 = vpop.f32.mrf.mxu0  ;;  %v3397_v9 = vpop.f32.mrf.mxu1 }
 0x2ae   :  { %v8019_v17 = vadd.f32 %v3236_v36, %v2948_v24  ;;  %v8022_v19 = vadd.f32 %v3397_v9, %v9903_v3  ;;  %v9907_v36 = vld [vmem:[#allocation27_spill] sm:$0xff] }
 0x2af   :  { %v3238_v18 = vpop.f32.mrf.mxu0  ;;  %v3399_v32 = vpop.f32.mrf.mxu1  ;;  %v2956_v24 = vadd.f32 %v9907_v36, %v9906_v45 }
 0x2b0   :  { %9902 = vst [vmem:[#allocation6_spill] sm:$0xff] %v8019_v17  ;;  %v9909_v18 = vld [vmem:[#allocation28_spill] sm:$0xff] }
 0x2b1   :  { %v3241_v48 = vpop.f32.mrf.mxu0  ;;  %v3402_v56 = vpop.f32.mrf.mxu1 }
 0x2b2   :  { %v8026_v23 = vadd.f32 %v3241_v48, %v2953_v55  ;;  %v8029_v51 = vadd.f32 %v3402_v56, %v7725_v26  ;;  %v2961_v55 = vadd.f32 %v7744_v58, %v9910_v61 }
 0x2b3   :  { %v3243_v10 = vpop.f32.mrf.mxu0  ;;  %v3404_v44 = vpop.f32.mrf.mxu1 }
 0x2b4   :  { %9905 = vst [vmem:[#allocation7_spill] sm:$0xff] %v8026_v23  ;;  %v9911_v10 = vld [vmem:[#allocation29_spill] sm:$0xff]  ;;  %v9912_v23 = vld [vmem:[#allocation15_spill] sm:$0xff] }
 0x2b5   :  { %v3244_v17 = vpop.f32.mrf.mxu0  ;;  %v3405_v9 = vpop.f32.mrf.mxu1 }
 0x2b6   :  { %v8033_v3 = vadd.f32 %v3244_v17, %v2956_v24  ;;  %v8036_v32 = vadd.f32 %v3405_v9, %v9909_v18  ;;  %v9913_v17 = vld [vmem:[#allocation30_spill] sm:$0xff] }
 0x2b7   :  { %v3246_v0 = vpop.f32.mrf.mxu0  ;;  %v3407_v50 = vpop.f32.mrf.mxu1  ;;  %v2964_v24 = vadd.f32 %v9913_v17, %v9912_v23 }
 0x2b8   :  { %9908 = vst [vmem:[#allocation21_spill] sm:$0xff] %v8033_v3  ;;  %v9914_v0 = vld [vmem:[#allocation31_spill] sm:$0xff] }
 0x2b9   :  { %v3249_v48 = vpop.f32.mrf.mxu0  ;;  %v3410_v26 = vpop.f32.mrf.mxu1 }
 0x2ba   :  { %v8040_v56 = vadd.f32 %v3249_v48, %v2961_v55  ;;  %v8043_v44 = vadd.f32 %v3410_v26, %v9911_v10 }
 0x2bb   :  { %v3251_v45 = vpop.f32.mrf.mxu0  ;;  %v3412_v36 = vpop.f32.mrf.mxu1 }
 0x2bd   :  { %v3252_v3 = vpop.f32.mrf.mxu0  ;;  %v3413_v9 = vpop.f32.mrf.mxu1 }
 0x2be   :  { %v8047_v18 = vadd.f32 %v3252_v3, %v2964_v24  ;;  %v8050_v50 = vadd.f32 %v3413_v9, %v9914_v0 }
 0x2bf   :  { %v3254_v58 = vpop.f32.mrf.mxu0  ;;  %v3415_v61 = vpop.f32.mrf.mxu1 }
 0x2c1   :  { %v3418_v52 = vpop.f32.mrf.mxu1  ;;  %v5664_v55 = vpop.f32.mrf.mxu0 }
 0x2c2   :  { %v8053_v48 = vadd.f32 %v3418_v52, %v7767_v40  ;;  %v8062_v9 = vadd.f32 %v5664_v55, %v7794_v37 }
 0x2c3   :  { %v3420_v26 = vpop.f32.mrf.mxu1  ;;  %v3579_v10 = vpop.f32.mrf.mxu0 }
 0x2c4   :  { %v8056_v45 = vadd.f32 %v3579_v10, %v7770_v14  ;;  %v3906_v26 = vmul.f32 %v8062_v9, %v8062_v9 }
 0x2c5   :  { %v3421_v23 = vpop.f32.mrf.mxu1  ;;  %v5665_v36 = vpop.f32.mrf.mxu0 }
 0x2c6   :  { %9915 = vst [vmem:[#allocation22_spill] sm:$0xff] %v8056_v45  ;;  %v8059_v3 = vadd.f32 %v3421_v23, %v7779_v30  ;;  %v3904_v40 = vmul.f32 %v8056_v45, %v8056_v45  ;;  %v8070_v14 = vadd.f32 %v5665_v36, %v7806_v57 }
 0x2c7   :  { %v3423_v17 = vpop.f32.mrf.mxu1  ;;  %v3582_v24 = vpop.f32.mrf.mxu0 }
 0x2c8   :  { %v8065_v0 = vadd.f32 %v3582_v24, %v7782_v11  ;;  %v3907_v24 = vmul.f32 %v8070_v14, %v8070_v14 }
 0x2c9   :  { %v3426_v52 = vpop.f32.mrf.mxu1  ;;  %v5668_v58 = vpop.f32.mrf.mxu0 }
 0x2ca   :  { %9916 = vst [vmem:[#allocation8_spill] sm:$0xff] %v8065_v0  ;;  %v3834_v30 = vadd.f32 %v8065_v0, %v8056_v45  ;;  %v3905_v61 = vmul.f32 %v8065_v0, %v8065_v0  ;;  %v8077_v37 = vadd.f32 %v3426_v52, %v7791_v42 }
 0x2cb   :  { %v3428_v55 = vpop.f32.mrf.mxu1  ;;  %v3595_v11 = vpop.f32.mrf.mxu0 }
 0x2cc   :  { %v3835_v10 = vadd.f32 %v3834_v30, %v8062_v9  ;;  %v3968_v23 = vadd.f32 %v3905_v61, %v3904_v40  ;;  %v8083_v57 = vadd.f32 %v3595_v11, %v7818_v1  ;;  %v8092_v55 = vadd.f32 %v5668_v58, %v7842_v27 }
 0x2cd   :  { %v3429_v36 = vpop.f32.mrf.mxu1  ;;  %v5669_v17 = vpop.f32.mrf.mxu0 }
 0x2ce   :  { %v3969_v0 = vadd.f32 %v3968_v23, %v3906_v26  ;;  %v3836_v42 = vadd.f32 %v3835_v10, %v8070_v14  ;;  %v8089_v52 = vadd.f32 %v3429_v36, %v7803_v62  ;;  %v3908_v1 = vmul.f32 %v8083_v57, %v8083_v57 }
 0x2cf   :  { %v3431_v45 = vpop.f32.mrf.mxu1  ;;  %v3598_v30 = vpop.f32.mrf.mxu0  ;;  %v8101_v26 = vadd.f32 %v5669_v17, %v7854_v39 }
 0x2d0   :  { %v3837_v40 = vadd.f32 %v3836_v42, %v8083_v57  ;;  %v3970_v61 = vadd.f32 %v3969_v0, %v3907_v24  ;;  %v8098_v11 = vadd.f32 %v3598_v30, %v7830_v13  ;;  %v3910_v13 = vmul.f32 %v8092_v55, %v8092_v55 }
 0x2d1   :  { %v3434_v10 = vpop.f32.mrf.mxu1  ;;  %v5672_v62 = vpop.f32.mrf.mxu0 }
 0x2d2   :  { %v3971_v23 = vadd.f32 %v3970_v61, %v3908_v1  ;;  %v3838_v27 = vadd.f32 %v3837_v40, %v8098_v11  ;;  %v3909_v45 = vmul.f32 %v8098_v11, %v8098_v11  ;;  %v8107_v58 = vadd.f32 %v3434_v10, %v7815_v34 }
 0x2d3   :  { %v3436_v36 = vpop.f32.mrf.mxu1  ;;  %v3611_v42 = vpop.f32.mrf.mxu0  ;;  %v3911_v40 = vmul.f32 %v8101_v26, %v8101_v26  ;;  %v8122_v10 = vadd.f32 %v5672_v62, %v7890_v20 }
 0x2d4   :  { %v3839_v0 = vadd.f32 %v3838_v27, %v8092_v55  ;;  %v3972_v39 = vadd.f32 %v3971_v23, %v3909_v45  ;;  %v8113_v17 = vadd.f32 %v3611_v42, %v7866_v53 }
 0x2d5   :  { %v3437_v24 = vpop.f32.mrf.mxu1  ;;  %v5673_v30 = vpop.f32.mrf.mxu0 }
 0x2d6   :  { %v3973_v1 = vadd.f32 %v3972_v39, %v3910_v13  ;;  %v3840_v34 = vadd.f32 %v3839_v0, %v8101_v26  ;;  %v8119_v61 = vadd.f32 %v3437_v24, %v7827_v21  ;;  %v3912_v53 = vmul.f32 %v8113_v17, %v8113_v17 }
 0x2d7   :  { %v3439_v36 = vpop.f32.mrf.mxu1  ;;  %v3614_v27 = vpop.f32.mrf.mxu0  ;;  %v8131_v13 = vadd.f32 %v5673_v30, %v7902_v38 }
 0x2d8   :  { %v3841_v23 = vadd.f32 %v3840_v34, %v8113_v17  ;;  %v3974_v45 = vadd.f32 %v3973_v1, %v3911_v40  ;;  %v8128_v42 = vadd.f32 %v3614_v27, %v7878_v8  ;;  %v3914_v8 = vmul.f32 %v8122_v10, %v8122_v10 }
 0x2d9   :  { %v3442_v0 = vpop.f32.mrf.mxu1  ;;  %v5676_v21 = vpop.f32.mrf.mxu0 }
 0x2da   :  { %v3975_v39 = vadd.f32 %v3974_v45, %v3912_v53  ;;  %v3842_v20 = vadd.f32 %v3841_v23, %v8128_v42  ;;  %v3913_v62 = vmul.f32 %v8128_v42, %v8128_v42  ;;  %v8137_v24 = vadd.f32 %v3442_v0, %v7839_v15 }
 0x2db   :  { %v3444_v34 = vpop.f32.mrf.mxu1  ;;  %v3627_v36 = vpop.f32.mrf.mxu0  ;;  %v3915_v23 = vmul.f32 %v8131_v13, %v8131_v13  ;;  %v8152_v0 = vadd.f32 %v5676_v21, %v7932_v25 }
 0x2dc   :  { %v3843_v40 = vadd.f32 %v3842_v20, %v8122_v10  ;;  %v3976_v38 = vadd.f32 %v3975_v39, %v3913_v62  ;;  %v8143_v30 = vadd.f32 %v3627_v36, %v7914_v54 }
 0x2dd   :  { %v3445_v1 = vpop.f32.mrf.mxu1  ;;  %v5677_v27 = vpop.f32.mrf.mxu0 }
 0x2de   :  { %v3977_v53 = vadd.f32 %v3976_v38, %v3914_v8  ;;  %v3844_v15 = vadd.f32 %v3843_v40, %v8131_v13  ;;  %v8149_v45 = vadd.f32 %v3445_v1, %v7851_v35  ;;  %v3916_v54 = vmul.f32 %v8143_v30, %v8143_v30 }
 0x2df   :  { %v3447_v34 = vpop.f32.mrf.mxu1  ;;  %v3630_v20 = vpop.f32.mrf.mxu0  ;;  %v8161_v8 = vadd.f32 %v5677_v27, %v7938_v33 }
 0x2e0   :  { %v3845_v39 = vadd.f32 %v3844_v15, %v8143_v30  ;;  %v3978_v62 = vadd.f32 %v3977_v53, %v3915_v23  ;;  %v8158_v36 = vadd.f32 %v3630_v20, %v7926_v12  ;;  %v3918_v12 = vmul.f32 %v8152_v0, %v8152_v0 }
 0x2e1   :  { %v3450_v40 = vpop.f32.mrf.mxu1  ;;  %v5680_v35 = vpop.f32.mrf.mxu0 }
 0x2e2   :  { %v3979_v38 = vadd.f32 %v3978_v62, %v3916_v54  ;;  %v3846_v25 = vadd.f32 %v3845_v39, %v8158_v36  ;;  %v3917_v21 = vmul.f32 %v8158_v36, %v8158_v36  ;;  %v8167_v1 = vadd.f32 %v3450_v40, %v7863_v6 }
 0x2e3   :  { %v3452_v15 = vpop.f32.mrf.mxu1  ;;  %v3643_v34 = vpop.f32.mrf.mxu0  ;;  %v3919_v39 = vmul.f32 %v8161_v8, %v8161_v8  ;;  %v8182_v40 = vadd.f32 %v5680_v35, %v7959_v28 }
 0x2e4   :  { %v3847_v23 = vadd.f32 %v3846_v25, %v8152_v0  ;;  %v3980_v33 = vadd.f32 %v3979_v38, %v3917_v21  ;;  %v8173_v27 = vadd.f32 %v3643_v34, %v7945_v47 }
 0x2e5   :  { %v3453_v53 = vpop.f32.mrf.mxu1  ;;  %v5681_v20 = vpop.f32.mrf.mxu0 }
 0x2e6   :  { %v3981_v54 = vadd.f32 %v3980_v33, %v3918_v12  ;;  %v3848_v6 = vadd.f32 %v3847_v23, %v8161_v8  ;;  %v8179_v62 = vadd.f32 %v3453_v53, %v7875_v16  ;;  %v3920_v47 = vmul.f32 %v8173_v27, %v8173_v27 }
 0x2e7   :  { %v3455_v15 = vpop.f32.mrf.mxu1  ;;  %v3646_v25 = vpop.f32.mrf.mxu0  ;;  %v8191_v12 = vadd.f32 %v5681_v20, %v7966_v22 }
 0x2e8   :  { %v3849_v38 = vadd.f32 %v3848_v6, %v8173_v27  ;;  %v3982_v21 = vadd.f32 %v3981_v54, %v3919_v39  ;;  %v8188_v34 = vadd.f32 %v3646_v25, %v7952_v4  ;;  %v3922_v4 = vmul.f32 %v8182_v40, %v8182_v40 }
 0x2e9   :  { %v3458_v23 = vpop.f32.mrf.mxu1  ;;  %v5684_v16 = vpop.f32.mrf.mxu0 }
 0x2ea   :  { %v3983_v33 = vadd.f32 %v3982_v21, %v3920_v47  ;;  %v3850_v28 = vadd.f32 %v3849_v38, %v8188_v34  ;;  %v3921_v35 = vmul.f32 %v8188_v34, %v8188_v34  ;;  %v8197_v53 = vadd.f32 %v3458_v23, %v7887_v5 }
 0x2eb   :  { %v3460_v6 = vpop.f32.mrf.mxu1  ;;  %v3659_v15 = vpop.f32.mrf.mxu0  ;;  %v3923_v38 = vmul.f32 %v8191_v12, %v8191_v12  ;;  %v8212_v23 = vadd.f32 %v5684_v16, %v7987_v59 }
 0x2ec   :  { %v3851_v39 = vadd.f32 %v3850_v28, %v8182_v40  ;;  %v3984_v22 = vadd.f32 %v3983_v33, %v3921_v35  ;;  %v8203_v20 = vadd.f32 %v3659_v15, %v7973_v49 }
 0x2ed   :  { %v3461_v54 = vpop.f32.mrf.mxu1  ;;  %v5685_v25 = vpop.f32.mrf.mxu0 }
 0x2ee   :  { %9917 = vst [vmem:[#allocation9_spill] sm:$0xff] %v8203_v20  ;;  %v3985_v47 = vadd.f32 %v3984_v22, %v3922_v4  ;;  %v3852_v5 = vadd.f32 %v3851_v39, %v8191_v12  ;;  %v8209_v21 = vadd.f32 %v3461_v54, %v7899_v63  ;;  %v3924_v49 = vmul.f32 %v8203_v20, %v8203_v20  ;;  %v9918_v54 = vld [vmem:[#allocation32_spill] sm:$0xff] }
 0x2ef   :  { %v3463_v6 = vpop.f32.mrf.mxu1  ;;  %v3662_v28 = vpop.f32.mrf.mxu0  ;;  %v8221_v4 = vadd.f32 %v5685_v25, %v7994_v60 }
 0x2f0   :  { %v3853_v33 = vadd.f32 %v3852_v5, %v8203_v20  ;;  %v3986_v35 = vadd.f32 %v3985_v47, %v3923_v38  ;;  %v8218_v15 = vadd.f32 %v3662_v28, %v7980_v41  ;;  %v3926_v41 = vmul.f32 %v8212_v23, %v8212_v23 }
 0x2f1   :  { %v3466_v39 = vpop.f32.mrf.mxu1  ;;  %v5688_v63 = vpop.f32.mrf.mxu0 }
 0x2f2   :  { %v3987_v22 = vadd.f32 %v3986_v35, %v3924_v49  ;;  %v3854_v59 = vadd.f32 %v3853_v33, %v8218_v15  ;;  %v3925_v16 = vmul.f32 %v8218_v15, %v8218_v15  ;;  %v8227_v5 = vadd.f32 %v3466_v39, %v9918_v54 }
 0x2f3   :  { %v3468_v6 = vpop.f32.mrf.mxu1  ;;  %v3675_v20 = vpop.f32.mrf.mxu0  ;;  %v3927_v33 = vmul.f32 %v8221_v4, %v8221_v4  ;;  %v8242_v54 = vadd.f32 %v5688_v63, %v8015_v7 }
 0x2f4   :  { %v3855_v38 = vadd.f32 %v3854_v59, %v8212_v23  ;;  %v3988_v60 = vadd.f32 %v3987_v22, %v3925_v16  ;;  %v8233_v25 = vadd.f32 %v3675_v20, %v8001_v29 }
 0x2f5   :  { %v3469_v47 = vpop.f32.mrf.mxu1  ;;  %v5689_v28 = vpop.f32.mrf.mxu0 }
 0x2f6   :  { %v3989_v49 = vadd.f32 %v3988_v60, %v3926_v41  ;;  %v3856_v35 = vadd.f32 %v3855_v38, %v8221_v4  ;;  %v8239_v39 = vadd.f32 %v3469_v47, %v7923_v46  ;;  %v3928_v29 = vmul.f32 %v8233_v25, %v8233_v25 }
 0x2f7   :  { %v3471_v6 = vpop.f32.mrf.mxu1  ;;  %v3678_v59 = vpop.f32.mrf.mxu0  ;;  %v8251_v41 = vadd.f32 %v5689_v28, %v8022_v19 }
 0x2f8   :  { %v3857_v22 = vadd.f32 %v3856_v35, %v8233_v25  ;;  %v3990_v20 = vadd.f32 %v3989_v49, %v3927_v33  ;;  %v8248_v16 = vadd.f32 %v3678_v59, %v8008_v31  ;;  %v3930_v31 = vmul.f32 %v8242_v54, %v8242_v54 }
 0x2f9   :  { %v3474_v38 = vpop.f32.mrf.mxu1  ;;  %v5692_v46 = vpop.f32.mrf.mxu0 }
 0x2fa   :  { %v3991_v60 = vadd.f32 %v3990_v20, %v3928_v29  ;;  %v3858_v7 = vadd.f32 %v3857_v22, %v8248_v16  ;;  %v3929_v63 = vmul.f32 %v8248_v16, %v8248_v16  ;;  %v8257_v47 = vadd.f32 %v3474_v38, %v7929_v2 }
 0x2fb   :  { %v3476_v35 = vpop.f32.mrf.mxu1  ;;  %v3691_v6 = vpop.f32.mrf.mxu0  ;;  %v3931_v22 = vmul.f32 %v8251_v41, %v8251_v41  ;;  %v8272_v38 = vadd.f32 %v5692_v46, %v8043_v44 }
 0x2fc   :  { %v3859_v33 = vadd.f32 %v3858_v7, %v8242_v54  ;;  %v3992_v19 = vadd.f32 %v3991_v60, %v3929_v63  ;;  %v8263_v28 = vadd.f32 %v3691_v6, %v8029_v51 }
 0x2fd   :  { %v3477_v49 = vpop.f32.mrf.mxu1  ;;  %v5693_v59 = vpop.f32.mrf.mxu0 }
 0x2fe   :  { %9919 = vst [vmem:[#allocation23_spill] sm:$0xff] %v8263_v28  ;;  %v3993_v29 = vadd.f32 %v3992_v19, %v3930_v31  ;;  %v3860_v2 = vadd.f32 %v3859_v33, %v8251_v41  ;;  %v8269_v20 = vadd.f32 %v3477_v49, %v7935_v43  ;;  %v3932_v51 = vmul.f32 %v8263_v28, %v8263_v28  ;;  %v9921_v49 = vld [vmem:[#allocation33_spill] sm:$0xff] }
 0x2ff   :  { %v3479_v35 = vpop.f32.mrf.mxu1  ;;  %v3694_v7 = vpop.f32.mrf.mxu0  ;;  %v8281_v31 = vadd.f32 %v5693_v59, %v8050_v50 }
 0x300   :  { %v3861_v60 = vadd.f32 %v3860_v2, %v8263_v28  ;;  %v3994_v63 = vadd.f32 %v3993_v29, %v3931_v22  ;;  %v8278_v6 = vadd.f32 %v3694_v7, %v8036_v32  ;;  %v3934_v32 = vmul.f32 %v8272_v38, %v8272_v38 }
 0x301   :  { %v3482_v33 = vpop.f32.mrf.mxu1  ;;  %v5696_v43 = vpop.f32.mrf.mxu0 }
 0x302   :  { %9920 = vst [vmem:[#allocation24_spill] sm:$0xff] %v8278_v6  ;;  %v3995_v19 = vadd.f32 %v3994_v63, %v3932_v51  ;;  %v3862_v44 = vadd.f32 %v3861_v60, %v8278_v6  ;;  %v3933_v46 = vmul.f32 %v8278_v6, %v8278_v6  ;;  %v8287_v2 = vadd.f32 %v3482_v33, %v9921_v49  ;;  %v9923_v33 = vld [vmem:[#allocation34_spill] sm:$0xff] }
 0x303   :  { %v3484_v35 = vpop.f32.mrf.mxu1  ;;  %v3707_v28 = vpop.f32.mrf.mxu0  ;;  %v3935_v60 = vmul.f32 %v8281_v31, %v8281_v31 }
 0x304   :  { %v3863_v22 = vadd.f32 %v3862_v44, %v8272_v38  ;;  %v3996_v50 = vadd.f32 %v3995_v19, %v3933_v46  ;;  %v8293_v59 = vadd.f32 %v3707_v28, %v8053_v48  ;;  %v8302_v35 = vadd.f32 %v5696_v43, %v8077_v37  ;;  %v9925_v43 = vld [vmem:[#allocation16_spill] sm:$0xff] }
 0x305   :  { %v3485_v29 = vpop.f32.mrf.mxu1  ;;  %v5697_v7 = vpop.f32.mrf.mxu0 }
 0x306   :  { %9922 = vst [vmem:[#allocation10_spill] sm:$0xff] %v8293_v59  ;;  %v3997_v51 = vadd.f32 %v3996_v50, %v3934_v32  ;;  %v3864_v63 = vadd.f32 %v3863_v22, %v8281_v31  ;;  %v8299_v49 = vadd.f32 %v3485_v29, %v9923_v33  ;;  %v3936_v48 = vmul.f32 %v8293_v59, %v8293_v59 }
 0x307   :  { %v3487_v6 = vpop.f32.mrf.mxu1  ;;  %v3710_v44 = vpop.f32.mrf.mxu0  ;;  %v8311_v32 = vadd.f32 %v5697_v7, %v8089_v52 }
 0x308   :  { %v3865_v19 = vadd.f32 %v3864_v63, %v8293_v59  ;;  %v3998_v28 = vadd.f32 %v3997_v51, %v3935_v60  ;;  %v8308_v46 = vadd.f32 %v3710_v44, %v8059_v3  ;;  %v3938_v3 = vmul.f32 %v8302_v35, %v8302_v35 }
 0x309   :  { %v3490_v22 = vpop.f32.mrf.mxu1  ;;  %v5700_v50 = vpop.f32.mrf.mxu0 }
 0x30a   :  { %9924 = vst [vmem:[#allocation11_spill] sm:$0xff] %v8308_v46  ;;  %v3999_v29 = vadd.f32 %v3998_v28, %v3936_v48  ;;  %v3866_v37 = vadd.f32 %v3865_v19, %v8308_v46  ;;  %v3937_v6 = vmul.f32 %v8308_v46, %v8308_v46  ;;  %v8317_v63 = vadd.f32 %v3490_v22, %v9925_v43  ;;  %v9927_v22 = vld [vmem:[#allocation2_spill] sm:$0xff] }
 0x30b   :  { %v3492_v33 = vpop.f32.mrf.mxu1  ;;  %v3723_v59 = vpop.f32.mrf.mxu0  ;;  %v3939_v19 = vmul.f32 %v8311_v32, %v8311_v32 }
 0x30c   :  { %v3867_v60 = vadd.f32 %v3866_v37, %v8302_v35  ;;  %v4000_v52 = vadd.f32 %v3999_v29, %v3937_v6  ;;  %v8323_v7 = vadd.f32 %v3723_v59, %v8107_v58  ;;  %v8332_v33 = vadd.f32 %v5700_v50, %v8137_v24  ;;  %v9930_v50 = vld [vmem:[#allocation3_spill] sm:$0xff] }
 0x30d   :  { %v3493_v51 = vpop.f32.mrf.mxu1  ;;  %v5701_v44 = vpop.f32.mrf.mxu0 }
 0x30e   :  { %9926 = vst [vmem:[#allocation25_spill] sm:$0xff] %v8323_v7  ;;  %v4001_v48 = vadd.f32 %v4000_v52, %v3938_v3  ;;  %v3868_v28 = vadd.f32 %v3867_v60, %v8311_v32  ;;  %v8329_v43 = vadd.f32 %v3493_v51, %v9927_v22  ;;  %v3940_v58 = vmul.f32 %v8323_v7, %v8323_v7 }
 0x30f   :  { %v3495_v46 = vpop.f32.mrf.mxu1  ;;  %v3726_v37 = vpop.f32.mrf.mxu0  ;;  %v8341_v3 = vadd.f32 %v5701_v44, %v8149_v45 }
 0x310   :  { %v3869_v29 = vadd.f32 %v3868_v28, %v8323_v7  ;;  %v4002_v59 = vadd.f32 %v4001_v48, %v3939_v19  ;;  %v8338_v6 = vadd.f32 %v3726_v37, %v8119_v61  ;;  %v3942_v61 = vmul.f32 %v8332_v33, %v8332_v33 }
 0x311   :  { %9929 = vst [vmem:[#allocation12_spill] sm:$0xff] %v8341_v3  ;;  %v3498_v60 = vpop.f32.mrf.mxu1  ;;  %v5704_v52 = vpop.f32.mrf.mxu0 }
 0x312   :  { %9928 = vst [vmem:[#allocation26_spill] sm:$0xff] %v8338_v6  ;;  %v4003_v51 = vadd.f32 %v4002_v59, %v3940_v58  ;;  %v3870_v24 = vadd.f32 %v3869_v29, %v8338_v6  ;;  %v3941_v46 = vmul.f32 %v8338_v6, %v8338_v6  ;;  %v8347_v28 = vadd.f32 %v3498_v60, %v9930_v50  ;;  %v9932_v60 = vld [vmem:[#allocation17_spill] sm:$0xff] }
 0x313   :  { %v3500_v22 = vpop.f32.mrf.mxu1  ;;  %v3739_v7 = vpop.f32.mrf.mxu0  ;;  %v3943_v29 = vmul.f32 %v8341_v3, %v8341_v3 }
 0x314   :  { %v3871_v19 = vadd.f32 %v3870_v24, %v8332_v33  ;;  %v4004_v45 = vadd.f32 %v4003_v51, %v3941_v46  ;;  %v8353_v44 = vadd.f32 %v3739_v7, %v8167_v1  ;;  %v8362_v22 = vadd.f32 %v5704_v52, %v8197_v53  ;;  %v9934_v52 = vld [vmem:[#allocation18_spill] sm:$0xff] }
 0x315   :  { %v3501_v48 = vpop.f32.mrf.mxu1  ;;  %v5705_v37 = vpop.f32.mrf.mxu0 }
 0x316   :  { %9931 = vst [vmem:[#allocation13_spill] sm:$0xff] %v8353_v44  ;;  %v4005_v58 = vadd.f32 %v4004_v45, %v3942_v61  ;;  %v3872_v59 = vadd.f32 %v3871_v19, %v8341_v3  ;;  %v8359_v50 = vadd.f32 %v3501_v48, %v9932_v60  ;;  %v3944_v1 = vmul.f32 %v8353_v44, %v8353_v44 }
 0x317   :  { %v3503_v6 = vpop.f32.mrf.mxu1  ;;  %v3742_v24 = vpop.f32.mrf.mxu0  ;;  %v8371_v61 = vadd.f32 %v5705_v37, %v8209_v21 }
 0x318   :  { %v3873_v51 = vadd.f32 %v3872_v59, %v8353_v44  ;;  %v4006_v7 = vadd.f32 %v4005_v58, %v3943_v29  ;;  %v8368_v46 = vadd.f32 %v3742_v24, %v8179_v62  ;;  %v3946_v62 = vmul.f32 %v8362_v22, %v8362_v22 }
 0x319   :  { %v3506_v19 = vpop.f32.mrf.mxu1  ;;  %v5708_v45 = vpop.f32.mrf.mxu0 }
 0x31a   :  { %9933 = vst [vmem:[#allocation27_spill] sm:$0xff] %v8368_v46  ;;  %v4007_v48 = vadd.f32 %v4006_v7, %v3944_v1  ;;  %v3874_v53 = vadd.f32 %v3873_v51, %v8368_v46  ;;  %v3945_v6 = vmul.f32 %v8368_v46, %v8368_v46  ;;  %v8377_v59 = vadd.f32 %v3506_v19, %v9934_v52  ;;  %v9936_v19 = vld [vmem:[#allocation4_spill] sm:$0xff] }
 0x31b   :  { %v3508_v60 = vpop.f32.mrf.mxu1  ;;  %v3755_v44 = vpop.f32.mrf.mxu0  ;;  %v3947_v51 = vmul.f32 %v8371_v61, %v8371_v61 }
 0x31c   :  { %v3875_v29 = vadd.f32 %v3874_v53, %v8362_v22  ;;  %v4008_v21 = vadd.f32 %v4007_v48, %v3945_v6  ;;  %v8383_v37 = vadd.f32 %v3755_v44, %v8227_v5  ;;  %v8390_v60 = vadd.f32 %v5708_v45, %v8257_v47  ;;  %v9938_v45 = vld [vmem:[#allocation5_spill] sm:$0xff] }
 0x31d   :  { %v3509_v58 = vpop.f32.mrf.mxu1  ;;  %v5709_v24 = vpop.f32.mrf.mxu0 }
 0x31e   :  { %9935 = vst [vmem:[#allocation28_spill] sm:$0xff] %v8383_v37  ;;  %v4009_v1 = vadd.f32 %v4008_v21, %v3946_v62  ;;  %v3876_v7 = vadd.f32 %v3875_v29, %v8371_v61  ;;  %v3510_v52 = vadd.f32 %v3509_v58, %v9936_v19  ;;  %v3948_v5 = vmul.f32 %v8383_v37, %v8383_v37 }
 0x31f   :  { %v3511_v46 = vpop.f32.mrf.mxu1  ;;  %v3758_v3 = vpop.f32.mrf.mxu0  ;;  %v8399_v6 = vadd.f32 %v5709_v24, %v8269_v20 }
 0x320   :  { %v3877_v48 = vadd.f32 %v3876_v7, %v8383_v37  ;;  %v4010_v44 = vadd.f32 %v4009_v1, %v3947_v51  ;;  %v8396_v53 = vadd.f32 %v3758_v3, %v8239_v39  ;;  %v3950_v51 = vmul.f32 %v8390_v60, %v8390_v60 }
 0x321   :  { %v3514_v62 = vpop.f32.mrf.mxu1  ;;  %v5712_v29 = vpop.f32.mrf.mxu0 }
 0x322   :  { %9937 = vst [vmem:[#allocation14_spill] sm:$0xff] %v8396_v53  ;;  %v4011_v21 = vadd.f32 %v4010_v44, %v3948_v5  ;;  %v3878_v47 = vadd.f32 %v3877_v48, %v8396_v53  ;;  %v3949_v46 = vmul.f32 %v8396_v53, %v8396_v53  ;;  %v3515_v58 = vadd.f32 %v3514_v62, %v9938_v45  ;;  %v9940_v62 = vld [vmem:[#allocation19_spill] sm:$0xff] }
 0x323   :  { %v3516_v7 = vpop.f32.mrf.mxu1  ;;  %v3771_v19 = vpop.f32.mrf.mxu0  ;;  %v3951_v48 = vmul.f32 %v8399_v6, %v8399_v6 }
 0x324   :  { %v3879_v39 = vadd.f32 %v3878_v47, %v8390_v60  ;;  %v4012_v3 = vadd.f32 %v4011_v21, %v3949_v46  ;;  %v8409_v20 = vadd.f32 %v3771_v19, %v8287_v2  ;;  %v8416_v7 = vadd.f32 %v5712_v29, %v8317_v63  ;;  %v9943_v29 = vld [vmem:[#allocation20_spill] sm:$0xff] }
 0x325   :  { %v3517_v24 = vpop.f32.mrf.mxu1  ;;  %v5713_v1 = vpop.f32.mrf.mxu0 }
 0x326   :  { %9939 = vst [vmem:[#allocation29_spill] sm:$0xff] %v8409_v20  ;;  %v4013_v5 = vadd.f32 %v4012_v3, %v3950_v51  ;;  %v3880_v44 = vadd.f32 %v3879_v39, %v8399_v6  ;;  %v3518_v45 = vadd.f32 %v3517_v24, %v9940_v62  ;;  %v3952_v2 = vmul.f32 %v8409_v20, %v8409_v20 }
 0x327   :  { %v3519_v53 = vpop.f32.mrf.mxu1  ;;  %v3774_v37 = vpop.f32.mrf.mxu0  ;;  %v8425_v19 = vadd.f32 %v5713_v1, %v8329_v43 }
 0x328   :  { %v3881_v21 = vadd.f32 %v3880_v44, %v8409_v20  ;;  %v4014_v47 = vadd.f32 %v4013_v5, %v3951_v48  ;;  %v8422_v46 = vadd.f32 %v3774_v37, %v8299_v49  ;;  %v3954_v48 = vmul.f32 %v8416_v7, %v8416_v7 }
 0x329   :  { %9942 = vst [vmem:[#allocation30_spill] sm:$0xff] %v8425_v19  ;;  %v3522_v51 = vpop.f32.mrf.mxu1  ;;  %v5716_v39 = vpop.f32.mrf.mxu0 }
 0x32a   :  { %9941 = vst [vmem:[#allocation15_spill] sm:$0xff] %v8422_v46  ;;  %v4015_v3 = vadd.f32 %v4014_v47, %v3952_v2  ;;  %v3882_v63 = vadd.f32 %v3881_v21, %v8422_v46  ;;  %v3953_v53 = vmul.f32 %v8422_v46, %v8422_v46  ;;  %v3523_v24 = vadd.f32 %v3522_v51, %v9943_v29  ;;  %v9945_v51 = vld [vmem:[#allocation6_spill] sm:$0xff] }
 0x32b   :  { %v3524_v44 = vpop.f32.mrf.mxu1  ;;  %v3787_v62 = vpop.f32.mrf.mxu0  ;;  %v3955_v21 = vmul.f32 %v8425_v19, %v8425_v19 }
 0x32c   :  { %v3883_v49 = vadd.f32 %v3882_v63, %v8416_v7  ;;  %v4016_v37 = vadd.f32 %v4015_v3, %v3953_v53  ;;  %v8435_v43 = vadd.f32 %v3787_v62, %v8347_v28  ;;  %v8442_v44 = vadd.f32 %v5716_v39, %v8377_v59 }
 0x32d   :  { %v3525_v1 = vpop.f32.mrf.mxu1  ;;  %v5717_v5 = vpop.f32.mrf.mxu0 }
 0x32e   :  { %9944 = vst [vmem:[#allocation31_spill] sm:$0xff] %v8435_v43  ;;  %v4017_v2 = vadd.f32 %v4016_v37, %v3954_v48  ;;  %v3884_v47 = vadd.f32 %v3883_v49, %v8425_v19  ;;  %v3526_v29 = vadd.f32 %v3525_v1, %v9945_v51  ;;  %9946 = vst [vmem:[#allocation32_spill] sm:$0xff] %v8442_v44 }
 0x32f   :  { %v3527_v46 = vpop.f32.mrf.mxu1  ;;  %v3790_v20 = vpop.f32.mrf.mxu0  ;;  %v3956_v28 = vmul.f32 %v8435_v43, %v8435_v43  ;;  %v8450_v62 = vadd.f32 %v5717_v5, %v3510_v52 }
 0x330   :  { %v3885_v3 = vadd.f32 %v3884_v47, %v8435_v43  ;;  %v4018_v63 = vadd.f32 %v4017_v2, %v3955_v21  ;;  %v8448_v53 = vadd.f32 %v3790_v20, %v8359_v50  ;;  %v9948_v46 = vld [vmem:[#allocation7_spill] sm:$0xff]  ;;  %v3958_v21 = vmul.f32 %v8442_v44, %v8442_v44 }
 0x331   :  { %v3530_v48 = vpop.f32.mrf.mxu1  ;;  %v5720_v49 = vpop.f32.mrf.mxu0 }
 0x332   :  { %9947 = vst [vmem:[#allocation33_spill] sm:$0xff] %v8448_v53  ;;  %v4019_v37 = vadd.f32 %v4018_v63, %v3956_v28  ;;  %v3886_v1 = vadd.f32 %v3885_v3, %v8448_v53  ;;  %v3957_v59 = vmul.f32 %v8448_v53, %v8448_v53  ;;  %v3531_v39 = vadd.f32 %v3530_v48, %v9948_v46  ;;  %v9950_v53 = vld [vmem:[#allocation21_spill] sm:$0xff] }
 0x333   :  { %v3532_v47 = vpop.f32.mrf.mxu1  ;;  %v3803_v51 = vpop.f32.mrf.mxu0  ;;  %v3959_v3 = vmul.f32 %v8450_v62, %v8450_v62  ;;  %v8465_v46 = vadd.f32 %v5720_v49, %v3523_v24 }
 0x334   :  { %v3887_v50 = vadd.f32 %v3886_v1, %v8442_v44  ;;  %v4020_v20 = vadd.f32 %v4019_v37, %v3957_v59  ;;  %v8459_v52 = vadd.f32 %v3803_v51, %v3515_v58 }
 0x335   :  { %v3533_v5 = vpop.f32.mrf.mxu1  ;;  %v5721_v2 = vpop.f32.mrf.mxu0 }
 0x336   :  { %9949 = vst [vmem:[#allocation34_spill] sm:$0xff] %v8459_v52  ;;  %v4021_v28 = vadd.f32 %v4020_v20, %v3958_v21  ;;  %v3888_v63 = vadd.f32 %v3887_v50, %v8450_v62  ;;  %v3534_v48 = vadd.f32 %v3533_v5, %v9950_v53  ;;  %v3960_v58 = vmul.f32 %v8459_v52, %v8459_v52 }
 0x337   :  { %v3535_v47 = vpop.f32.mrf.mxu1  ;;  %v3806_v43 = vpop.f32.mrf.mxu0  ;;  %v8472_v21 = vadd.f32 %v5721_v2, %v3526_v29  ;;  %v3962_v5 = vmul.f32 %v8465_v46, %v8465_v46 }
 0x338   :  { %v3889_v19 = vadd.f32 %v3888_v63, %v8459_v52  ;;  %v4022_v37 = vadd.f32 %v4021_v28, %v3959_v3  ;;  %v8470_v1 = vadd.f32 %v3806_v43, %v3518_v45 }
 0x339   :  { %v3538_v59 = vpop.f32.mrf.mxu1  ;;  %v5724_v51 = vpop.f32.mrf.mxu0 }
 0x33a   :  { %v4023_v44 = vadd.f32 %v4022_v37, %v3960_v58  ;;  %v3890_v50 = vadd.f32 %v3889_v19, %v8470_v1  ;;  %v3961_v24 = vmul.f32 %v8470_v1, %v8470_v1  ;;  %v3539_v53 = vadd.f32 %v3538_v59, %v8040_v56 }
 0x33b   :  { %v3540_v49 = vpop.f32.mrf.mxu1  ;;  %v3819_v20 = vpop.f32.mrf.mxu0  ;;  %v3963_v19 = vmul.f32 %v8472_v21, %v8472_v21 }
 0x33c   :  { %v3891_v45 = vadd.f32 %v3890_v50, %v8465_v46  ;;  %v4024_v43 = vadd.f32 %v4023_v44, %v3961_v24  ;;  %v8481_v3 = vadd.f32 %v3819_v20, %v3531_v39  ;;  %v8486_v47 = vadd.f32 %v5724_v51, %v3539_v53 }
 0x33d   :  { %v3541_v28 = vpop.f32.mrf.mxu1  ;;  %v5725_v29 = vpop.f32.mrf.mxu0 }
 0x33e   :  { %v4025_v2 = vadd.f32 %v4024_v43, %v3962_v5  ;;  %v3892_v63 = vadd.f32 %v3891_v45, %v8472_v21  ;;  %v3542_v56 = vadd.f32 %v3541_v28, %v8047_v18  ;;  %v3964_v44 = vmul.f32 %v8481_v3, %v8481_v3 }
 0x33f   :  { %v3543_v58 = vpop.f32.mrf.mxu1  ;;  %v3822_v37 = vpop.f32.mrf.mxu0  ;;  %v3966_v18 = vmul.f32 %v8486_v47, %v8486_v47 }
 0x340   :  { %v3893_v59 = vadd.f32 %v3892_v63, %v8481_v3  ;;  %v4026_v39 = vadd.f32 %v4025_v2, %v3963_v19  ;;  %v8492_v50 = vadd.f32 %v3822_v37, %v3534_v48  ;;  %v8494_v49 = vadd.f32 %v5725_v29, %v3542_v56 }
 0x342   :  { %v4027_v24 = vadd.f32 %v4026_v39, %v3964_v44  ;;  %v3894_v20 = vadd.f32 %v3893_v59, %v8492_v50  ;;  %v3965_v51 = vmul.f32 %v8492_v50, %v8492_v50  ;;  %v3967_v45 = vmul.f32 %v8494_v49, %v8494_v49 }
 0x344   :  { %v3895_v53 = vadd.f32 %v3894_v20, %v8486_v47  ;;  %v4028_v5 = vadd.f32 %v4027_v24, %v3965_v51 }
 0x346   :  { %v3896_v48 = vadd.f32 %v3895_v53, %v8494_v49  ;;  %v4029_v43 = vadd.f32 %v4028_v5, %v3966_v18  ;;  %v4049_v5 = vlaneseq }
 0x348   :  { %v3897_v28 = vrot.slane %v3896_v48, 4  ;;  %v4030_v29 = vadd.f32 %v4029_v43, %v3967_v45  ;;  %v8509_v43 = vshrl.u32 %v4049_v5, 7  ;;  %v8611_v5 = vld [vmem:[%s9746_s4 + $0x78] sm:$0xff]  }
 0x349   :  { %9966 = vst [vmem:[#allocation38_spill] sm:$0xff] %v8611_v5  ;;  %v8684_v5 = vld [vmem:[%s9746_s4 + $0xc8] sm:$0xff]  }
 0x34a   :  { %v3898_v19 = vadd.f32 %v3897_v28, %v3896_v48  ;;  %v4031_v2 = vrot.slane %v4030_v29, 4  ;;  %v8514_v28 = vld [vmem:[%s9746_s4] sm:$0xff]   ;;  %9976 = vst [vmem:[#allocation48_spill] sm:$0xff] %v8684_v5 }
 0x34b   :  { %9951 = vst [vmem:[#allocation16_spill] sm:$0xff] %v8514_v28  ;;  %v9997_v28 = vld [vmem:[#allocation27_spill] sm:$0xff] }
 0x34c   :  { %v3899_v63 = vrot.slane %v3898_v19, 2  ;;  %v4032_v56 = vadd.f32 %v4031_v2, %v4030_v29  ;;  %v8524_v29 = vld [vmem:[%s9746_s4 + $0x10] sm:$0xff]   ;;  %v8534_v2 = vld [vmem:[%s9746_s4 + $0x20] sm:$0xff]  }
 0x34d   :  { %9953 = vst [vmem:[#allocation3_spill] sm:$0xff] %v8524_v29  ;;  %9955 = vst [vmem:[#allocation18_spill] sm:$0xff] %v8534_v2  ;;  %v8693_v29 = vld [vmem:[%s9746_s4 + $0xd0] sm:$0xff]   ;;  %v8725_v2 = vld [vmem:[%s9748_s3] sm:$0x1] }
 0x34e   :  { %v3900_v58 = vadd.f32 %v3899_v63, %v3898_v19  ;;  %v4033_v37 = vrot.slane %v4032_v56, 2  ;;  %v8529_v19 = vld [vmem:[%s9746_s4 + $0x18] sm:$0xff]   ;;  %v8602_v63 = vld [vmem:[%s9746_s4 + $0x70] sm:$0xff]   ;;  %9977 = vst [vmem:[#allocation49_spill] sm:$0xff] %v8693_v29 }
 0x34f   :  { %9954 = vst [vmem:[#allocation17_spill] sm:$0xff] %v8529_v19  ;;  %9965 = vst [vmem:[#allocation37_spill] sm:$0xff] %v8602_v63  ;;  %v8670_v63 = vld [vmem:[%s9746_s4 + $0xb8] sm:$0xff]   ;;  %v8706_v19 = vld [vmem:[%s9746_s4 + $0xe0] sm:$0xff]  }
 0x350   :  { %v3901_v59 = vrot.slane %v3900_v58, 1  ;;  %v4034_v44 = vadd.f32 %v4033_v37, %v4032_v56  ;;  %v8546_v37 = vld [vmem:[%s9746_s4 + $0x30] sm:$0xff]   ;;  %v8653_v56 = vld [vmem:[%s9746_s4 + $0xa8] sm:$0xff]   ;;  %9974 = vst [vmem:[#allocation46_spill] sm:$0xff] %v8670_v63  ;;  %9979 = vst [vmem:[#allocation51_spill] sm:$0xff] %v8706_v19 }
 0x351   :  { %9957 = vst [vmem:[#allocation5_spill] sm:$0xff] %v8546_v37  ;;  %9972 = vst [vmem:[#allocation44_spill] sm:$0xff] %v8653_v56  ;;  %v8679_v37 = vld [vmem:[%s9746_s4 + $0xc0] sm:$0xff]   ;;  %v9985_v56 = vld [vmem:[#allocation8_spill] sm:$0xff] }
 0x352   :  { %v3902_v39 = vadd.f32 %v3901_v59, %v3900_v58  ;;  %v4035_v52 = vrot.slane %v4034_v44, 1  ;;  %v8541_v58 = vld [vmem:[%s9746_s4 + $0x28] sm:$0xff]   ;;  %v8588_v59 = vld [vmem:[%s9746_s4 + $0x60] sm:$0xff]   ;;  %9975 = vst [vmem:[#allocation47_spill] sm:$0xff] %v8679_v37  ;;  %v8739_v37 = vld [vmem:[%s9746_s4 + $0xf8] sm:$0xff]  }
 0x353   :  { %9956 = vst [vmem:[#allocation4_spill] sm:$0xff] %v8541_v58  ;;  %9963 = vst [vmem:[#allocation35_spill] sm:$0xff] %v8588_v59  ;;  %v8701_v59 = vld [vmem:[%s9746_s4 + $0xd8] sm:$0xff]   ;;  %v9988_v29 = vld [vmem:[#allocation24_spill] sm:$0xff] }
 0x354   :  { %v8505_v20 = vmul.f32 0.001953125, %v3902_v39  ;;  %v4036_v24 = vadd.f32 %v4035_v52, %v4034_v44  ;;  %v8519_v52 = vld [vmem:[%s9746_s4 + $0x8] sm:$0xff]   ;;  %v8574_v39 = vld [vmem:[%s9746_s4 + $0x50] sm:$0xff]   ;;  %v8639_v44 = vld [vmem:[%s9746_s4 + $0x98] sm:$0xff]   ;;  %9978 = vst [vmem:[#allocation50_spill] sm:$0xff] %v8701_v59 }
 0x355   :  { %9952 = vst [vmem:[#allocation2_spill] sm:$0xff] %v8519_v52  ;;  %9961 = vst [vmem:[#allocation7_spill] sm:$0xff] %v8574_v39  ;;  %v4041_v39 = vld [vmem:[%s9747_s2] sm:$0x1]  ;;  %v9994_v59 = vld [vmem:[#allocation12_spill] sm:$0xff] }
 0x356   :  { %v4037_v51 = vmul.f32 0.001953125, %v4036_v24  ;;  %v4038_v53 = vmul.f32 %v8505_v20, %v8505_v20  ;;  %v8569_v24 = vld [vmem:[%s9746_s4 + $0x48] sm:$0xff]   ;;  %9970 = vst [vmem:[#allocation42_spill] sm:$0xff] %v8639_v44  ;;  %9983 = vst [vmem:[#allocation54_spill] sm:$0xff] %v8739_v37  ;;  %v9989_v37 = vld [vmem:[#allocation10_spill] sm:$0xff] }
 0x357   :  { %9960 = vst [vmem:[#allocation6_spill] sm:$0xff] %v8569_v24  ;;  %v8630_v24 = vld [vmem:[%s9746_s4 + $0x90] sm:$0xff]   ;;  %v9992_v19 = vld [vmem:[#allocation26_spill] sm:$0xff]  ;;  %v9996_v52 = vld [vmem:[#allocation13_spill] sm:$0xff] }
 0x358   :  { %v4039_v18 = vsub.f32 %v4037_v51, %v4038_v53  ;;  %v8555_v51 = vld [vmem:[%s9746_s4 + $0x38] sm:$0xff]   ;;  %v8560_v53 = vld [vmem:[%s9746_s4 + $0x40] sm:$0xff]   ;;  %9969 = vst [vmem:[#allocation41_spill] sm:$0xff] %v8630_v24  ;;  %v8720_v24 = vld [vmem:[%s9746_s4 + $0xf0] sm:$0xff]  }
 0x359   :  { %9958 = vst [vmem:[#allocation19_spill] sm:$0xff] %v8555_v51  ;;  %9959 = vst [vmem:[#allocation20_spill] sm:$0xff] %v8560_v53  ;;  %v8616_v51 = vld [vmem:[%s9746_s4 + $0x80] sm:$0xff]  }
 0x35a   :  { %v4040_v45 = vmax.f32 %v4039_v18, 0.0  ;;  %9967 = vst [vmem:[#allocation39_spill] sm:$0xff] %v8616_v51  ;;  %v8625_v18 = vld [vmem:[%s9746_s4 + $0x88] sm:$0xff]   ;;  %9981 = vst [vmem:[#allocation53_spill] sm:$0xff] %v8720_v24 }
 0x35b   :  { %9968 = vst [vmem:[#allocation40_spill] sm:$0xff] %v8625_v18  ;;  %v8715_v51 = vld [vmem:[%s9746_s4 + $0xe8] sm:$0xff]   ;;  %v9982_v18 = vsub.s32 0, %v8509_v43 }
 0x35c   :  { %v4042_v48 = vadd.f32 1e-05, %v4040_v45  ;;  %v8597_v45 = vld [vmem:[%s9746_s4 + $0x68] sm:$0xff]   ;;  %9980 = vst [vmem:[#allocation52_spill] sm:$0xff] %v8715_v51  ;;  %v9991_v51 = vld [vmem:[#allocation25_spill] sm:$0xff] }
 0x35d   :  { %9964 = vst [vmem:[#allocation36_spill] sm:$0xff] %v8597_v45  ;;  %v8658_v45 = vld [vmem:[%s9746_s4 + $0xb0] sm:$0xff]   ;;  %v9990_v24 = vld [vmem:[#allocation11_spill] sm:$0xff] }
 0x35e   :  { %6247 = vrsqrt.f32 %v4042_v48  ;;  %v8583_v48 = vld [vmem:[%s9746_s4 + $0x58] sm:$0xff]   ;;  %9973 = vst [vmem:[#allocation45_spill] sm:$0xff] %v8658_v45 }
 0x35f   :  { %9962 = vst [vmem:[#allocation21_spill] sm:$0xff] %v8583_v48  ;;  %v8644_v48 = vld [vmem:[%s9746_s4 + $0xa0] sm:$0xff]  }
 0x360   :  { %9971 = vst [vmem:[#allocation43_spill] sm:$0xff] %v8644_v48  ;;  %v9984_v48 = vld [vmem:[#allocation22_spill] sm:$0xff] }
 0x36b   :  { %v6248_v58 = vpop.eup %6247 }
 0x36c   :  { %v4044_v44 = vmul.f32 %v6248_v58, %v4041_v39 }
 0x36e   :  { %v8728_v58 = vmul.f32 %v4044_v44, %v8505_v20  ;;  %v8732_v39 = vrot.slane %v4044_v44, %v9982_v18  ;;  %v9986_v20 = vld [vmem:[#allocation9_spill] sm:$0xff]  ;;  %v9987_v18 = vld [vmem:[#allocation23_spill] sm:$0xff] }
 0x370   :  { %v8753_v63 = vmul.f32 %v8732_v39, %v9984_v48  ;;  %v8759_v44 = vmul.f32 %v8732_v39, %v9985_v56  ;;  %v8763_v53 = vmul.f32 %v8732_v39, %v8062_v9  ;;  %v8767_v5 = vmul.f32 %v8732_v39, %v8070_v14 }
 0x371   :  { %v8771_v48 = vmul.f32 %v8732_v39, %v8083_v57  ;;  %v8775_v45 = vmul.f32 %v8732_v39, %v8098_v11  ;;  %v8779_v56 = vmul.f32 %v8732_v39, %v8092_v55  ;;  %v8783_v9 = vmul.f32 %v8732_v39, %v8101_v26 }
 0x372   :  { %v8787_v14 = vmul.f32 %v8732_v39, %v8113_v17  ;;  %v8791_v57 = vmul.f32 %v8732_v39, %v8128_v42  ;;  %v8795_v11 = vmul.f32 %v8732_v39, %v8122_v10  ;;  %v8799_v55 = vmul.f32 %v8732_v39, %v8131_v13 }
 0x373   :  { %v8803_v26 = vmul.f32 %v8732_v39, %v8143_v30  ;;  %v8807_v17 = vmul.f32 %v8732_v39, %v8158_v36  ;;  %v8811_v42 = vmul.f32 %v8732_v39, %v8152_v0  ;;  %v8815_v10 = vmul.f32 %v8732_v39, %v8161_v8 }
 0x374   :  { %v8819_v13 = vmul.f32 %v8732_v39, %v8173_v27  ;;  %v8823_v30 = vmul.f32 %v8732_v39, %v8188_v34  ;;  %v8827_v36 = vmul.f32 %v8732_v39, %v8182_v40  ;;  %v8831_v0 = vmul.f32 %v8732_v39, %v8191_v12 }
 0x375   :  { %v8835_v8 = vmul.f32 %v8732_v39, %v9986_v20  ;;  %v8839_v27 = vmul.f32 %v8732_v39, %v8218_v15  ;;  %v8843_v34 = vmul.f32 %v8732_v39, %v8212_v23  ;;  %v8847_v40 = vmul.f32 %v8732_v39, %v8221_v4 }
 0x376   :  { %v8851_v12 = vmul.f32 %v8732_v39, %v8233_v25  ;;  %v8855_v20 = vmul.f32 %v8732_v39, %v8248_v16  ;;  %v8859_v15 = vmul.f32 %v8732_v39, %v8242_v54  ;;  %v8863_v23 = vmul.f32 %v8732_v39, %v8251_v41 }
 0x377   :  { %v8867_v4 = vmul.f32 %v8732_v39, %v9987_v18  ;;  %v8871_v25 = vmul.f32 %v8732_v39, %v9988_v29  ;;  %v8875_v16 = vmul.f32 %v8732_v39, %v8272_v38  ;;  %v8879_v54 = vmul.f32 %v8732_v39, %v8281_v31 }
 0x378   :  { %v8883_v41 = vmul.f32 %v8732_v39, %v9989_v37  ;;  %v8887_v18 = vmul.f32 %v8732_v39, %v9990_v24  ;;  %v8891_v29 = vmul.f32 %v8732_v39, %v8302_v35  ;;  %v8895_v38 = vmul.f32 %v8732_v39, %v8311_v32 }
 0x379   :  { %v8899_v31 = vmul.f32 %v8732_v39, %v9991_v51  ;;  %v8903_v37 = vmul.f32 %v8732_v39, %v9992_v19  ;;  %v8907_v24 = vmul.f32 %v8732_v39, %v8332_v33  ;;  %v8911_v35 = vmul.f32 %v8732_v39, %v9994_v59 }
 0x37a   :  { %v8915_v32 = vmul.f32 %v8732_v39, %v9996_v52  ;;  %v8919_v51 = vmul.f32 %v8732_v39, %v9997_v28  ;;  %v8923_v19 = vmul.f32 %v8732_v39, %v8362_v22  ;;  %v8927_v33 = vmul.f32 %v8732_v39, %v8371_v61 }
 0x37b   :  { %9993 = vst [vmem:[#allocation22_spill] sm:$0xff] %v8907_v24  ;;  %9995 = vst [vmem:[#allocation8_spill] sm:$0xff] %v8911_v35  ;;  %v10000_v24 = vld [vmem:[#allocation28_spill] sm:$0xff]  ;;  %v10001_v35 = vld [vmem:[#allocation14_spill] sm:$0xff]  ;;  %v8939_v28 = vmul.f32 %v8732_v39, %v8390_v60  ;;  %v8943_v22 = vmul.f32 %v8732_v39, %v8399_v6  ;;  %v8959_v60 = vmul.f32 %v8732_v39, %v8470_v1 }
 0x37c   :  { %9998 = vst [vmem:[#allocation9_spill] sm:$0xff] %v8923_v19  ;;  %9999 = vst [vmem:[#allocation23_spill] sm:$0xff] %v8927_v33  ;;  %v8931_v59 = vmul.f32 %v8732_v39, %v10000_v24  ;;  %v8935_v52 = vmul.f32 %v8732_v39, %v10001_v35  ;;  %v10002_v19 = vld [vmem:[#allocation29_spill] sm:$0xff]  ;;  %v10003_v33 = vld [vmem:[#allocation15_spill] sm:$0xff]  ;;  %v8955_v35 = vmul.f32 %v8732_v39, %v8416_v7 }
 0x37d   :  { %v8947_v61 = vmul.f32 %v8732_v39, %v10002_v19  ;;  %v8951_v24 = vmul.f32 %v8732_v39, %v10003_v33  ;;  %10005 = vst [vmem:[#allocation10_spill] sm:$0xff] %v8959_v60  ;;  %v8963_v6 = vmul.f32 %v8732_v39, %v8465_v46  ;;  %v8967_v19 = vmul.f32 %v8732_v39, %v8472_v21  ;;  %v10011_v60 = vld [vmem:[#allocation30_spill] sm:$0xff] }
 0x37e   :  { %10004 = vst [vmem:[#allocation24_spill] sm:$0xff] %v8955_v35  ;;  %v8971_v33 = vmul.f32 %v8732_v39, %v8481_v3  ;;  %v8975_v7 = vmul.f32 %v8732_v39, %v8492_v50  ;;  %v8979_v1 = vmul.f32 %v8732_v39, %v8486_v47  ;;  %v4105_v46 = vmul.f32 %v8732_v39, %v10011_v60 }
 0x37f   :  { %10006 = vst [vmem:[#allocation11_spill] sm:$0xff] %v8963_v6  ;;  %10007 = vst [vmem:[#allocation25_spill] sm:$0xff] %v8967_v19  ;;  %v10012_v6 = vld [vmem:[#allocation31_spill] sm:$0xff]  ;;  %v8987_v21 = vmul.f32 %v8732_v39, %v8494_v49  ;;  %v10013_v3 = vsub.s32 0, %v8509_v43  ;;  %v10014_v50 = vsub.f32 %v8725_v2, %v8728_v58  ;;  %v10017_v19 = vld [vmem:[#allocation34_spill] sm:$0xff] }
 0x380   :  { %10008 = vst [vmem:[#allocation26_spill] sm:$0xff] %v8971_v33  ;;  %10009 = vst [vmem:[#allocation12_spill] sm:$0xff] %v8975_v7  ;;  %v4106_v35 = vmul.f32 %v8732_v39, %v10012_v6  ;;  %v10015_v33 = vld [vmem:[#allocation33_spill] sm:$0xff]  ;;  %v4109_v6 = vmul.f32 %v8732_v39, %v8450_v62  ;;  %v4110_v49 = vmul.f32 %v8732_v39, %v10017_v19 }
 0x381   :  { %10010 = vst [vmem:[#allocation13_spill] sm:$0xff] %v8979_v1  ;;  %v8994_v7 = vrot.slane %v10014_v50, %v10013_v3  ;;  %v4107_v47 = vmul.f32 %v8732_v39, %v10015_v33  ;;  %v10016_v1 = vld [vmem:[#allocation32_spill] sm:$0xff] }
 0x382   :  { %v4108_v60 = vmul.f32 %v8732_v39, %v10016_v1  ;;  %v10019_v19 = vld [vmem:[#allocation8_spill] sm:$0xff] }
 0x383   :  { %v9006_v43 = vadd.f32 %v8994_v7, %v8753_v63  ;;  %v9010_v2 = vadd.f32 %v8994_v7, %v8759_v44  ;;  %v9014_v58 = vadd.f32 %v8994_v7, %v8763_v53  ;;  %v9018_v33 = vadd.f32 %v8994_v7, %v8767_v5  ;;  %v10020_v1 = vld [vmem:[#allocation9_spill] sm:$0xff]  ;;  %v10021_v3 = vld [vmem:[#allocation23_spill] sm:$0xff] }
 0x384   :  { %v9022_v62 = vadd.f32 %v8994_v7, %v8771_v48  ;;  %v9026_v63 = vadd.f32 %v8994_v7, %v8775_v45  ;;  %v9030_v39 = vadd.f32 %v8994_v7, %v8779_v56  ;;  %v9034_v53 = vadd.f32 %v8994_v7, %v8783_v9 }
 0x385   :  { %v9038_v5 = vadd.f32 %v8994_v7, %v8787_v14  ;;  %v9042_v44 = vadd.f32 %v8994_v7, %v8791_v57  ;;  %v9046_v45 = vadd.f32 %v8994_v7, %v8795_v11  ;;  %v9050_v48 = vadd.f32 %v8994_v7, %v8799_v55 }
 0x386   :  { %v9054_v56 = vadd.f32 %v8994_v7, %v8803_v26  ;;  %v9058_v9 = vadd.f32 %v8994_v7, %v8807_v17  ;;  %v9062_v14 = vadd.f32 %v8994_v7, %v8811_v42  ;;  %v9066_v57 = vadd.f32 %v8994_v7, %v8815_v10 }
 0x387   :  { %v9070_v11 = vadd.f32 %v8994_v7, %v8819_v13  ;;  %v9074_v55 = vadd.f32 %v8994_v7, %v8823_v30  ;;  %v9078_v26 = vadd.f32 %v8994_v7, %v8827_v36  ;;  %v9082_v17 = vadd.f32 %v8994_v7, %v8831_v0 }
 0x388   :  { %v9086_v42 = vadd.f32 %v8994_v7, %v8835_v8  ;;  %v9090_v10 = vadd.f32 %v8994_v7, %v8839_v27  ;;  %v9094_v13 = vadd.f32 %v8994_v7, %v8843_v34  ;;  %v9098_v30 = vadd.f32 %v8994_v7, %v8847_v40 }
 0x389   :  { %v9102_v36 = vadd.f32 %v8994_v7, %v8851_v12  ;;  %v9106_v0 = vadd.f32 %v8994_v7, %v8855_v20  ;;  %v9110_v8 = vadd.f32 %v8994_v7, %v8859_v15  ;;  %v9114_v27 = vadd.f32 %v8994_v7, %v8863_v23 }
 0x38a   :  { %v9118_v34 = vadd.f32 %v8994_v7, %v8867_v4  ;;  %v9122_v40 = vadd.f32 %v8994_v7, %v8871_v25  ;;  %v9126_v12 = vadd.f32 %v8994_v7, %v8875_v16  ;;  %v9130_v20 = vadd.f32 %v8994_v7, %v8879_v54 }
 0x38b   :  { %v9134_v15 = vadd.f32 %v8994_v7, %v8883_v41  ;;  %v9138_v23 = vadd.f32 %v8994_v7, %v8887_v18  ;;  %v9142_v4 = vadd.f32 %v8994_v7, %v8891_v29  ;;  %v9146_v25 = vadd.f32 %v8994_v7, %v8895_v38  ;;  %v10018_v41 = vld [vmem:[#allocation22_spill] sm:$0xff] }
 0x38c   :  { %v9150_v16 = vadd.f32 %v8994_v7, %v8899_v31  ;;  %v9154_v54 = vadd.f32 %v8994_v7, %v8903_v37  ;;  %v9158_v18 = vadd.f32 %v8994_v7, %v10018_v41  ;;  %v9162_v29 = vadd.f32 %v8994_v7, %v10019_v19 }
 0x38d   :  { %v9166_v38 = vadd.f32 %v8994_v7, %v8915_v32  ;;  %v9170_v31 = vadd.f32 %v8994_v7, %v8919_v51  ;;  %v9174_v37 = vadd.f32 %v8994_v7, %v10020_v1  ;;  %v9178_v50 = vadd.f32 %v8994_v7, %v10021_v3  ;;  %v10024_v3 = vld [vmem:[#allocation24_spill] sm:$0xff] }
 0x38e   :  { %v9182_v41 = vadd.f32 %v8994_v7, %v8931_v59  ;;  %v9186_v32 = vadd.f32 %v8994_v7, %v8935_v52  ;;  %v9190_v51 = vadd.f32 %v8994_v7, %v8939_v28  ;;  %v9194_v19 = vadd.f32 %v8994_v7, %v8943_v22 }
 0x38f   :  { %v9198_v1 = vadd.f32 %v8994_v7, %v8947_v61  ;;  %v9202_v59 = vadd.f32 %v8994_v7, %v8951_v24  ;;  %v9206_v52 = vadd.f32 %v8994_v7, %v10024_v3  ;;  %v9212_v28 = vadd.f32 %v8994_v7, %v4106_v35  ;;  %v10029_v3 = vld [vmem:[#allocation10_spill] sm:$0xff] }
 0x390   :  { %10022 = vst [vmem:[#allocation27_spill] sm:$0xff] %v9186_v32  ;;  %v9209_v32 = vadd.f32 %v8994_v7, %v4105_v46  ;;  %v9215_v22 = vadd.f32 %v8994_v7, %v4107_v47  ;;  %v9218_v61 = vadd.f32 %v8994_v7, %v4108_v60  ;;  %v9224_v24 = vadd.f32 %v8994_v7, %v4110_v49  ;;  %v10031_v46 = vld [vmem:[#allocation11_spill] sm:$0xff]  ;;  %v10035_v60 = vld [vmem:[#allocation26_spill] sm:$0xff] }
 0x391   :  { %10023 = vst [vmem:[#allocation28_spill] sm:$0xff] %v9198_v1  ;;  %10025 = vst [vmem:[#allocation14_spill] sm:$0xff] %v9206_v52  ;;  %v9221_v1 = vadd.f32 %v8994_v7, %v4109_v6  ;;  %v9228_v52 = vadd.f32 %v8994_v7, %v10029_v3  ;;  %v9232_v35 = vadd.f32 %v8994_v7, %v10031_v46  ;;  %v10037_v6 = vld [vmem:[#allocation12_spill] sm:$0xff] }
 0x392   :  { %10026 = vst [vmem:[#allocation29_spill] sm:$0xff] %v9212_v28  ;;  %10027 = vst [vmem:[#allocation15_spill] sm:$0xff] %v9218_v61  ;;  %v10033_v28 = vld [vmem:[#allocation25_spill] sm:$0xff]  ;;  %v9240_v61 = vadd.f32 %v8994_v7, %v10035_v60  ;;  %v9244_v49 = vadd.f32 %v8994_v7, %v10037_v6  ;;  %v9252_v46 = vadd.f32 %v8994_v7, %v8987_v21  ;;  %v10046_v6 = vld [vmem:[#allocation2_spill] sm:$0xff] }
 0x393   :  { %10028 = vst [vmem:[#allocation30_spill] sm:$0xff] %v9224_v24  ;;  %10030 = vst [vmem:[#allocation31_spill] sm:$0xff] %v9228_v52  ;;  %v9236_v47 = vadd.f32 %v8994_v7, %v10033_v28  ;;  %v10039_v24 = vld [vmem:[#allocation13_spill] sm:$0xff]  ;;  %v10051_v21 = vld [vmem:[#allocation3_spill] sm:$0xff] }
 0x394   :  { %10032 = vst [vmem:[#allocation33_spill] sm:$0xff] %v9232_v35  ;;  %10036 = vst [vmem:[#allocation34_spill] sm:$0xff] %v9240_v61  ;;  %v9248_v3 = vadd.f32 %v8994_v7, %v10039_v24  ;;  %v10041_v35 = vld [vmem:[#allocation16_spill] sm:$0xff]  ;;  %v10049_v24 = vunpack.c.h.bf16 %v10046_v6 }
 0x395   :  { %10034 = vst [vmem:[#allocation32_spill] sm:$0xff] %v9236_v47  ;;  %10038 = vst [vmem:[#allocation22_spill] sm:$0xff] %v9244_v49  ;;  %v10042_v28 = vunpack.c.l.bf16 %v10041_v35  ;;  %v10044_v60 = vunpack.c.h.bf16 %v10041_v35  ;;  %v10047_v49 = vunpack.c.l.bf16 %v10046_v6  ;;  %v10054_v35 = vunpack.c.h.bf16 %v10051_v21  ;;  %v10058_v6 = vld [vmem:[#allocation18_spill] sm:$0xff] }
 0x396   :  { %10040 = vst [vmem:[#allocation8_spill] sm:$0xff] %v9252_v46  ;;  %v9272_v7 = vadd.f32 %v10049_v24, %v9018_v33  ;;  %v10052_v46 = vunpack.c.l.bf16 %v10051_v21  ;;  %v10059_v24 = vunpack.c.l.bf16 %v10058_v6  ;;  %v10061_v21 = vld [vmem:[#allocation4_spill] sm:$0xff] }
 0x397   :  { %v9257_v47 = vadd.f32 %v10042_v28, %v9006_v43  ;;  %v9262_v61 = vadd.f32 %v10044_v60, %v9010_v2  ;;  %v9267_v52 = vadd.f32 %v10047_v49, %v9014_v58  ;;  %v9282_v2 = vadd.f32 %v10054_v35, %v9026_v63  ;;  %v10055_v28 = vld [vmem:[#allocation17_spill] sm:$0xff] }
 0x398   :  { %10050 = vst [vmem:[#allocation10_spill] sm:$0xff] %v9272_v7  ;;  %v9277_v43 = vadd.f32 %v10052_v46, %v9022_v62  ;;  %v10056_v60 = vunpack.c.l.bf16 %v10055_v28  ;;  %v10057_v49 = vunpack.c.h.bf16 %v10055_v28  ;;  %v9297_v62 = vadd.f32 %v10059_v24, %v9038_v5  ;;  %v10067_v24 = vld [vmem:[#allocation19_spill] sm:$0xff] }
 0x399   :  { %10043 = vst [vmem:[#allocation9_spill] sm:$0xff] %v9257_v47  ;;  %10045 = vst [vmem:[#allocation23_spill] sm:$0xff] %v9262_v61  ;;  %v10060_v46 = vunpack.c.h.bf16 %v10058_v6  ;;  %v10062_v35 = vunpack.c.l.bf16 %v10061_v21  ;;  %v10063_v28 = vunpack.c.h.bf16 %v10061_v21  ;;  %v10069_v21 = vunpack.c.h.bf16 %v10067_v24 }
 0x39a   :  { %10048 = vst [vmem:[#allocation24_spill] sm:$0xff] %v9267_v52  ;;  %10053 = vst [vmem:[#allocation11_spill] sm:$0xff] %v9277_v43  ;;  %v9287_v58 = vadd.f32 %v10056_v60, %v9030_v39  ;;  %v9292_v33 = vadd.f32 %v10057_v49, %v9034_v53  ;;  %v10064_v60 = vld [vmem:[#allocation5_spill] sm:$0xff] }
 0x39b   :  { %v9302_v63 = vadd.f32 %v10060_v46, %v9042_v44  ;;  %v9307_v39 = vadd.f32 %v10062_v35, %v9046_v45  ;;  %v9312_v53 = vadd.f32 %v10063_v28, %v9050_v48  ;;  %v10065_v49 = vunpack.c.l.bf16 %v10064_v60  ;;  %v10070_v35 = vld [vmem:[#allocation20_spill] sm:$0xff] }
 0x39c   :  { %v10066_v6 = vunpack.c.h.bf16 %v10064_v60  ;;  %v10068_v46 = vunpack.c.l.bf16 %v10067_v24  ;;  %v9332_v48 = vadd.f32 %v10069_v21, %v9066_v57  ;;  %v10071_v28 = vunpack.c.l.bf16 %v10070_v35 }
 0x39d   :  { %v9317_v5 = vadd.f32 %v10065_v49, %v9054_v56  ;;  %v10072_v60 = vunpack.c.h.bf16 %v10070_v35  ;;  %v10073_v49 = vld [vmem:[#allocation6_spill] sm:$0xff] }
 0x39e   :  { %v9322_v44 = vadd.f32 %v10066_v6, %v9058_v9  ;;  %v9327_v45 = vadd.f32 %v10068_v46, %v9062_v14  ;;  %v9337_v56 = vadd.f32 %v10071_v28, %v9070_v11  ;;  %v10074_v6 = vunpack.c.l.bf16 %v10073_v49  ;;  %v10076_v46 = vld [vmem:[#allocation7_spill] sm:$0xff]  ;;  %v10079_v28 = vld [vmem:[#allocation21_spill] sm:$0xff] }
 0x39f   :  { %v9342_v9 = vadd.f32 %v10072_v60, %v9074_v55  ;;  %v10075_v24 = vunpack.c.h.bf16 %v10073_v49  ;;  %v10077_v21 = vunpack.c.l.bf16 %v10076_v46  ;;  %v10078_v35 = vunpack.c.h.bf16 %v10076_v46 }
 0x3a0   :  { %v9347_v14 = vadd.f32 %v10074_v6, %v9078_v26  ;;  %v10080_v60 = vunpack.c.l.bf16 %v10079_v28  ;;  %v10081_v49 = vunpack.c.h.bf16 %v10079_v28  ;;  %v10082_v6 = vld [vmem:[#allocation35_spill] sm:$0xff] }
 0x3a1   :  { %v9352_v57 = vadd.f32 %v10075_v24, %v9082_v17  ;;  %v9357_v11 = vadd.f32 %v10077_v21, %v9086_v42  ;;  %v9362_v55 = vadd.f32 %v10078_v35, %v9090_v10  ;;  %v10083_v24 = vunpack.c.l.bf16 %v10082_v6  ;;  %v10085_v21 = vld [vmem:[#allocation36_spill] sm:$0xff] }
 0x3a2   :  { %v9367_v26 = vadd.f32 %v10080_v60, %v9094_v13  ;;  %v9372_v17 = vadd.f32 %v10081_v49, %v9098_v30  ;;  %v10084_v46 = vunpack.c.h.bf16 %v10082_v6  ;;  %v10086_v35 = vunpack.c.l.bf16 %v10085_v21  ;;  %v10088_v60 = vld [vmem:[#allocation37_spill] sm:$0xff] }
 0x3a3   :  { %v9377_v42 = vadd.f32 %v10083_v24, %v9102_v36  ;;  %v10087_v28 = vunpack.c.h.bf16 %v10085_v21  ;;  %v10089_v49 = vunpack.c.l.bf16 %v10088_v60  ;;  %v10090_v6 = vunpack.c.h.bf16 %v10088_v60  ;;  %v10091_v24 = vld [vmem:[#allocation38_spill] sm:$0xff] }
 0x3a4   :  { %v9382_v10 = vadd.f32 %v10084_v46, %v9106_v0  ;;  %v9387_v13 = vadd.f32 %v10086_v35, %v9110_v8  ;;  %v10092_v46 = vunpack.c.l.bf16 %v10091_v24  ;;  %v10093_v21 = vunpack.c.h.bf16 %v10091_v24  ;;  %v10094_v35 = vld [vmem:[#allocation39_spill] sm:$0xff] }
 0x3a5   :  { %v9392_v30 = vadd.f32 %v10087_v28, %v9114_v27  ;;  %v9397_v36 = vadd.f32 %v10089_v49, %v9118_v34  ;;  %v9402_v0 = vadd.f32 %v10090_v6, %v9122_v40  ;;  %v10095_v28 = vunpack.c.l.bf16 %v10094_v35  ;;  %v10097_v49 = vld [vmem:[#allocation40_spill] sm:$0xff] }
 0x3a6   :  { %v9407_v8 = vadd.f32 %v10092_v46, %v9126_v12  ;;  %v9412_v27 = vadd.f32 %v10093_v21, %v9130_v20  ;;  %v10096_v60 = vunpack.c.h.bf16 %v10094_v35  ;;  %v10098_v6 = vunpack.c.l.bf16 %v10097_v49  ;;  %v10100_v46 = vld [vmem:[#allocation41_spill] sm:$0xff] }
 0x3a7   :  { %v9417_v34 = vadd.f32 %v10095_v28, %v9134_v15  ;;  %v10099_v24 = vunpack.c.h.bf16 %v10097_v49  ;;  %v10101_v21 = vunpack.c.l.bf16 %v10100_v46  ;;  %v10102_v35 = vunpack.c.h.bf16 %v10100_v46  ;;  %v10103_v28 = vld [vmem:[#allocation42_spill] sm:$0xff] }
 0x3a8   :  { %v9422_v40 = vadd.f32 %v10096_v60, %v9138_v23  ;;  %v9427_v12 = vadd.f32 %v10098_v6, %v9142_v4  ;;  %v10104_v60 = vunpack.c.l.bf16 %v10103_v28  ;;  %v10105_v49 = vunpack.c.h.bf16 %v10103_v28  ;;  %v10106_v6 = vld [vmem:[#allocation43_spill] sm:$0xff] }
 0x3a9   :  { %v9432_v20 = vadd.f32 %v10099_v24, %v9146_v25  ;;  %v9437_v15 = vadd.f32 %v10101_v21, %v9150_v16  ;;  %v9442_v23 = vadd.f32 %v10102_v35, %v9154_v54  ;;  %v10107_v24 = vunpack.c.l.bf16 %v10106_v6  ;;  %v10110_v21 = vld [vmem:[#allocation44_spill] sm:$0xff] }
 0x3aa   :  { %v9447_v4 = vadd.f32 %v10104_v60, %v9158_v18  ;;  %v9452_v25 = vadd.f32 %v10105_v49, %v9162_v29  ;;  %v10108_v46 = vunpack.c.h.bf16 %v10106_v6  ;;  %v10111_v35 = vunpack.c.l.bf16 %v10110_v21  ;;  %v10114_v60 = vld [vmem:[#allocation45_spill] sm:$0xff] }
 0x3ab   :  { %v9457_v16 = vadd.f32 %v10107_v24, %v9166_v38  ;;  %v10112_v28 = vunpack.c.h.bf16 %v10110_v21  ;;  %v10115_v49 = vunpack.c.l.bf16 %v10114_v60  ;;  %v10116_v24 = vld [vmem:[#allocation27_spill] sm:$0xff]  ;;  %v10117_v6 = vunpack.c.h.bf16 %v10114_v60 }
 0x3ac   :  { %v9462_v54 = vadd.f32 %v10108_v46, %v9170_v31  ;;  %v9467_v18 = vadd.f32 %v10111_v35, %v9174_v37  ;;  %v10119_v46 = vld [vmem:[#allocation46_spill] sm:$0xff]  ;;  %v10123_v35 = vld [vmem:[#allocation28_spill] sm:$0xff] }
 0x3ad   :  { %v9472_v29 = vadd.f32 %v10112_v28, %v9178_v50  ;;  %v9477_v38 = vadd.f32 %v10115_v49, %v9182_v41  ;;  %v9482_v31 = vadd.f32 %v10117_v6, %v10116_v24  ;;  %v10121_v21 = vunpack.c.h.bf16 %v10119_v46  ;;  %v10124_v28 = vld [vmem:[#allocation47_spill] sm:$0xff]  ;;  %v10128_v24 = vld [vmem:[#allocation14_spill] sm:$0xff]  ;;  %v10129_v6 = vld [vmem:[#allocation48_spill] sm:$0xff] }
 0x3ae   :  { %10109 = vst [vmem:[#allocation25_spill] sm:$0xff] %v9462_v54  ;;  %v10120_v54 = vunpack.c.l.bf16 %v10119_v46  ;;  %v10126_v60 = vunpack.c.h.bf16 %v10124_v28  ;;  %v10133_v46 = vld [vmem:[#allocation29_spill] sm:$0xff] }
 0x3af   :  { %10113 = vst [vmem:[#allocation26_spill] sm:$0xff] %v9472_v29  ;;  %10118 = vst [vmem:[#allocation12_spill] sm:$0xff] %v9482_v31  ;;  %v9492_v50 = vadd.f32 %v10121_v21, %v9194_v19  ;;  %v10125_v29 = vunpack.c.l.bf16 %v10124_v28  ;;  %v10130_v31 = vunpack.c.l.bf16 %v10129_v6  ;;  %v10134_v21 = vld [vmem:[#allocation49_spill] sm:$0xff]  ;;  %v10139_v28 = vld [vmem:[#allocation15_spill] sm:$0xff] }
 0x3b0   :  { %v9487_v37 = vadd.f32 %v10120_v54, %v9190_v51  ;;  %v9502_v49 = vadd.f32 %v10126_v60, %v9202_v59  ;;  %v10131_v54 = vunpack.c.h.bf16 %v10129_v6  ;;  %v10140_v60 = vld [vmem:[#allocation50_spill] sm:$0xff] }
 0x3b1   :  { %10122 = vst [vmem:[#allocation13_spill] sm:$0xff] %v9492_v50  ;;  %v9497_v41 = vadd.f32 %v10125_v29, %v10123_v35  ;;  %v9507_v51 = vadd.f32 %v10130_v31, %v10128_v24  ;;  %v10135_v50 = vunpack.c.l.bf16 %v10134_v21  ;;  %v10137_v35 = vunpack.c.h.bf16 %v10134_v21  ;;  %v10145_v6 = vld [vmem:[#allocation30_spill] sm:$0xff] }
 0x3b2   :  { %10127 = vst [vmem:[#allocation16_spill] sm:$0xff] %v9502_v49  ;;  %v9512_v19 = vadd.f32 %v10131_v54, %v9209_v32  ;;  %v10141_v49 = vunpack.c.l.bf16 %v10140_v60  ;;  %v10143_v24 = vunpack.c.h.bf16 %v10140_v60  ;;  %v10146_v54 = vld [vmem:[#allocation51_spill] sm:$0xff] }
 0x3b3   :  { %v9517_v29 = vadd.f32 %v10135_v50, %v10133_v46  ;;  %v9522_v59 = vadd.f32 %v10137_v35, %v9215_v22  ;;  %v10148_v46 = vld [vmem:[#allocation31_spill] sm:$0xff]  ;;  %v10149_v21 = vunpack.c.h.bf16 %v10146_v54  ;;  %v10151_v35 = vld [vmem:[#allocation33_spill] sm:$0xff] }
 0x3b4   :  { %10132 = vst [vmem:[#allocation2_spill] sm:$0xff] %v9512_v19  ;;  %v9527_v31 = vadd.f32 %v10141_v49, %v10139_v28  ;;  %v9532_v32 = vadd.f32 %v10143_v24, %v9221_v1  ;;  %v10147_v19 = vunpack.c.l.bf16 %v10146_v54  ;;  %v10154_v28 = vld [vmem:[#allocation32_spill] sm:$0xff]  ;;  %v10157_v24 = vld [vmem:[#allocation34_spill] sm:$0xff] }
 0x3b5   :  { %10136 = vst [vmem:[#allocation3_spill] sm:$0xff] %v9517_v29  ;;  %10138 = vst [vmem:[#allocation17_spill] sm:$0xff] %v9522_v59  ;;  %v9542_v22 = vadd.f32 %v10149_v21, %v10148_v46  ;;  %v10152_v59 = vld [vmem:[#allocation52_spill] sm:$0xff]  ;;  %v10164_v21 = vld [vmem:[#allocation54_spill] sm:$0xff] }
 0x3b6   :  { %10142 = vst [vmem:[#allocation18_spill] sm:$0xff] %v9527_v31  ;;  %10144 = vst [vmem:[#allocation4_spill] sm:$0xff] %v9532_v32  ;;  %v9537_v50 = vadd.f32 %v10147_v19, %v10145_v6  ;;  %v10153_v29 = vunpack.c.l.bf16 %v10152_v59  ;;  %v10155_v60 = vunpack.c.h.bf16 %v10152_v59  ;;  %v10158_v32 = vld [vmem:[#allocation53_spill] sm:$0xff]  ;;  %v10161_v6 = vld [vmem:[#allocation22_spill] sm:$0xff]  ;;  %v10168_v59 = vunpack.c.h.bf16 %v10164_v21 }
 0x3b7   :  { %10150 = vst [vmem:[#allocation5_spill] sm:$0xff] %v9542_v22  ;;  %v10159_v31 = vunpack.c.l.bf16 %v10158_v32  ;;  %v10162_v54 = vunpack.c.h.bf16 %v10158_v32  ;;  %v10165_v22 = vunpack.c.l.bf16 %v10164_v21  ;;  %v4388_v21 = vmax.f32 %v9297_v62, 0.0  ;;  %v10171_v43 = vld [vmem:[#allocation26_spill] sm:$0xff]  ;;  %v10172_v7 = vld [vmem:[#allocation12_spill] sm:$0xff] }
 0x3b8   :  { %v9547_v49 = vadd.f32 %v10153_v29, %v10151_v35  ;;  %v9552_v1 = vadd.f32 %v10155_v60, %v10154_v28  ;;  %v10167_v35 = vld [vmem:[#allocation8_spill] sm:$0xff]  ;;  %v4393_v32 = vmax.f32 %v9322_v44, 0.0  ;;  %v4398_v62 = vmax.f32 %v9347_v14, 0.0  ;;  %v10170_v60 = vld [vmem:[#allocation25_spill] sm:$0xff] }
 0x3b9   :  { %v9557_v19 = vadd.f32 %v10159_v31, %v10157_v24  ;;  %v9562_v46 = vadd.f32 %v10162_v54, %v10161_v6  ;;  %v9567_v29 = vadd.f32 %v10165_v22, %v9248_v3  ;;  %v9572_v28 = vadd.f32 %v10168_v59, %v10167_v35  ;;  %v10173_v52 = vld [vmem:[#allocation13_spill] sm:$0xff]  ;;  %v10174_v61 = vld [vmem:[#allocation16_spill] sm:$0xff] }
 0x3ba   :  { %10156 = vst [vmem:[#allocation19_spill] sm:$0xff] %v9552_v1  ;;  %v4385_v54 = vmax.f32 %v9282_v2, 0.0  ;;  %v4386_v3 = vmax.f32 %v9287_v58, 0.0  ;;  %v4387_v22 = vmax.f32 %v9292_v33, 0.0  ;;  %v4389_v35 = vmax.f32 %v9302_v63, 0.0 }
 0x3bb   :  { %10160 = vst [vmem:[#allocation20_spill] sm:$0xff] %v9557_v19  ;;  %10163 = vst [vmem:[#allocation6_spill] sm:$0xff] %v9562_v46  ;;  %v4390_v59 = vmax.f32 %v9307_v39, 0.0  ;;  %v4391_v31 = vmax.f32 %v9312_v53, 0.0  ;;  %v4392_v24 = vmax.f32 %v9317_v5, 0.0  ;;  %v4394_v6 = vmax.f32 %v9327_v45, 0.0 }
 0x3bc   :  { %10166 = vst [vmem:[#allocation7_spill] sm:$0xff] %v9567_v29  ;;  %10169 = vst [vmem:[#allocation21_spill] sm:$0xff] %v9572_v28  ;;  %v4395_v2 = vmax.f32 %v9332_v48, 0.0  ;;  %v4396_v58 = vmax.f32 %v9337_v56, 0.0  ;;  %v4397_v33 = vmax.f32 %v9342_v9, 0.0  ;;  %v4399_v63 = vmax.f32 %v9352_v57, 0.0 }
 0x3bd   :  { %v4400_v39 = vmax.f32 %v9357_v11, 0.0  ;;  %v4401_v53 = vmax.f32 %v9362_v55, 0.0  ;;  %v4402_v5 = vmax.f32 %v9367_v26, 0.0  ;;  %v4403_v44 = vmax.f32 %v9372_v17, 0.0  ;;  %v10175_v47 = vld [vmem:[#allocation2_spill] sm:$0xff]  ;;  %v10176_v28 = vld [vmem:[#allocation3_spill] sm:$0xff] }
 0x3be   :  { %v4404_v45 = vmax.f32 %v9377_v42, 0.0  ;;  %v4405_v48 = vmax.f32 %v9382_v10, 0.0  ;;  %v4406_v56 = vmax.f32 %v9387_v13, 0.0  ;;  %v4407_v9 = vmax.f32 %v9392_v30, 0.0  ;;  %v10177_v29 = vld [vmem:[#allocation17_spill] sm:$0xff]  ;;  %v10178_v46 = vld [vmem:[#allocation18_spill] sm:$0xff] }
 0x3bf   :  { %v4408_v14 = vmax.f32 %v9397_v36, 0.0  ;;  %v4409_v57 = vmax.f32 %v9402_v0, 0.0  ;;  %v4410_v11 = vmax.f32 %v9407_v8, 0.0  ;;  %v4411_v55 = vmax.f32 %v9412_v27, 0.0  ;;  %v10179_v19 = vld [vmem:[#allocation4_spill] sm:$0xff]  ;;  %v10180_v1 = vld [vmem:[#allocation5_spill] sm:$0xff] }
 0x3c0   :  { %v4412_v26 = vmax.f32 %v9417_v34, 0.0  ;;  %v4413_v17 = vmax.f32 %v9422_v40, 0.0  ;;  %v4414_v42 = vmax.f32 %v9427_v12, 0.0  ;;  %v4415_v10 = vmax.f32 %v9432_v20, 0.0 }
 0x3c1   :  { %v4416_v13 = vmax.f32 %v9437_v15, 0.0  ;;  %v4417_v30 = vmax.f32 %v9442_v23, 0.0  ;;  %v4418_v36 = vmax.f32 %v9447_v4, 0.0  ;;  %v4419_v0 = vmax.f32 %v9452_v25, 0.0 }
 0x3c2   :  { %v4420_v8 = vmax.f32 %v9457_v16, 0.0  ;;  %v4421_v27 = vmax.f32 %v10170_v60, 0.0  ;;  %v4422_v34 = vmax.f32 %v9467_v18, 0.0  ;;  %v4423_v40 = vmax.f32 %v10171_v43, 0.0 }
 0x3c3   :  { %v4424_v12 = vmax.f32 %v9477_v38, 0.0  ;;  %v4425_v20 = vmax.f32 %v10172_v7, 0.0  ;;  %v4426_v15 = vmax.f32 %v9487_v37, 0.0  ;;  %v4427_v23 = vmax.f32 %v10173_v52, 0.0 }
 0x3c4   :  { %v4428_v4 = vmax.f32 %v9497_v41, 0.0  ;;  %v4429_v25 = vmax.f32 %v10174_v61, 0.0  ;;  %v4430_v16 = vmax.f32 %v9507_v51, 0.0  ;;  %v4431_v60 = vmax.f32 %v10175_v47, 0.0  ;;  %v10181_v61 = vld [vmem:[#allocation19_spill] sm:$0xff]  ;;  %v10182_v47 = vld [vmem:[#allocation20_spill] sm:$0xff] }
 0x3c5   :  { %v4432_v18 = vmax.f32 %v10176_v28, 0.0  ;;  %v4433_v43 = vmax.f32 %v10177_v29, 0.0  ;;  %v4434_v38 = vmax.f32 %v10178_v46, 0.0  ;;  %v4435_v7 = vmax.f32 %v10179_v19, 0.0  ;;  %v10183_v29 = vld [vmem:[#allocation6_spill] sm:$0xff]  ;;  %v10184_v19 = vld [vmem:[#allocation7_spill] sm:$0xff] }
 0x3c6   :  { %v4436_v37 = vmax.f32 %v9537_v50, 0.0  ;;  %v4437_v52 = vmax.f32 %v10180_v1, 0.0  ;;  %v4438_v41 = vmax.f32 %v9547_v49, 0.0  ;;  %v4439_v51 = vmax.f32 %v10181_v61, 0.0  ;;  %v10185_v1 = vld [vmem:[#allocation21_spill] sm:$0xff] }
 0x3c7   :  { %v4440_v28 = vmax.f32 %v10182_v47, 0.0  ;;  %v4441_v46 = vmax.f32 %v10183_v29, 0.0  ;;  %v4442_v50 = vmax.f32 %v10184_v19, 0.0  ;;  %v4443_v49 = vmax.f32 %v10185_v1, 0.0  ;;  %v10186_v61 = vld [vmem:[#allocation9_spill] sm:$0xff]  ;;  %v10188_v29 = vld [vmem:[#allocation23_spill] sm:$0xff] }
 0x3c8   :  { %v10187_v47 = vmax.f32 %v10186_v61, 0.0  ;;  %v10189_v19 = vmax.f32 %v10188_v29, 0.0  ;;  %v10190_v61 = vld [vmem:[#allocation24_spill] sm:$0xff] }
 0x3c9   :  { %v10191_v29 = vmax.f32 %v10190_v61, 0.0 }
 0x3ca   :  { %v5387_v1 = vpack.c.bf16 %v10189_v19, %v10187_v47  ;;  %v10192_v19 = vld [vmem:[#allocation10_spill] sm:$0xff] }
 0x3cb   :  { %v10193_v47 = vmax.f32 %v10192_v19, 0.0  ;;  %v10194_v19 = vld [vmem:[#allocation11_spill] sm:$0xff] }
 0x3cc   :  { %5388 = vst [vmem:[%s9749_s5] sm:$0xff] %v5387_v1  }
 0x3cd   :  { %v5392_v61 = vpack.c.bf16 %v10193_v47, %v10191_v29  ;;  %v10195_v29 = vmax.f32 %v10194_v19, 0.0  ;;  %v5402_v19 = vpack.c.bf16 %v4387_v22, %v4386_v3  ;;  %v5417_v3 = vpack.c.bf16 %v4393_v32, %v4392_v24 }
 0x3ce   :  { %v5422_v22 = vpack.c.bf16 %v4395_v2, %v4394_v6  ;;  %v5437_v24 = vpack.c.bf16 %v4401_v53, %v4400_v39  ;;  %v5442_v32 = vpack.c.bf16 %v4403_v44, %v4402_v5  ;;  %v5447_v6 = vpack.c.bf16 %v4405_v48, %v4404_v45 }
 0x3cf   :  { %v5397_v47 = vpack.c.bf16 %v4385_v54, %v10195_v29  ;;  %v5407_v29 = vpack.c.bf16 %v4389_v35, %v4388_v21  ;;  %v5412_v54 = vpack.c.bf16 %v4391_v31, %v4390_v59  ;;  %5575 = vst [vmem:[%s9749_s5 + $0x8] sm:$0xff] %v5392_v61   ;;  %5577 = vst [vmem:[%s9749_s5 + $0x18] sm:$0xff] %v5402_v19  }
 0x3d0   :  { %v5427_v21 = vpack.c.bf16 %v4397_v33, %v4396_v58  ;;  %v5432_v31 = vpack.c.bf16 %v4399_v63, %v4398_v62  ;;  %5580 = vst [vmem:[%s9749_s5 + $0x30] sm:$0xff] %v5417_v3   ;;  %5581 = vst [vmem:[%s9749_s5 + $0x38] sm:$0xff] %v5422_v22   ;;  %v5452_v35 = vpack.c.bf16 %v4407_v9, %v4406_v56 }
 0x3d1   :  { %5576 = vst [vmem:[%s9749_s5 + $0x10] sm:$0xff] %v5397_v47   ;;  %5578 = vst [vmem:[%s9749_s5 + $0x20] sm:$0xff] %v5407_v29   ;;  %v5457_v59 = vpack.c.bf16 %v4409_v57, %v4408_v14  ;;  %v5462_v2 = vpack.c.bf16 %v4411_v55, %v4410_v11  ;;  %v5467_v58 = vpack.c.bf16 %v4413_v17, %v4412_v26 }
 0x3d2   :  { %5579 = vst [vmem:[%s9749_s5 + $0x28] sm:$0xff] %v5412_v54   ;;  %5582 = vst [vmem:[%s9749_s5 + $0x40] sm:$0xff] %v5427_v21   ;;  %v5472_v33 = vpack.c.bf16 %v4415_v10, %v4414_v42  ;;  %v5477_v62 = vpack.c.bf16 %v4417_v30, %v4416_v13  ;;  %v5482_v63 = vpack.c.bf16 %v4419_v0, %v4418_v36 }
 0x3d3   :  { %5583 = vst [vmem:[%s9749_s5 + $0x48] sm:$0xff] %v5432_v31   ;;  %5584 = vst [vmem:[%s9749_s5 + $0x50] sm:$0xff] %v5437_v24   ;;  %v5487_v39 = vpack.c.bf16 %v4421_v27, %v4420_v8  ;;  %v5492_v53 = vpack.c.bf16 %v4423_v40, %v4422_v34  ;;  %v5497_v5 = vpack.c.bf16 %v4425_v20, %v4424_v12 }
 0x3d4   :  { %5585 = vst [vmem:[%s9749_s5 + $0x58] sm:$0xff] %v5442_v32   ;;  %5586 = vst [vmem:[%s9749_s5 + $0x60] sm:$0xff] %v5447_v6   ;;  %v5502_v44 = vpack.c.bf16 %v4427_v23, %v4426_v15  ;;  %v5507_v45 = vpack.c.bf16 %v4429_v25, %v4428_v4  ;;  %v5512_v48 = vpack.c.bf16 %v4431_v60, %v4430_v16 }
 0x3d5   :  { %5587 = vst [vmem:[%s9749_s5 + $0x68] sm:$0xff] %v5452_v35   ;;  %5588 = vst [vmem:[%s9749_s5 + $0x70] sm:$0xff] %v5457_v59   ;;  %v5517_v56 = vpack.c.bf16 %v4433_v43, %v4432_v18  ;;  %v5522_v9 = vpack.c.bf16 %v4435_v7, %v4434_v38  ;;  %v5527_v14 = vpack.c.bf16 %v4437_v52, %v4436_v37 }
 0x3d6   :  { %5589 = vst [vmem:[%s9749_s5 + $0x78] sm:$0xff] %v5462_v2   ;;  %5590 = vst [vmem:[%s9749_s5 + $0x80] sm:$0xff] %v5467_v58   ;;  %v5532_v57 = vpack.c.bf16 %v4439_v51, %v4438_v41  ;;  %v5537_v11 = vpack.c.bf16 %v4441_v46, %v4440_v28  ;;  %v5542_v55 = vpack.c.bf16 %v4443_v49, %v4442_v50 }
 0x3d7   :  { %5591 = vst [vmem:[%s9749_s5 + $0x88] sm:$0xff] %v5472_v33   ;;  %5592 = vst [vmem:[%s9749_s5 + $0x90] sm:$0xff] %v5477_v62  }
 0x3d8   :  { %5593 = vst [vmem:[%s9749_s5 + $0x98] sm:$0xff] %v5482_v63   ;;  %5594 = vst [vmem:[%s9749_s5 + $0xa0] sm:$0xff] %v5487_v39  }
 0x3d9   :  { %5595 = vst [vmem:[%s9749_s5 + $0xa8] sm:$0xff] %v5492_v53   ;;  %5596 = vst [vmem:[%s9749_s5 + $0xb0] sm:$0xff] %v5497_v5  }
 0x3da   :  { %5597 = vst [vmem:[%s9749_s5 + $0xb8] sm:$0xff] %v5502_v44   ;;  %5598 = vst [vmem:[%s9749_s5 + $0xc0] sm:$0xff] %v5507_v45  }
 0x3db   :  { %5599 = vst [vmem:[%s9749_s5 + $0xc8] sm:$0xff] %v5512_v48   ;;  %5600 = vst [vmem:[%s9749_s5 + $0xd0] sm:$0xff] %v5517_v56  }
 0x3dc   :  { %5601 = vst [vmem:[%s9749_s5 + $0xd8] sm:$0xff] %v5522_v9   ;;  %5602 = vst [vmem:[%s9749_s5 + $0xe0] sm:$0xff] %v5527_v14  }
 0x3dd   :  { %5603 = vst [vmem:[%s9749_s5 + $0xe8] sm:$0xff] %v5532_v57   ;;  %5604 = vst [vmem:[%s9749_s5 + $0xf0] sm:$0xff] %v5537_v11  }
 0x3de   :  { %5605 = vst [vmem:[%s9749_s5 + $0xf8] sm:$0xff] %v5542_v55  }

// kernel: student_resnet_forward.11
= control target key start
LH: loop header
LB: loop body
LE: loop exit
PB: predicated region body
PF: predicated region fallthrough
CT: control target
= control target key end

     0   :  { %s3387_s1 = inlined_call_operand.vmem [shape: bf16[1152,128], index: 1, kind: input, shape index: {}]   ;;  %s3388_s0 = inlined_call_operand.vmem [shape: bf16[128,1152], index: 0, kind: input, shape index: {}]   ;;  %s3389_s2 = inlined_call_operand.vmem [shape: f32[1,128], index: 2, kind: input, shape index: {}]   ;;  %s3390_s4 = inlined_call_operand.vmem [shape: bf16[128,128], index: 4, kind: input, shape index: {}]   ;;  %s3391_s3 = inlined_call_operand.vmem [shape: f32[1,128], index: 3, kind: input, shape index: {}]   ;;  %s3392_s5 = inlined_call_operand.vmem [shape: bf16[128,128], index: 5, kind: output, shape index: {}]  }
   0x1   :  { %v2374_v0 = vld [vmem:[%s3387_s1 + $0x78] sm:$0xff]   ;;  %v2378_v4 = vld [vmem:[%s3387_s1 + $0x70] sm:$0xff]   ;;  %v2382_v8 = vld [vmem:[%s3387_s1 + $0x68] sm:$0xff]  }
   0x2   :  { %v2375_v1 = vld [vmem:[%s3387_s1 + $0xf8] sm:$0xff]   ;;  %2054 = vmatprep.subr.bf16.mxu0 %v2374_v0  ;;  %v2379_v5 = vld [vmem:[%s3387_s1 + $0xf0] sm:$0xff]   ;;  %v2383_v9 = vld [vmem:[%s3387_s1 + $0xe8] sm:$0xff]  }
   0x3   :  { %v2376_v2 = vld [vmem:[%s3387_s1 + $0x38] sm:$0xff]   ;;  %2118 = vmatprep.subr.bf16.mxu1 %v2375_v1  ;;  %v2380_v6 = vld [vmem:[%s3387_s1 + $0x30] sm:$0xff]   ;;  %v2384_v10 = vld [vmem:[%s3387_s1 + $0x28] sm:$0xff]  }
   0x4   :  { %v2377_v3 = vld [vmem:[%s3387_s1 + $0xb8] sm:$0xff]   ;;  %2055 = vmatpush3.bf16.msra.mxu0 %v2376_v2  ;;  %v2381_v7 = vld [vmem:[%s3387_s1 + $0xb0] sm:$0xff]   ;;  %v2385_v11 = vld [vmem:[%s3387_s1 + $0xa8] sm:$0xff]  }
   0x5   :  { %2119 = vmatpush3.bf16.msra.mxu1 %v2377_v3  ;;  %2056 = vmatprep.subr.bf16.mxu0 %v2378_v4  ;;  %v2386_v12 = vld [vmem:[%s3387_s1 + $0x60] sm:$0xff]   ;;  %v2390_v16 = vld [vmem:[%s3387_s1 + $0x58] sm:$0xff]   ;;  %v2394_v20 = vld [vmem:[%s3387_s1 + $0x50] sm:$0xff]  }
   0x6   :  { %2120 = vmatprep.subr.bf16.mxu1 %v2379_v5  ;;  %v2387_v13 = vld [vmem:[%s3387_s1 + $0xe0] sm:$0xff]   ;;  %v2391_v17 = vld [vmem:[%s3387_s1 + $0xd8] sm:$0xff]   ;;  %v2395_v21 = vld [vmem:[%s3387_s1 + $0xd0] sm:$0xff]  }
   0x7   :  { %v2388_v14 = vld [vmem:[%s3387_s1 + $0x20] sm:$0xff]   ;;  %v2392_v18 = vld [vmem:[%s3387_s1 + $0x18] sm:$0xff]   ;;  %v2396_v22 = vld [vmem:[%s3387_s1 + $0x10] sm:$0xff]  }
   0x8   :  { %2057 = vmatpush3.bf16.msra.mxu0 %v2380_v6  ;;  %v2389_v15 = vld [vmem:[%s3387_s1 + $0xa0] sm:$0xff]   ;;  %v2393_v19 = vld [vmem:[%s3387_s1 + $0x98] sm:$0xff]   ;;  %v2397_v23 = vld [vmem:[%s3387_s1 + $0x90] sm:$0xff]  }
   0x9   :  { %2121 = vmatpush3.bf16.msra.mxu1 %v2381_v7  ;;  %2058 = vmatprep.subr.bf16.mxu0 %v2382_v8  ;;  %v2398_v24 = vld [vmem:[%s3387_s1 + $0x48] sm:$0xff]   ;;  %v2402_v28 = vld [vmem:[%s3387_s1 + $0x40] sm:$0xff]   ;;  %v2412_v36 = vld [vmem:[%s3387_s1 + $0x178] sm:$0xff]  }
   0xa   :  { %2122 = vmatprep.subr.bf16.mxu1 %v2383_v9  ;;  %v2399_v25 = vld [vmem:[%s3387_s1 + $0xc8] sm:$0xff]   ;;  %v2403_v29 = vld [vmem:[%s3387_s1 + $0xc0] sm:$0xff]   ;;  %v2413_v37 = vld [vmem:[%s3387_s1 + $0x138] sm:$0xff]  }
   0xb   :  { %v2400_v26 = vld [vmem:[%s3387_s1 + $0x8] sm:$0xff]   ;;  %v2404_v30 = vld [vmem:[%s3387_s1] sm:$0xff]   ;;  %v2416_v39 = vld [vmem:[%s3388_s0 + $0x54] ss:$36 sps:$4 sm:$0xff]  }
   0xc   :  { %2059 = vmatpush3.bf16.msra.mxu0 %v2384_v10  ;;  %v2401_v27 = vld [vmem:[%s3387_s1 + $0x88] sm:$0xff]   ;;  %v2405_v31 = vld [vmem:[%s3387_s1 + $0x80] sm:$0xff]   ;;  %v2419_v41 = vld [vmem:[%s3388_s0 + $0x50] ss:$36 sps:$4 sm:$0xff]  }
   0xd   :  { %2123 = vmatpush3.bf16.msra.mxu1 %v2385_v11  ;;  %2060 = vmatprep.subr.bf16.mxu0 %v2386_v12  ;;  %v2406_v32 = vld [vmem:[%s3388_s0] ss:$36 sps:$4 sm:$0xff]   ;;  %v2409_v34 = vld [vmem:[%s3388_s0 + $0x8] ss:$36 sps:$4 sm:$0xff]   ;;  %v2420_v42 = vld [vmem:[%s3387_s1 + $0x170] sm:$0xff]  }
   0xe   :  { %2124 = vmatprep.subr.bf16.mxu1 %v2387_v13  ;;  %v2408_v33 = vld [vmem:[%s3388_s0 + $0x4] ss:$36 sps:$4 sm:$0xff]   ;;  %v2411_v35 = vld [vmem:[%s3388_s0 + $0xc] ss:$36 sps:$4 sm:$0xff]   ;;  %v2422_v44 = vld [vmem:[%s3388_s0 + $0x94] ss:$36 sps:$4 sm:$0xff]  }
   0xf   :  { %1077 = vmatprep.mubr.bf16.mxu0 %v2408_v33  ;;  %1174 = vmatprep.mubr.bf16.mxu1 %v2411_v35  ;;  %v2414_v38 = vld [vmem:[%s3388_s0 + $0x4c] ss:$36 sps:$4 sm:$0xff]   ;;  %v2424_v45 = vld [vmem:[%s3388_s0 + $0x9c] ss:$36 sps:$4 sm:$0xff]   ;;  %v2434_v53 = vld [vmem:[%s3388_s0 + $0xe4] ss:$36 sps:$4 sm:$0xff]  }
  0x10   :  { %2061 = vmatpush3.bf16.msra.mxu0 %v2388_v14  ;;  %v2418_v40 = vld [vmem:[%s3388_s0 + $0x48] ss:$36 sps:$4 sm:$0xff]   ;;  %v2421_v43 = vld [vmem:[%s3387_s1 + $0x130] sm:$0xff]   ;;  %v2429_v47 = vld [vmem:[%s3387_s1 + $0x1f8] sm:$0xff]  }
  0x11   :  { %2125 = vmatpush3.bf16.msra.mxu1 %v2389_v15  ;;  %2062 = vmatprep.subr.bf16.mxu0 %v2390_v16  ;;  %v2428_v46 = vld [vmem:[%s3387_s1 + $0x168] sm:$0xff]   ;;  %v2426_v48 = vld [vmem:[%s3388_s0 + $0x90] ss:$36 sps:$4 sm:$0xff]   ;;  %v2431_v50 = vld [vmem:[%s3387_s1 + $0x1b8] sm:$0xff]  }
  0x12   :  { %2126 = vmatprep.subr.bf16.mxu1 %v2391_v17  ;;  %v2430_v49 = vld [vmem:[%s3387_s1 + $0x128] sm:$0xff]   ;;  %v2427_v51 = vld [vmem:[%s3388_s0 + $0x98] ss:$36 sps:$4 sm:$0xff]   ;;  %v2438_v54 = vld [vmem:[%s3387_s1 + $0x160] sm:$0xff]  }
  0x13   :  { %v2432_v52 = vld [vmem:[%s3388_s0 + $0xdc] ss:$36 sps:$4 sm:$0xff]   ;;  %v2439_v55 = vld [vmem:[%s3387_s1 + $0x1f0] sm:$0xff]   ;;  %v2442_v60 = vld [vmem:[%s3388_s0 + $0x124] ss:$36 sps:$4 sm:$0xff]  }
  0x14   :  { %2063 = vmatpush3.bf16.msra.mxu0 %v2392_v18  ;;  %v2440_v56 = vld [vmem:[%s3387_s1 + $0x120] sm:$0xff]   ;;  %v2441_v57 = vld [vmem:[%s3387_s1 + $0x1b0] sm:$0xff]   ;;  %v2436_v58 = vld [vmem:[%s3388_s0 + $0xd8] ss:$36 sps:$4 sm:$0xff]  }
  0x15   :  { %2127 = vmatpush3.bf16.msra.mxu1 %v2393_v19  ;;  %2064 = vmatprep.subr.bf16.mxu0 %v2394_v20  ;;  %v2437_v59 = vld [vmem:[%s3388_s0 + $0xe0] ss:$36 sps:$4 sm:$0xff]   ;;  %v2444_v61 = vld [vmem:[%s3388_s0 + $0x12c] ss:$36 sps:$4 sm:$0xff]   ;;  %v2448_v62 = vld [vmem:[%s3387_s1 + $0x158] sm:$0xff]  }
  0x16   :  { %2128 = vmatprep.subr.bf16.mxu1 %v2395_v21  ;;  %v2449_v63 = vld [vmem:[%s3387_s1 + $0x1e8] sm:$0xff]   ;;  %v2450_v0 = vld [vmem:[%s3387_s1 + $0x118] sm:$0xff]   ;;  %v2446_v2 = vld [vmem:[%s3388_s0 + $0x120] ss:$36 sps:$4 sm:$0xff]  }
  0x17   :  { %v2451_v1 = vld [vmem:[%s3387_s1 + $0x1a8] sm:$0xff]   ;;  %v2454_v5 = vld [vmem:[%s3388_s0 + $0x174] ss:$36 sps:$4 sm:$0xff]   ;;  %v2459_v7 = vld [vmem:[%s3387_s1 + $0x1e0] sm:$0xff]  }
  0x18   :  { %2065 = vmatpush3.bf16.msra.mxu0 %v2396_v22  ;;  %v2447_v3 = vld [vmem:[%s3388_s0 + $0x128] ss:$36 sps:$4 sm:$0xff]   ;;  %v2458_v6 = vld [vmem:[%s3387_s1 + $0x150] sm:$0xff]   ;;  %v2461_v9 = vld [vmem:[%s3387_s1 + $0x1a0] sm:$0xff]  }
  0x19   :  { %2129 = vmatpush3.bf16.msra.mxu1 %v2397_v23  ;;  %2066 = vmatprep.subr.bf16.mxu0 %v2398_v24  ;;  %v2452_v4 = vld [vmem:[%s3388_s0 + $0x16c] ss:$36 sps:$4 sm:$0xff]   ;;  %v2462_v12 = vld [vmem:[%s3388_s0 + $0x1b4] ss:$36 sps:$4 sm:$0xff]   ;;  %v2464_v14 = vld [vmem:[%s3388_s0 + $0x1bc] ss:$36 sps:$4 sm:$0xff]  }
  0x1a   :  { %2130 = vmatprep.subr.bf16.mxu1 %v2399_v25  ;;  %v2460_v8 = vld [vmem:[%s3387_s1 + $0x110] sm:$0xff]   ;;  %v2456_v10 = vld [vmem:[%s3388_s0 + $0x168] ss:$36 sps:$4 sm:$0xff]   ;;  %v2469_v15 = vld [vmem:[%s3387_s1 + $0x1d8] sm:$0xff]  }
  0x1b   :  { %v2457_v11 = vld [vmem:[%s3388_s0 + $0x170] ss:$36 sps:$4 sm:$0xff]   ;;  %v2468_v13 = vld [vmem:[%s3387_s1 + $0x148] sm:$0xff]   ;;  %v2471_v17 = vld [vmem:[%s3387_s1 + $0x198] sm:$0xff]  }
  0x1c   :  { %2067 = vmatpush3.bf16.msra.mxu0 %v2400_v26  ;;  %v2470_v16 = vld [vmem:[%s3387_s1 + $0x108] sm:$0xff]   ;;  %v2472_v18 = vld [vmem:[%s3387_s1 + $0x1d0] sm:$0xff]   ;;  %v2467_v21 = vld [vmem:[%s3388_s0 + $0x1b8] ss:$36 sps:$4 sm:$0xff]  }
  0x1d   :  { %2131 = vmatpush3.bf16.msra.mxu1 %v2401_v27  ;;  %2068 = vmatprep.subr.bf16.mxu0 %v2402_v28  ;;  %v2473_v19 = vld [vmem:[%s3387_s1 + $0x190] sm:$0xff]   ;;  %v2474_v22 = vld [vmem:[%s3388_s0 + $0x1fc] ss:$36 sps:$4 sm:$0xff]   ;;  %v2476_v23 = vld [vmem:[%s3388_s0 + $0x204] ss:$36 sps:$4 sm:$0xff]  }
  0x1e   :  { %2132 = vmatprep.subr.bf16.mxu1 %v2403_v29  ;;  %v2466_v20 = vld [vmem:[%s3388_s0 + $0x1b0] ss:$36 sps:$4 sm:$0xff]   ;;  %v2480_v24 = vld [vmem:[%s3387_s1 + $0x140] sm:$0xff]   ;;  %v2481_v25 = vld [vmem:[%s3387_s1 + $0x1c8] sm:$0xff]  }
  0x1f   :  { %v2482_v26 = vld [vmem:[%s3387_s1 + $0x100] sm:$0xff]   ;;  %v2483_v27 = vld [vmem:[%s3387_s1 + $0x188] sm:$0xff]   ;;  %v2478_v29 = vld [vmem:[%s3388_s0 + $0x1f8] ss:$36 sps:$4 sm:$0xff]  }
  0x20   :  { %2069 = vmatpush3.bf16.msra.mxu0 %v2404_v30  ;;  %v2484_v28 = vld [vmem:[%s3387_s1 + $0x1c0] sm:$0xff]   ;;  %v2488_v33 = vld [vmem:[%s3388_s0 + $0x14] ss:$36 sps:$4 sm:$0xff]  }
  0x21   :  { %2133 = vmatpush3.bf16.msra.mxu1 %v2405_v31  ;;  %2182 = vmatprep.subr.bf16.mxu0 %v2412_v36  ;;  %v2479_v30 = vld [vmem:[%s3388_s0 + $0x200] ss:$36 sps:$4 sm:$0xff]   ;;  %v2486_v35 = vld [vmem:[%s3388_s0 + $0x10] ss:$36 sps:$4 sm:$0xff]   ;;  %v2489_v36 = vld [vmem:[%s3388_s0 + $0x18] ss:$36 sps:$4 sm:$0xff]  }
  0x22   :  { %2246 = vmatprep.subr.bf16.mxu1 %v2429_v47  ;;  %v2485_v31 = vld [vmem:[%s3387_s1 + $0x180] sm:$0xff]  }
  0x23   :  { %1078 = vmatmul.mubr.bf16.vlgmr.msra.gmra.mxu0 %v2406_v32  ;;  %v2492_v32 = vld [vmem:[%s3387_s1 + $0x238] sm:$0xff]   ;;  %v2504_v47 = vld [vmem:[%s3388_s0 + $0xa0] ss:$36 sps:$4 sm:$0xff]  }
  0x24   :  { %1175 = vmatmul.mubr.bf16.vlgmr.msra.gmra.mxu1 %v2409_v34  ;;  %2183 = vmatpush3.bf16.msra.mxu0 %v2413_v37  ;;  %v2491_v34 = vld [vmem:[%s3388_s0 + $0x1c] ss:$36 sps:$4 sm:$0xff]  }
  0x25   :  { %1085 = vmatprep.mubr.bf16.mxu0 %v2414_v38  ;;  %1182 = vmatprep.mubr.bf16.mxu1 %v2416_v39  ;;  %v2493_v37 = vld [vmem:[%s3388_s0 + $0x5c] ss:$36 sps:$4 sm:$0xff]   ;;  %v2495_v38 = vld [vmem:[%s3388_s0 + $0x64] ss:$36 sps:$4 sm:$0xff]   ;;  %v2499_v39 = vld [vmem:[%s3387_s1 + $0x230] sm:$0xff]  }
  0x26   :  { %2184 = vmatprep.subr.bf16.mxu0 %v2420_v42  ;;  %2247 = vmatpush3.bf16.msra.mxu1 %v2431_v50  ;;  %v2498_v42 = vld [vmem:[%s3388_s0 + $0x60] ss:$36 sps:$4 sm:$0xff]   ;;  %v2509_v50 = vld [vmem:[%s3388_s0 + $0xf4] ss:$36 sps:$4 sm:$0xff]  }
  0x27   :  { %2248 = vmatprep.subr.bf16.mxu1 %v2439_v55  ;;  %v2514_v55 = vld [vmem:[%s3388_s0 + $0x134] ss:$36 sps:$4 sm:$0xff]  }
  0x28   :  { %2185 = vmatpush3.bf16.msra.mxu0 %v2421_v43  ;;  %v2500_v43 = vld [vmem:[%s3388_s0 + $0xa4] ss:$36 sps:$4 sm:$0xff]  }
  0x29   :  { %2186 = vmatprep.subr.bf16.mxu0 %v2428_v46  ;;  %v2520_v46 = vld [vmem:[%s3387_s1 + $0x218] sm:$0xff]  }
  0x2a   :  { %2249 = vmatpush3.bf16.msra.mxu1 %v2441_v57  ;;  %v2541_v57 = vld [vmem:[%s3387_s1 + $0x200] sm:$0xff]  }
  0x2b   :  { %1086 = vmatmul.mubr.bf16.gmra.mxu0 %v2418_v40  ;;  %2250 = vmatprep.subr.bf16.mxu1 %v2449_v63  ;;  %v2506_v40 = vld [vmem:[%s3387_s1 + $0x228] sm:$0xff]   ;;  %v2526_v63 = vld [vmem:[%s3388_s0 + $0x180] ss:$36 sps:$4 sm:$0xff]  }
  0x2c   :  { %1183 = vmatmul.mubr.bf16.gmra.mxu1 %v2419_v41  ;;  %1093 = vmatprep.mubr.bf16.mxu0 %v2422_v44  ;;  %v2497_v41 = vld [vmem:[%s3388_s0 + $0x58] ss:$36 sps:$4 sm:$0xff]   ;;  %v2502_v44 = vld [vmem:[%s3388_s0 + $0xac] ss:$36 sps:$4 sm:$0xff]  }
  0x2d   :  { %1190 = vmatprep.mubr.bf16.mxu1 %v2424_v45  ;;  %2187 = vmatpush3.bf16.msra.mxu0 %v2430_v49  ;;  %v2513_v45 = vld [vmem:[%s3387_s1 + $0x220] sm:$0xff]   ;;  %v2507_v49 = vld [vmem:[%s3388_s0 + $0xec] ss:$36 sps:$4 sm:$0xff]  }
  0x2e   :  { %2188 = vmatprep.subr.bf16.mxu0 %v2438_v54  ;;  %2251 = vmatpush3.bf16.msra.mxu1 %v2451_v1  ;;  %v2512_v54 = vld [vmem:[%s3388_s0 + $0xf0] ss:$36 sps:$4 sm:$0xff]  }
  0x2f   :  { %2252 = vmatprep.subr.bf16.mxu1 %v2459_v7  ;;  %v2530_v1 = vld [vmem:[%s3388_s0 + $0x1cc] ss:$36 sps:$4 sm:$0xff]  }
  0x30   :  { %v2540_v7 = vld [vmem:[%s3388_s0 + $0x210] ss:$36 sps:$4 sm:$0xff]  }
  0x31   :  { %2189 = vmatpush3.bf16.msra.mxu0 %v2440_v56  ;;  %v2516_v56 = vld [vmem:[%s3388_s0 + $0x13c] ss:$36 sps:$4 sm:$0xff]  }
  0x32   :  { %2190 = vmatprep.subr.bf16.mxu0 %v2448_v62  ;;  %2253 = vmatpush3.bf16.msra.mxu1 %v2461_v9  ;;  %v2525_v62 = vld [vmem:[%s3388_s0 + $0x178] ss:$36 sps:$4 sm:$0xff]   ;;  %v2543_v9 = vld [vmem:[%s3388_s0 + $0x140] ss:$36 sps:$4 sm:$0xff]  }
  0x33   :  { %1094 = vmatmul.mubr.bf16.gmra.mxu0 %v2426_v48  ;;  %2254 = vmatprep.subr.bf16.mxu1 %v2469_v15  ;;  %v2505_v48 = vld [vmem:[%s3388_s0 + $0xa8] ss:$36 sps:$4 sm:$0xff]   ;;  %v2549_v15 = vld [vmem:[%s3388_s0 + $0x218] ss:$36 sps:$4 sm:$0xff]  }
  0x34   :  { %1191 = vmatmul.mubr.bf16.gmra.mxu1 %v2427_v51  ;;  %1101 = vmatprep.mubr.bf16.mxu0 %v2432_v52  ;;  %v2527_v51 = vld [vmem:[%s3387_s1 + $0x210] sm:$0xff]   ;;  %v2511_v52 = vld [vmem:[%s3388_s0 + $0xe8] ss:$36 sps:$4 sm:$0xff]  }
  0x35   :  { %1198 = vmatprep.mubr.bf16.mxu1 %v2434_v53  ;;  %2191 = vmatpush3.bf16.msra.mxu0 %v2450_v0  ;;  %v2534_v53 = vld [vmem:[%s3387_s1 + $0x208] sm:$0xff]  }
  0x36   :  { %2192 = vmatprep.subr.bf16.mxu0 %v2458_v6  ;;  %2255 = vmatpush3.bf16.msra.mxu1 %v2471_v17  ;;  %v2528_v0 = vld [vmem:[%s3388_s0 + $0x1c4] ss:$36 sps:$4 sm:$0xff]  }
  0x37   :  { %2256 = vmatprep.subr.bf16.mxu1 %v2472_v18  ;;  %v2539_v6 = vld [vmem:[%s3388_s0 + $0x208] ss:$36 sps:$4 sm:$0xff]  }
  0x39   :  { %2193 = vmatpush3.bf16.msra.mxu0 %v2460_v8  ;;  %v2542_v8 = vld [vmem:[%s3388_s0 + $0x20] ss:$36 sps:$4 sm:$0xff]  }
  0x3a   :  { %2194 = vmatprep.subr.bf16.mxu0 %v2468_v13  ;;  %2257 = vmatpush3.bf16.msra.mxu1 %v2473_v19  ;;  %v2547_v13 = vld [vmem:[%s3388_s0 + $0x1d0] ss:$36 sps:$4 sm:$0xff]  }
  0x3b   :  { %1102 = vmatmul.mubr.bf16.gmra.mxu0 %v2436_v58  ;;  %2258 = vmatprep.subr.bf16.mxu1 %v2481_v25  ;;  %v2518_v58 = vld [vmem:[%s3388_s0 + $0x130] ss:$36 sps:$4 sm:$0xff]  }
  0x3c   :  { %1199 = vmatmul.mubr.bf16.gmra.mxu1 %v2437_v59  ;;  %1109 = vmatprep.mubr.bf16.mxu0 %v2442_v60  ;;  %v2519_v59 = vld [vmem:[%s3388_s0 + $0x138] ss:$36 sps:$4 sm:$0xff]  }
  0x3d   :  { %1206 = vmatprep.mubr.bf16.mxu1 %v2444_v61  ;;  %2195 = vmatpush3.bf16.msra.mxu0 %v2470_v16  ;;  %v2521_v60 = vld [vmem:[%s3388_s0 + $0x17c] ss:$36 sps:$4 sm:$0xff]   ;;  %v2523_v61 = vld [vmem:[%s3388_s0 + $0x184] ss:$36 sps:$4 sm:$0xff]  }
  0x3e   :  { %2196 = vmatprep.subr.bf16.mxu0 %v2480_v24  ;;  %2259 = vmatpush3.bf16.msra.mxu1 %v2483_v27 }
  0x3f   :  { %2260 = vmatprep.subr.bf16.mxu1 %v2484_v28 }
  0x41   :  { %2197 = vmatpush3.bf16.msra.mxu0 %v2482_v26 }
  0x42   :  { %2326 = vmatprep.subr.bf16.mxu0 %v2492_v32  ;;  %2261 = vmatpush3.bf16.msra.mxu1 %v2485_v31 }
  0x43   :  { %1110 = vmatmul.mubr.bf16.gmra.mxu0 %v2446_v2  ;;  %2358 = vmatprep.subr.bf16.mxu1 %v2492_v32  ;;  %v2532_v2 = vld [vmem:[%s3388_s0 + $0x1c0] ss:$36 sps:$4 sm:$0xff]  }
  0x44   :  { %1207 = vmatmul.mubr.bf16.gmra.mxu1 %v2447_v3  ;;  %1117 = vmatprep.mubr.bf16.mxu0 %v2452_v4  ;;  %v2533_v3 = vld [vmem:[%s3388_s0 + $0x1c8] ss:$36 sps:$4 sm:$0xff]  }
  0x45   :  { %1214 = vmatprep.mubr.bf16.mxu1 %v2454_v5  ;;  %v2535_v4 = vld [vmem:[%s3388_s0 + $0x20c] ss:$36 sps:$4 sm:$0xff]   ;;  %v2537_v5 = vld [vmem:[%s3388_s0 + $0x214] ss:$36 sps:$4 sm:$0xff]  }
  0x4b   :  { %1118 = vmatmul.mubr.bf16.gmra.mxu0 %v2456_v10  ;;  %v2544_v10 = vld [vmem:[%s3388_s0 + $0x68] ss:$36 sps:$4 sm:$0xff]  }
  0x4c   :  { %1215 = vmatmul.mubr.bf16.gmra.mxu1 %v2457_v11  ;;  %1125 = vmatprep.mubr.bf16.mxu0 %v2462_v12  ;;  %v2545_v11 = vld [vmem:[%s3388_s0 + $0x188] ss:$36 sps:$4 sm:$0xff]   ;;  %v2546_v12 = vld [vmem:[%s3388_s0 + $0xb0] ss:$36 sps:$4 sm:$0xff]  }
  0x4d   :  { %1222 = vmatprep.mubr.bf16.mxu1 %v2464_v14  ;;  %v2548_v14 = vld [vmem:[%s3388_s0 + $0xf8] ss:$36 sps:$4 sm:$0xff]  }
  0x53   :  { %1126 = vmatmul.mubr.bf16.gmra.mxu0 %v2466_v20 }
  0x54   :  { %1223 = vmatmul.mubr.bf16.gmra.mxu1 %v2467_v21  ;;  %1133 = vmatprep.mubr.bf16.mxu0 %v2474_v22 }
  0x55   :  { %1230 = vmatprep.mubr.bf16.mxu1 %v2476_v23 }
  0x5b   :  { %1134 = vmatmul.mubr.bf16.gmra.mxu0 %v2478_v29 }
  0x5c   :  { %1231 = vmatmul.mubr.bf16.gmra.mxu1 %v2479_v30  ;;  %1271 = vmatprep.mubr.bf16.mxu0 %v2488_v33 }
  0x5d   :  { %1368 = vmatprep.mubr.bf16.mxu1 %v2491_v34 }
  0x63   :  { %1272 = vmatmul.mubr.bf16.vlgmr.msra.gmra.mxu0 %v2486_v35 }
  0x64   :  { %1369 = vmatmul.mubr.bf16.vlgmr.msra.gmra.mxu1 %v2489_v36  ;;  %2327 = vmatpush3.bf16.msra.mxu0 %v2492_v32 }
  0x65   :  { %1279 = vmatprep.mubr.bf16.mxu0 %v2493_v37  ;;  %1376 = vmatprep.mubr.bf16.mxu1 %v2495_v38 }
  0x66   :  { %2328 = vmatprep.subr.bf16.mxu0 %v2499_v39  ;;  %2366 = vmatpush3.bf16.msra.mxu1 %v2492_v32 }
  0x67   :  { %2359 = vmatprep.subr.bf16.mxu1 %v2499_v39 }
  0x68   :  { %2329 = vmatpush3.bf16.msra.mxu0 %v2499_v39 }
  0x69   :  { %2330 = vmatprep.subr.bf16.mxu0 %v2506_v40 }
  0x6a   :  { %2367 = vmatpush3.bf16.msra.mxu1 %v2499_v39 }
  0x6b   :  { %1280 = vmatmul.mubr.bf16.gmra.mxu0 %v2497_v41  ;;  %2360 = vmatprep.subr.bf16.mxu1 %v2506_v40 }
  0x6c   :  { %1377 = vmatmul.mubr.bf16.gmra.mxu1 %v2498_v42  ;;  %1287 = vmatprep.mubr.bf16.mxu0 %v2500_v43 }
  0x6d   :  { %1384 = vmatprep.mubr.bf16.mxu1 %v2502_v44  ;;  %2331 = vmatpush3.bf16.msra.mxu0 %v2506_v40 }
  0x6e   :  { %2332 = vmatprep.subr.bf16.mxu0 %v2513_v45  ;;  %2368 = vmatpush3.bf16.msra.mxu1 %v2506_v40 }
  0x6f   :  { %2361 = vmatprep.subr.bf16.mxu1 %v2513_v45 }
  0x71   :  { %2333 = vmatpush3.bf16.msra.mxu0 %v2513_v45 }
  0x72   :  { %2334 = vmatprep.subr.bf16.mxu0 %v2520_v46  ;;  %2369 = vmatpush3.bf16.msra.mxu1 %v2513_v45 }
  0x73   :  { %1288 = vmatmul.mubr.bf16.gmra.mxu0 %v2504_v47  ;;  %2362 = vmatprep.subr.bf16.mxu1 %v2520_v46 }
  0x74   :  { %1385 = vmatmul.mubr.bf16.gmra.mxu1 %v2505_v48  ;;  %1295 = vmatprep.mubr.bf16.mxu0 %v2507_v49 }
  0x75   :  { %1392 = vmatprep.mubr.bf16.mxu1 %v2509_v50  ;;  %2335 = vmatpush3.bf16.msra.mxu0 %v2520_v46 }
  0x76   :  { %2336 = vmatprep.subr.bf16.mxu0 %v2527_v51  ;;  %2370 = vmatpush3.bf16.msra.mxu1 %v2520_v46 }
  0x77   :  { %2363 = vmatprep.subr.bf16.mxu1 %v2527_v51 }
  0x79   :  { %2337 = vmatpush3.bf16.msra.mxu0 %v2527_v51 }
  0x7a   :  { %2338 = vmatprep.subr.bf16.mxu0 %v2534_v53  ;;  %2371 = vmatpush3.bf16.msra.mxu1 %v2527_v51 }
  0x7b   :  { %1296 = vmatmul.mubr.bf16.gmra.mxu0 %v2511_v52  ;;  %2364 = vmatprep.subr.bf16.mxu1 %v2534_v53 }
  0x7c   :  { %1393 = vmatmul.mubr.bf16.gmra.mxu1 %v2512_v54  ;;  %1303 = vmatprep.mubr.bf16.mxu0 %v2514_v55 }
  0x7d   :  { %1400 = vmatprep.mubr.bf16.mxu1 %v2516_v56  ;;  %2339 = vmatpush3.bf16.msra.mxu0 %v2534_v53 }
  0x7e   :  { %2340 = vmatprep.subr.bf16.mxu0 %v2541_v57  ;;  %2372 = vmatpush3.bf16.msra.mxu1 %v2534_v53 }
  0x7f   :  { %2365 = vmatprep.subr.bf16.mxu1 %v2541_v57 }
  0x81   :  { %2341 = vmatpush3.bf16.msra.mxu0 %v2541_v57 }
  0x82   :  { %2373 = vmatpush3.bf16.msra.mxu1 %v2541_v57 }
  0x83   :  { %1304 = vmatmul.mubr.bf16.gmra.mxu0 %v2518_v58 }
  0x84   :  { %1401 = vmatmul.mubr.bf16.gmra.mxu1 %v2519_v59  ;;  %1311 = vmatprep.mubr.bf16.mxu0 %v2521_v60 }
  0x85   :  { %1408 = vmatprep.mubr.bf16.mxu1 %v2523_v61 }
  0x8b   :  { %1312 = vmatmul.mubr.bf16.gmra.mxu0 %v2525_v62 }
  0x8c   :  { %1409 = vmatmul.mubr.bf16.gmra.mxu1 %v2526_v63  ;;  %1319 = vmatprep.mubr.bf16.mxu0 %v2528_v0 }
  0x8d   :  { %1416 = vmatprep.mubr.bf16.mxu1 %v2530_v1 }
  0x93   :  { %1320 = vmatmul.mubr.bf16.gmra.mxu0 %v2532_v2 }
  0x94   :  { %1417 = vmatmul.mubr.bf16.gmra.mxu1 %v2533_v3  ;;  %1327 = vmatprep.mubr.bf16.mxu0 %v2535_v4 }
  0x95   :  { %1424 = vmatprep.mubr.bf16.mxu1 %v2537_v5 }
  0x9b   :  { %1328 = vmatmul.mubr.bf16.gmra.mxu0 %v2539_v6 }
  0x9c   :  { %1425 = vmatmul.mubr.bf16.gmra.mxu1 %v2540_v7  ;;  %2342 = vmatprep.mubr.bf16.mxu0 %v2542_v8 }
  0x9d   :  { %2350 = vmatprep.mubr.bf16.mxu1 %v2543_v9 }
  0xa3   :  { %2343 = vmatmul.mubr.bf16.vlgmr.msra.gmra.mxu0 %v2544_v10 }
  0xa4   :  { %2351 = vmatmul.mubr.bf16.vlgmr.msra.gmra.mxu1 %v2545_v11  ;;  %2346 = vmatprep.mubr.bf16.mxu0 %v2546_v12 }
  0xa5   :  { %2354 = vmatprep.mubr.bf16.mxu1 %v2547_v13 }
  0xab   :  { %2347 = vmatmul.mubr.bf16.gmra.mxu0 %v2548_v14 }
  0xac   :  { %2355 = vmatmul.mubr.bf16.gmra.mxu1 %v2549_v15 }
  0xe3   :  { %v2070_v16 = vpop.f32.mrf.mxu0 }
  0xe4   :  { %v2134_v17 = vpop.f32.mrf.mxu1 }
  0xe5   :  { %v2071_v18 = vpop.f32.mrf.mxu0 }
  0xe6   :  { %v2072_v19 = vadd.f32 %v2071_v18, %v2070_v16  ;;  %v2135_v20 = vpop.f32.mrf.mxu1 }
  0xe7   :  { %v2136_v21 = vadd.f32 %v2135_v20, %v2134_v17  ;;  %v2073_v22 = vpop.f32.mrf.mxu0 }
  0xe8   :  { %v2137_v23 = vpop.f32.mrf.mxu1 }
  0xe9   :  { %v3014_v24 = vadd.f32 %v2136_v21, %v2072_v19  ;;  %v2074_v25 = vpop.f32.mrf.mxu0 }
  0xea   :  { %v2075_v26 = vadd.f32 %v2074_v25, %v2073_v22  ;;  %v2138_v27 = vpop.f32.mrf.mxu1 }
  0xeb   :  { %v2139_v28 = vadd.f32 %v2138_v27, %v2137_v23  ;;  %v2076_v29 = vpop.f32.mrf.mxu0 }
  0xec   :  { %v2140_v30 = vpop.f32.mrf.mxu1 }
  0xed   :  { %v3016_v31 = vadd.f32 %v2139_v28, %v2075_v26  ;;  %v2077_v32 = vpop.f32.mrf.mxu0 }
  0xee   :  { %v2078_v33 = vadd.f32 %v2077_v32, %v2076_v29  ;;  %v2141_v34 = vpop.f32.mrf.mxu1 }
  0xef   :  { %v2142_v35 = vadd.f32 %v2141_v34, %v2140_v30  ;;  %v2079_v36 = vpop.f32.mrf.mxu0 }
  0xf0   :  { %v2143_v37 = vpop.f32.mrf.mxu1 }
  0xf1   :  { %v3018_v38 = vadd.f32 %v2142_v35, %v2078_v33  ;;  %v2080_v39 = vpop.f32.mrf.mxu0 }
  0xf2   :  { %v2081_v40 = vadd.f32 %v2080_v39, %v2079_v36  ;;  %v2144_v41 = vpop.f32.mrf.mxu1 }
  0xf3   :  { %v2145_v42 = vadd.f32 %v2144_v41, %v2143_v37  ;;  %v2082_v43 = vpop.f32.mrf.mxu0 }
  0xf4   :  { %v2146_v44 = vpop.f32.mrf.mxu1 }
  0xf5   :  { %v3020_v45 = vadd.f32 %v2145_v42, %v2081_v40  ;;  %v2083_v46 = vpop.f32.mrf.mxu0 }
  0xf6   :  { %v2084_v47 = vadd.f32 %v2083_v46, %v2082_v43  ;;  %v2147_v48 = vpop.f32.mrf.mxu1 }
  0xf7   :  { %v2148_v49 = vadd.f32 %v2147_v48, %v2146_v44  ;;  %v2085_v50 = vpop.f32.mrf.mxu0 }
  0xf8   :  { %v2149_v51 = vpop.f32.mrf.mxu1 }
  0xf9   :  { %v3022_v52 = vadd.f32 %v2148_v49, %v2084_v47  ;;  %v2086_v53 = vpop.f32.mrf.mxu0 }
  0xfa   :  { %v2087_v54 = vadd.f32 %v2086_v53, %v2085_v50  ;;  %v2150_v55 = vpop.f32.mrf.mxu1 }
  0xfb   :  { %v2151_v56 = vadd.f32 %v2150_v55, %v2149_v51  ;;  %v2088_v57 = vpop.f32.mrf.mxu0 }
  0xfc   :  { %v2152_v58 = vpop.f32.mrf.mxu1 }
  0xfd   :  { %v3024_v59 = vadd.f32 %v2151_v56, %v2087_v54  ;;  %v2089_v60 = vpop.f32.mrf.mxu0 }
  0xfe   :  { %v2090_v61 = vadd.f32 %v2089_v60, %v2088_v57  ;;  %v2153_v62 = vpop.f32.mrf.mxu1 }
  0xff   :  { %v2154_v63 = vadd.f32 %v2153_v62, %v2152_v58  ;;  %v2091_v0 = vpop.f32.mrf.mxu0 }
 0x100   :  { %v2155_v1 = vpop.f32.mrf.mxu1 }
 0x101   :  { %v3026_v2 = vadd.f32 %v2154_v63, %v2090_v61  ;;  %v2092_v3 = vpop.f32.mrf.mxu0 }
 0x102   :  { %v2093_v4 = vadd.f32 %v2092_v3, %v2091_v0  ;;  %v2156_v5 = vpop.f32.mrf.mxu1 }
 0x103   :  { %v2157_v6 = vadd.f32 %v2156_v5, %v2155_v1  ;;  %v2094_v7 = vpop.f32.mrf.mxu0 }
 0x104   :  { %v2158_v8 = vpop.f32.mrf.mxu1 }
 0x105   :  { %v3028_v9 = vadd.f32 %v2157_v6, %v2093_v4  ;;  %v2095_v10 = vpop.f32.mrf.mxu0 }
 0x106   :  { %v2096_v11 = vadd.f32 %v2095_v10, %v2094_v7  ;;  %v2159_v12 = vpop.f32.mrf.mxu1 }
 0x107   :  { %v2160_v13 = vadd.f32 %v2159_v12, %v2158_v8  ;;  %v2097_v14 = vpop.f32.mrf.mxu0 }
 0x108   :  { %v2161_v15 = vpop.f32.mrf.mxu1 }
 0x109   :  { %v3030_v16 = vadd.f32 %v2160_v13, %v2096_v11  ;;  %v2098_v17 = vpop.f32.mrf.mxu0 }
 0x10a   :  { %v2099_v18 = vadd.f32 %v2098_v17, %v2097_v14  ;;  %v2162_v19 = vpop.f32.mrf.mxu1 }
 0x10b   :  { %v2163_v20 = vadd.f32 %v2162_v19, %v2161_v15  ;;  %v2100_v21 = vpop.f32.mrf.mxu0 }
 0x10c   :  { %v2164_v22 = vpop.f32.mrf.mxu1 }
 0x10d   :  { %v3032_v23 = vadd.f32 %v2163_v20, %v2099_v18  ;;  %v2101_v25 = vpop.f32.mrf.mxu0 }
 0x10e   :  { %v2102_v26 = vadd.f32 %v2101_v25, %v2100_v21  ;;  %v2165_v27 = vpop.f32.mrf.mxu1 }
 0x10f   :  { %v2166_v28 = vadd.f32 %v2165_v27, %v2164_v22  ;;  %v2103_v29 = vpop.f32.mrf.mxu0 }
 0x110   :  { %v2167_v30 = vpop.f32.mrf.mxu1 }
 0x111   :  { %v3034_v32 = vadd.f32 %v2166_v28, %v2102_v26  ;;  %v2104_v33 = vpop.f32.mrf.mxu0 }
 0x112   :  { %v2105_v34 = vadd.f32 %v2104_v33, %v2103_v29  ;;  %v2168_v35 = vpop.f32.mrf.mxu1 }
 0x113   :  { %3393 = vst [vmem:[#allocation2_spill] sm:$0xff] %v3034_v32  ;;  %v2169_v36 = vadd.f32 %v2168_v35, %v2167_v30  ;;  %v2106_v37 = vpop.f32.mrf.mxu0 }
 0x114   :  { %v2170_v39 = vpop.f32.mrf.mxu1 }
 0x115   :  { %v3036_v40 = vadd.f32 %v2169_v36, %v2105_v34  ;;  %v2107_v41 = vpop.f32.mrf.mxu0 }
 0x116   :  { %v2108_v42 = vadd.f32 %v2107_v41, %v2106_v37  ;;  %v2171_v43 = vpop.f32.mrf.mxu1 }
 0x117   :  { %3394 = vst [vmem:[#allocation3_spill] sm:$0xff] %v3036_v40  ;;  %v2172_v44 = vadd.f32 %v2171_v43, %v2170_v39  ;;  %v2109_v46 = vpop.f32.mrf.mxu0 }
 0x118   :  { %v2173_v47 = vpop.f32.mrf.mxu1 }
 0x119   :  { %v3038_v48 = vadd.f32 %v2172_v44, %v2108_v42  ;;  %v2110_v49 = vpop.f32.mrf.mxu0 }
 0x11a   :  { %v2111_v50 = vadd.f32 %v2110_v49, %v2109_v46  ;;  %v2174_v51 = vpop.f32.mrf.mxu1 }
 0x11b   :  { %3395 = vst [vmem:[#allocation4_spill] sm:$0xff] %v3038_v48  ;;  %v2175_v53 = vadd.f32 %v2174_v51, %v2173_v47  ;;  %v2112_v54 = vpop.f32.mrf.mxu0 }
 0x11c   :  { %v2176_v55 = vpop.f32.mrf.mxu1 }
 0x11d   :  { %v3040_v56 = vadd.f32 %v2175_v53, %v2111_v50  ;;  %v2113_v57 = vpop.f32.mrf.mxu0 }
 0x11e   :  { %v2114_v58 = vadd.f32 %v2113_v57, %v2112_v54  ;;  %v2177_v60 = vpop.f32.mrf.mxu1 }
 0x11f   :  { %3396 = vst [vmem:[#allocation5_spill] sm:$0xff] %v3040_v56  ;;  %v2178_v61 = vadd.f32 %v2177_v60, %v2176_v55  ;;  %v2115_v62 = vpop.f32.mrf.mxu0 }
 0x120   :  { %v2179_v63 = vpop.f32.mrf.mxu1 }
 0x121   :  { %v3042_v0 = vadd.f32 %v2178_v61, %v2114_v58  ;;  %v2116_v1 = vpop.f32.mrf.mxu0 }
 0x122   :  { %v2117_v3 = vadd.f32 %v2116_v1, %v2115_v62  ;;  %v2180_v4 = vpop.f32.mrf.mxu1 }
 0x123   :  { %3397 = vst [vmem:[#allocation6_spill] sm:$0xff] %v3042_v0  ;;  %v2181_v5 = vadd.f32 %v2180_v4, %v2179_v63  ;;  %v2198_v6 = vpop.f32.mrf.mxu0 }
 0x124   :  { %v3044_v7 = vpop.f32.mrf.mxu1 }
 0x125   :  { %v3046_v8 = vadd.f32 %v2181_v5, %v2117_v3  ;;  %v2199_v10 = vpop.f32.mrf.mxu0 }
 0x126   :  { %v2200_v11 = vadd.f32 %v2199_v10, %v2198_v6  ;;  %v3048_v12 = vpop.f32.mrf.mxu1 }
 0x127   :  { %3398 = vst [vmem:[#allocation7_spill] sm:$0xff] %v3046_v8  ;;  %v2201_v13 = vpop.f32.mrf.mxu0 }
 0x128   :  { %v3051_v14 = vadd.f32 %v2200_v11, %v3014_v24  ;;  %v3053_v15 = vpop.f32.mrf.mxu1 }
 0x129   :  { %v2202_v17 = vpop.f32.mrf.mxu0 }
 0x12a   :  { %v3055_v18 = vpop.f32.mrf.mxu1 }
 0x12b   :  { %v2204_v19 = vpop.f32.mrf.mxu0 }
 0x12c   :  { %v3057_v20 = vpop.f32.mrf.mxu1 }
 0x12d   :  { %v2205_v21 = vpop.f32.mrf.mxu0 }
 0x12e   :  { %v2269_v22 = vpop.f32.mrf.mxu1 }
 0x12f   :  { %v2207_v25 = vpop.f32.mrf.mxu0 }
 0x130   :  { %v3059_v26 = vpop.f32.mrf.mxu1 }
 0x131   :  { %v2208_v27 = vpop.f32.mrf.mxu0 }
 0x132   :  { %v2272_v28 = vpop.f32.mrf.mxu1 }
 0x133   :  { %v2210_v29 = vpop.f32.mrf.mxu0 }
 0x134   :  { %v3061_v30 = vpop.f32.mrf.mxu1 }
 0x135   :  { %v2211_v24 = vpop.f32.mrf.mxu0 }
 0x136   :  { %v2275_v33 = vpop.f32.mrf.mxu1 }
 0x137   :  { %v2213_v34 = vpop.f32.mrf.mxu0 }
 0x138   :  { %v3063_v35 = vpop.f32.mrf.mxu1 }
 0x139   :  { %v2214_v36 = vpop.f32.mrf.mxu0 }
 0x13a   :  { %v3065_v37 = vpop.f32.mrf.mxu1 }
 0x13b   :  { %v2216_v39 = vpop.f32.mrf.mxu0 }
 0x13c   :  { %v3067_v41 = vpop.f32.mrf.mxu1 }
 0x13d   :  { %v2217_v42 = vpop.f32.mrf.mxu0 }
 0x13e   :  { %v3069_v43 = vpop.f32.mrf.mxu1 }
 0x13f   :  { %v2219_v44 = vpop.f32.mrf.mxu0 }
 0x140   :  { %v3071_v46 = vpop.f32.mrf.mxu1 }
 0x141   :  { %v2220_v47 = vpop.f32.mrf.mxu0 }
 0x142   :  { %v3073_v49 = vpop.f32.mrf.mxu1 }
 0x143   :  { %v3075_v50 = vpop.f32.mrf.mxu0 }
 0x144   :  { %v3077_v51 = vpop.f32.mrf.mxu1 }
 0x145   :  { %v3079_v53 = vpop.f32.mrf.mxu0 }
 0x146   :  { %v3081_v54 = vpop.f32.mrf.mxu1 }
 0x147   :  { %v3083_v55 = vpop.f32.mrf.mxu0 }
 0x148   :  { %v3085_v57 = vpop.f32.mrf.mxu1 }
 0x149   :  { %v3087_v58 = vpop.f32.mrf.mxu0 }
 0x14a   :  { %v3089_v60 = vpop.f32.mrf.mxu1 }
 0x14b   :  { %v3091_v61 = vpop.f32.mrf.mxu0 }
 0x14c   :  { %v3093_v62 = vpop.f32.mrf.mxu1 }
 0x14d   :  { %3399 = vst [vmem:[#allocation8_spill] sm:$0xff] %v3093_v62  ;;  %v3095_v63 = vpop.f32.mrf.mxu0 }
 0x14e   :  { %v3097_v1 = vpop.f32.mrf.mxu1 }
 0x14f   :  { %3400 = vst [vmem:[#allocation9_spill] sm:$0xff] %v3097_v1  ;;  %v3099_v3 = vpop.f32.mrf.mxu0 }
 0x150   :  { %v3101_v4 = vpop.f32.mrf.mxu1 }
 0x151   :  { %3401 = vst [vmem:[#allocation10_spill] sm:$0xff] %v3101_v4  ;;  %v3103_v5 = vpop.f32.mrf.mxu0 }
 0x152   :  { %v3105_v6 = vpop.f32.mrf.mxu1 }
 0x153   :  { %3402 = vst [vmem:[#allocation11_spill] sm:$0xff] %v3105_v6  ;;  %v3107_v10 = vpop.f32.mrf.mxu0 }
 0x154   :  { %3403 = vst [vmem:[#allocation12_spill] sm:$0xff] %v3107_v10  ;;  %v3109_v11 = vpop.f32.mrf.mxu1 }
 0x155   :  { %3404 = vst [vmem:[#allocation13_spill] sm:$0xff] %v3109_v11  ;;  %v3111_v8 = vpop.f32.mrf.mxu0 }
 0x156   :  { %3405 = vst [vmem:[#allocation14_spill] sm:$0xff] %v3111_v8  ;;  %v3113_v0 = vpop.f32.mrf.mxu1  ;;  %v2203_v8 = vadd.f32 %v2202_v17, %v2201_v13  ;;  %v2270_v17 = vadd.f32 %v2269_v22, %v3057_v20 }
 0x157   :  { %3406 = vst [vmem:[#allocation15_spill] sm:$0xff] %v3113_v0  ;;  %v3115_v56 = vpop.f32.mrf.mxu0  ;;  %v2206_v0 = vadd.f32 %v2205_v21, %v2204_v19 }
 0x158   :  { %3407 = vst [vmem:[#allocation16_spill] sm:$0xff] %v3115_v56  ;;  %v3117_v48 = vpop.f32.mrf.mxu1  ;;  %v2209_v56 = vadd.f32 %v2208_v27, %v2207_v25  ;;  %v2273_v25 = vadd.f32 %v2272_v28, %v3059_v26 }
 0x159   :  { %3408 = vst [vmem:[#allocation17_spill] sm:$0xff] %v3117_v48  ;;  %v3119_v40 = vpop.f32.mrf.mxu0  ;;  %v1282_v13 = vadd.f32 %v2206_v0, %v3018_v38  ;;  %v2221_v38 = vadd.f32 %v2220_v47, %v2219_v44 }
 0x15a   :  { %3409 = vst [vmem:[#allocation18_spill] sm:$0xff] %v3119_v40  ;;  %v3121_v1 = vpop.f32.mrf.mxu1  ;;  %v2212_v40 = vadd.f32 %v2211_v24, %v2210_v29  ;;  %v1285_v21 = vadd.f32 %v2209_v56, %v3020_v45  ;;  %v2276_v29 = vadd.f32 %v2275_v33, %v3061_v30  ;;  %v2279_v56 = vadd.f32 %v3065_v37, %v3063_v35 }
 0x15b   :  { %3410 = vst [vmem:[#allocation19_spill] sm:$0xff] %v3121_v1  ;;  %v3123_v4 = vpop.f32.mrf.mxu0  ;;  %v2264_v1 = vadd.f32 %v3048_v12, %v3044_v7  ;;  %v2215_v7 = vadd.f32 %v2214_v36, %v2213_v34  ;;  %v1301_v34 = vadd.f32 %v2221_v38, %v3028_v9  ;;  %v2224_v35 = vadd.f32 %v3079_v53, %v3075_v50 }
 0x15c   :  { %3411 = vst [vmem:[#allocation20_spill] sm:$0xff] %v3123_v4  ;;  %v3125_v62 = vpop.f32.mrf.mxu1  ;;  %v1290_v27 = vadd.f32 %v2212_v40, %v3022_v52  ;;  %v1382_v26 = vadd.f32 %v2273_v25, %v1285_v21  ;;  %v2227_v9 = vadd.f32 %v3087_v58, %v3083_v55 }
 0x15d   :  { %3412 = vst [vmem:[#allocation21_spill] sm:$0xff] %v3125_v62  ;;  %v3127_v6 = vpop.f32.mrf.mxu0  ;;  %v1293_v45 = vadd.f32 %v2215_v7, %v3024_v59  ;;  %v2285_v59 = vadd.f32 %v3073_v49, %v3071_v46  ;;  %v1306_v53 = vadd.f32 %v2224_v35, %v3030_v16  ;;  %v2291_v16 = vadd.f32 %v3089_v60, %v3085_v57  ;;  %v3418_v60 = vld [vmem:[#allocation12_spill] sm:$0xff]  ;;  %v3419_v38 = vld [vmem:[#allocation14_spill] sm:$0xff] }
 0x15e   :  { %3413 = vst [vmem:[#allocation22_spill] sm:$0xff] %v3127_v6  ;;  %v3129_v10 = vpop.f32.mrf.mxu1  ;;  %v1277_v6 = vadd.f32 %v2203_v8, %v3016_v31  ;;  %v1371_v31 = vadd.f32 %v2264_v1, %v3051_v14  ;;  %v2282_v14 = vadd.f32 %v3069_v43, %v3067_v41  ;;  %v1387_v24 = vadd.f32 %v2276_v29, %v1290_v27  ;;  %v3415_v29 = vld [vmem:[#allocation2_spill] sm:$0xff] }
 0x15f   :  { %3414 = vst [vmem:[#allocation23_spill] sm:$0xff] %v3129_v10  ;;  %v3131_v11 = vpop.f32.mrf.mxu0  ;;  %v2267_v10 = vadd.f32 %v3055_v18, %v3053_v15  ;;  %v2218_v15 = vadd.f32 %v2217_v42, %v2216_v39  ;;  %v1379_v18 = vadd.f32 %v2270_v17, %v1282_v13  ;;  %v1390_v44 = vadd.f32 %v2279_v56, %v1293_v45  ;;  %v3420_v56 = vld [vmem:[#allocation3_spill] sm:$0xff] }
 0x160   :  { %v3133_v32 = vpop.f32.mrf.mxu1  ;;  %v2230_v1 = vadd.f32 %v3095_v63, %v3091_v61  ;;  %v1398_v17 = vadd.f32 %v2285_v59, %v1301_v34  ;;  %v1309_v21 = vadd.f32 %v2227_v9, %v3032_v23 }
 0x161   :  { %v3135_v48 = vpop.f32.mrf.mxu0  ;;  %v1374_v22 = vadd.f32 %v2267_v10, %v1277_v6  ;;  %v1298_v33 = vadd.f32 %v2218_v15, %v3026_v2  ;;  %v3417_v15 = vld [vmem:[#allocation9_spill] sm:$0xff]  ;;  %v3424_v34 = vld [vmem:[#allocation18_spill] sm:$0xff] }
 0x162   :  { %v3139_v4 = vpop.f32.mrf.mxu1  ;;  %v1314_v23 = vadd.f32 %v2230_v1, %v3415_v29  ;;  %v1406_v35 = vadd.f32 %v2291_v16, %v1309_v21  ;;  %v3431_v21 = vld [vmem:[#allocation17_spill] sm:$0xff]  ;;  %v3432_v16 = vld [vmem:[#allocation19_spill] sm:$0xff] }
 0x163   :  { %v2344_v62 = vpop.f32.mrf.mxu0  ;;  %v1395_v55 = vadd.f32 %v2282_v14, %v1298_v33  ;;  %v3422_v14 = vld [vmem:[#allocation11_spill] sm:$0xff]  ;;  %v3423_v33 = vld [vmem:[#allocation16_spill] sm:$0xff] }
 0x164   :  { %v3146_v19 = vpop.f32.mrf.mxu1  ;;  %v3164_v28 = vadd.f32 %v2344_v62, %v1379_v18  ;;  %v2288_v62 = vadd.f32 %v3081_v54, %v3077_v51  ;;  %v2233_v51 = vadd.f32 %v3103_v5, %v3099_v3  ;;  %v2236_v3 = vadd.f32 %v3419_v38, %v3418_v60 }
 0x165   :  { %v1467_v12 = vpop.f32.mrf.mxu0  ;;  %v2239_v59 = vadd.f32 %v3424_v34, %v3423_v33 }
 0x166   :  { %v3153_v8 = vpop.f32.mrf.mxu1  ;;  %v3155_v20 = vadd.f32 %v1467_v12, %v1371_v31  ;;  %v1554_v46 = vmul.f32 %v3164_v28, %v3164_v28  ;;  %v3416_v31 = vld [vmem:[#allocation8_spill] sm:$0xff]  ;;  %v1403_v5 = vadd.f32 %v2288_v62, %v1306_v53  ;;  %v3429_v62 = vld [vmem:[#allocation22_spill] sm:$0xff]  ;;  %v3435_v60 = vld [vmem:[#allocation23_spill] sm:$0xff] }
 0x167   :  { %v2345_v0 = vpop.f32.mrf.mxu0  ;;  %v2294_v57 = vadd.f32 %v3417_v15, %v3416_v31  ;;  %v3428_v53 = vld [vmem:[#allocation20_spill] sm:$0xff]  ;;  %v3433_v31 = vld [vmem:[#allocation6_spill] sm:$0xff] }
 0x168   :  { %v3160_v52 = vpop.f32.mrf.mxu1  ;;  %v1552_v37 = vmul.f32 %v3155_v20, %v3155_v20  ;;  %v3176_v39 = vadd.f32 %v2345_v0, %v1382_v26  ;;  %v1317_v26 = vadd.f32 %v2233_v51, %v3420_v56  ;;  %v2242_v1 = vadd.f32 %v3429_v62, %v3428_v53 }
 0x169   :  { %v1470_v40 = vpop.f32.mrf.mxu0  ;;  %v2303_v51 = vadd.f32 %v3432_v16, %v3431_v21 }
 0x16a   :  { %v3166_v30 = vadd.f32 %v1470_v40, %v1374_v22  ;;  %v1502_v42 = vpop.f32.mrf.mxu1  ;;  %v1555_v6 = vmul.f32 %v3176_v39, %v3176_v39  ;;  %v3421_v40 = vld [vmem:[#allocation10_spill] sm:$0xff]  ;;  %v1330_v15 = vadd.f32 %v2242_v1, %v3433_v31 }
 0x16b   :  { %v2348_v36 = vpop.f32.mrf.mxu0 }
 0x16c   :  { %v1530_v41 = vadd.f32 %v3166_v30, %v3155_v20  ;;  %v1553_v2 = vmul.f32 %v3166_v30, %v3166_v30  ;;  %v3202_v54 = vadd.f32 %v2348_v36, %v1395_v55  ;;  %v2356_v61 = vpop.f32.mrf.mxu1  ;;  %v1411_v55 = vadd.f32 %v2294_v57, %v1314_v23  ;;  %v3434_v57 = vld [vmem:[#allocation21_spill] sm:$0xff] }
 0x16d   :  { %v1483_v43 = vpop.f32.mrf.mxu0  ;;  %v2306_v38 = vadd.f32 %v3435_v60, %v3434_v57 }
 0x16e   :  { %v1531_v47 = vadd.f32 %v1530_v41, %v3164_v28  ;;  %v1568_v49 = vadd.f32 %v1553_v2, %v1552_v37  ;;  %v3187_v50 = vadd.f32 %v1483_v43, %v1387_v24  ;;  %v2297_v24 = vadd.f32 %v3422_v14, %v3421_v40  ;;  %v1515_v36 = vpop.f32.mrf.mxu1  ;;  %v3425_v43 = vld [vmem:[#allocation4_spill] sm:$0xff] }
 0x16f   :  { %v2349_v58 = vpop.f32.mrf.mxu0  ;;  %v3225_v37 = vadd.f32 %v3153_v8, %v1403_v5  ;;  %v1558_v41 = vmul.f32 %v3202_v54, %v3202_v54  ;;  %v1427_v33 = vadd.f32 %v2306_v38, %v1330_v15 }
 0x170   :  { %v1569_v10 = vadd.f32 %v1568_v49, %v1554_v46  ;;  %v1532_v13 = vadd.f32 %v1531_v47, %v3176_v39  ;;  %v1556_v7 = vmul.f32 %v3187_v50, %v3187_v50  ;;  %v3214_v18 = vadd.f32 %v2349_v58, %v1398_v17  ;;  %v3426_v46 = vld [vmem:[#allocation13_spill] sm:$0xff]  ;;  %v3427_v47 = vld [vmem:[#allocation15_spill] sm:$0xff] }
 0x171   :  { %v1486_v63 = vpop.f32.mrf.mxu0  ;;  %v2300_v49 = vadd.f32 %v3427_v47, %v3426_v46  ;;  %v3235_v58 = vadd.f32 %v1502_v42, %v1406_v35  ;;  %v1560_v42 = vmul.f32 %v3225_v37, %v3225_v37 }
 0x172   :  { %v1533_v25 = vadd.f32 %v1532_v13, %v3187_v50  ;;  %v1570_v12 = vadd.f32 %v1569_v10, %v1555_v6  ;;  %v3207_v27 = vadd.f32 %v1486_v63, %v1390_v44  ;;  %v1322_v44 = vadd.f32 %v2236_v3, %v3425_v43  ;;  %v3430_v13 = vld [vmem:[#allocation5_spill] sm:$0xff] }
 0x173   :  { %v1559_v8 = vmul.f32 %v3214_v18, %v3214_v18  ;;  %v1325_v17 = vadd.f32 %v2239_v59, %v3430_v13  ;;  %v2245_v63 = vadd.f32 %v3135_v48, %v3131_v11  ;;  %v1561_v48 = vmul.f32 %v3235_v58, %v3235_v58 }
 0x174   :  { %v1571_v0 = vadd.f32 %v1570_v12, %v1556_v7  ;;  %v1534_v22 = vadd.f32 %v1533_v25, %v3207_v27  ;;  %v1557_v45 = vmul.f32 %v3207_v27, %v3207_v27  ;;  %v1414_v25 = vadd.f32 %v2297_v24, %v1317_v26  ;;  %v2357_v7 = vpop.f32.mrf.mxu1 }
 0x175   :  { %v3246_v12 = vadd.f32 %v3146_v19, %v1411_v55  ;;  %v1419_v3 = vadd.f32 %v2300_v49, %v1322_v44  ;;  %v1422_v56 = vadd.f32 %v2303_v51, %v1325_v17 }
 0x176   :  { %v1535_v2 = vadd.f32 %v1534_v22, %v3202_v54  ;;  %v1572_v9 = vadd.f32 %v1571_v0, %v1557_v45  ;;  %v3255_v5 = vadd.f32 %v3160_v52, %v1414_v25  ;;  %v3436_v0 = vld [vmem:[#allocation7_spill] sm:$0xff]  ;;  %v2309_v45 = vadd.f32 %v3139_v4, %v3133_v32  ;;  %v1518_v26 = vpop.f32.mrf.mxu1 }
 0x177   :  { %v1333_v22 = vadd.f32 %v2245_v63, %v3436_v0  ;;  %v1562_v40 = vmul.f32 %v3246_v12, %v3246_v12  ;;  %v3265_v14 = vadd.f32 %v1515_v36, %v1419_v3  ;;  %v3270_v59 = vadd.f32 %v1518_v26, %v1422_v56  ;;  %v3295_v0 = vld [vmem:[%s3390_s4] sm:$0xff]   ;;  %v3305_v56 = vld [vmem:[%s3390_s4 + $0x10] sm:$0xff]  }
 0x178   :  { %v1536_v6 = vadd.f32 %v1535_v2, %v3214_v18  ;;  %v1573_v10 = vadd.f32 %v1572_v9, %v1558_v41  ;;  %v1563_v34 = vmul.f32 %v3255_v5, %v3255_v5  ;;  %v3273_v4 = vadd.f32 %v2356_v61, %v1427_v33 }
 0x179   :  { %v1430_v32 = vadd.f32 %v2309_v45, %v1333_v22  ;;  %v1564_v2 = vmul.f32 %v3265_v14, %v3265_v14  ;;  %v1565_v46 = vmul.f32 %v3270_v59, %v3270_v59  ;;  %v1601_v3 = vlaneseq  ;;  %v3300_v22 = vld [vmem:[%s3390_s4 + $0x8] sm:$0xff]  }
 0x17a   :  { %v1537_v29 = vadd.f32 %v1536_v6, %v3225_v37  ;;  %v1574_v23 = vadd.f32 %v1573_v10, %v1559_v8  ;;  %v1566_v49 = vmul.f32 %v3273_v4, %v3273_v4  ;;  %v1970_v33 = vunpack.c.l.bf16 %v3295_v0 }
 0x17b   :  { %v3278_v43 = vadd.f32 %v2357_v7, %v1430_v32  ;;  %v3327_v32 = vld [vmem:[%s3390_s4 + $0x28] sm:$0xff]  }
 0x17c   :  { %v1575_v11 = vadd.f32 %v1574_v23, %v1560_v42  ;;  %v1538_v19 = vadd.f32 %v1537_v29, %v3235_v58 }
 0x17d   :  { %v1567_v62 = vmul.f32 %v3278_v43, %v3278_v43 }
 0x17e   :  { %v1539_v52 = vadd.f32 %v1538_v19, %v3246_v12  ;;  %v1576_v24 = vadd.f32 %v1575_v11, %v1561_v48  ;;  %v1602_v48 = vshrl.u32 %v1601_v3, 7  ;;  %v1593_v11 = vld [vmem:[%s3389_s2] sm:$0x1] }
 0x180   :  { %v1540_v35 = vadd.f32 %v1539_v52, %v3255_v5  ;;  %v1577_v41 = vadd.f32 %v1576_v24, %v1562_v40  ;;  %v1603_v19 = vsub.s32 0, %v1602_v48  ;;  %v3310_v40 = vld [vmem:[%s3390_s4 + $0x18] sm:$0xff]   ;;  %v3315_v52 = vld [vmem:[%s3390_s4 + $0x20] sm:$0xff]  }
 0x181   :  { %v1597_v24 = vld [vmem:[%s3391_s3] sm:$0x1] }
 0x182   :  { %v1541_v36 = vadd.f32 %v1540_v35, %v3265_v14  ;;  %v1578_v9 = vadd.f32 %v1577_v41, %v1563_v34  ;;  %v1971_v34 = vunpack.c.h.bf16 %v3295_v0  ;;  %v1974_v35 = vunpack.c.l.bf16 %v3300_v22 }
 0x183   :  { %v1975_v41 = vunpack.c.h.bf16 %v3300_v22 }
 0x184   :  { %v1542_v44 = vadd.f32 %v1541_v36, %v3270_v59  ;;  %v1579_v47 = vadd.f32 %v1578_v9, %v1564_v2  ;;  %v3332_v2 = vld [vmem:[%s3390_s4 + $0x30] sm:$0xff]  }
 0x186   :  { %v1543_v61 = vadd.f32 %v1542_v44, %v3273_v4  ;;  %v1580_v53 = vadd.f32 %v1579_v47, %v1565_v46  ;;  %v1978_v44 = vunpack.c.l.bf16 %v3305_v56  ;;  %v1979_v46 = vunpack.c.h.bf16 %v3305_v56 }
 0x187   :  { %v1982_v47 = vunpack.c.l.bf16 %v3310_v40 }
 0x188   :  { %v1544_v1 = vadd.f32 %v1543_v61, %v3278_v43  ;;  %v1581_v55 = vadd.f32 %v1580_v53, %v1566_v49  ;;  %v1983_v49 = vunpack.c.h.bf16 %v3310_v40  ;;  %v1986_v61 = vunpack.c.l.bf16 %v3315_v52 }
 0x189   :  { %v1987_v53 = vunpack.c.h.bf16 %v3315_v52 }
 0x18a   :  { %v1545_v8 = vrot.slane %v1544_v1, 4  ;;  %v1582_v6 = vadd.f32 %v1581_v55, %v1567_v62  ;;  %v1991_v55 = vunpack.c.h.bf16 %v3327_v32 }
 0x18c   :  { %v1546_v10 = vadd.f32 %v1545_v8, %v1544_v1  ;;  %v1583_v13 = vrot.slane %v1582_v6, 4  ;;  %v1990_v1 = vunpack.c.l.bf16 %v3327_v32  ;;  %v1994_v8 = vunpack.c.l.bf16 %v3332_v2 }
 0x18e   :  { %v1547_v17 = vrot.slane %v1546_v10, 2  ;;  %v1584_v21 = vadd.f32 %v1583_v13, %v1582_v6 }
 0x190   :  { %v1548_v16 = vadd.f32 %v1547_v17, %v1546_v10  ;;  %v1585_v51 = vrot.slane %v1584_v21, 2 }
 0x192   :  { %v1549_v63 = vrot.slane %v1548_v16, 1  ;;  %v1586_v25 = vadd.f32 %v1585_v51, %v1584_v21 }
 0x194   :  { %v1550_v7 = vadd.f32 %v1549_v63, %v1548_v16  ;;  %v1587_v42 = vrot.slane %v1586_v25, 1 }
 0x196   :  { %v1551_v29 = vmul.f32 0.0078125, %v1550_v7  ;;  %v1588_v23 = vadd.f32 %v1587_v42, %v1586_v25  ;;  %v2046_v25 = vld [vmem:[%s3390_s4 + $0x38] sm:$0xff]   ;;  %v1995_v42 = vunpack.c.h.bf16 %v3332_v2 }
 0x198   :  { %v1589_v31 = vmul.f32 0.0078125, %v1588_v23  ;;  %v1590_v15 = vmul.f32 %v1551_v29, %v1551_v29  ;;  %v1999_v23 = vunpack.c.h.bf16 %v2046_v25 }
 0x19a   :  { %v1591_v57 = vsub.f32 %v1589_v31, %v1590_v15 }
 0x19c   :  { %v1592_v60 = vmax.f32 %v1591_v57, 0.0 }
 0x19e   :  { %v1594_v38 = vadd.f32 1e-05, %v1592_v60 }
 0x1a0   :  { %2550 = vrsqrt.f32 %v1594_v38 }
 0x1ad   :  { %v2551_v45 = vpop.eup %2550 }
 0x1ae   :  { %v1596_v26 = vmul.f32 %v2551_v45, %v1593_v11 }
 0x1b0   :  { %v1598_v36 = vmul.f32 %v1596_v26, %v1551_v29  ;;  %v1604_v9 = vrot.slane %v1596_v26, %v1603_v19  ;;  %v1998_v29 = vunpack.c.l.bf16 %v2046_v25 }
 0x1b2   :  { %v1599_v62 = vsub.f32 %v1597_v24, %v1598_v36  ;;  %v1606_v6 = vmul.f32 %v1604_v9, %v3155_v20  ;;  %v1607_v10 = vmul.f32 %v1604_v9, %v3166_v30  ;;  %v1611_v13 = vmul.f32 %v1604_v9, %v3207_v27 }
 0x1b3   :  { %v1612_v17 = vmul.f32 %v1604_v9, %v3202_v54  ;;  %v1613_v21 = vmul.f32 %v1604_v9, %v3214_v18  ;;  %v1614_v16 = vmul.f32 %v1604_v9, %v3225_v37  ;;  %v1615_v51 = vmul.f32 %v1604_v9, %v3235_v58 }
 0x1b4   :  { %v1616_v63 = vmul.f32 %v1604_v9, %v3246_v12  ;;  %v1617_v20 = vmul.f32 %v1604_v9, %v3255_v5  ;;  %v1618_v30 = vmul.f32 %v1604_v9, %v3265_v14  ;;  %v1619_v27 = vmul.f32 %v1604_v9, %v3270_v59 }
 0x1b5   :  { %v1620_v54 = vmul.f32 %v1604_v9, %v3273_v4  ;;  %v1608_v18 = vmul.f32 %v1604_v9, %v3164_v28  ;;  %v1609_v37 = vmul.f32 %v1604_v9, %v3176_v39  ;;  %v1621_v58 = vmul.f32 %v1604_v9, %v3278_v43 }
 0x1b6   :  { %v1626_v7 = vrot.slane %v1599_v62, %v1603_v19  ;;  %v1610_v12 = vmul.f32 %v1604_v9, %v3187_v50 }
 0x1b8   :  { %v1628_v5 = vadd.f32 %v1626_v7, %v1606_v6  ;;  %v1629_v31 = vadd.f32 %v1626_v7, %v1607_v10  ;;  %v1630_v14 = vadd.f32 %v1626_v7, %v1608_v18  ;;  %v1631_v15 = vadd.f32 %v1626_v7, %v1609_v37 }
 0x1b9   :  { %v1632_v59 = vadd.f32 %v1626_v7, %v1610_v12  ;;  %v1633_v57 = vadd.f32 %v1626_v7, %v1611_v13  ;;  %v1634_v4 = vadd.f32 %v1626_v7, %v1612_v17  ;;  %v1635_v60 = vadd.f32 %v1626_v7, %v1613_v21 }
 0x1ba   :  { %v1636_v28 = vadd.f32 %v1626_v7, %v1614_v16  ;;  %v1637_v38 = vadd.f32 %v1626_v7, %v1615_v51  ;;  %v1638_v39 = vadd.f32 %v1626_v7, %v1616_v63  ;;  %v1639_v3 = vadd.f32 %v1626_v7, %v1617_v20 }
 0x1bb   :  { %v1640_v43 = vadd.f32 %v1626_v7, %v1618_v30  ;;  %v1641_v48 = vadd.f32 %v1626_v7, %v1619_v27  ;;  %v1642_v11 = vadd.f32 %v1626_v7, %v1620_v54  ;;  %v1643_v50 = vadd.f32 %v1626_v7, %v1621_v58 }
 0x1bc   :  { %v1676_v19 = vadd.f32 %v1970_v33, %v1628_v5  ;;  %v1677_v0 = vadd.f32 %v1971_v34, %v1629_v31  ;;  %v1678_v22 = vadd.f32 %v1974_v35, %v1630_v14  ;;  %v1679_v45 = vadd.f32 %v1975_v41, %v1631_v15 }
 0x1bd   :  { %v1680_v56 = vadd.f32 %v1978_v44, %v1632_v59  ;;  %v1681_v26 = vadd.f32 %v1979_v46, %v1633_v57  ;;  %v1682_v40 = vadd.f32 %v1982_v47, %v1634_v4  ;;  %v1683_v52 = vadd.f32 %v1983_v49, %v1635_v60 }
 0x1be   :  { %v1684_v24 = vadd.f32 %v1986_v61, %v1636_v28  ;;  %v1685_v32 = vadd.f32 %v1987_v53, %v1637_v38  ;;  %v1686_v2 = vadd.f32 %v1990_v1, %v1638_v39  ;;  %v1687_v36 = vadd.f32 %v1991_v55, %v1639_v3 }
 0x1bf   :  { %v1688_v9 = vadd.f32 %v1994_v8, %v1640_v43  ;;  %v1689_v62 = vadd.f32 %v1995_v42, %v1641_v48  ;;  %v1690_v6 = vadd.f32 %v1998_v29, %v1642_v11  ;;  %v1691_v10 = vadd.f32 %v1999_v23, %v1643_v50 }
 0x1c0   :  { %v1692_v13 = vmax.f32 %v1676_v19, 0.0  ;;  %v1693_v17 = vmax.f32 %v1677_v0, 0.0  ;;  %v1694_v21 = vmax.f32 %v1678_v22, 0.0  ;;  %v1695_v16 = vmax.f32 %v1679_v45, 0.0 }
 0x1c1   :  { %v1696_v33 = vmax.f32 %v1680_v56, 0.0  ;;  %v1697_v34 = vmax.f32 %v1681_v26, 0.0  ;;  %v1698_v35 = vmax.f32 %v1682_v40, 0.0  ;;  %v1699_v41 = vmax.f32 %v1683_v52, 0.0 }
 0x1c2   :  { %v1700_v44 = vmax.f32 %v1684_v24, 0.0  ;;  %v1701_v46 = vmax.f32 %v1685_v32, 0.0  ;;  %v1702_v47 = vmax.f32 %v1686_v2, 0.0  ;;  %v1703_v49 = vmax.f32 %v1687_v36, 0.0 }
 0x1c3   :  { %v1704_v61 = vmax.f32 %v1688_v9, 0.0  ;;  %v1705_v53 = vmax.f32 %v1689_v62, 0.0  ;;  %v1706_v1 = vmax.f32 %v1690_v6, 0.0  ;;  %v1707_v55 = vmax.f32 %v1691_v10, 0.0 }
 0x1c4   :  { %v2003_v8 = vpack.c.bf16 %v1693_v17, %v1692_v13  ;;  %v2008_v51 = vpack.c.bf16 %v1695_v16, %v1694_v21  ;;  %v2013_v63 = vpack.c.bf16 %v1697_v34, %v1696_v33  ;;  %v2018_v25 = vpack.c.bf16 %v1699_v41, %v1698_v35 }
 0x1c5   :  { %v2023_v20 = vpack.c.bf16 %v1701_v46, %v1700_v44  ;;  %v2028_v30 = vpack.c.bf16 %v1703_v49, %v1702_v47  ;;  %v2033_v27 = vpack.c.bf16 %v1705_v53, %v1704_v61  ;;  %v2038_v54 = vpack.c.bf16 %v1707_v55, %v1706_v1 }
 0x1c6   :  { %2004 = vst [vmem:[%s3392_s5] sm:$0xff] %v2003_v8   ;;  %2047 = vst [vmem:[%s3392_s5 + $0x8] sm:$0xff] %v2008_v51  }
 0x1c7   :  { %2048 = vst [vmem:[%s3392_s5 + $0x10] sm:$0xff] %v2013_v63   ;;  %2049 = vst [vmem:[%s3392_s5 + $0x18] sm:$0xff] %v2018_v25  }
 0x1c8   :  { %2050 = vst [vmem:[%s3392_s5 + $0x20] sm:$0xff] %v2023_v20   ;;  %2051 = vst [vmem:[%s3392_s5 + $0x28] sm:$0xff] %v2028_v30  }
 0x1c9   :  { %2052 = vst [vmem:[%s3392_s5 + $0x30] sm:$0xff] %v2033_v27   ;;  %2053 = vst [vmem:[%s3392_s5 + $0x38] sm:$0xff] %v2038_v54  }

// kernel: student_resnet_forward.12
= control target key start
LH: loop header
LB: loop body
LE: loop exit
PB: predicated region body
PF: predicated region fallthrough
CT: control target
= control target key end

     0   :  { %s1691_s1 = inlined_call_operand.vmem [shape: bf16[1152,128], index: 1, kind: input, shape index: {}]   ;;  %s1692_s0 = inlined_call_operand.vmem [shape: bf16[32,1152], index: 0, kind: input, shape index: {}]   ;;  %s1693_s2 = inlined_call_operand.vmem [shape: f32[1,128], index: 2, kind: input, shape index: {}]   ;;  %s1694_s3 = inlined_call_operand.vmem [shape: f32[1,128], index: 3, kind: input, shape index: {}]   ;;  %s1695_s4 = inlined_call_operand.vmem [shape: bf16[32,128], index: 4, kind: output, shape index: {}]  }
   0x1   :  { %v1284_v0 = vld [vmem:[%s1691_s1 + $0x78] sm:$0xff]   ;;  %v1288_v4 = vld [vmem:[%s1691_s1 + $0x70] sm:$0xff]   ;;  %v1292_v8 = vld [vmem:[%s1691_s1 + $0x68] sm:$0xff]  }
   0x2   :  { %v1285_v1 = vld [vmem:[%s1691_s1 + $0xf8] sm:$0xff]   ;;  %1142 = vmatprep.subr.bf16.mxu0 %v1284_v0  ;;  %v1289_v5 = vld [vmem:[%s1691_s1 + $0xf0] sm:$0xff]   ;;  %v1293_v9 = vld [vmem:[%s1691_s1 + $0xe8] sm:$0xff]  }
   0x3   :  { %v1286_v2 = vld [vmem:[%s1691_s1 + $0x38] sm:$0xff]   ;;  %1170 = vmatprep.subr.bf16.mxu1 %v1285_v1  ;;  %v1290_v6 = vld [vmem:[%s1691_s1 + $0x30] sm:$0xff]   ;;  %v1294_v10 = vld [vmem:[%s1691_s1 + $0x28] sm:$0xff]  }
   0x4   :  { %v1287_v3 = vld [vmem:[%s1691_s1 + $0xb8] sm:$0xff]   ;;  %1143 = vmatpush3.bf16.msra.mxu0 %v1286_v2  ;;  %v1291_v7 = vld [vmem:[%s1691_s1 + $0xb0] sm:$0xff]   ;;  %v1295_v11 = vld [vmem:[%s1691_s1 + $0xa8] sm:$0xff]  }
   0x5   :  { %1171 = vmatpush3.bf16.msra.mxu1 %v1287_v3  ;;  %1144 = vmatprep.subr.bf16.mxu0 %v1288_v4  ;;  %v1296_v12 = vld [vmem:[%s1691_s1 + $0x60] sm:$0xff]   ;;  %v1300_v16 = vld [vmem:[%s1691_s1 + $0x58] sm:$0xff]   ;;  %v1304_v20 = vld [vmem:[%s1691_s1 + $0x50] sm:$0xff]  }
   0x6   :  { %1172 = vmatprep.subr.bf16.mxu1 %v1289_v5  ;;  %v1297_v13 = vld [vmem:[%s1691_s1 + $0xe0] sm:$0xff]   ;;  %v1301_v17 = vld [vmem:[%s1691_s1 + $0xd8] sm:$0xff]   ;;  %v1305_v21 = vld [vmem:[%s1691_s1 + $0xd0] sm:$0xff]  }
   0x7   :  { %v1298_v14 = vld [vmem:[%s1691_s1 + $0x20] sm:$0xff]   ;;  %v1302_v18 = vld [vmem:[%s1691_s1 + $0x18] sm:$0xff]   ;;  %v1306_v22 = vld [vmem:[%s1691_s1 + $0x10] sm:$0xff]  }
   0x8   :  { %1145 = vmatpush3.bf16.msra.mxu0 %v1290_v6  ;;  %v1299_v15 = vld [vmem:[%s1691_s1 + $0xa0] sm:$0xff]   ;;  %v1303_v19 = vld [vmem:[%s1691_s1 + $0x98] sm:$0xff]   ;;  %v1307_v23 = vld [vmem:[%s1691_s1 + $0x90] sm:$0xff]  }
   0x9   :  { %1173 = vmatpush3.bf16.msra.mxu1 %v1291_v7  ;;  %1146 = vmatprep.subr.bf16.mxu0 %v1292_v8  ;;  %v1308_v24 = vld [vmem:[%s1691_s1 + $0x48] sm:$0xff]   ;;  %v1312_v28 = vld [vmem:[%s1691_s1 + $0x40] sm:$0xff]   ;;  %v1322_v36 = vld [vmem:[%s1691_s1 + $0x178] sm:$0xff]  }
   0xa   :  { %1174 = vmatprep.subr.bf16.mxu1 %v1293_v9  ;;  %v1309_v25 = vld [vmem:[%s1691_s1 + $0xc8] sm:$0xff]   ;;  %v1313_v29 = vld [vmem:[%s1691_s1 + $0xc0] sm:$0xff]   ;;  %v1323_v37 = vld [vmem:[%s1691_s1 + $0x138] sm:$0xff]  }
   0xb   :  { %v1310_v26 = vld [vmem:[%s1691_s1 + $0x8] sm:$0xff]   ;;  %v1314_v30 = vld [vmem:[%s1691_s1] sm:$0xff]   ;;  %v1324_v38 = vld [vmem:[%s1691_s1 + $0x1f8] sm:$0xff]  }
   0xc   :  { %1147 = vmatpush3.bf16.msra.mxu0 %v1294_v10  ;;  %v1311_v27 = vld [vmem:[%s1691_s1 + $0x88] sm:$0xff]   ;;  %v1315_v31 = vld [vmem:[%s1691_s1 + $0x80] sm:$0xff]   ;;  %v1325_v39 = vld [vmem:[%s1691_s1 + $0x1b8] sm:$0xff]  }
   0xd   :  { %1175 = vmatpush3.bf16.msra.mxu1 %v1295_v11  ;;  %1148 = vmatprep.subr.bf16.mxu0 %v1296_v12  ;;  %v1316_v32 = vld [vmem:[%s1692_s0] ss:$36 sps:$4 sm:$0xff]   ;;  %v1319_v34 = vld [vmem:[%s1692_s0 + $0x8] ss:$36 sps:$4 sm:$0xff]   ;;  %v1326_v40 = vld [vmem:[%s1691_s1 + $0x170] sm:$0xff]  }
   0xe   :  { %1176 = vmatprep.subr.bf16.mxu1 %v1297_v13  ;;  %v1318_v33 = vld [vmem:[%s1692_s0 + $0x4] ss:$36 sps:$4 sm:$0xff]   ;;  %v1321_v35 = vld [vmem:[%s1692_s0 + $0xc] ss:$36 sps:$4 sm:$0xff]   ;;  %v1338_v52 = vld [vmem:[%s1691_s1 + $0x158] sm:$0xff]  }
   0xf   :  { %738 = vmatprep.mubr.bf16.mxu0 %v1318_v33  ;;  %787 = vmatprep.mubr.bf16.mxu1 %v1321_v35  ;;  %v1327_v41 = vld [vmem:[%s1691_s1 + $0x130] sm:$0xff]   ;;  %v1330_v44 = vld [vmem:[%s1691_s1 + $0x168] sm:$0xff]   ;;  %v1334_v48 = vld [vmem:[%s1691_s1 + $0x160] sm:$0xff]  }
  0x10   :  { %1149 = vmatpush3.bf16.msra.mxu0 %v1298_v14  ;;  %v1328_v42 = vld [vmem:[%s1691_s1 + $0x1f0] sm:$0xff]   ;;  %v1331_v45 = vld [vmem:[%s1691_s1 + $0x128] sm:$0xff]   ;;  %v1335_v49 = vld [vmem:[%s1691_s1 + $0x120] sm:$0xff]  }
  0x11   :  { %1177 = vmatpush3.bf16.msra.mxu1 %v1299_v15  ;;  %1150 = vmatprep.subr.bf16.mxu0 %v1300_v16  ;;  %v1329_v43 = vld [vmem:[%s1691_s1 + $0x1b0] sm:$0xff]   ;;  %v1332_v46 = vld [vmem:[%s1691_s1 + $0x1e8] sm:$0xff]   ;;  %v1336_v50 = vld [vmem:[%s1691_s1 + $0x1e0] sm:$0xff]  }
  0x12   :  { %1178 = vmatprep.subr.bf16.mxu1 %v1301_v17  ;;  %v1333_v47 = vld [vmem:[%s1691_s1 + $0x1a8] sm:$0xff]   ;;  %v1337_v51 = vld [vmem:[%s1691_s1 + $0x1a0] sm:$0xff]   ;;  %v1339_v53 = vld [vmem:[%s1691_s1 + $0x118] sm:$0xff]  }
  0x13   :  { %v1340_v54 = vld [vmem:[%s1692_s0 + $0x4c] ss:$36 sps:$4 sm:$0xff]   ;;  %v1342_v55 = vld [vmem:[%s1692_s0 + $0x54] ss:$36 sps:$4 sm:$0xff]   ;;  %v1356_v4 = vld [vmem:[%s1691_s1 + $0x140] sm:$0xff]  }
  0x14   :  { %1151 = vmatpush3.bf16.msra.mxu0 %v1302_v18  ;;  %v1344_v56 = vld [vmem:[%s1691_s1 + $0x1d8] sm:$0xff]   ;;  %v1345_v57 = vld [vmem:[%s1692_s0 + $0x48] ss:$36 sps:$4 sm:$0xff]   ;;  %v1346_v58 = vld [vmem:[%s1692_s0 + $0x50] ss:$36 sps:$4 sm:$0xff]  }
  0x15   :  { %1179 = vmatpush3.bf16.msra.mxu1 %v1303_v19  ;;  %1152 = vmatprep.subr.bf16.mxu0 %v1304_v20  ;;  %v1347_v59 = vld [vmem:[%s1691_s1 + $0x198] sm:$0xff]   ;;  %v1348_v60 = vld [vmem:[%s1691_s1 + $0x150] sm:$0xff]   ;;  %v1352_v0 = vld [vmem:[%s1691_s1 + $0x148] sm:$0xff]  }
  0x16   :  { %1180 = vmatprep.subr.bf16.mxu1 %v1305_v21  ;;  %v1349_v61 = vld [vmem:[%s1691_s1 + $0x110] sm:$0xff]   ;;  %v1353_v1 = vld [vmem:[%s1691_s1 + $0x108] sm:$0xff]   ;;  %v1357_v5 = vld [vmem:[%s1691_s1 + $0x100] sm:$0xff]  }
  0x17   :  { %v1350_v62 = vld [vmem:[%s1691_s1 + $0x1d0] sm:$0xff]   ;;  %v1354_v2 = vld [vmem:[%s1691_s1 + $0x1c8] sm:$0xff]   ;;  %v1358_v6 = vld [vmem:[%s1691_s1 + $0x1c0] sm:$0xff]  }
  0x18   :  { %1153 = vmatpush3.bf16.msra.mxu0 %v1306_v22  ;;  %v1351_v63 = vld [vmem:[%s1691_s1 + $0x190] sm:$0xff]   ;;  %v1355_v3 = vld [vmem:[%s1691_s1 + $0x188] sm:$0xff]   ;;  %v1362_v9 = vld [vmem:[%s1691_s1 + $0x180] sm:$0xff]  }
  0x19   :  { %1181 = vmatpush3.bf16.msra.mxu1 %v1307_v23  ;;  %1154 = vmatprep.subr.bf16.mxu0 %v1308_v24  ;;  %v1359_v7 = vld [vmem:[%s1692_s0 + $0x10] ss:$36 sps:$4 sm:$0xff]   ;;  %v1363_v10 = vld [vmem:[%s1691_s1 + $0x238] sm:$0xff]   ;;  %v1371_v16 = vld [vmem:[%s1691_s1 + $0x228] sm:$0xff]  }
  0x1a   :  { %1182 = vmatprep.subr.bf16.mxu1 %v1309_v25  ;;  %v1361_v8 = vld [vmem:[%s1692_s0 + $0x14] ss:$36 sps:$4 sm:$0xff]   ;;  %v1366_v12 = vld [vmem:[%s1692_s0 + $0x1c] ss:$36 sps:$4 sm:$0xff]   ;;  %v1372_v17 = vld [vmem:[%s1692_s0 + $0x64] ss:$36 sps:$4 sm:$0xff]  }
  0x1b   :  { %v1364_v11 = vld [vmem:[%s1692_s0 + $0x18] ss:$36 sps:$4 sm:$0xff]   ;;  %v1367_v13 = vld [vmem:[%s1691_s1 + $0x230] sm:$0xff]   ;;  %v1374_v18 = vld [vmem:[%s1692_s0 + $0x60] ss:$36 sps:$4 sm:$0xff]  }
  0x1c   :  { %1155 = vmatpush3.bf16.msra.mxu0 %v1310_v26  ;;  %v1368_v14 = vld [vmem:[%s1692_s0 + $0x5c] ss:$36 sps:$4 sm:$0xff]   ;;  %v1377_v22 = vld [vmem:[%s1691_s1 + $0x210] sm:$0xff]   ;;  %v1378_v23 = vld [vmem:[%s1691_s1 + $0x208] sm:$0xff]  }
  0x1d   :  { %1183 = vmatpush3.bf16.msra.mxu1 %v1311_v27  ;;  %1156 = vmatprep.subr.bf16.mxu0 %v1312_v28  ;;  %v1370_v15 = vld [vmem:[%s1692_s0 + $0x58] ss:$36 sps:$4 sm:$0xff]   ;;  %v1375_v19 = vld [vmem:[%s1691_s1 + $0x220] sm:$0xff]   ;;  %v1381_v25 = vld [vmem:[%s1692_s0 + $0x68] ss:$36 sps:$4 sm:$0xff]  }
  0x1e   :  { %1184 = vmatprep.subr.bf16.mxu1 %v1313_v29  ;;  %v1376_v20 = vld [vmem:[%s1691_s1 + $0x218] sm:$0xff]   ;;  %v1380_v21 = vld [vmem:[%s1692_s0 + $0x20] ss:$36 sps:$4 sm:$0xff]  }
  0x1f   :  { %v1379_v24 = vld [vmem:[%s1691_s1 + $0x200] sm:$0xff]  }
  0x20   :  { %1157 = vmatpush3.bf16.msra.mxu0 %v1314_v30 }
  0x21   :  { %1185 = vmatpush3.bf16.msra.mxu1 %v1315_v31  ;;  %1198 = vmatprep.subr.bf16.mxu0 %v1322_v36 }
  0x22   :  { %1226 = vmatprep.subr.bf16.mxu1 %v1324_v38 }
  0x23   :  { %739 = vmatmul.mubr.bf16.vlgmr.msra.gmra.mxu0 %v1316_v32 }
  0x24   :  { %788 = vmatmul.mubr.bf16.vlgmr.msra.gmra.mxu1 %v1319_v34  ;;  %1199 = vmatpush3.bf16.msra.mxu0 %v1323_v37 }
  0x25   :  { %1227 = vmatpush3.bf16.msra.mxu1 %v1325_v39  ;;  %1200 = vmatprep.subr.bf16.mxu0 %v1326_v40 }
  0x26   :  { %1228 = vmatprep.subr.bf16.mxu1 %v1328_v42  ;;  %746 = vmatprep.mubr.bf16.mxu0 %v1340_v54 }
  0x27   :  { %795 = vmatprep.mubr.bf16.mxu1 %v1342_v55 }
  0x28   :  { %1201 = vmatpush3.bf16.msra.mxu0 %v1327_v41 }
  0x29   :  { %1229 = vmatpush3.bf16.msra.mxu1 %v1329_v43  ;;  %1202 = vmatprep.subr.bf16.mxu0 %v1330_v44 }
  0x2a   :  { %1230 = vmatprep.subr.bf16.mxu1 %v1332_v46 }
  0x2b   :  { %747 = vmatmul.mubr.bf16.gmra.mxu0 %v1345_v57 }
  0x2c   :  { %1203 = vmatpush3.bf16.msra.mxu0 %v1331_v45  ;;  %796 = vmatmul.mubr.bf16.gmra.mxu1 %v1346_v58 }
  0x2d   :  { %1231 = vmatpush3.bf16.msra.mxu1 %v1333_v47  ;;  %1204 = vmatprep.subr.bf16.mxu0 %v1334_v48 }
  0x2e   :  { %1232 = vmatprep.subr.bf16.mxu1 %v1336_v50  ;;  %836 = vmatprep.mubr.bf16.mxu0 %v1361_v8 }
  0x2f   :  { %885 = vmatprep.mubr.bf16.mxu1 %v1366_v12 }
  0x30   :  { %1205 = vmatpush3.bf16.msra.mxu0 %v1335_v49 }
  0x31   :  { %1233 = vmatpush3.bf16.msra.mxu1 %v1337_v51  ;;  %1206 = vmatprep.subr.bf16.mxu0 %v1338_v52 }
  0x32   :  { %1234 = vmatprep.subr.bf16.mxu1 %v1344_v56 }
  0x34   :  { %1207 = vmatpush3.bf16.msra.mxu0 %v1339_v53 }
  0x35   :  { %1235 = vmatpush3.bf16.msra.mxu1 %v1347_v59  ;;  %1208 = vmatprep.subr.bf16.mxu0 %v1348_v60 }
  0x36   :  { %1236 = vmatprep.subr.bf16.mxu1 %v1350_v62 }
  0x38   :  { %1209 = vmatpush3.bf16.msra.mxu0 %v1349_v61 }
  0x39   :  { %1237 = vmatpush3.bf16.msra.mxu1 %v1351_v63  ;;  %1210 = vmatprep.subr.bf16.mxu0 %v1352_v0 }
  0x3a   :  { %1238 = vmatprep.subr.bf16.mxu1 %v1354_v2 }
  0x3c   :  { %1211 = vmatpush3.bf16.msra.mxu0 %v1353_v1 }
  0x3d   :  { %1239 = vmatpush3.bf16.msra.mxu1 %v1355_v3  ;;  %1212 = vmatprep.subr.bf16.mxu0 %v1356_v4 }
  0x3e   :  { %1240 = vmatprep.subr.bf16.mxu1 %v1358_v6 }
  0x40   :  { %1213 = vmatpush3.bf16.msra.mxu0 %v1357_v5 }
  0x41   :  { %1241 = vmatpush3.bf16.msra.mxu1 %v1362_v9  ;;  %1264 = vmatprep.subr.bf16.mxu0 %v1363_v10 }
  0x43   :  { %837 = vmatmul.mubr.bf16.vlgmr.msra.gmra.mxu0 %v1359_v7 }
  0x44   :  { %1265 = vmatpush3.bf16.msra.mxu0 %v1363_v10  ;;  %886 = vmatmul.mubr.bf16.vlgmr.msra.gmra.mxu1 %v1364_v11 }
  0x45   :  { %1266 = vmatprep.subr.bf16.mxu0 %v1367_v13  ;;  %844 = vmatprep.mubr.bf16.mxu0 %v1368_v14 }
  0x46   :  { %893 = vmatprep.mubr.bf16.mxu1 %v1372_v17 }
  0x48   :  { %1267 = vmatpush3.bf16.msra.mxu0 %v1367_v13 }
  0x49   :  { %1268 = vmatprep.subr.bf16.mxu0 %v1371_v16 }
  0x4b   :  { %845 = vmatmul.mubr.bf16.gmra.mxu0 %v1370_v15 }
  0x4c   :  { %1269 = vmatpush3.bf16.msra.mxu0 %v1371_v16  ;;  %894 = vmatmul.mubr.bf16.gmra.mxu1 %v1374_v18 }
  0x4d   :  { %1270 = vmatprep.subr.bf16.mxu0 %v1375_v19  ;;  %1280 = vmatprep.mubr.bf16.mxu0 %v1380_v21 }
  0x50   :  { %1271 = vmatpush3.bf16.msra.mxu0 %v1375_v19 }
  0x51   :  { %1272 = vmatprep.subr.bf16.mxu0 %v1376_v20 }
  0x54   :  { %1273 = vmatpush3.bf16.msra.mxu0 %v1376_v20 }
  0x55   :  { %1274 = vmatprep.subr.bf16.mxu0 %v1377_v22 }
  0x58   :  { %1275 = vmatpush3.bf16.msra.mxu0 %v1377_v22 }
  0x59   :  { %1276 = vmatprep.subr.bf16.mxu0 %v1378_v23 }
  0x5c   :  { %1277 = vmatpush3.bf16.msra.mxu0 %v1378_v23 }
  0x5d   :  { %1278 = vmatprep.subr.bf16.mxu0 %v1379_v24 }
  0x60   :  { %1279 = vmatpush3.bf16.msra.mxu0 %v1379_v24 }
  0x63   :  { %1281 = vmatmul.mubr.bf16.vlgmr.msra.gmra.mxu0 %v1381_v25 }
  0xe3   :  { %v1158_v26 = vpop.f32.mrf.mxu0 }
  0xe4   :  { %v1186_v27 = vpop.f32.mrf.mxu1 }
  0xe5   :  { %v1159_v28 = vpop.f32.mrf.mxu0 }
  0xe6   :  { %v1187_v29 = vpop.f32.mrf.mxu1  ;;  %v1160_v55 = vadd.f32 %v1159_v28, %v1158_v26 }
  0xe7   :  { %v1161_v30 = vpop.f32.mrf.mxu0  ;;  %v1188_v56 = vadd.f32 %v1187_v29, %v1186_v27 }
  0xe8   :  { %v1189_v31 = vpop.f32.mrf.mxu1 }
  0xe9   :  { %v1162_v32 = vpop.f32.mrf.mxu0  ;;  %v790_v2 = vadd.f32 %v1188_v56, %v1160_v55 }
  0xea   :  { %v1190_v34 = vpop.f32.mrf.mxu1  ;;  %v1163_v57 = vadd.f32 %v1162_v32, %v1161_v30 }
  0xeb   :  { %v1164_v33 = vpop.f32.mrf.mxu0  ;;  %v1191_v58 = vadd.f32 %v1190_v34, %v1189_v31 }
  0xec   :  { %v1192_v35 = vpop.f32.mrf.mxu1 }
  0xed   :  { %v1165_v36 = vpop.f32.mrf.mxu0  ;;  %v793_v5 = vadd.f32 %v1191_v58, %v1163_v57  ;;  %v986_v58 = vlaneseq }
  0xee   :  { %v1193_v37 = vpop.f32.mrf.mxu1  ;;  %v1166_v59 = vadd.f32 %v1165_v36, %v1164_v33 }
  0xef   :  { %v1167_v38 = vpop.f32.mrf.mxu0  ;;  %v1194_v60 = vadd.f32 %v1193_v37, %v1192_v35 }
  0xf0   :  { %v1195_v39 = vpop.f32.mrf.mxu1 }
  0xf1   :  { %v1168_v40 = vpop.f32.mrf.mxu0  ;;  %v798_v6 = vadd.f32 %v1194_v60, %v1166_v59  ;;  %v987_v59 = vshrl.u32 %v986_v58, 7  ;;  %v978_v60 = vld [vmem:[%s1693_s2] sm:$0x1] }
  0xf2   :  { %v1196_v42 = vpop.f32.mrf.mxu1  ;;  %v1169_v62 = vadd.f32 %v1168_v40, %v1167_v38 }
  0xf3   :  { %v1197_v63 = vadd.f32 %v1196_v42, %v1195_v39 }
  0xf5   :  { %v801_v10 = vadd.f32 %v1197_v63, %v1169_v62 }
 0x103   :  { %v1214_v41 = vpop.f32.mrf.mxu0 }
 0x104   :  { %v1242_v44 = vpop.f32.mrf.mxu1 }
 0x105   :  { %v1215_v43 = vpop.f32.mrf.mxu0 }
 0x106   :  { %v1243_v46 = vpop.f32.mrf.mxu1  ;;  %v1216_v61 = vadd.f32 %v1215_v43, %v1214_v41 }
 0x107   :  { %v1217_v45 = vpop.f32.mrf.mxu0  ;;  %v1244_v8 = vadd.f32 %v1243_v46, %v1242_v44 }
 0x108   :  { %v1245_v48 = vpop.f32.mrf.mxu1  ;;  %v839_v7 = vadd.f32 %v1216_v61, %v790_v2  ;;  %v988_v61 = vsub.s32 0, %v987_v59 }
 0x109   :  { %v1218_v47 = vpop.f32.mrf.mxu0 }
 0x10a   :  { %v1246_v50 = vpop.f32.mrf.mxu1  ;;  %v1219_v3 = vadd.f32 %v1218_v47, %v1217_v45  ;;  %v888_v20 = vadd.f32 %v1244_v8, %v839_v7 }
 0x10b   :  { %v1220_v49 = vpop.f32.mrf.mxu0  ;;  %v1247_v14 = vadd.f32 %v1246_v50, %v1245_v48 }
 0x10c   :  { %v1248_v52 = vpop.f32.mrf.mxu1  ;;  %v842_v13 = vadd.f32 %v1219_v3, %v793_v5 }
 0x10d   :  { %v1221_v51 = vpop.f32.mrf.mxu0 }
 0x10e   :  { %v1249_v54 = vpop.f32.mrf.mxu1  ;;  %v1222_v4 = vadd.f32 %v1221_v51, %v1220_v49  ;;  %v891_v24 = vadd.f32 %v1247_v14, %v842_v13 }
 0x10f   :  { %v1223_v53 = vpop.f32.mrf.mxu0  ;;  %v1250_v16 = vadd.f32 %v1249_v54, %v1248_v52 }
 0x110   :  { %v1251_v1 = vpop.f32.mrf.mxu1  ;;  %v847_v15 = vadd.f32 %v1222_v4, %v798_v6 }
 0x111   :  { %v1224_v0 = vpop.f32.mrf.mxu0 }
 0x112   :  { %v1225_v9 = vadd.f32 %v1224_v0, %v1223_v53  ;;  %v1252_v11 = vpop.f32.mrf.mxu1  ;;  %v896_v22 = vadd.f32 %v1250_v16, %v847_v15  ;;  %v982_v0 = vld [vmem:[%s1694_s3] sm:$0x1] }
 0x113   :  { %v1253_v19 = vadd.f32 %v1252_v11, %v1251_v1 }
 0x114   :  { %v850_v18 = vadd.f32 %v1225_v9, %v801_v10 }
 0x116   :  { %v899_v27 = vadd.f32 %v1253_v19, %v850_v18 }
 0x123   :  { %v1282_v12 = vpop.f32.mrf.mxu0 }
 0x124   :  { %v945_v26 = vadd.f32 %v1282_v12, %v896_v22 }
 0x125   :  { %v936_v17 = vpop.f32.mrf.mxu0 }
 0x126   :  { %v937_v23 = vadd.f32 %v936_v17, %v888_v20  ;;  %v963_v33 = vmul.f32 %v945_v26, %v945_v26 }
 0x127   :  { %v1283_v21 = vpop.f32.mrf.mxu0 }
 0x128   :  { %v961_v29 = vmul.f32 %v937_v23, %v937_v23  ;;  %v948_v30 = vadd.f32 %v1283_v21, %v899_v27 }
 0x129   :  { %v939_v25 = vpop.f32.mrf.mxu0 }
 0x12a   :  { %v940_v28 = vadd.f32 %v939_v25, %v891_v24  ;;  %v964_v36 = vmul.f32 %v948_v30, %v948_v30 }
 0x12c   :  { %v951_v31 = vadd.f32 %v940_v28, %v937_v23  ;;  %v962_v32 = vmul.f32 %v940_v28, %v940_v28 }
 0x12e   :  { %v952_v34 = vadd.f32 %v951_v31, %v945_v26  ;;  %v965_v35 = vadd.f32 %v962_v32, %v961_v29 }
 0x130   :  { %v953_v37 = vadd.f32 %v952_v34, %v948_v30  ;;  %v966_v38 = vadd.f32 %v965_v35, %v963_v33 }
 0x132   :  { %v954_v39 = vrot.slane %v953_v37, 4  ;;  %v967_v40 = vadd.f32 %v966_v38, %v964_v36 }
 0x134   :  { %v955_v41 = vadd.f32 %v954_v39, %v953_v37  ;;  %v968_v42 = vrot.slane %v967_v40, 4 }
 0x136   :  { %v956_v43 = vrot.slane %v955_v41, 2  ;;  %v969_v44 = vadd.f32 %v968_v42, %v967_v40 }
 0x138   :  { %v957_v45 = vadd.f32 %v956_v43, %v955_v41  ;;  %v970_v46 = vrot.slane %v969_v44, 2 }
 0x13a   :  { %v958_v47 = vrot.slane %v957_v45, 1  ;;  %v971_v48 = vadd.f32 %v970_v46, %v969_v44 }
 0x13c   :  { %v959_v49 = vadd.f32 %v958_v47, %v957_v45  ;;  %v972_v50 = vrot.slane %v971_v48, 1 }
 0x13e   :  { %v960_v51 = vmul.f32 0.03125, %v959_v49  ;;  %v973_v52 = vadd.f32 %v972_v50, %v971_v48 }
 0x140   :  { %v974_v53 = vmul.f32 0.03125, %v973_v52  ;;  %v975_v54 = vmul.f32 %v960_v51, %v960_v51 }
 0x142   :  { %v976_v55 = vsub.f32 %v974_v53, %v975_v54 }
 0x144   :  { %v977_v56 = vmax.f32 %v976_v55, 0.0 }
 0x146   :  { %v979_v57 = vadd.f32 1e-05, %v977_v56 }
 0x148   :  { %1382 = vrsqrt.f32 %v979_v57 }
 0x155   :  { %v1383_v62 = vpop.eup %1382 }
 0x156   :  { %v981_v63 = vmul.f32 %v1383_v62, %v978_v60 }
 0x158   :  { %v983_v1 = vmul.f32 %v981_v63, %v960_v51  ;;  %v989_v2 = vrot.slane %v981_v63, %v988_v61 }
 0x15a   :  { %v984_v3 = vsub.f32 %v982_v0, %v983_v1  ;;  %v991_v4 = vmul.f32 %v989_v2, %v937_v23  ;;  %v992_v5 = vmul.f32 %v989_v2, %v940_v28  ;;  %v993_v6 = vmul.f32 %v989_v2, %v945_v26 }
 0x15b   :  { %v994_v7 = vmul.f32 %v989_v2, %v948_v30 }
 0x15c   :  { %v999_v8 = vrot.slane %v984_v3, %v988_v61 }
 0x15e   :  { %v1001_v9 = vadd.f32 %v999_v8, %v991_v4  ;;  %v1002_v10 = vadd.f32 %v999_v8, %v992_v5  ;;  %v1003_v11 = vadd.f32 %v999_v8, %v993_v6  ;;  %v1004_v12 = vadd.f32 %v999_v8, %v994_v7 }
 0x160   :  { %v1005_v13 = vmax.f32 %v1001_v9, 0.0  ;;  %v1006_v14 = vmax.f32 %v1002_v10, 0.0  ;;  %v1007_v15 = vmax.f32 %v1003_v11, 0.0  ;;  %v1008_v16 = vmax.f32 %v1004_v12, 0.0 }
 0x162   :  { %v1134_v17 = vpack.c.bf16 %v1006_v14, %v1005_v13  ;;  %v1139_v18 = vpack.c.bf16 %v1008_v16, %v1007_v15 }
 0x164   :  { %1135 = vst [vmem:[%s1695_s4] sm:$0xff] %v1134_v17   ;;  %1141 = vst [vmem:[%s1695_s4 + $0x8] sm:$0xff] %v1139_v18  }

// kernel: student_resnet_forward.13
= control target key start
LH: loop header
LB: loop body
LE: loop exit
PB: predicated region body
PF: predicated region fallthrough
CT: control target
= control target key end

     0   :  { %s1726_s1 = inlined_call_operand.vmem [shape: bf16[1152,128], index: 1, kind: input, shape index: {}]   ;;  %s1727_s0 = inlined_call_operand.vmem [shape: bf16[32,1152], index: 0, kind: input, shape index: {}]   ;;  %s1728_s2 = inlined_call_operand.vmem [shape: f32[1,128], index: 2, kind: input, shape index: {}]   ;;  %s1729_s3 = inlined_call_operand.vmem [shape: f32[1,128], index: 3, kind: input, shape index: {}]   ;;  %s1730_s4 = inlined_call_operand.vmem [shape: bf16[32,128], index: 4, kind: input, shape index: {}]   ;;  %s1731_s5 = inlined_call_operand.vmem [shape: bf16[32,128], index: 5, kind: output, shape index: {}]  }
   0x1   :  { %v1308_v0 = vld [vmem:[%s1726_s1 + $0x78] sm:$0xff]   ;;  %v1312_v4 = vld [vmem:[%s1726_s1 + $0x70] sm:$0xff]   ;;  %v1316_v8 = vld [vmem:[%s1726_s1 + $0x68] sm:$0xff]  }
   0x2   :  { %v1309_v1 = vld [vmem:[%s1726_s1 + $0xf8] sm:$0xff]   ;;  %1166 = vmatprep.subr.bf16.mxu0 %v1308_v0  ;;  %v1313_v5 = vld [vmem:[%s1726_s1 + $0xf0] sm:$0xff]   ;;  %v1317_v9 = vld [vmem:[%s1726_s1 + $0xe8] sm:$0xff]  }
   0x3   :  { %v1310_v2 = vld [vmem:[%s1726_s1 + $0x38] sm:$0xff]   ;;  %1194 = vmatprep.subr.bf16.mxu1 %v1309_v1  ;;  %v1314_v6 = vld [vmem:[%s1726_s1 + $0x30] sm:$0xff]   ;;  %v1318_v10 = vld [vmem:[%s1726_s1 + $0x28] sm:$0xff]  }
   0x4   :  { %v1311_v3 = vld [vmem:[%s1726_s1 + $0xb8] sm:$0xff]   ;;  %1167 = vmatpush3.bf16.msra.mxu0 %v1310_v2  ;;  %v1315_v7 = vld [vmem:[%s1726_s1 + $0xb0] sm:$0xff]   ;;  %v1319_v11 = vld [vmem:[%s1726_s1 + $0xa8] sm:$0xff]  }
   0x5   :  { %1195 = vmatpush3.bf16.msra.mxu1 %v1311_v3  ;;  %1168 = vmatprep.subr.bf16.mxu0 %v1312_v4  ;;  %v1320_v12 = vld [vmem:[%s1726_s1 + $0x60] sm:$0xff]   ;;  %v1324_v16 = vld [vmem:[%s1726_s1 + $0x58] sm:$0xff]   ;;  %v1328_v20 = vld [vmem:[%s1726_s1 + $0x50] sm:$0xff]  }
   0x6   :  { %1196 = vmatprep.subr.bf16.mxu1 %v1313_v5  ;;  %v1321_v13 = vld [vmem:[%s1726_s1 + $0xe0] sm:$0xff]   ;;  %v1325_v17 = vld [vmem:[%s1726_s1 + $0xd8] sm:$0xff]   ;;  %v1329_v21 = vld [vmem:[%s1726_s1 + $0xd0] sm:$0xff]  }
   0x7   :  { %v1322_v14 = vld [vmem:[%s1726_s1 + $0x20] sm:$0xff]   ;;  %v1326_v18 = vld [vmem:[%s1726_s1 + $0x18] sm:$0xff]   ;;  %v1330_v22 = vld [vmem:[%s1726_s1 + $0x10] sm:$0xff]  }
   0x8   :  { %1169 = vmatpush3.bf16.msra.mxu0 %v1314_v6  ;;  %v1323_v15 = vld [vmem:[%s1726_s1 + $0xa0] sm:$0xff]   ;;  %v1327_v19 = vld [vmem:[%s1726_s1 + $0x98] sm:$0xff]   ;;  %v1331_v23 = vld [vmem:[%s1726_s1 + $0x90] sm:$0xff]  }
   0x9   :  { %1197 = vmatpush3.bf16.msra.mxu1 %v1315_v7  ;;  %1170 = vmatprep.subr.bf16.mxu0 %v1316_v8  ;;  %v1332_v24 = vld [vmem:[%s1726_s1 + $0x48] sm:$0xff]   ;;  %v1336_v28 = vld [vmem:[%s1726_s1 + $0x40] sm:$0xff]   ;;  %v1346_v36 = vld [vmem:[%s1726_s1 + $0x178] sm:$0xff]  }
   0xa   :  { %1198 = vmatprep.subr.bf16.mxu1 %v1317_v9  ;;  %v1333_v25 = vld [vmem:[%s1726_s1 + $0xc8] sm:$0xff]   ;;  %v1337_v29 = vld [vmem:[%s1726_s1 + $0xc0] sm:$0xff]   ;;  %v1347_v37 = vld [vmem:[%s1726_s1 + $0x138] sm:$0xff]  }
   0xb   :  { %v1334_v26 = vld [vmem:[%s1726_s1 + $0x8] sm:$0xff]   ;;  %v1338_v30 = vld [vmem:[%s1726_s1] sm:$0xff]   ;;  %v1348_v38 = vld [vmem:[%s1726_s1 + $0x1f8] sm:$0xff]  }
   0xc   :  { %1171 = vmatpush3.bf16.msra.mxu0 %v1318_v10  ;;  %v1335_v27 = vld [vmem:[%s1726_s1 + $0x88] sm:$0xff]   ;;  %v1339_v31 = vld [vmem:[%s1726_s1 + $0x80] sm:$0xff]   ;;  %v1349_v39 = vld [vmem:[%s1726_s1 + $0x1b8] sm:$0xff]  }
   0xd   :  { %1199 = vmatpush3.bf16.msra.mxu1 %v1319_v11  ;;  %1172 = vmatprep.subr.bf16.mxu0 %v1320_v12  ;;  %v1340_v32 = vld [vmem:[%s1727_s0] ss:$36 sps:$4 sm:$0xff]   ;;  %v1343_v34 = vld [vmem:[%s1727_s0 + $0x8] ss:$36 sps:$4 sm:$0xff]   ;;  %v1350_v40 = vld [vmem:[%s1726_s1 + $0x170] sm:$0xff]  }
   0xe   :  { %1200 = vmatprep.subr.bf16.mxu1 %v1321_v13  ;;  %v1342_v33 = vld [vmem:[%s1727_s0 + $0x4] ss:$36 sps:$4 sm:$0xff]   ;;  %v1345_v35 = vld [vmem:[%s1727_s0 + $0xc] ss:$36 sps:$4 sm:$0xff]   ;;  %v1362_v52 = vld [vmem:[%s1726_s1 + $0x158] sm:$0xff]  }
   0xf   :  { %741 = vmatprep.mubr.bf16.mxu0 %v1342_v33  ;;  %790 = vmatprep.mubr.bf16.mxu1 %v1345_v35  ;;  %v1351_v41 = vld [vmem:[%s1726_s1 + $0x130] sm:$0xff]   ;;  %v1354_v44 = vld [vmem:[%s1726_s1 + $0x168] sm:$0xff]   ;;  %v1358_v48 = vld [vmem:[%s1726_s1 + $0x160] sm:$0xff]  }
  0x10   :  { %1173 = vmatpush3.bf16.msra.mxu0 %v1322_v14  ;;  %v1352_v42 = vld [vmem:[%s1726_s1 + $0x1f0] sm:$0xff]   ;;  %v1355_v45 = vld [vmem:[%s1726_s1 + $0x128] sm:$0xff]   ;;  %v1359_v49 = vld [vmem:[%s1726_s1 + $0x120] sm:$0xff]  }
  0x11   :  { %1201 = vmatpush3.bf16.msra.mxu1 %v1323_v15  ;;  %1174 = vmatprep.subr.bf16.mxu0 %v1324_v16  ;;  %v1353_v43 = vld [vmem:[%s1726_s1 + $0x1b0] sm:$0xff]   ;;  %v1356_v46 = vld [vmem:[%s1726_s1 + $0x1e8] sm:$0xff]   ;;  %v1360_v50 = vld [vmem:[%s1726_s1 + $0x1e0] sm:$0xff]  }
  0x12   :  { %1202 = vmatprep.subr.bf16.mxu1 %v1325_v17  ;;  %v1357_v47 = vld [vmem:[%s1726_s1 + $0x1a8] sm:$0xff]   ;;  %v1361_v51 = vld [vmem:[%s1726_s1 + $0x1a0] sm:$0xff]   ;;  %v1363_v53 = vld [vmem:[%s1726_s1 + $0x118] sm:$0xff]  }
  0x13   :  { %v1364_v54 = vld [vmem:[%s1727_s0 + $0x4c] ss:$36 sps:$4 sm:$0xff]   ;;  %v1366_v55 = vld [vmem:[%s1727_s0 + $0x54] ss:$36 sps:$4 sm:$0xff]   ;;  %v1380_v4 = vld [vmem:[%s1726_s1 + $0x140] sm:$0xff]  }
  0x14   :  { %1175 = vmatpush3.bf16.msra.mxu0 %v1326_v18  ;;  %v1368_v56 = vld [vmem:[%s1726_s1 + $0x1d8] sm:$0xff]   ;;  %v1369_v57 = vld [vmem:[%s1727_s0 + $0x48] ss:$36 sps:$4 sm:$0xff]   ;;  %v1370_v58 = vld [vmem:[%s1727_s0 + $0x50] ss:$36 sps:$4 sm:$0xff]  }
  0x15   :  { %1203 = vmatpush3.bf16.msra.mxu1 %v1327_v19  ;;  %1176 = vmatprep.subr.bf16.mxu0 %v1328_v20  ;;  %v1371_v59 = vld [vmem:[%s1726_s1 + $0x198] sm:$0xff]   ;;  %v1372_v60 = vld [vmem:[%s1726_s1 + $0x150] sm:$0xff]   ;;  %v1376_v0 = vld [vmem:[%s1726_s1 + $0x148] sm:$0xff]  }
  0x16   :  { %1204 = vmatprep.subr.bf16.mxu1 %v1329_v21  ;;  %v1373_v61 = vld [vmem:[%s1726_s1 + $0x110] sm:$0xff]   ;;  %v1377_v1 = vld [vmem:[%s1726_s1 + $0x108] sm:$0xff]   ;;  %v1381_v5 = vld [vmem:[%s1726_s1 + $0x100] sm:$0xff]  }
  0x17   :  { %v1374_v62 = vld [vmem:[%s1726_s1 + $0x1d0] sm:$0xff]   ;;  %v1378_v2 = vld [vmem:[%s1726_s1 + $0x1c8] sm:$0xff]   ;;  %v1382_v6 = vld [vmem:[%s1726_s1 + $0x1c0] sm:$0xff]  }
  0x18   :  { %1177 = vmatpush3.bf16.msra.mxu0 %v1330_v22  ;;  %v1375_v63 = vld [vmem:[%s1726_s1 + $0x190] sm:$0xff]   ;;  %v1379_v3 = vld [vmem:[%s1726_s1 + $0x188] sm:$0xff]   ;;  %v1386_v9 = vld [vmem:[%s1726_s1 + $0x180] sm:$0xff]  }
  0x19   :  { %1205 = vmatpush3.bf16.msra.mxu1 %v1331_v23  ;;  %1178 = vmatprep.subr.bf16.mxu0 %v1332_v24  ;;  %v1383_v7 = vld [vmem:[%s1727_s0 + $0x10] ss:$36 sps:$4 sm:$0xff]   ;;  %v1387_v10 = vld [vmem:[%s1726_s1 + $0x238] sm:$0xff]   ;;  %v1395_v16 = vld [vmem:[%s1726_s1 + $0x228] sm:$0xff]  }
  0x1a   :  { %1206 = vmatprep.subr.bf16.mxu1 %v1333_v25  ;;  %v1385_v8 = vld [vmem:[%s1727_s0 + $0x14] ss:$36 sps:$4 sm:$0xff]   ;;  %v1390_v12 = vld [vmem:[%s1727_s0 + $0x1c] ss:$36 sps:$4 sm:$0xff]   ;;  %v1396_v17 = vld [vmem:[%s1727_s0 + $0x64] ss:$36 sps:$4 sm:$0xff]  }
  0x1b   :  { %v1388_v11 = vld [vmem:[%s1727_s0 + $0x18] ss:$36 sps:$4 sm:$0xff]   ;;  %v1391_v13 = vld [vmem:[%s1726_s1 + $0x230] sm:$0xff]   ;;  %v1398_v18 = vld [vmem:[%s1727_s0 + $0x60] ss:$36 sps:$4 sm:$0xff]  }
  0x1c   :  { %1179 = vmatpush3.bf16.msra.mxu0 %v1334_v26  ;;  %v1392_v14 = vld [vmem:[%s1727_s0 + $0x5c] ss:$36 sps:$4 sm:$0xff]   ;;  %v1401_v22 = vld [vmem:[%s1726_s1 + $0x210] sm:$0xff]   ;;  %v1402_v23 = vld [vmem:[%s1726_s1 + $0x208] sm:$0xff]  }
  0x1d   :  { %1207 = vmatpush3.bf16.msra.mxu1 %v1335_v27  ;;  %1180 = vmatprep.subr.bf16.mxu0 %v1336_v28  ;;  %v1394_v15 = vld [vmem:[%s1727_s0 + $0x58] ss:$36 sps:$4 sm:$0xff]   ;;  %v1399_v19 = vld [vmem:[%s1726_s1 + $0x220] sm:$0xff]   ;;  %v1405_v25 = vld [vmem:[%s1727_s0 + $0x68] ss:$36 sps:$4 sm:$0xff]  }
  0x1e   :  { %1208 = vmatprep.subr.bf16.mxu1 %v1337_v29  ;;  %v1400_v20 = vld [vmem:[%s1726_s1 + $0x218] sm:$0xff]   ;;  %v1404_v21 = vld [vmem:[%s1727_s0 + $0x20] ss:$36 sps:$4 sm:$0xff]  }
  0x1f   :  { %v1403_v24 = vld [vmem:[%s1726_s1 + $0x200] sm:$0xff]  }
  0x20   :  { %1181 = vmatpush3.bf16.msra.mxu0 %v1338_v30 }
  0x21   :  { %1209 = vmatpush3.bf16.msra.mxu1 %v1339_v31  ;;  %1222 = vmatprep.subr.bf16.mxu0 %v1346_v36 }
  0x22   :  { %1250 = vmatprep.subr.bf16.mxu1 %v1348_v38 }
  0x23   :  { %742 = vmatmul.mubr.bf16.vlgmr.msra.gmra.mxu0 %v1340_v32 }
  0x24   :  { %791 = vmatmul.mubr.bf16.vlgmr.msra.gmra.mxu1 %v1343_v34  ;;  %1223 = vmatpush3.bf16.msra.mxu0 %v1347_v37 }
  0x25   :  { %1251 = vmatpush3.bf16.msra.mxu1 %v1349_v39  ;;  %1224 = vmatprep.subr.bf16.mxu0 %v1350_v40 }
  0x26   :  { %1252 = vmatprep.subr.bf16.mxu1 %v1352_v42  ;;  %749 = vmatprep.mubr.bf16.mxu0 %v1364_v54 }
  0x27   :  { %798 = vmatprep.mubr.bf16.mxu1 %v1366_v55 }
  0x28   :  { %1225 = vmatpush3.bf16.msra.mxu0 %v1351_v41 }
  0x29   :  { %1253 = vmatpush3.bf16.msra.mxu1 %v1353_v43  ;;  %1226 = vmatprep.subr.bf16.mxu0 %v1354_v44 }
  0x2a   :  { %1254 = vmatprep.subr.bf16.mxu1 %v1356_v46 }
  0x2b   :  { %750 = vmatmul.mubr.bf16.gmra.mxu0 %v1369_v57 }
  0x2c   :  { %1227 = vmatpush3.bf16.msra.mxu0 %v1355_v45  ;;  %799 = vmatmul.mubr.bf16.gmra.mxu1 %v1370_v58 }
  0x2d   :  { %1255 = vmatpush3.bf16.msra.mxu1 %v1357_v47  ;;  %1228 = vmatprep.subr.bf16.mxu0 %v1358_v48 }
  0x2e   :  { %1256 = vmatprep.subr.bf16.mxu1 %v1360_v50  ;;  %839 = vmatprep.mubr.bf16.mxu0 %v1385_v8 }
  0x2f   :  { %888 = vmatprep.mubr.bf16.mxu1 %v1390_v12 }
  0x30   :  { %1229 = vmatpush3.bf16.msra.mxu0 %v1359_v49 }
  0x31   :  { %1257 = vmatpush3.bf16.msra.mxu1 %v1361_v51  ;;  %1230 = vmatprep.subr.bf16.mxu0 %v1362_v52 }
  0x32   :  { %1258 = vmatprep.subr.bf16.mxu1 %v1368_v56 }
  0x34   :  { %1231 = vmatpush3.bf16.msra.mxu0 %v1363_v53 }
  0x35   :  { %1259 = vmatpush3.bf16.msra.mxu1 %v1371_v59  ;;  %1232 = vmatprep.subr.bf16.mxu0 %v1372_v60 }
  0x36   :  { %1260 = vmatprep.subr.bf16.mxu1 %v1374_v62 }
  0x38   :  { %1233 = vmatpush3.bf16.msra.mxu0 %v1373_v61 }
  0x39   :  { %1261 = vmatpush3.bf16.msra.mxu1 %v1375_v63  ;;  %1234 = vmatprep.subr.bf16.mxu0 %v1376_v0 }
  0x3a   :  { %1262 = vmatprep.subr.bf16.mxu1 %v1378_v2 }
  0x3c   :  { %1235 = vmatpush3.bf16.msra.mxu0 %v1377_v1 }
  0x3d   :  { %1263 = vmatpush3.bf16.msra.mxu1 %v1379_v3  ;;  %1236 = vmatprep.subr.bf16.mxu0 %v1380_v4 }
  0x3e   :  { %1264 = vmatprep.subr.bf16.mxu1 %v1382_v6 }
  0x40   :  { %1237 = vmatpush3.bf16.msra.mxu0 %v1381_v5 }
  0x41   :  { %1265 = vmatpush3.bf16.msra.mxu1 %v1386_v9  ;;  %1288 = vmatprep.subr.bf16.mxu0 %v1387_v10 }
  0x43   :  { %840 = vmatmul.mubr.bf16.vlgmr.msra.gmra.mxu0 %v1383_v7 }
  0x44   :  { %1289 = vmatpush3.bf16.msra.mxu0 %v1387_v10  ;;  %889 = vmatmul.mubr.bf16.vlgmr.msra.gmra.mxu1 %v1388_v11 }
  0x45   :  { %1290 = vmatprep.subr.bf16.mxu0 %v1391_v13  ;;  %847 = vmatprep.mubr.bf16.mxu0 %v1392_v14 }
  0x46   :  { %896 = vmatprep.mubr.bf16.mxu1 %v1396_v17 }
  0x48   :  { %1291 = vmatpush3.bf16.msra.mxu0 %v1391_v13 }
  0x49   :  { %1292 = vmatprep.subr.bf16.mxu0 %v1395_v16 }
  0x4b   :  { %848 = vmatmul.mubr.bf16.gmra.mxu0 %v1394_v15 }
  0x4c   :  { %1293 = vmatpush3.bf16.msra.mxu0 %v1395_v16  ;;  %897 = vmatmul.mubr.bf16.gmra.mxu1 %v1398_v18 }
  0x4d   :  { %1294 = vmatprep.subr.bf16.mxu0 %v1399_v19  ;;  %1304 = vmatprep.mubr.bf16.mxu0 %v1404_v21 }
  0x50   :  { %1295 = vmatpush3.bf16.msra.mxu0 %v1399_v19 }
  0x51   :  { %1296 = vmatprep.subr.bf16.mxu0 %v1400_v20 }
  0x54   :  { %1297 = vmatpush3.bf16.msra.mxu0 %v1400_v20 }
  0x55   :  { %1298 = vmatprep.subr.bf16.mxu0 %v1401_v22 }
  0x58   :  { %1299 = vmatpush3.bf16.msra.mxu0 %v1401_v22 }
  0x59   :  { %1300 = vmatprep.subr.bf16.mxu0 %v1402_v23 }
  0x5c   :  { %1301 = vmatpush3.bf16.msra.mxu0 %v1402_v23 }
  0x5d   :  { %1302 = vmatprep.subr.bf16.mxu0 %v1403_v24 }
  0x60   :  { %1303 = vmatpush3.bf16.msra.mxu0 %v1403_v24 }
  0x63   :  { %1305 = vmatmul.mubr.bf16.vlgmr.msra.gmra.mxu0 %v1405_v25 }
  0xe3   :  { %v1182_v26 = vpop.f32.mrf.mxu0 }
  0xe4   :  { %v1210_v27 = vpop.f32.mrf.mxu1 }
  0xe5   :  { %v1183_v28 = vpop.f32.mrf.mxu0 }
  0xe6   :  { %v1211_v29 = vpop.f32.mrf.mxu1  ;;  %v1184_v55 = vadd.f32 %v1183_v28, %v1182_v26 }
  0xe7   :  { %v1185_v30 = vpop.f32.mrf.mxu0  ;;  %v1212_v56 = vadd.f32 %v1211_v29, %v1210_v27 }
  0xe8   :  { %v1213_v31 = vpop.f32.mrf.mxu1 }
  0xe9   :  { %v1186_v32 = vpop.f32.mrf.mxu0  ;;  %v793_v2 = vadd.f32 %v1212_v56, %v1184_v55 }
  0xea   :  { %v1214_v34 = vpop.f32.mrf.mxu1  ;;  %v1187_v57 = vadd.f32 %v1186_v32, %v1185_v30 }
  0xeb   :  { %v1188_v33 = vpop.f32.mrf.mxu0  ;;  %v1215_v58 = vadd.f32 %v1214_v34, %v1213_v31 }
  0xec   :  { %v1216_v35 = vpop.f32.mrf.mxu1 }
  0xed   :  { %v1189_v36 = vpop.f32.mrf.mxu0  ;;  %v796_v5 = vadd.f32 %v1215_v58, %v1187_v57  ;;  %v989_v58 = vlaneseq }
  0xee   :  { %v1217_v37 = vpop.f32.mrf.mxu1  ;;  %v1190_v59 = vadd.f32 %v1189_v36, %v1188_v33 }
  0xef   :  { %v1191_v38 = vpop.f32.mrf.mxu0  ;;  %v1218_v60 = vadd.f32 %v1217_v37, %v1216_v35 }
  0xf0   :  { %v1219_v39 = vpop.f32.mrf.mxu1 }
  0xf1   :  { %v1192_v40 = vpop.f32.mrf.mxu0  ;;  %v801_v6 = vadd.f32 %v1218_v60, %v1190_v59  ;;  %v990_v59 = vshrl.u32 %v989_v58, 7  ;;  %v981_v60 = vld [vmem:[%s1728_s2] sm:$0x1] }
  0xf2   :  { %v1220_v42 = vpop.f32.mrf.mxu1  ;;  %v1193_v62 = vadd.f32 %v1192_v40, %v1191_v38 }
  0xf3   :  { %v1221_v63 = vadd.f32 %v1220_v42, %v1219_v39 }
  0xf5   :  { %v804_v10 = vadd.f32 %v1221_v63, %v1193_v62 }
 0x103   :  { %v1238_v41 = vpop.f32.mrf.mxu0 }
 0x104   :  { %v1266_v44 = vpop.f32.mrf.mxu1 }
 0x105   :  { %v1239_v43 = vpop.f32.mrf.mxu0 }
 0x106   :  { %v1267_v46 = vpop.f32.mrf.mxu1  ;;  %v1240_v61 = vadd.f32 %v1239_v43, %v1238_v41 }
 0x107   :  { %v1241_v45 = vpop.f32.mrf.mxu0  ;;  %v1268_v8 = vadd.f32 %v1267_v46, %v1266_v44 }
 0x108   :  { %v1269_v48 = vpop.f32.mrf.mxu1  ;;  %v842_v7 = vadd.f32 %v1240_v61, %v793_v2  ;;  %v991_v61 = vsub.s32 0, %v990_v59 }
 0x109   :  { %v1242_v47 = vpop.f32.mrf.mxu0 }
 0x10a   :  { %v1270_v50 = vpop.f32.mrf.mxu1  ;;  %v1243_v3 = vadd.f32 %v1242_v47, %v1241_v45  ;;  %v891_v20 = vadd.f32 %v1268_v8, %v842_v7 }
 0x10b   :  { %v1244_v49 = vpop.f32.mrf.mxu0  ;;  %v1271_v14 = vadd.f32 %v1270_v50, %v1269_v48 }
 0x10c   :  { %v1272_v52 = vpop.f32.mrf.mxu1  ;;  %v845_v13 = vadd.f32 %v1243_v3, %v796_v5 }
 0x10d   :  { %v1245_v51 = vpop.f32.mrf.mxu0 }
 0x10e   :  { %v1273_v54 = vpop.f32.mrf.mxu1  ;;  %v1246_v4 = vadd.f32 %v1245_v51, %v1244_v49  ;;  %v894_v24 = vadd.f32 %v1271_v14, %v845_v13 }
 0x10f   :  { %v1247_v53 = vpop.f32.mrf.mxu0  ;;  %v1274_v16 = vadd.f32 %v1273_v54, %v1272_v52 }
 0x110   :  { %v1275_v1 = vpop.f32.mrf.mxu1  ;;  %v850_v15 = vadd.f32 %v1246_v4, %v801_v6  ;;  %v1164_v4 = vld [vmem:[%s1730_s4 + $0x8] sm:$0xff]  }
 0x111   :  { %v1248_v0 = vpop.f32.mrf.mxu0 }
 0x112   :  { %v1249_v9 = vadd.f32 %v1248_v0, %v1247_v53  ;;  %v1276_v11 = vpop.f32.mrf.mxu1  ;;  %v899_v22 = vadd.f32 %v1274_v16, %v850_v15  ;;  %v985_v0 = vld [vmem:[%s1729_s3] sm:$0x1] }
 0x113   :  { %v1277_v19 = vadd.f32 %v1276_v11, %v1275_v1  ;;  %v1147_v1 = vld [vmem:[%s1730_s4] sm:$0xff]  }
 0x114   :  { %v853_v18 = vadd.f32 %v1249_v9, %v804_v10  ;;  %v1148_v6 = vunpack.c.l.bf16 %v1147_v1  ;;  %v1149_v8 = vunpack.c.h.bf16 %v1147_v1  ;;  %v1152_v9 = vunpack.c.l.bf16 %v1164_v4 }
 0x115   :  { %v1153_v10 = vunpack.c.h.bf16 %v1164_v4 }
 0x116   :  { %v902_v27 = vadd.f32 %v1277_v19, %v853_v18 }
 0x123   :  { %v1306_v12 = vpop.f32.mrf.mxu0 }
 0x124   :  { %v948_v26 = vadd.f32 %v1306_v12, %v899_v22 }
 0x125   :  { %v939_v17 = vpop.f32.mrf.mxu0 }
 0x126   :  { %v940_v23 = vadd.f32 %v939_v17, %v891_v20  ;;  %v966_v33 = vmul.f32 %v948_v26, %v948_v26 }
 0x127   :  { %v1307_v21 = vpop.f32.mrf.mxu0 }
 0x128   :  { %v964_v29 = vmul.f32 %v940_v23, %v940_v23  ;;  %v951_v30 = vadd.f32 %v1307_v21, %v902_v27 }
 0x129   :  { %v942_v25 = vpop.f32.mrf.mxu0 }
 0x12a   :  { %v943_v28 = vadd.f32 %v942_v25, %v894_v24  ;;  %v967_v36 = vmul.f32 %v951_v30, %v951_v30 }
 0x12c   :  { %v954_v31 = vadd.f32 %v943_v28, %v940_v23  ;;  %v965_v32 = vmul.f32 %v943_v28, %v943_v28 }
 0x12e   :  { %v955_v34 = vadd.f32 %v954_v31, %v948_v26  ;;  %v968_v35 = vadd.f32 %v965_v32, %v964_v29 }
 0x130   :  { %v956_v37 = vadd.f32 %v955_v34, %v951_v30  ;;  %v969_v38 = vadd.f32 %v968_v35, %v966_v33 }
 0x132   :  { %v957_v39 = vrot.slane %v956_v37, 4  ;;  %v970_v40 = vadd.f32 %v969_v38, %v967_v36 }
 0x134   :  { %v958_v41 = vadd.f32 %v957_v39, %v956_v37  ;;  %v971_v42 = vrot.slane %v970_v40, 4 }
 0x136   :  { %v959_v43 = vrot.slane %v958_v41, 2  ;;  %v972_v44 = vadd.f32 %v971_v42, %v970_v40 }
 0x138   :  { %v960_v45 = vadd.f32 %v959_v43, %v958_v41  ;;  %v973_v46 = vrot.slane %v972_v44, 2 }
 0x13a   :  { %v961_v47 = vrot.slane %v960_v45, 1  ;;  %v974_v48 = vadd.f32 %v973_v46, %v972_v44 }
 0x13c   :  { %v962_v49 = vadd.f32 %v961_v47, %v960_v45  ;;  %v975_v50 = vrot.slane %v974_v48, 1 }
 0x13e   :  { %v963_v51 = vmul.f32 0.03125, %v962_v49  ;;  %v976_v52 = vadd.f32 %v975_v50, %v974_v48 }
 0x140   :  { %v977_v53 = vmul.f32 0.03125, %v976_v52  ;;  %v978_v54 = vmul.f32 %v963_v51, %v963_v51 }
 0x142   :  { %v979_v55 = vsub.f32 %v977_v53, %v978_v54 }
 0x144   :  { %v980_v56 = vmax.f32 %v979_v55, 0.0 }
 0x146   :  { %v982_v57 = vadd.f32 1e-05, %v980_v56 }
 0x148   :  { %1406 = vrsqrt.f32 %v982_v57 }
 0x155   :  { %v1407_v62 = vpop.eup %1406 }
 0x156   :  { %v984_v63 = vmul.f32 %v1407_v62, %v981_v60 }
 0x158   :  { %v986_v2 = vmul.f32 %v984_v63, %v963_v51  ;;  %v992_v3 = vrot.slane %v984_v63, %v991_v61 }
 0x15a   :  { %v987_v5 = vsub.f32 %v985_v0, %v986_v2  ;;  %v994_v7 = vmul.f32 %v992_v3, %v940_v23  ;;  %v995_v11 = vmul.f32 %v992_v3, %v943_v28  ;;  %v996_v12 = vmul.f32 %v992_v3, %v948_v26 }
 0x15b   :  { %v997_v13 = vmul.f32 %v992_v3, %v951_v30 }
 0x15c   :  { %v1002_v14 = vrot.slane %v987_v5, %v991_v61 }
 0x15e   :  { %v1004_v15 = vadd.f32 %v1002_v14, %v994_v7  ;;  %v1005_v16 = vadd.f32 %v1002_v14, %v995_v11  ;;  %v1006_v17 = vadd.f32 %v1002_v14, %v996_v12  ;;  %v1007_v18 = vadd.f32 %v1002_v14, %v997_v13 }
 0x160   :  { %v1016_v19 = vadd.f32 %v1148_v6, %v1004_v15  ;;  %v1017_v20 = vadd.f32 %v1149_v8, %v1005_v16  ;;  %v1018_v21 = vadd.f32 %v1152_v9, %v1006_v17  ;;  %v1019_v22 = vadd.f32 %v1153_v10, %v1007_v18 }
 0x162   :  { %v1020_v24 = vmax.f32 %v1016_v19, 0.0  ;;  %v1021_v25 = vmax.f32 %v1017_v20, 0.0  ;;  %v1022_v27 = vmax.f32 %v1018_v21, 0.0  ;;  %v1023_v29 = vmax.f32 %v1019_v22, 0.0 }
 0x164   :  { %v1157_v23 = vpack.c.bf16 %v1021_v25, %v1020_v24  ;;  %v1162_v31 = vpack.c.bf16 %v1023_v29, %v1022_v27 }
 0x166   :  { %1158 = vst [vmem:[%s1731_s5] sm:$0xff] %v1157_v23   ;;  %1165 = vst [vmem:[%s1731_s5 + $0x8] sm:$0xff] %v1162_v31  }

</bundles_post_ra>
